<compile_context>
chip_gen: v7x
topology: tpu7x:2x2x1
jax: 0.10.0
libtpu: 0.0.40
codegen_flags: <defaults>
</compile_context>

<pallas_src>
import functools
import math

import jax
import jax.numpy as jnp
import numpy as np
from jax.experimental import pallas as pl
from jax.experimental.pallas import tpu as pltpu

# ----------------------------- config ---------------------------------------
HIDDEN = 32
K_STEPS = 2
L_LEVELS = 2

MXU_DTYPE = jnp.bfloat16          # matmul-operand dtype (f32 accumulation)
_LOG2PI = math.log(2.0 * math.pi)


# ----------------------------- Pallas kernel --------------------------------
def _make_level_kernel(H, W, K, c2, hidden, has_split):
    """One fused kernel per level: K FlowSteps (+ Split2d prior log-prob)."""
    M = H * W
    PAD = W + 1                                      # max |row shift| of a 3x3
    OFFS = [(dh, dw) for dh in (-1, 0, 1) for dw in (-1, 0, 1)]

    def kernel(z_ref, aw11, aw12, aw21, aw22, ab1, ab2,
               w1, b1, w2, b2, w3s, b3s, w3t, b3t, *rest):
        if has_split:
            wsm, bsm, wsl, bsl, zo_ref, ld_ref, pad1, pad3 = rest
        else:
            zo_ref, ld_ref, pad1, pad3 = rest

        # Zero the halo scratch once; only the middle rows get rewritten, so
        # the border rows stay zero and provide the conv's "same" padding.
        pad1[...] = jnp.zeros(pad1.shape, pad1.dtype)
        pad3[...] = jnp.zeros(pad3.shape, pad3.dtype)

        # Lateral (dw) validity masks, shared by every 3x3 conv in this level.
        ww = jax.lax.broadcasted_iota(jnp.int32, (M, 1), 0) % W
        mask_l = (ww >= 1).astype(jnp.float32)        # source column w-1 valid
        mask_r = (ww <= W - 2).astype(jnp.float32)    # source column w+1 valid

        def conv3x3(x, pad_ref, weights_for):
            """3x3 'same' conv on the raster-flattened image x: (M, cin) f32.

            weights_for(idx) -> tuple of (cin, cout_j) MXU-dtype matrices; the
            shifted+masked window is shared by all of them (one window load,
            one mask, a couple of tiny MXU pushes).  Returns f32 (M, cout_j).
            """
            pad_ref[pl.ds(PAD, M), :] = x
            accs = None
            for idx, (dh, dw) in enumerate(OFFS):
                win = pad_ref[pl.ds(PAD + dh * W + dw, M), :]
                if dw == -1:
                    win = win * mask_l
                elif dw == 1:
                    win = win * mask_r
                wb = win.astype(MXU_DTYPE)
                parts = [jnp.dot(wb, wj, preferred_element_type=jnp.float32)
                         for wj in weights_for(idx)]
                accs = parts if accs is None else [a + p for a, p in zip(accs, parts)]
            return accs

        z1 = z_ref[0, 0]                              # (M, c2) f32
        z2 = z_ref[0, 1]
        ld_acc = jnp.zeros((M, 1), jnp.float32)

        for k in range(K):
            # --- ActNorm2d + invertible 1x1 conv (folded, block-split, f32) --
            f1 = (jnp.dot(z1, aw11[k], preferred_element_type=jnp.float32)
                  + jnp.dot(z2, aw21[k], preferred_element_type=jnp.float32)
                  + ab1[k])
            f2 = (jnp.dot(z1, aw12[k], preferred_element_type=jnp.float32)
                  + jnp.dot(z2, aw22[k], preferred_element_type=jnp.float32)
                  + ab2[k])
            z1, z2 = f1, f2

            # --- affine coupling: conv3x3 -> ReLU -> conv1x1 -> ReLU -> conv3x3
            (h,) = conv3x3(z1, pad1, lambda idx: (w1[k, idx],))
            h = jnp.maximum(h + b1[k], 0.0)
            h = jnp.dot(h.astype(MXU_DTYPE), w2[k],
                        preferred_element_type=jnp.float32)
            h = jnp.maximum(h + b2[k], 0.0)
            shift, sraw = conv3x3(h, pad3,
                                  lambda idx: (w3s[k, idx], w3t[k, idx]))
            shift = shift + b3s[k]
            scale = jax.nn.sigmoid(sraw + b3t[k] + 2.0)
            z2 = (z2 + shift) * scale
            ld_acc = ld_acc + jnp.sum(jnp.log(scale), axis=1, keepdims=True)

        if has_split:
            # Split2d prior: conv3x3 on z1 -> (mean, logs); gaussian logp of z2
            mean, logs = conv3x3(z1, pad1, lambda idx: (wsm[idx], wsl[idx]))
            mean = mean + bsm[...]
            logs = logs + bsl[...]
            d = z2 - mean
            ll = -0.5 * (_LOG2PI + 2.0 * logs + d * d * jnp.exp(-2.0 * logs))
            ld_acc = ld_acc + jnp.sum(ll, axis=1, keepdims=True)
            zo_ref[0] = z1
        else:
            zo_ref[0, 0] = z1
            zo_ref[0, 1] = z2

        # One dense per-batch scalar instead of (M, 1) lane-masked row outputs.
        ones_row = jnp.ones((1, M), jnp.float32)
        ld_ref[0] = jnp.dot(ones_row, ld_acc, preferred_element_type=jnp.float32)

    return kernel


def level_forward(z_halves, lp, *, H, W, K, has_split):
    """z_halves: (B, 2, M, c2) f32 (z1 / z2 channel halves)."""
    B, _, M, c2 = z_halves.shape
    hidden = lp["w2"].shape[-1]
    kernel = _make_level_kernel(H, W, K, c2, hidden, has_split)

    ins = [z_halves, lp["aw11"], lp["aw12"], lp["aw21"], lp["aw22"],
           lp["ab1"], lp["ab2"], lp["w1"], lp["b1"], lp["w2"], lp["b2"],
           lp["w3s"], lp["b3s"], lp["w3t"], lp["b3t"]]
    if has_split:
        ins += [lp["wsm"], lp["bsm"], lp["wsl"], lp["bsl"]]

    def _const_spec(a):
        nd = a.ndim
        return pl.BlockSpec(a.shape, lambda b, nd=nd: (0,) * nd)

    in_specs = [pl.BlockSpec((1, 2, M, c2), lambda b: (b, 0, 0, 0))]
    in_specs += [_const_spec(a) for a in ins[1:]]

    if has_split:
        zo_shape = (B, M, c2)
        zo_spec = pl.BlockSpec((1, M, c2), lambda b: (b, 0, 0))
    else:
        zo_shape = (B, 2, M, c2)
        zo_spec = pl.BlockSpec((1, 2, M, c2), lambda b: (b, 0, 0, 0))

    out_shape = (jax.ShapeDtypeStruct(zo_shape, jnp.float32),
                 jax.ShapeDtypeStruct((B, 1, 1), jnp.float32))
    out_specs = (zo_spec, pl.BlockSpec((1, 1, 1), lambda b: (b, 0, 0)))

    pad_rows = M + 2 * (W + 1)
    scratch = [pltpu.VMEM((pad_rows, c2), jnp.float32),      # halo for z1-width
               pltpu.VMEM((pad_rows, hidden), jnp.float32)]  # halo for hidden

    return pl.pallas_call(
        kernel,
        out_shape=out_shape,
        grid=(B,),
        in_specs=in_specs,
        out_specs=out_specs,
        scratch_shapes=scratch,
        compiler_params=pltpu.CompilerParams(
            dimension_semantics=("parallel",)),   # shard batch across TCs (v7x)
    )(*ins)


# ----------------------------- glue (layout) ---------------------------------
def squeeze2d_nhwc(x):
    """PyTorch SqueezeLayer(factor=2) semantics, NHWC layout.

    Output channel index = c*4 + fh*2 + fw (matches torch's NCHW squeeze)."""
    b, h, w, c = x.shape
    x = x.reshape(b, h // 2, 2, w // 2, 2, c)
    x = x.transpose(0, 1, 3, 5, 2, 4)
    return x.reshape(b, h // 2, w // 2, c * 4)


# ----------------------------- flow forward ----------------------------------
def flownet_encode(x_nchw, params, *, K, L, logdet=0.0):
    B = x_nchw.shape[0]
    z = jnp.transpose(x_nchw, (0, 2, 3, 1))          # NCHW -> NHWC (boundary)
    ld_vec = jnp.zeros((B,), jnp.float32) + logdet
    for i in range(L):
        z = squeeze2d_nhwc(z)
        _, H, W, C = z.shape
        c2 = C // 2
        has_split = i < L - 1
        lp = params["levels"][i]
        zf = z.reshape(B, H * W, C)
        z_halves = jnp.stack([zf[..., :c2], zf[..., c2:]], axis=1)  # (B,2,M,c2)
        z_out, ld = level_forward(z_halves, lp, H=H, W=W, K=K,
                                  has_split=has_split)
        ld_vec = ld_vec + ld[:, 0, 0] + (H * W) * lp["ld_const_sum"]
        if has_split:
            z = z_out.reshape(B, H, W, c2)
        else:
            z = jnp.concatenate([z_out[:, 0], z_out[:, 1]],
                                axis=-1).reshape(B, H, W, C)
    return jnp.transpose(z, (0, 3, 1, 2)), ld_vec    # back to NCHW


# TODO(synk): decode (reverse=True) path and ActNorm's data-dependent
# first-batch initialization are not implemented (stateful / sampling).


# ----------------------------- parameters ------------------------------------
def init_params(key, img_shape, hidden, K, L):
    """Synthetic parameters in a PyTorch-equivalent layout.

    Conv weights are stored as (kh, kw, c_in, c_out); when loading a real
    checkpoint permute torch's (c_out, c_in, kh, kw) via w.permute(2, 3, 1, 0).
    """
    H, W, C = img_shape
    assert C in (1, 3)
    levels = []
    for i in range(L):
        C, H, W = C * 4, H // 2, W // 2
        c2 = C // 2
        steps = []
        for _ in range(K):
            key, *ks = jax.random.split(key, 9)
            q, _ = jnp.linalg.qr(jax.random.normal(ks[0], (C, C), jnp.float32))
            steps.append(dict(
                an_bias=0.1 * jax.random.normal(ks[1], (C,), jnp.float32),
                an_logs=0.1 * jax.random.normal(ks[2], (C,), jnp.float32),
                inv_w=q,
                w1=0.1 * jax.random.normal(ks[3], (3, 3, c2, hidden), jnp.float32),
                b1=0.02 * jax.random.normal(ks[4], (hidden,), jnp.float32),
                w2=0.1 * jax.random.normal(ks[5], (hidden, hidden), jnp.float32),
                b2=jnp.zeros((hidden,), jnp.float32),
                # TODO(synk): real glow Conv2dZeros also applies a learned
                # exp(logs*3) per-channel output scale - fold it into w3/b3
                # (and split_w/split_b) here when loading a real checkpoint.
                w3=0.1 * jax.random.normal(ks[6], (3, 3, hidden, C), jnp.float32),
                b3=0.02 * jax.random.normal(ks[7], (C,), jnp.float32),
            ))
        level = dict(steps=steps)
        if i < L - 1:
            key, ksw, ksb = jax.random.split(key, 3)
            level["split_w"] = 0.1 * jax.random.normal(ksw, (3, 3, c2, C), jnp.float32)
            level["split_b"] = 0.02 * jax.random.normal(ksb, (C,), jnp.float32)
            C = C // 2
        levels.append(level)
    return dict(levels=levels)


def prepare_params(raw, hidden):
    """One-time parameter prep (hoisted off the per-forward critical path):
      * fold ActNorm into the 1x1 inv-conv and split it into c2 x c2 blocks so
        the kernel keeps z1/z2 as separate lane-dense halves (no lane slicing),
      * de-interleave the 'cross' shift/scale (mean/logs) output channels of
        the coupling / prior 3x3 convs into separate (9, c_in, c2) tensors,
      * precompute the constant (actnorm + slogdet) per-pixel logdet term,
      * cast coupling-NN matmul weights to MXU_DTYPE (bf16 in / f32 accumulate).
    All transforms are exact w.r.t. the original forward semantics."""
    prepared = {"levels": []}
    names = ["aw11", "aw12", "aw21", "aw22", "ab1", "ab2",
             "w1", "b1", "w2", "b2", "w3s", "b3s", "w3t", "b3t"]
    for lvl in raw["levels"]:
        acc = {n: [] for n in names}
        ld_sum = jnp.asarray(0.0, jnp.float32)
        for s in lvl["steps"]:
            C = s["inv_w"].shape[0]
            c2 = C // 2
            e = jnp.exp(s["an_logs"])
            AW = s["inv_w"].T * e[:, None]                       # diag(e) @ W.T
            ab = ((s["an_bias"] * e) @ s["inv_w"].T)[None, :]    # (1, C)
            _, lad = jnp.linalg.slogdet(s["inv_w"])
            ld_sum = ld_sum + jnp.sum(s["an_logs"]) + lad
            acc["aw11"].append(AW[:c2, :c2]); acc["aw12"].append(AW[:c2, c2:])
            acc["aw21"].append(AW[c2:, :c2]); acc["aw22"].append(AW[c2:, c2:])
            acc["ab1"].append(ab[:, :c2]);    acc["ab2"].append(ab[:, c2:])
            acc["w1"].append(s["w1"].reshape(9, c2, hidden))
            acc["b1"].append(s["b1"][None, :])
            acc["w2"].append(s["w2"]); acc["b2"].append(s["b2"][None, :])
            # 'cross' split: shift = channels 0::2, scale = channels 1::2
            acc["w3s"].append(s["w3"][..., 0::2].reshape(9, hidden, c2))
            acc["w3t"].append(s["w3"][..., 1::2].reshape(9, hidden, c2))
            acc["b3s"].append(s["b3"][0::2][None, :])
            acc["b3t"].append(s["b3"][1::2][None, :])
        plvl = {n: jnp.stack(v) for n, v in acc.items()}
        for n in ("w1", "w2", "w3s", "w3t"):
            plvl[n] = plvl[n].astype(MXU_DTYPE)
        plvl["ld_const_sum"] = ld_sum
        if "split_w" in lvl:
            C = lvl["split_w"].shape[-1]
            c2 = C // 2
            plvl["wsm"] = lvl["split_w"][..., 0::2].reshape(9, c2, c2).astype(MXU_DTYPE)
            plvl["wsl"] = lvl["split_w"][..., 1::2].reshape(9, c2, c2).astype(MXU_DTYPE)
            plvl["bsm"] = lvl["split_b"][0::2][None, :]
            plvl["bsl"] = lvl["split_b"][1::2][None, :]
        prepared["levels"].append(plvl)
    return prepared


# ----------------------------- pure-JAX reference ----------------------------
def _ref_conv3x3(x, w9_list, b_list, H, W):
    """x: (B, M, cin) f32 -> list of (B, M, cout) f32 (same bf16 casts)."""
    B, M, cin = x.shape
    xp = jnp.pad(x.reshape(B, H, W, cin), ((0, 0), (1, 1), (1, 1), (0, 0)))
    outs = [jnp.zeros((B, M, w9.shape[-1]), jnp.float32) for w9 in w9_list]
    idx = 0
    for dh in range(3):
        for dw in range(3):
            win = xp[:, dh:dh + H, dw:dw + W, :].reshape(B, M, cin)
            win = win.astype(w9_list[0].dtype)
            for j, w9 in enumerate(w9_list):
                outs[j] = outs[j] + jnp.einsum(
                    "bmc,cn->bmn", win, w9[idx],
                    preferred_element_type=jnp.float32)
            idx += 1
    return [o + b for o, b in zip(outs, b_list)]


def flownet_encode_ref(x_nchw, params, *, K, L):
    hi = jax.lax.Precision.HIGHEST
    B = x_nchw.shape[0]
    z = jnp.transpose(x_nchw, (0, 2, 3, 1))
    logdet = jnp.zeros((B,), jnp.float32)
    for i in range(L):
        z = squeeze2d_nhwc(z)
        _, H, W, C = z.shape
        c2 = C // 2
        lp = params["levels"][i]
        zf = z.reshape(B, H * W, C)
        z1, z2 = zf[..., :c2], zf[..., c2:]
        for k in range(K):
            f1 = (jnp.einsum("bmc,cd->bmd", z1, lp["aw11"][k], precision=hi)
                  + jnp.einsum("bmc,cd->bmd", z2, lp["aw21"][k], precision=hi)
                  + lp["ab1"][k])
            f2 = (jnp.einsum("bmc,cd->bmd", z1, lp["aw12"][k], precision=hi)
                  + jnp.einsum("bmc,cd->bmd", z2, lp["aw22"][k], precision=hi)
                  + lp["ab2"][k])
            z1, z2 = f1, f2
            (h,) = _ref_conv3x3(z1, [lp["w1"][k]], [lp["b1"][k]], H, W)
            h = jnp.maximum(h, 0.0)
            h = jnp.einsum("bmc,cd->bmd", h.astype(MXU_DTYPE), lp["w2"][k],
                           preferred_element_type=jnp.float32) + lp["b2"][k]
            h = jnp.maximum(h, 0.0)
            shift, sraw = _ref_conv3x3(h, [lp["w3s"][k], lp["w3t"][k]],
                                       [lp["b3s"][k], lp["b3t"][k]], H, W)
            scale = jax.nn.sigmoid(sraw + 2.0)
            z2 = (z2 + shift) * scale
            logdet = logdet + jnp.sum(jnp.log(scale), axis=(1, 2))
        logdet = logdet + (H * W) * lp["ld_const_sum"]
        if i < L - 1:
            mean, logs = _ref_conv3x3(z1, [lp["wsm"], lp["wsl"]],
                                      [lp["bsm"], lp["bsl"]], H, W)
            d = z2 - mean
            logdet = logdet + jnp.sum(
                -0.5 * (_LOG2PI + 2.0 * logs + d * d * jnp.exp(-2.0 * logs)),
                axis=(1, 2))
            z = z1.reshape(B, H, W, c2)
        else:
            z = jnp.concatenate([z1, z2], axis=-1).reshape(B, H, W, C)
    return jnp.transpose(z, (0, 3, 1, 2)), logdet


# ----------------------------- main ------------------------------------------
if __name__ == "__main__":
    key = jax.random.PRNGKey(0)
    kx, kp = jax.random.split(key)

    B, H, W, C = 2, 16, 16, 3              # img_shape = (H, W, C); input NCHW
    x = jax.random.normal(kx, (B, C, H, W), jnp.float32)
    raw = init_params(kp, (H, W, C), HIDDEN, K_STEPS, L_LEVELS)
    params = prepare_params(raw, HIDDEN)   # one-time prep, outside the jit

    encode = jax.jit(functools.partial(flownet_encode, K=K_STEPS, L=L_LEVELS))
    z, logdet = encode(x, params)
    jax.block_until_ready((z, logdet))

    # L=2: 3 -> 12 (split -> 6) -> 24 channels, 16 -> 8 -> 4 spatial
    assert z.shape == (B, 24, 4, 4), z.shape
    assert logdet.shape == (B,), logdet.shape
    assert bool(jnp.all(jnp.isfinite(z))) and bool(jnp.all(jnp.isfinite(logdet)))

    # correctness vs. a pure-JAX reference using identical math / bf16 casts
    z_ref, ld_exp = flownet_encode_ref(x, params, K=K_STEPS, L=L_LEVELS)
    np.testing.assert_allclose(np.asarray(z), np.asarray(z_ref),
                               rtol=2e-2, atol=2e-2)
    np.testing.assert_allclose(np.asarray(logdet), np.asarray(ld_exp),
                               rtol=1e-2, atol=1.0)
    print("KERNEL_OK")
</pallas_src>

<mosaic_0001>
module attributes {stable_mosaic.version = 11 : i64} {
  func.func @kernel(%arg0: i32, %arg1: memref<1x2x64x6xf32, #tpu.memory_space<vmem>>, %arg2: memref<2x6x6xf32, #tpu.memory_space<vmem>>, %arg3: memref<2x6x6xf32, #tpu.memory_space<vmem>>, %arg4: memref<2x6x6xf32, #tpu.memory_space<vmem>>, %arg5: memref<2x6x6xf32, #tpu.memory_space<vmem>>, %arg6: memref<2x1x6xf32, #tpu.memory_space<vmem>>, %arg7: memref<2x1x6xf32, #tpu.memory_space<vmem>>, %arg8: memref<2x9x6x32xbf16, #tpu.memory_space<vmem>>, %arg9: memref<2x1x32xf32, #tpu.memory_space<vmem>>, %arg10: memref<2x32x32xbf16, #tpu.memory_space<vmem>>, %arg11: memref<2x1x32xf32, #tpu.memory_space<vmem>>, %arg12: memref<2x9x32x6xbf16, #tpu.memory_space<vmem>>, %arg13: memref<2x1x6xf32, #tpu.memory_space<vmem>>, %arg14: memref<2x9x32x6xbf16, #tpu.memory_space<vmem>>, %arg15: memref<2x1x6xf32, #tpu.memory_space<vmem>>, %arg16: memref<9x6x6xbf16, #tpu.memory_space<vmem>>, %arg17: memref<1x6xf32, #tpu.memory_space<vmem>>, %arg18: memref<9x6x6xbf16, #tpu.memory_space<vmem>>, %arg19: memref<1x6xf32, #tpu.memory_space<vmem>>, %arg20: memref<1x64x6xf32, #tpu.memory_space<vmem>>, %arg21: memref<1x1x1xf32, #tpu.memory_space<vmem>>, %arg22: memref<82x6xf32, #tpu.memory_space<vmem>>, %arg23: memref<82x32xf32, #tpu.memory_space<vmem>>) attributes {dimension_semantics = [#tpu.dimension_semantics<parallel>], iteration_bounds = array<i64: 2>, scalar_prefetch = 0 : i64, scratch_operands = 2 : i64, tpu.core_type = #tpu.core_type<tc>, window_params = [{transform_indices = @transform_0, window_bounds = array<i64: 1, 2, 64, 6>}, {pipeline_mode = #tpu.pipeline_mode<synchronous>, transform_indices = @transform_1, window_bounds = array<i64: 2, 6, 6>}, {pipeline_mode = #tpu.pipeline_mode<synchronous>, transform_indices = @transform_2, window_bounds = array<i64: 2, 6, 6>}, {pipeline_mode = #tpu.pipeline_mode<synchronous>, transform_indices = @transform_3, window_bounds = array<i64: 2, 6, 6>}, {pipeline_mode = #tpu.pipeline_mode<synchronous>, transform_indices = @transform_4, window_bounds = array<i64: 2, 6, 6>}, {pipeline_mode = #tpu.pipeline_mode<synchronous>, transform_indices = @transform_5, window_bounds = array<i64: 2, 1, 6>}, {pipeline_mode = #tpu.pipeline_mode<synchronous>, transform_indices = @transform_6, window_bounds = array<i64: 2, 1, 6>}, {pipeline_mode = #tpu.pipeline_mode<synchronous>, transform_indices = @transform_7, window_bounds = array<i64: 2, 9, 6, 32>}, {pipeline_mode = #tpu.pipeline_mode<synchronous>, transform_indices = @transform_8, window_bounds = array<i64: 2, 1, 32>}, {pipeline_mode = #tpu.pipeline_mode<synchronous>, transform_indices = @transform_9, window_bounds = array<i64: 2, 32, 32>}, {pipeline_mode = #tpu.pipeline_mode<synchronous>, transform_indices = @transform_10, window_bounds = array<i64: 2, 1, 32>}, {pipeline_mode = #tpu.pipeline_mode<synchronous>, transform_indices = @transform_11, window_bounds = array<i64: 2, 9, 32, 6>}, {pipeline_mode = #tpu.pipeline_mode<synchronous>, transform_indices = @transform_12, window_bounds = array<i64: 2, 1, 6>}, {pipeline_mode = #tpu.pipeline_mode<synchronous>, transform_indices = @transform_13, window_bounds = array<i64: 2, 9, 32, 6>}, {pipeline_mode = #tpu.pipeline_mode<synchronous>, transform_indices = @transform_14, window_bounds = array<i64: 2, 1, 6>}, {pipeline_mode = #tpu.pipeline_mode<synchronous>, transform_indices = @transform_15, window_bounds = array<i64: 9, 6, 6>}, {pipeline_mode = #tpu.pipeline_mode<synchronous>, transform_indices = @transform_16, window_bounds = array<i64: 1, 6>}, {pipeline_mode = #tpu.pipeline_mode<synchronous>, transform_indices = @transform_17, window_bounds = array<i64: 9, 6, 6>}, {pipeline_mode = #tpu.pipeline_mode<synchronous>, transform_indices = @transform_18, window_bounds = array<i64: 1, 6>}, {transform_indices = @transform_19, window_bounds = array<i64: 1, 64, 6>}, {transform_indices = @transform_20, window_bounds = array<i64: 1, 1, 1>}]} {
    %cst = arith.constant 0.000000e+00 : f32
    %0 = vector.broadcast %cst : f32 to vector<82x6xf32>
    %c0 = arith.constant 0 : index
    %c0_0 = arith.constant 0 : index
    %1 = vector.load %arg22[%c0, %c0_0] : memref<82x6xf32, #tpu.memory_space<vmem>>, vector<82x6xf32>
    tpu.vector_store %arg22[%c0, %c0_0], %0 {strides = array<i32>} : memref<82x6xf32, #tpu.memory_space<vmem>>, vector<82x6xf32>,
    %cst_1 = arith.constant 0.000000e+00 : f32
    %2 = vector.broadcast %cst_1 : f32 to vector<82x32xf32>
    %c0_2 = arith.constant 0 : index
    %c0_3 = arith.constant 0 : index
    %3 = vector.load %arg23[%c0_2, %c0_3] : memref<82x32xf32, #tpu.memory_space<vmem>>, vector<82x32xf32>
    tpu.vector_store %arg23[%c0_2, %c0_3], %2 {strides = array<i32>} : memref<82x32xf32, #tpu.memory_space<vmem>>, vector<82x32xf32>,
    %4 = tpu.iota {dimensions = array<i32: 0>} : vector<64x1xi32>
    %c8_i32 = arith.constant 8 : i32
    %c0_i32 = arith.constant 0 : i32
    %5 = arith.cmpi eq, %c8_i32, %c0_i32 : i32
    %c1_i32 = arith.constant 1 : i32
    %6 = arith.select %5, %c1_i32, %c8_i32 : i32
    %7 = vector.broadcast %6 : i32 to vector<64x1xi32>
    %8 = arith.remsi %4, %7 : vector<64x1xi32>
    %c0_i32_4 = arith.constant 0 : i32
    %9 = vector.broadcast %c0_i32_4 : i32 to vector<64x1xi32>
    %10 = arith.cmpi ne, %8, %9 : vector<64x1xi32>
    %c0_i32_5 = arith.constant 0 : i32
    %11 = vector.broadcast %c0_i32_5 : i32 to vector<64x1xi32>
    %12 = arith.cmpi slt, %8, %11 : vector<64x1xi32>
    %c0_i32_6 = arith.constant 0 : i32
    %13 = arith.cmpi slt, %6, %c0_i32_6 : i32
    %14 = vector.broadcast %13 : i1 to vector<64x1xi1>
    %15 = vector.broadcast %14 : vector<64x1xi1> to vector<64x1xi1>
    %16 = arith.xori %12, %15 : vector<64x1xi1>
    %17 = arith.andi %16, %10 : vector<64x1xi1>
    %18 = vector.broadcast %6 : i32 to vector<64x1xi32>
    %19 = arith.addi %8, %18 : vector<64x1xi32>
    %20 = arith.select %17, %19, %8 : vector<64x1xi1>, vector<64x1xi32>
    %c1_i32_7 = arith.constant 1 : i32
    %21 = vector.broadcast %c1_i32_7 : i32 to vector<64x1xi32>
    %22 = arith.cmpi sge, %20, %21 : vector<64x1xi32>
    %23 = arith.extui %22 : vector<64x1xi1> to vector<64x1xi32>
    %24 = arith.sitofp %23 : vector<64x1xi32> to vector<64x1xf32>
    %c6_i32 = arith.constant 6 : i32
    %25 = vector.broadcast %c6_i32 : i32 to vector<64x1xi32>
    %26 = arith.cmpi sle, %20, %25 : vector<64x1xi32>
    %27 = arith.extui %26 : vector<64x1xi1> to vector<64x1xi32>
    %28 = arith.sitofp %27 : vector<64x1xi32> to vector<64x1xf32>
    %c0_8 = arith.constant 0 : index
    %c0_9 = arith.constant 0 : index
    %c0_10 = arith.constant 0 : index
    %c0_11 = arith.constant 0 : index
    %29 = vector.load %arg1[%c0_8, %c0_9, %c0_10, %c0_11] : memref<1x2x64x6xf32, #tpu.memory_space<vmem>>, vector<1x1x64x6xf32>
    %30 = vector.shape_cast %29 : vector<1x1x64x6xf32> to vector<64x6xf32>
    %c0_12 = arith.constant 0 : index
    %c1 = arith.constant 1 : index
    %c0_13 = arith.constant 0 : index
    %c0_14 = arith.constant 0 : index
    %31 = vector.load %arg1[%c0_12, %c1, %c0_13, %c0_14] : memref<1x2x64x6xf32, #tpu.memory_space<vmem>>, vector<1x1x64x6xf32>
    %32 = vector.shape_cast %31 : vector<1x1x64x6xf32> to vector<64x6xf32>
    %cst_15 = arith.constant 0.000000e+00 : f32
    %33 = vector.broadcast %cst_15 : f32 to vector<64x1xf32>
    %c0_16 = arith.constant 0 : index
    %c0_17 = arith.constant 0 : index
    %c0_18 = arith.constant 0 : index
    %34 = vector.load %arg2[%c0_16, %c0_17, %c0_18] : memref<2x6x6xf32, #tpu.memory_space<vmem>>, vector<1x6x6xf32>
    %35 = vector.shape_cast %34 : vector<1x6x6xf32> to vector<6x6xf32>
    %cst_19 = arith.constant dense<0.000000e+00> : vector<64x6xf32>
    %36 = tpu.matmul %30, %35, %cst_19 {dimension_numbers = #tpu.dot_dimension_numbers<[1], [0], [0], [1], [0, 0, 1, 1], [], []>} : vector<64x6xf32>, vector<6x6xf32>, vector<64x6xf32> -> vector<64x6xf32>
    %c0_20 = arith.constant 0 : index
    %c0_21 = arith.constant 0 : index
    %c0_22 = arith.constant 0 : index
    %37 = vector.load %arg4[%c0_20, %c0_21, %c0_22] : memref<2x6x6xf32, #tpu.memory_space<vmem>>, vector<1x6x6xf32>
    %38 = vector.shape_cast %37 : vector<1x6x6xf32> to vector<6x6xf32>
    %cst_23 = arith.constant dense<0.000000e+00> : vector<64x6xf32>
    %39 = tpu.matmul %32, %38, %cst_23 {dimension_numbers = #tpu.dot_dimension_numbers<[1], [0], [0], [1], [0, 0, 1, 1], [], []>} : vector<64x6xf32>, vector<6x6xf32>, vector<64x6xf32> -> vector<64x6xf32>
    %40 = arith.addf %36, %39 : vector<64x6xf32>
    %c0_24 = arith.constant 0 : index
    %c0_25 = arith.constant 0 : index
    %c0_26 = arith.constant 0 : index
    %41 = vector.load %arg6[%c0_24, %c0_25, %c0_26] : memref<2x1x6xf32, #tpu.memory_space<vmem>>, vector<1x1x6xf32>
    %42 = vector.shape_cast %41 : vector<1x1x6xf32> to vector<1x6xf32>
    %43 = vector.broadcast %42 : vector<1x6xf32> to vector<64x6xf32>
    %44 = arith.addf %40, %43 : vector<64x6xf32>
    %c0_27 = arith.constant 0 : index
    %c0_28 = arith.constant 0 : index
    %c0_29 = arith.constant 0 : index
    %45 = vector.load %arg3[%c0_27, %c0_28, %c0_29] : memref<2x6x6xf32, #tpu.memory_space<vmem>>, vector<1x6x6xf32>
    %46 = vector.shape_cast %45 : vector<1x6x6xf32> to vector<6x6xf32>
    %cst_30 = arith.constant dense<0.000000e+00> : vector<64x6xf32>
    %47 = tpu.matmul %30, %46, %cst_30 {dimension_numbers = #tpu.dot_dimension_numbers<[1], [0], [0], [1], [0, 0, 1, 1], [], []>} : vector<64x6xf32>, vector<6x6xf32>, vector<64x6xf32> -> vector<64x6xf32>
    %c0_31 = arith.constant 0 : index
    %c0_32 = arith.constant 0 : index
    %c0_33 = arith.constant 0 : index
    %48 = vector.load %arg5[%c0_31, %c0_32, %c0_33] : memref<2x6x6xf32, #tpu.memory_space<vmem>>, vector<1x6x6xf32>
    %49 = vector.shape_cast %48 : vector<1x6x6xf32> to vector<6x6xf32>
    %cst_34 = arith.constant dense<0.000000e+00> : vector<64x6xf32>
    %50 = tpu.matmul %32, %49, %cst_34 {dimension_numbers = #tpu.dot_dimension_numbers<[1], [0], [0], [1], [0, 0, 1, 1], [], []>} : vector<64x6xf32>, vector<6x6xf32>, vector<64x6xf32> -> vector<64x6xf32>
    %51 = arith.addf %47, %50 : vector<64x6xf32>
    %c0_35 = arith.constant 0 : index
    %c0_36 = arith.constant 0 : index
    %c0_37 = arith.constant 0 : index
    %52 = vector.load %arg7[%c0_35, %c0_36, %c0_37] : memref<2x1x6xf32, #tpu.memory_space<vmem>>, vector<1x1x6xf32>
    %53 = vector.shape_cast %52 : vector<1x1x6xf32> to vector<1x6xf32>
    %54 = vector.broadcast %53 : vector<1x6xf32> to vector<64x6xf32>
    %55 = arith.addf %51, %54 : vector<64x6xf32>
    %c9 = arith.constant 9 : index
    %c0_38 = arith.constant 0 : index
    %56 = vector.load %arg22[%c9, %c0_38] : memref<82x6xf32, #tpu.memory_space<vmem>>, vector<64x6xf32>
    tpu.vector_store %arg22[%c9, %c0_38], %44 {strides = array<i32>} : memref<82x6xf32, #tpu.memory_space<vmem>>, vector<64x6xf32>,
    %c0_39 = arith.constant 0 : index
    %c0_40 = arith.constant 0 : index
    %57 = vector.load %arg22[%c0_39, %c0_40] : memref<82x6xf32, #tpu.memory_space<vmem>>, vector<64x6xf32>
    %58 = vector.broadcast %24 : vector<64x1xf32> to vector<64x6xf32>
    %59 = arith.mulf %57, %58 : vector<64x6xf32>
    %60 = arith.truncf %59 : vector<64x6xf32> to vector<64x6xbf16>
    %c0_41 = arith.constant 0 : index
    %c0_42 = arith.constant 0 : index
    %c0_43 = arith.constant 0 : index
    %c0_44 = arith.constant 0 : index
    %61 = vector.load %arg8[%c0_41, %c0_42, %c0_43, %c0_44] : memref<2x9x6x32xbf16, #tpu.memory_space<vmem>>, vector<1x1x6x32xbf16>
    %62 = vector.shape_cast %61 : vector<1x1x6x32xbf16> to vector<6x32xbf16>
    %cst_45 = arith.constant dense<0.000000e+00> : vector<64x32xf32>
    %63 = tpu.matmul %60, %62, %cst_45 {dimension_numbers = #tpu.dot_dimension_numbers<[1], [0], [0], [1], [0, 0, 1, 1], [], []>} : vector<64x6xbf16>, vector<6x32xbf16>, vector<64x32xf32> -> vector<64x32xf32>
    %c1_46 = arith.constant 1 : index
    %c0_47 = arith.constant 0 : index
    %64 = vector.load %arg22[%c1_46, %c0_47] : memref<82x6xf32, #tpu.memory_space<vmem>>, vector<64x6xf32>
    %65 = arith.truncf %64 : vector<64x6xf32> to vector<64x6xbf16>
    %c0_48 = arith.constant 0 : index
    %c1_49 = arith.constant 1 : index
    %c0_50 = arith.constant 0 : index
    %c0_51 = arith.constant 0 : index
    %66 = vector.load %arg8[%c0_48, %c1_49, %c0_50, %c0_51] : memref<2x9x6x32xbf16, #tpu.memory_space<vmem>>, vector<1x1x6x32xbf16>
    %67 = vector.shape_cast %66 : vector<1x1x6x32xbf16> to vector<6x32xbf16>
    %cst_52 = arith.constant dense<0.000000e+00> : vector<64x32xf32>
    %68 = tpu.matmul %65, %67, %cst_52 {dimension_numbers = #tpu.dot_dimension_numbers<[1], [0], [0], [1], [0, 0, 1, 1], [], []>} : vector<64x6xbf16>, vector<6x32xbf16>, vector<64x32xf32> -> vector<64x32xf32>
    %69 = arith.addf %63, %68 : vector<64x32xf32>
    %c2 = arith.constant 2 : index
    %c0_53 = arith.constant 0 : index
    %70 = vector.load %arg22[%c2, %c0_53] : memref<82x6xf32, #tpu.memory_space<vmem>>, vector<64x6xf32>
    %71 = vector.broadcast %28 : vector<64x1xf32> to vector<64x6xf32>
    %72 = arith.mulf %70, %71 : vector<64x6xf32>
    %73 = arith.truncf %72 : vector<64x6xf32> to vector<64x6xbf16>
    %c0_54 = arith.constant 0 : index
    %c2_55 = arith.constant 2 : index
    %c0_56 = arith.constant 0 : index
    %c0_57 = arith.constant 0 : index
    %74 = vector.load %arg8[%c0_54, %c2_55, %c0_56, %c0_57] : memref<2x9x6x32xbf16, #tpu.memory_space<vmem>>, vector<1x1x6x32xbf16>
    %75 = vector.shape_cast %74 : vector<1x1x6x32xbf16> to vector<6x32xbf16>
    %cst_58 = arith.constant dense<0.000000e+00> : vector<64x32xf32>
    %76 = tpu.matmul %73, %75, %cst_58 {dimension_numbers = #tpu.dot_dimension_numbers<[1], [0], [0], [1], [0, 0, 1, 1], [], []>} : vector<64x6xbf16>, vector<6x32xbf16>, vector<64x32xf32> -> vector<64x32xf32>
    %77 = arith.addf %69, %76 : vector<64x32xf32>
    %c8 = arith.constant 8 : index
    %c0_59 = arith.constant 0 : index
    %78 = vector.load %arg22[%c8, %c0_59] : memref<82x6xf32, #tpu.memory_space<vmem>>, vector<64x6xf32>
    %79 = vector.broadcast %24 : vector<64x1xf32> to vector<64x6xf32>
    %80 = arith.mulf %78, %79 : vector<64x6xf32>
    %81 = arith.truncf %80 : vector<64x6xf32> to vector<64x6xbf16>
    %c0_60 = arith.constant 0 : index
    %c3 = arith.constant 3 : index
    %c0_61 = arith.constant 0 : index
    %c0_62 = arith.constant 0 : index
    %82 = vector.load %arg8[%c0_60, %c3, %c0_61, %c0_62] : memref<2x9x6x32xbf16, #tpu.memory_space<vmem>>, vector<1x1x6x32xbf16>
    %83 = vector.shape_cast %82 : vector<1x1x6x32xbf16> to vector<6x32xbf16>
    %cst_63 = arith.constant dense<0.000000e+00> : vector<64x32xf32>
    %84 = tpu.matmul %81, %83, %cst_63 {dimension_numbers = #tpu.dot_dimension_numbers<[1], [0], [0], [1], [0, 0, 1, 1], [], []>} : vector<64x6xbf16>, vector<6x32xbf16>, vector<64x32xf32> -> vector<64x32xf32>
    %85 = arith.addf %77, %84 : vector<64x32xf32>
    %c9_64 = arith.constant 9 : index
    %c0_65 = arith.constant 0 : index
    %86 = vector.load %arg22[%c9_64, %c0_65] : memref<82x6xf32, #tpu.memory_space<vmem>>, vector<64x6xf32>
    %87 = arith.truncf %86 : vector<64x6xf32> to vector<64x6xbf16>
    %c0_66 = arith.constant 0 : index
    %c4 = arith.constant 4 : index
    %c0_67 = arith.constant 0 : index
    %c0_68 = arith.constant 0 : index
    %88 = vector.load %arg8[%c0_66, %c4, %c0_67, %c0_68] : memref<2x9x6x32xbf16, #tpu.memory_space<vmem>>, vector<1x1x6x32xbf16>
    %89 = vector.shape_cast %88 : vector<1x1x6x32xbf16> to vector<6x32xbf16>
    %cst_69 = arith.constant dense<0.000000e+00> : vector<64x32xf32>
    %90 = tpu.matmul %87, %89, %cst_69 {dimension_numbers = #tpu.dot_dimension_numbers<[1], [0], [0], [1], [0, 0, 1, 1], [], []>} : vector<64x6xbf16>, vector<6x32xbf16>, vector<64x32xf32> -> vector<64x32xf32>
    %91 = arith.addf %85, %90 : vector<64x32xf32>
    %c10 = arith.constant 10 : index
    %c0_70 = arith.constant 0 : index
    %92 = vector.load %arg22[%c10, %c0_70] : memref<82x6xf32, #tpu.memory_space<vmem>>, vector<64x6xf32>
    %93 = vector.broadcast %28 : vector<64x1xf32> to vector<64x6xf32>
    %94 = arith.mulf %92, %93 : vector<64x6xf32>
    %95 = arith.truncf %94 : vector<64x6xf32> to vector<64x6xbf16>
    %c0_71 = arith.constant 0 : index
    %c5 = arith.constant 5 : index
    %c0_72 = arith.constant 0 : index
    %c0_73 = arith.constant 0 : index
    %96 = vector.load %arg8[%c0_71, %c5, %c0_72, %c0_73] : memref<2x9x6x32xbf16, #tpu.memory_space<vmem>>, vector<1x1x6x32xbf16>
    %97 = vector.shape_cast %96 : vector<1x1x6x32xbf16> to vector<6x32xbf16>
    %cst_74 = arith.constant dense<0.000000e+00> : vector<64x32xf32>
    %98 = tpu.matmul %95, %97, %cst_74 {dimension_numbers = #tpu.dot_dimension_numbers<[1], [0], [0], [1], [0, 0, 1, 1], [], []>} : vector<64x6xbf16>, vector<6x32xbf16>, vector<64x32xf32> -> vector<64x32xf32>
    %99 = arith.addf %91, %98 : vector<64x32xf32>
    %c16 = arith.constant 16 : index
    %c0_75 = arith.constant 0 : index
    %100 = vector.load %arg22[%c16, %c0_75] : memref<82x6xf32, #tpu.memory_space<vmem>>, vector<64x6xf32>
    %101 = vector.broadcast %24 : vector<64x1xf32> to vector<64x6xf32>
    %102 = arith.mulf %100, %101 : vector<64x6xf32>
    %103 = arith.truncf %102 : vector<64x6xf32> to vector<64x6xbf16>
    %c0_76 = arith.constant 0 : index
    %c6 = arith.constant 6 : index
    %c0_77 = arith.constant 0 : index
    %c0_78 = arith.constant 0 : index
    %104 = vector.load %arg8[%c0_76, %c6, %c0_77, %c0_78] : memref<2x9x6x32xbf16, #tpu.memory_space<vmem>>, vector<1x1x6x32xbf16>
    %105 = vector.shape_cast %104 : vector<1x1x6x32xbf16> to vector<6x32xbf16>
    %cst_79 = arith.constant dense<0.000000e+00> : vector<64x32xf32>
    %106 = tpu.matmul %103, %105, %cst_79 {dimension_numbers = #tpu.dot_dimension_numbers<[1], [0], [0], [1], [0, 0, 1, 1], [], []>} : vector<64x6xbf16>, vector<6x32xbf16>, vector<64x32xf32> -> vector<64x32xf32>
    %107 = arith.addf %99, %106 : vector<64x32xf32>
    %c17 = arith.constant 17 : index
    %c0_80 = arith.constant 0 : index
    %108 = vector.load %arg22[%c17, %c0_80] : memref<82x6xf32, #tpu.memory_space<vmem>>, vector<64x6xf32>
    %109 = arith.truncf %108 : vector<64x6xf32> to vector<64x6xbf16>
    %c0_81 = arith.constant 0 : index
    %c7 = arith.constant 7 : index
    %c0_82 = arith.constant 0 : index
    %c0_83 = arith.constant 0 : index
    %110 = vector.load %arg8[%c0_81, %c7, %c0_82, %c0_83] : memref<2x9x6x32xbf16, #tpu.memory_space<vmem>>, vector<1x1x6x32xbf16>
    %111 = vector.shape_cast %110 : vector<1x1x6x32xbf16> to vector<6x32xbf16>
    %cst_84 = arith.constant dense<0.000000e+00> : vector<64x32xf32>
    %112 = tpu.matmul %109, %111, %cst_84 {dimension_numbers = #tpu.dot_dimension_numbers<[1], [0], [0], [1], [0, 0, 1, 1], [], []>} : vector<64x6xbf16>, vector<6x32xbf16>, vector<64x32xf32> -> vector<64x32xf32>
    %113 = arith.addf %107, %112 : vector<64x32xf32>
    %c18 = arith.constant 18 : index
    %c0_85 = arith.constant 0 : index
    %114 = vector.load %arg22[%c18, %c0_85] : memref<82x6xf32, #tpu.memory_space<vmem>>, vector<64x6xf32>
    %115 = vector.broadcast %28 : vector<64x1xf32> to vector<64x6xf32>
    %116 = arith.mulf %114, %115 : vector<64x6xf32>
    %117 = arith.truncf %116 : vector<64x6xf32> to vector<64x6xbf16>
    %c0_86 = arith.constant 0 : index
    %c8_87 = arith.constant 8 : index
    %c0_88 = arith.constant 0 : index
    %c0_89 = arith.constant 0 : index
    %118 = vector.load %arg8[%c0_86, %c8_87, %c0_88, %c0_89] : memref<2x9x6x32xbf16, #tpu.memory_space<vmem>>, vector<1x1x6x32xbf16>
    %119 = vector.shape_cast %118 : vector<1x1x6x32xbf16> to vector<6x32xbf16>
    %cst_90 = arith.constant dense<0.000000e+00> : vector<64x32xf32>
    %120 = tpu.matmul %117, %119, %cst_90 {dimension_numbers = #tpu.dot_dimension_numbers<[1], [0], [0], [1], [0, 0, 1, 1], [], []>} : vector<64x6xbf16>, vector<6x32xbf16>, vector<64x32xf32> -> vector<64x32xf32>
    %121 = arith.addf %113, %120 : vector<64x32xf32>
    %c0_91 = arith.constant 0 : index
    %c0_92 = arith.constant 0 : index
    %c0_93 = arith.constant 0 : index
    %122 = vector.load %arg9[%c0_91, %c0_92, %c0_93] : memref<2x1x32xf32, #tpu.memory_space<vmem>>, vector<1x1x32xf32>
    %123 = vector.shape_cast %122 : vector<1x1x32xf32> to vector<1x32xf32>
    %124 = vector.broadcast %123 : vector<1x32xf32> to vector<64x32xf32>
    %125 = arith.addf %121, %124 : vector<64x32xf32>
    %cst_94 = arith.constant 0.000000e+00 : f32
    %126 = vector.broadcast %cst_94 : f32 to vector<64x32xf32>
    %127 = arith.maximumf %125, %126 : vector<64x32xf32>
    %128 = arith.truncf %127 : vector<64x32xf32> to vector<64x32xbf16>
    %c0_95 = arith.constant 0 : index
    %c0_96 = arith.constant 0 : index
    %c0_97 = arith.constant 0 : index
    %129 = vector.load %arg10[%c0_95, %c0_96, %c0_97] : memref<2x32x32xbf16, #tpu.memory_space<vmem>>, vector<1x32x32xbf16>
    %130 = vector.shape_cast %129 : vector<1x32x32xbf16> to vector<32x32xbf16>
    %cst_98 = arith.constant dense<0.000000e+00> : vector<64x32xf32>
    %131 = tpu.matmul %128, %130, %cst_98 {dimension_numbers = #tpu.dot_dimension_numbers<[1], [0], [0], [1], [0, 0, 1, 1], [], []>} : vector<64x32xbf16>, vector<32x32xbf16>, vector<64x32xf32> -> vector<64x32xf32>
    %c0_99 = arith.constant 0 : index
    %c0_100 = arith.constant 0 : index
    %c0_101 = arith.constant 0 : index
    %132 = vector.load %arg11[%c0_99, %c0_100, %c0_101] : memref<2x1x32xf32, #tpu.memory_space<vmem>>, vector<1x1x32xf32>
    %133 = vector.shape_cast %132 : vector<1x1x32xf32> to vector<1x32xf32>
    %134 = vector.broadcast %133 : vector<1x32xf32> to vector<64x32xf32>
    %135 = arith.addf %131, %134 : vector<64x32xf32>
    %cst_102 = arith.constant 0.000000e+00 : f32
    %136 = vector.broadcast %cst_102 : f32 to vector<64x32xf32>
    %137 = arith.maximumf %135, %136 : vector<64x32xf32>
    %c9_103 = arith.constant 9 : index
    %c0_104 = arith.constant 0 : index
    %138 = vector.load %arg23[%c9_103, %c0_104] : memref<82x32xf32, #tpu.memory_space<vmem>>, vector<64x32xf32>
    tpu.vector_store %arg23[%c9_103, %c0_104], %137 {strides = array<i32>} : memref<82x32xf32, #tpu.memory_space<vmem>>, vector<64x32xf32>,
    %c0_105 = arith.constant 0 : index
    %c0_106 = arith.constant 0 : index
    %139 = vector.load %arg23[%c0_105, %c0_106] : memref<82x32xf32, #tpu.memory_space<vmem>>, vector<64x32xf32>
    %140 = vector.broadcast %24 : vector<64x1xf32> to vector<64x32xf32>
    %141 = arith.mulf %139, %140 : vector<64x32xf32>
    %142 = arith.truncf %141 : vector<64x32xf32> to vector<64x32xbf16>
    %c0_107 = arith.constant 0 : index
    %c0_108 = arith.constant 0 : index
    %c0_109 = arith.constant 0 : index
    %c0_110 = arith.constant 0 : index
    %143 = vector.load %arg12[%c0_107, %c0_108, %c0_109, %c0_110] : memref<2x9x32x6xbf16, #tpu.memory_space<vmem>>, vector<1x1x32x6xbf16>
    %144 = vector.shape_cast %143 : vector<1x1x32x6xbf16> to vector<32x6xbf16>
    %c0_111 = arith.constant 0 : index
    %c0_112 = arith.constant 0 : index
    %c0_113 = arith.constant 0 : index
    %c0_114 = arith.constant 0 : index
    %145 = vector.load %arg14[%c0_111, %c0_112, %c0_113, %c0_114] : memref<2x9x32x6xbf16, #tpu.memory_space<vmem>>, vector<1x1x32x6xbf16>
    %146 = vector.shape_cast %145 : vector<1x1x32x6xbf16> to vector<32x6xbf16>
    %cst_115 = arith.constant dense<0.000000e+00> : vector<64x6xf32>
    %147 = tpu.matmul %142, %144, %cst_115 {dimension_numbers = #tpu.dot_dimension_numbers<[1], [0], [0], [1], [0, 0, 1, 1], [], []>} : vector<64x32xbf16>, vector<32x6xbf16>, vector<64x6xf32> -> vector<64x6xf32>
    %cst_116 = arith.constant dense<0.000000e+00> : vector<64x6xf32>
    %148 = tpu.matmul %142, %146, %cst_116 {dimension_numbers = #tpu.dot_dimension_numbers<[1], [0], [0], [1], [0, 0, 1, 1], [], []>} : vector<64x32xbf16>, vector<32x6xbf16>, vector<64x6xf32> -> vector<64x6xf32>
    %c1_117 = arith.constant 1 : index
    %c0_118 = arith.constant 0 : index
    %149 = vector.load %arg23[%c1_117, %c0_118] : memref<82x32xf32, #tpu.memory_space<vmem>>, vector<64x32xf32>
    %150 = arith.truncf %149 : vector<64x32xf32> to vector<64x32xbf16>
    %c0_119 = arith.constant 0 : index
    %c1_120 = arith.constant 1 : index
    %c0_121 = arith.constant 0 : index
    %c0_122 = arith.constant 0 : index
    %151 = vector.load %arg12[%c0_119, %c1_120, %c0_121, %c0_122] : memref<2x9x32x6xbf16, #tpu.memory_space<vmem>>, vector<1x1x32x6xbf16>
    %152 = vector.shape_cast %151 : vector<1x1x32x6xbf16> to vector<32x6xbf16>
    %c0_123 = arith.constant 0 : index
    %c1_124 = arith.constant 1 : index
    %c0_125 = arith.constant 0 : index
    %c0_126 = arith.constant 0 : index
    %153 = vector.load %arg14[%c0_123, %c1_124, %c0_125, %c0_126] : memref<2x9x32x6xbf16, #tpu.memory_space<vmem>>, vector<1x1x32x6xbf16>
    %154 = vector.shape_cast %153 : vector<1x1x32x6xbf16> to vector<32x6xbf16>
    %cst_127 = arith.constant dense<0.000000e+00> : vector<64x6xf32>
    %155 = tpu.matmul %150, %152, %cst_127 {dimension_numbers = #tpu.dot_dimension_numbers<[1], [0], [0], [1], [0, 0, 1, 1], [], []>} : vector<64x32xbf16>, vector<32x6xbf16>, vector<64x6xf32> -> vector<64x6xf32>
    %cst_128 = arith.constant dense<0.000000e+00> : vector<64x6xf32>
    %156 = tpu.matmul %150, %154, %cst_128 {dimension_numbers = #tpu.dot_dimension_numbers<[1], [0], [0], [1], [0, 0, 1, 1], [], []>} : vector<64x32xbf16>, vector<32x6xbf16>, vector<64x6xf32> -> vector<64x6xf32>
    %157 = arith.addf %147, %155 : vector<64x6xf32>
    %158 = arith.addf %148, %156 : vector<64x6xf32>
    %c2_129 = arith.constant 2 : index
    %c0_130 = arith.constant 0 : index
    %159 = vector.load %arg23[%c2_129, %c0_130] : memref<82x32xf32, #tpu.memory_space<vmem>>, vector<64x32xf32>
    %160 = vector.broadcast %28 : vector<64x1xf32> to vector<64x32xf32>
    %161 = arith.mulf %159, %160 : vector<64x32xf32>
    %162 = arith.truncf %161 : vector<64x32xf32> to vector<64x32xbf16>
    %c0_131 = arith.constant 0 : index
    %c2_132 = arith.constant 2 : index
    %c0_133 = arith.constant 0 : index
    %c0_134 = arith.constant 0 : index
    %163 = vector.load %arg12[%c0_131, %c2_132, %c0_133, %c0_134] : memref<2x9x32x6xbf16, #tpu.memory_space<vmem>>, vector<1x1x32x6xbf16>
    %164 = vector.shape_cast %163 : vector<1x1x32x6xbf16> to vector<32x6xbf16>
    %c0_135 = arith.constant 0 : index
    %c2_136 = arith.constant 2 : index
    %c0_137 = arith.constant 0 : index
    %c0_138 = arith.constant 0 : index
    %165 = vector.load %arg14[%c0_135, %c2_136, %c0_137, %c0_138] : memref<2x9x32x6xbf16, #tpu.memory_space<vmem>>, vector<1x1x32x6xbf16>
    %166 = vector.shape_cast %165 : vector<1x1x32x6xbf16> to vector<32x6xbf16>
    %cst_139 = arith.constant dense<0.000000e+00> : vector<64x6xf32>
    %167 = tpu.matmul %162, %164, %cst_139 {dimension_numbers = #tpu.dot_dimension_numbers<[1], [0], [0], [1], [0, 0, 1, 1], [], []>} : vector<64x32xbf16>, vector<32x6xbf16>, vector<64x6xf32> -> vector<64x6xf32>
    %cst_140 = arith.constant dense<0.000000e+00> : vector<64x6xf32>
    %168 = tpu.matmul %162, %166, %cst_140 {dimension_numbers = #tpu.dot_dimension_numbers<[1], [0], [0], [1], [0, 0, 1, 1], [], []>} : vector<64x32xbf16>, vector<32x6xbf16>, vector<64x6xf32> -> vector<64x6xf32>
    %169 = arith.addf %157, %167 : vector<64x6xf32>
    %170 = arith.addf %158, %168 : vector<64x6xf32>
    %c8_141 = arith.constant 8 : index
    %c0_142 = arith.constant 0 : index
    %171 = vector.load %arg23[%c8_141, %c0_142] : memref<82x32xf32, #tpu.memory_space<vmem>>, vector<64x32xf32>
    %172 = vector.broadcast %24 : vector<64x1xf32> to vector<64x32xf32>
    %173 = arith.mulf %171, %172 : vector<64x32xf32>
    %174 = arith.truncf %173 : vector<64x32xf32> to vector<64x32xbf16>
    %c0_143 = arith.constant 0 : index
    %c3_144 = arith.constant 3 : index
    %c0_145 = arith.constant 0 : index
    %c0_146 = arith.constant 0 : index
    %175 = vector.load %arg12[%c0_143, %c3_144, %c0_145, %c0_146] : memref<2x9x32x6xbf16, #tpu.memory_space<vmem>>, vector<1x1x32x6xbf16>
    %176 = vector.shape_cast %175 : vector<1x1x32x6xbf16> to vector<32x6xbf16>
    %c0_147 = arith.constant 0 : index
    %c3_148 = arith.constant 3 : index
    %c0_149 = arith.constant 0 : index
    %c0_150 = arith.constant 0 : index
    %177 = vector.load %arg14[%c0_147, %c3_148, %c0_149, %c0_150] : memref<2x9x32x6xbf16, #tpu.memory_space<vmem>>, vector<1x1x32x6xbf16>
    %178 = vector.shape_cast %177 : vector<1x1x32x6xbf16> to vector<32x6xbf16>
    %cst_151 = arith.constant dense<0.000000e+00> : vector<64x6xf32>
    %179 = tpu.matmul %174, %176, %cst_151 {dimension_numbers = #tpu.dot_dimension_numbers<[1], [0], [0], [1], [0, 0, 1, 1], [], []>} : vector<64x32xbf16>, vector<32x6xbf16>, vector<64x6xf32> -> vector<64x6xf32>
    %cst_152 = arith.constant dense<0.000000e+00> : vector<64x6xf32>
    %180 = tpu.matmul %174, %178, %cst_152 {dimension_numbers = #tpu.dot_dimension_numbers<[1], [0], [0], [1], [0, 0, 1, 1], [], []>} : vector<64x32xbf16>, vector<32x6xbf16>, vector<64x6xf32> -> vector<64x6xf32>
    %181 = arith.addf %169, %179 : vector<64x6xf32>
    %182 = arith.addf %170, %180 : vector<64x6xf32>
    %c9_153 = arith.constant 9 : index
    %c0_154 = arith.constant 0 : index
    %183 = vector.load %arg23[%c9_153, %c0_154] : memref<82x32xf32, #tpu.memory_space<vmem>>, vector<64x32xf32>
    %184 = arith.truncf %183 : vector<64x32xf32> to vector<64x32xbf16>
    %c0_155 = arith.constant 0 : index
    %c4_156 = arith.constant 4 : index
    %c0_157 = arith.constant 0 : index
    %c0_158 = arith.constant 0 : index
    %185 = vector.load %arg12[%c0_155, %c4_156, %c0_157, %c0_158] : memref<2x9x32x6xbf16, #tpu.memory_space<vmem>>, vector<1x1x32x6xbf16>
    %186 = vector.shape_cast %185 : vector<1x1x32x6xbf16> to vector<32x6xbf16>
    %c0_159 = arith.constant 0 : index
    %c4_160 = arith.constant 4 : index
    %c0_161 = arith.constant 0 : index
    %c0_162 = arith.constant 0 : index
    %187 = vector.load %arg14[%c0_159, %c4_160, %c0_161, %c0_162] : memref<2x9x32x6xbf16, #tpu.memory_space<vmem>>, vector<1x1x32x6xbf16>
    %188 = vector.shape_cast %187 : vector<1x1x32x6xbf16> to vector<32x6xbf16>
    %cst_163 = arith.constant dense<0.000000e+00> : vector<64x6xf32>
    %189 = tpu.matmul %184, %186, %cst_163 {dimension_numbers = #tpu.dot_dimension_numbers<[1], [0], [0], [1], [0, 0, 1, 1], [], []>} : vector<64x32xbf16>, vector<32x6xbf16>, vector<64x6xf32> -> vector<64x6xf32>
    %cst_164 = arith.constant dense<0.000000e+00> : vector<64x6xf32>
    %190 = tpu.matmul %184, %188, %cst_164 {dimension_numbers = #tpu.dot_dimension_numbers<[1], [0], [0], [1], [0, 0, 1, 1], [], []>} : vector<64x32xbf16>, vector<32x6xbf16>, vector<64x6xf32> -> vector<64x6xf32>
    %191 = arith.addf %181, %189 : vector<64x6xf32>
    %192 = arith.addf %182, %190 : vector<64x6xf32>
    %c10_165 = arith.constant 10 : index
    %c0_166 = arith.constant 0 : index
    %193 = vector.load %arg23[%c10_165, %c0_166] : memref<82x32xf32, #tpu.memory_space<vmem>>, vector<64x32xf32>
    %194 = vector.broadcast %28 : vector<64x1xf32> to vector<64x32xf32>
    %195 = arith.mulf %193, %194 : vector<64x32xf32>
    %196 = arith.truncf %195 : vector<64x32xf32> to vector<64x32xbf16>
    %c0_167 = arith.constant 0 : index
    %c5_168 = arith.constant 5 : index
    %c0_169 = arith.constant 0 : index
    %c0_170 = arith.constant 0 : index
    %197 = vector.load %arg12[%c0_167, %c5_168, %c0_169, %c0_170] : memref<2x9x32x6xbf16, #tpu.memory_space<vmem>>, vector<1x1x32x6xbf16>
    %198 = vector.shape_cast %197 : vector<1x1x32x6xbf16> to vector<32x6xbf16>
    %c0_171 = arith.constant 0 : index
    %c5_172 = arith.constant 5 : index
    %c0_173 = arith.constant 0 : index
    %c0_174 = arith.constant 0 : index
    %199 = vector.load %arg14[%c0_171, %c5_172, %c0_173, %c0_174] : memref<2x9x32x6xbf16, #tpu.memory_space<vmem>>, vector<1x1x32x6xbf16>
    %200 = vector.shape_cast %199 : vector<1x1x32x6xbf16> to vector<32x6xbf16>
    %cst_175 = arith.constant dense<0.000000e+00> : vector<64x6xf32>
    %201 = tpu.matmul %196, %198, %cst_175 {dimension_numbers = #tpu.dot_dimension_numbers<[1], [0], [0], [1], [0, 0, 1, 1], [], []>} : vector<64x32xbf16>, vector<32x6xbf16>, vector<64x6xf32> -> vector<64x6xf32>
    %cst_176 = arith.constant dense<0.000000e+00> : vector<64x6xf32>
    %202 = tpu.matmul %196, %200, %cst_176 {dimension_numbers = #tpu.dot_dimension_numbers<[1], [0], [0], [1], [0, 0, 1, 1], [], []>} : vector<64x32xbf16>, vector<32x6xbf16>, vector<64x6xf32> -> vector<64x6xf32>
    %203 = arith.addf %191, %201 : vector<64x6xf32>
    %204 = arith.addf %192, %202 : vector<64x6xf32>
    %c16_177 = arith.constant 16 : index
    %c0_178 = arith.constant 0 : index
    %205 = vector.load %arg23[%c16_177, %c0_178] : memref<82x32xf32, #tpu.memory_space<vmem>>, vector<64x32xf32>
    %206 = vector.broadcast %24 : vector<64x1xf32> to vector<64x32xf32>
    %207 = arith.mulf %205, %206 : vector<64x32xf32>
    %208 = arith.truncf %207 : vector<64x32xf32> to vector<64x32xbf16>
    %c0_179 = arith.constant 0 : index
    %c6_180 = arith.constant 6 : index
    %c0_181 = arith.constant 0 : index
    %c0_182 = arith.constant 0 : index
    %209 = vector.load %arg12[%c0_179, %c6_180, %c0_181, %c0_182] : memref<2x9x32x6xbf16, #tpu.memory_space<vmem>>, vector<1x1x32x6xbf16>
    %210 = vector.shape_cast %209 : vector<1x1x32x6xbf16> to vector<32x6xbf16>
    %c0_183 = arith.constant 0 : index
    %c6_184 = arith.constant 6 : index
    %c0_185 = arith.constant 0 : index
    %c0_186 = arith.constant 0 : index
    %211 = vector.load %arg14[%c0_183, %c6_184, %c0_185, %c0_186] : memref<2x9x32x6xbf16, #tpu.memory_space<vmem>>, vector<1x1x32x6xbf16>
    %212 = vector.shape_cast %211 : vector<1x1x32x6xbf16> to vector<32x6xbf16>
    %cst_187 = arith.constant dense<0.000000e+00> : vector<64x6xf32>
    %213 = tpu.matmul %208, %210, %cst_187 {dimension_numbers = #tpu.dot_dimension_numbers<[1], [0], [0], [1], [0, 0, 1, 1], [], []>} : vector<64x32xbf16>, vector<32x6xbf16>, vector<64x6xf32> -> vector<64x6xf32>
    %cst_188 = arith.constant dense<0.000000e+00> : vector<64x6xf32>
    %214 = tpu.matmul %208, %212, %cst_188 {dimension_numbers = #tpu.dot_dimension_numbers<[1], [0], [0], [1], [0, 0, 1, 1], [], []>} : vector<64x32xbf16>, vector<32x6xbf16>, vector<64x6xf32> -> vector<64x6xf32>
    %215 = arith.addf %203, %213 : vector<64x6xf32>
    %216 = arith.addf %204, %214 : vector<64x6xf32>
    %c17_189 = arith.constant 17 : index
    %c0_190 = arith.constant 0 : index
    %217 = vector.load %arg23[%c17_189, %c0_190] : memref<82x32xf32, #tpu.memory_space<vmem>>, vector<64x32xf32>
    %218 = arith.truncf %217 : vector<64x32xf32> to vector<64x32xbf16>
    %c0_191 = arith.constant 0 : index
    %c7_192 = arith.constant 7 : index
    %c0_193 = arith.constant 0 : index
    %c0_194 = arith.constant 0 : index
    %219 = vector.load %arg12[%c0_191, %c7_192, %c0_193, %c0_194] : memref<2x9x32x6xbf16, #tpu.memory_space<vmem>>, vector<1x1x32x6xbf16>
    %220 = vector.shape_cast %219 : vector<1x1x32x6xbf16> to vector<32x6xbf16>
    %c0_195 = arith.constant 0 : index
    %c7_196 = arith.constant 7 : index
    %c0_197 = arith.constant 0 : index
    %c0_198 = arith.constant 0 : index
    %221 = vector.load %arg14[%c0_195, %c7_196, %c0_197, %c0_198] : memref<2x9x32x6xbf16, #tpu.memory_space<vmem>>, vector<1x1x32x6xbf16>
    %222 = vector.shape_cast %221 : vector<1x1x32x6xbf16> to vector<32x6xbf16>
    %cst_199 = arith.constant dense<0.000000e+00> : vector<64x6xf32>
    %223 = tpu.matmul %218, %220, %cst_199 {dimension_numbers = #tpu.dot_dimension_numbers<[1], [0], [0], [1], [0, 0, 1, 1], [], []>} : vector<64x32xbf16>, vector<32x6xbf16>, vector<64x6xf32> -> vector<64x6xf32>
    %cst_200 = arith.constant dense<0.000000e+00> : vector<64x6xf32>
    %224 = tpu.matmul %218, %222, %cst_200 {dimension_numbers = #tpu.dot_dimension_numbers<[1], [0], [0], [1], [0, 0, 1, 1], [], []>} : vector<64x32xbf16>, vector<32x6xbf16>, vector<64x6xf32> -> vector<64x6xf32>
    %225 = arith.addf %215, %223 : vector<64x6xf32>
    %226 = arith.addf %216, %224 : vector<64x6xf32>
    %c18_201 = arith.constant 18 : index
    %c0_202 = arith.constant 0 : index
    %227 = vector.load %arg23[%c18_201, %c0_202] : memref<82x32xf32, #tpu.memory_space<vmem>>, vector<64x32xf32>
    %228 = vector.broadcast %28 : vector<64x1xf32> to vector<64x32xf32>
    %229 = arith.mulf %227, %228 : vector<64x32xf32>
    %230 = arith.truncf %229 : vector<64x32xf32> to vector<64x32xbf16>
    %c0_203 = arith.constant 0 : index
    %c8_204 = arith.constant 8 : index
    %c0_205 = arith.constant 0 : index
    %c0_206 = arith.constant 0 : index
    %231 = vector.load %arg12[%c0_203, %c8_204, %c0_205, %c0_206] : memref<2x9x32x6xbf16, #tpu.memory_space<vmem>>, vector<1x1x32x6xbf16>
    %232 = vector.shape_cast %231 : vector<1x1x32x6xbf16> to vector<32x6xbf16>
    %c0_207 = arith.constant 0 : index
    %c8_208 = arith.constant 8 : index
    %c0_209 = arith.constant 0 : index
    %c0_210 = arith.constant 0 : index
    %233 = vector.load %arg14[%c0_207, %c8_208, %c0_209, %c0_210] : memref<2x9x32x6xbf16, #tpu.memory_space<vmem>>, vector<1x1x32x6xbf16>
    %234 = vector.shape_cast %233 : vector<1x1x32x6xbf16> to vector<32x6xbf16>
    %cst_211 = arith.constant dense<0.000000e+00> : vector<64x6xf32>
    %235 = tpu.matmul %230, %232, %cst_211 {dimension_numbers = #tpu.dot_dimension_numbers<[1], [0], [0], [1], [0, 0, 1, 1], [], []>} : vector<64x32xbf16>, vector<32x6xbf16>, vector<64x6xf32> -> vector<64x6xf32>
    %cst_212 = arith.constant dense<0.000000e+00> : vector<64x6xf32>
    %236 = tpu.matmul %230, %234, %cst_212 {dimension_numbers = #tpu.dot_dimension_numbers<[1], [0], [0], [1], [0, 0, 1, 1], [], []>} : vector<64x32xbf16>, vector<32x6xbf16>, vector<64x6xf32> -> vector<64x6xf32>
    %237 = arith.addf %225, %235 : vector<64x6xf32>
    %238 = arith.addf %226, %236 : vector<64x6xf32>
    %c0_213 = arith.constant 0 : index
    %c0_214 = arith.constant 0 : index
    %c0_215 = arith.constant 0 : index
    %239 = vector.load %arg13[%c0_213, %c0_214, %c0_215] : memref<2x1x6xf32, #tpu.memory_space<vmem>>, vector<1x1x6xf32>
    %240 = vector.shape_cast %239 : vector<1x1x6xf32> to vector<1x6xf32>
    %241 = vector.broadcast %240 : vector<1x6xf32> to vector<64x6xf32>
    %242 = arith.addf %237, %241 : vector<64x6xf32>
    %c0_216 = arith.constant 0 : index
    %c0_217 = arith.constant 0 : index
    %c0_218 = arith.constant 0 : index
    %243 = vector.load %arg15[%c0_216, %c0_217, %c0_218] : memref<2x1x6xf32, #tpu.memory_space<vmem>>, vector<1x1x6xf32>
    %244 = vector.shape_cast %243 : vector<1x1x6xf32> to vector<1x6xf32>
    %245 = vector.broadcast %244 : vector<1x6xf32> to vector<64x6xf32>
    %246 = arith.addf %238, %245 : vector<64x6xf32>
    %cst_219 = arith.constant 2.000000e+00 : f32
    %247 = vector.broadcast %cst_219 : f32 to vector<64x6xf32>
    %248 = arith.addf %246, %247 : vector<64x6xf32>
    %249 = arith.negf %248 : vector<64x6xf32>
    %250 = math.exp %249 : vector<64x6xf32>
    %cst_220 = arith.constant 1.000000e+00 : f32
    %251 = vector.broadcast %cst_220 : f32 to vector<64x6xf32>
    %252 = arith.addf %251, %250 : vector<64x6xf32>
    %253 = arith.divf %251, %252 : vector<64x6xf32>
    %254 = arith.addf %55, %242 : vector<64x6xf32>
    %255 = arith.mulf %254, %253 : vector<64x6xf32>
    %256 = math.log %253 : vector<64x6xf32>
    %cst_221 = arith.constant dense<0.000000e+00> : vector<64xf32>
    %257 = vector.multi_reduction <add>, %256, %cst_221 [1] : vector<64x6xf32> to vector<64xf32>
    %258 = vector.shape_cast %257 : vector<64xf32> to vector<64x1xf32>
    %259 = arith.addf %33, %258 : vector<64x1xf32>
    %c1_222 = arith.constant 1 : index
    %c0_223 = arith.constant 0 : index
    %c0_224 = arith.constant 0 : index
    %260 = vector.load %arg2[%c1_222, %c0_223, %c0_224] : memref<2x6x6xf32, #tpu.memory_space<vmem>>, vector<1x6x6xf32>
    %261 = vector.shape_cast %260 : vector<1x6x6xf32> to vector<6x6xf32>
    %cst_225 = arith.constant dense<0.000000e+00> : vector<64x6xf32>
    %262 = tpu.matmul %44, %261, %cst_225 {dimension_numbers = #tpu.dot_dimension_numbers<[1], [0], [0], [1], [0, 0, 1, 1], [], []>} : vector<64x6xf32>, vector<6x6xf32>, vector<64x6xf32> -> vector<64x6xf32>
    %c1_226 = arith.constant 1 : index
    %c0_227 = arith.constant 0 : index
    %c0_228 = arith.constant 0 : index
    %263 = vector.load %arg4[%c1_226, %c0_227, %c0_228] : memref<2x6x6xf32, #tpu.memory_space<vmem>>, vector<1x6x6xf32>
    %264 = vector.shape_cast %263 : vector<1x6x6xf32> to vector<6x6xf32>
    %cst_229 = arith.constant dense<0.000000e+00> : vector<64x6xf32>
    %265 = tpu.matmul %255, %264, %cst_229 {dimension_numbers = #tpu.dot_dimension_numbers<[1], [0], [0], [1], [0, 0, 1, 1], [], []>} : vector<64x6xf32>, vector<6x6xf32>, vector<64x6xf32> -> vector<64x6xf32>
    %266 = arith.addf %262, %265 : vector<64x6xf32>
    %c1_230 = arith.constant 1 : index
    %c0_231 = arith.constant 0 : index
    %c0_232 = arith.constant 0 : index
    %267 = vector.load %arg6[%c1_230, %c0_231, %c0_232] : memref<2x1x6xf32, #tpu.memory_space<vmem>>, vector<1x1x6xf32>
    %268 = vector.shape_cast %267 : vector<1x1x6xf32> to vector<1x6xf32>
    %269 = vector.broadcast %268 : vector<1x6xf32> to vector<64x6xf32>
    %270 = arith.addf %266, %269 : vector<64x6xf32>
    %c1_233 = arith.constant 1 : index
    %c0_234 = arith.constant 0 : index
    %c0_235 = arith.constant 0 : index
    %271 = vector.load %arg3[%c1_233, %c0_234, %c0_235] : memref<2x6x6xf32, #tpu.memory_space<vmem>>, vector<1x6x6xf32>
    %272 = vector.shape_cast %271 : vector<1x6x6xf32> to vector<6x6xf32>
    %cst_236 = arith.constant dense<0.000000e+00> : vector<64x6xf32>
    %273 = tpu.matmul %44, %272, %cst_236 {dimension_numbers = #tpu.dot_dimension_numbers<[1], [0], [0], [1], [0, 0, 1, 1], [], []>} : vector<64x6xf32>, vector<6x6xf32>, vector<64x6xf32> -> vector<64x6xf32>
    %c1_237 = arith.constant 1 : index
    %c0_238 = arith.constant 0 : index
    %c0_239 = arith.constant 0 : index
    %274 = vector.load %arg5[%c1_237, %c0_238, %c0_239] : memref<2x6x6xf32, #tpu.memory_space<vmem>>, vector<1x6x6xf32>
    %275 = vector.shape_cast %274 : vector<1x6x6xf32> to vector<6x6xf32>
    %cst_240 = arith.constant dense<0.000000e+00> : vector<64x6xf32>
    %276 = tpu.matmul %255, %275, %cst_240 {dimension_numbers = #tpu.dot_dimension_numbers<[1], [0], [0], [1], [0, 0, 1, 1], [], []>} : vector<64x6xf32>, vector<6x6xf32>, vector<64x6xf32> -> vector<64x6xf32>
    %277 = arith.addf %273, %276 : vector<64x6xf32>
    %c1_241 = arith.constant 1 : index
    %c0_242 = arith.constant 0 : index
    %c0_243 = arith.constant 0 : index
    %278 = vector.load %arg7[%c1_241, %c0_242, %c0_243] : memref<2x1x6xf32, #tpu.memory_space<vmem>>, vector<1x1x6xf32>
    %279 = vector.shape_cast %278 : vector<1x1x6xf32> to vector<1x6xf32>
    %280 = vector.broadcast %279 : vector<1x6xf32> to vector<64x6xf32>
    %281 = arith.addf %277, %280 : vector<64x6xf32>
    %c9_244 = arith.constant 9 : index
    %c0_245 = arith.constant 0 : index
    %282 = vector.load %arg22[%c9_244, %c0_245] : memref<82x6xf32, #tpu.memory_space<vmem>>, vector<64x6xf32>
    tpu.vector_store %arg22[%c9_244, %c0_245], %270 {strides = array<i32>} : memref<82x6xf32, #tpu.memory_space<vmem>>, vector<64x6xf32>,
    %c0_246 = arith.constant 0 : index
    %c0_247 = arith.constant 0 : index
    %283 = vector.load %arg22[%c0_246, %c0_247] : memref<82x6xf32, #tpu.memory_space<vmem>>, vector<64x6xf32>
    %284 = vector.broadcast %24 : vector<64x1xf32> to vector<64x6xf32>
    %285 = arith.mulf %283, %284 : vector<64x6xf32>
    %286 = arith.truncf %285 : vector<64x6xf32> to vector<64x6xbf16>
    %c1_248 = arith.constant 1 : index
    %c0_249 = arith.constant 0 : index
    %c0_250 = arith.constant 0 : index
    %c0_251 = arith.constant 0 : index
    %287 = vector.load %arg8[%c1_248, %c0_249, %c0_250, %c0_251] : memref<2x9x6x32xbf16, #tpu.memory_space<vmem>>, vector<1x1x6x32xbf16>
    %288 = vector.shape_cast %287 : vector<1x1x6x32xbf16> to vector<6x32xbf16>
    %cst_252 = arith.constant dense<0.000000e+00> : vector<64x32xf32>
    %289 = tpu.matmul %286, %288, %cst_252 {dimension_numbers = #tpu.dot_dimension_numbers<[1], [0], [0], [1], [0, 0, 1, 1], [], []>} : vector<64x6xbf16>, vector<6x32xbf16>, vector<64x32xf32> -> vector<64x32xf32>
    %c1_253 = arith.constant 1 : index
    %c0_254 = arith.constant 0 : index
    %290 = vector.load %arg22[%c1_253, %c0_254] : memref<82x6xf32, #tpu.memory_space<vmem>>, vector<64x6xf32>
    %291 = arith.truncf %290 : vector<64x6xf32> to vector<64x6xbf16>
    %c1_255 = arith.constant 1 : index
    %c1_256 = arith.constant 1 : index
    %c0_257 = arith.constant 0 : index
    %c0_258 = arith.constant 0 : index
    %292 = vector.load %arg8[%c1_255, %c1_256, %c0_257, %c0_258] : memref<2x9x6x32xbf16, #tpu.memory_space<vmem>>, vector<1x1x6x32xbf16>
    %293 = vector.shape_cast %292 : vector<1x1x6x32xbf16> to vector<6x32xbf16>
    %cst_259 = arith.constant dense<0.000000e+00> : vector<64x32xf32>
    %294 = tpu.matmul %291, %293, %cst_259 {dimension_numbers = #tpu.dot_dimension_numbers<[1], [0], [0], [1], [0, 0, 1, 1], [], []>} : vector<64x6xbf16>, vector<6x32xbf16>, vector<64x32xf32> -> vector<64x32xf32>
    %295 = arith.addf %289, %294 : vector<64x32xf32>
    %c2_260 = arith.constant 2 : index
    %c0_261 = arith.constant 0 : index
    %296 = vector.load %arg22[%c2_260, %c0_261] : memref<82x6xf32, #tpu.memory_space<vmem>>, vector<64x6xf32>
    %297 = vector.broadcast %28 : vector<64x1xf32> to vector<64x6xf32>
    %298 = arith.mulf %296, %297 : vector<64x6xf32>
    %299 = arith.truncf %298 : vector<64x6xf32> to vector<64x6xbf16>
    %c1_262 = arith.constant 1 : index
    %c2_263 = arith.constant 2 : index
    %c0_264 = arith.constant 0 : index
    %c0_265 = arith.constant 0 : index
    %300 = vector.load %arg8[%c1_262, %c2_263, %c0_264, %c0_265] : memref<2x9x6x32xbf16, #tpu.memory_space<vmem>>, vector<1x1x6x32xbf16>
    %301 = vector.shape_cast %300 : vector<1x1x6x32xbf16> to vector<6x32xbf16>
    %cst_266 = arith.constant dense<0.000000e+00> : vector<64x32xf32>
    %302 = tpu.matmul %299, %301, %cst_266 {dimension_numbers = #tpu.dot_dimension_numbers<[1], [0], [0], [1], [0, 0, 1, 1], [], []>} : vector<64x6xbf16>, vector<6x32xbf16>, vector<64x32xf32> -> vector<64x32xf32>
    %303 = arith.addf %295, %302 : vector<64x32xf32>
    %c8_267 = arith.constant 8 : index
    %c0_268 = arith.constant 0 : index
    %304 = vector.load %arg22[%c8_267, %c0_268] : memref<82x6xf32, #tpu.memory_space<vmem>>, vector<64x6xf32>
    %305 = vector.broadcast %24 : vector<64x1xf32> to vector<64x6xf32>
    %306 = arith.mulf %304, %305 : vector<64x6xf32>
    %307 = arith.truncf %306 : vector<64x6xf32> to vector<64x6xbf16>
    %c1_269 = arith.constant 1 : index
    %c3_270 = arith.constant 3 : index
    %c0_271 = arith.constant 0 : index
    %c0_272 = arith.constant 0 : index
    %308 = vector.load %arg8[%c1_269, %c3_270, %c0_271, %c0_272] : memref<2x9x6x32xbf16, #tpu.memory_space<vmem>>, vector<1x1x6x32xbf16>
    %309 = vector.shape_cast %308 : vector<1x1x6x32xbf16> to vector<6x32xbf16>
    %cst_273 = arith.constant dense<0.000000e+00> : vector<64x32xf32>
    %310 = tpu.matmul %307, %309, %cst_273 {dimension_numbers = #tpu.dot_dimension_numbers<[1], [0], [0], [1], [0, 0, 1, 1], [], []>} : vector<64x6xbf16>, vector<6x32xbf16>, vector<64x32xf32> -> vector<64x32xf32>
    %311 = arith.addf %303, %310 : vector<64x32xf32>
    %c9_274 = arith.constant 9 : index
    %c0_275 = arith.constant 0 : index
    %312 = vector.load %arg22[%c9_274, %c0_275] : memref<82x6xf32, #tpu.memory_space<vmem>>, vector<64x6xf32>
    %313 = arith.truncf %312 : vector<64x6xf32> to vector<64x6xbf16>
    %c1_276 = arith.constant 1 : index
    %c4_277 = arith.constant 4 : index
    %c0_278 = arith.constant 0 : index
    %c0_279 = arith.constant 0 : index
    %314 = vector.load %arg8[%c1_276, %c4_277, %c0_278, %c0_279] : memref<2x9x6x32xbf16, #tpu.memory_space<vmem>>, vector<1x1x6x32xbf16>
    %315 = vector.shape_cast %314 : vector<1x1x6x32xbf16> to vector<6x32xbf16>
    %cst_280 = arith.constant dense<0.000000e+00> : vector<64x32xf32>
    %316 = tpu.matmul %313, %315, %cst_280 {dimension_numbers = #tpu.dot_dimension_numbers<[1], [0], [0], [1], [0, 0, 1, 1], [], []>} : vector<64x6xbf16>, vector<6x32xbf16>, vector<64x32xf32> -> vector<64x32xf32>
    %317 = arith.addf %311, %316 : vector<64x32xf32>
    %c10_281 = arith.constant 10 : index
    %c0_282 = arith.constant 0 : index
    %318 = vector.load %arg22[%c10_281, %c0_282] : memref<82x6xf32, #tpu.memory_space<vmem>>, vector<64x6xf32>
    %319 = vector.broadcast %28 : vector<64x1xf32> to vector<64x6xf32>
    %320 = arith.mulf %318, %319 : vector<64x6xf32>
    %321 = arith.truncf %320 : vector<64x6xf32> to vector<64x6xbf16>
    %c1_283 = arith.constant 1 : index
    %c5_284 = arith.constant 5 : index
    %c0_285 = arith.constant 0 : index
    %c0_286 = arith.constant 0 : index
    %322 = vector.load %arg8[%c1_283, %c5_284, %c0_285, %c0_286] : memref<2x9x6x32xbf16, #tpu.memory_space<vmem>>, vector<1x1x6x32xbf16>
    %323 = vector.shape_cast %322 : vector<1x1x6x32xbf16> to vector<6x32xbf16>
    %cst_287 = arith.constant dense<0.000000e+00> : vector<64x32xf32>
    %324 = tpu.matmul %321, %323, %cst_287 {dimension_numbers = #tpu.dot_dimension_numbers<[1], [0], [0], [1], [0, 0, 1, 1], [], []>} : vector<64x6xbf16>, vector<6x32xbf16>, vector<64x32xf32> -> vector<64x32xf32>
    %325 = arith.addf %317, %324 : vector<64x32xf32>
    %c16_288 = arith.constant 16 : index
    %c0_289 = arith.constant 0 : index
    %326 = vector.load %arg22[%c16_288, %c0_289] : memref<82x6xf32, #tpu.memory_space<vmem>>, vector<64x6xf32>
    %327 = vector.broadcast %24 : vector<64x1xf32> to vector<64x6xf32>
    %328 = arith.mulf %326, %327 : vector<64x6xf32>
    %329 = arith.truncf %328 : vector<64x6xf32> to vector<64x6xbf16>
    %c1_290 = arith.constant 1 : index
    %c6_291 = arith.constant 6 : index
    %c0_292 = arith.constant 0 : index
    %c0_293 = arith.constant 0 : index
    %330 = vector.load %arg8[%c1_290, %c6_291, %c0_292, %c0_293] : memref<2x9x6x32xbf16, #tpu.memory_space<vmem>>, vector<1x1x6x32xbf16>
    %331 = vector.shape_cast %330 : vector<1x1x6x32xbf16> to vector<6x32xbf16>
    %cst_294 = arith.constant dense<0.000000e+00> : vector<64x32xf32>
    %332 = tpu.matmul %329, %331, %cst_294 {dimension_numbers = #tpu.dot_dimension_numbers<[1], [0], [0], [1], [0, 0, 1, 1], [], []>} : vector<64x6xbf16>, vector<6x32xbf16>, vector<64x32xf32> -> vector<64x32xf32>
    %333 = arith.addf %325, %332 : vector<64x32xf32>
    %c17_295 = arith.constant 17 : index
    %c0_296 = arith.constant 0 : index
    %334 = vector.load %arg22[%c17_295, %c0_296] : memref<82x6xf32, #tpu.memory_space<vmem>>, vector<64x6xf32>
    %335 = arith.truncf %334 : vector<64x6xf32> to vector<64x6xbf16>
    %c1_297 = arith.constant 1 : index
    %c7_298 = arith.constant 7 : index
    %c0_299 = arith.constant 0 : index
    %c0_300 = arith.constant 0 : index
    %336 = vector.load %arg8[%c1_297, %c7_298, %c0_299, %c0_300] : memref<2x9x6x32xbf16, #tpu.memory_space<vmem>>, vector<1x1x6x32xbf16>
    %337 = vector.shape_cast %336 : vector<1x1x6x32xbf16> to vector<6x32xbf16>
    %cst_301 = arith.constant dense<0.000000e+00> : vector<64x32xf32>
    %338 = tpu.matmul %335, %337, %cst_301 {dimension_numbers = #tpu.dot_dimension_numbers<[1], [0], [0], [1], [0, 0, 1, 1], [], []>} : vector<64x6xbf16>, vector<6x32xbf16>, vector<64x32xf32> -> vector<64x32xf32>
    %339 = arith.addf %333, %338 : vector<64x32xf32>
    %c18_302 = arith.constant 18 : index
    %c0_303 = arith.constant 0 : index
    %340 = vector.load %arg22[%c18_302, %c0_303] : memref<82x6xf32, #tpu.memory_space<vmem>>, vector<64x6xf32>
    %341 = vector.broadcast %28 : vector<64x1xf32> to vector<64x6xf32>
    %342 = arith.mulf %340, %341 : vector<64x6xf32>
    %343 = arith.truncf %342 : vector<64x6xf32> to vector<64x6xbf16>
    %c1_304 = arith.constant 1 : index
    %c8_305 = arith.constant 8 : index
    %c0_306 = arith.constant 0 : index
    %c0_307 = arith.constant 0 : index
    %344 = vector.load %arg8[%c1_304, %c8_305, %c0_306, %c0_307] : memref<2x9x6x32xbf16, #tpu.memory_space<vmem>>, vector<1x1x6x32xbf16>
    %345 = vector.shape_cast %344 : vector<1x1x6x32xbf16> to vector<6x32xbf16>
    %cst_308 = arith.constant dense<0.000000e+00> : vector<64x32xf32>
    %346 = tpu.matmul %343, %345, %cst_308 {dimension_numbers = #tpu.dot_dimension_numbers<[1], [0], [0], [1], [0, 0, 1, 1], [], []>} : vector<64x6xbf16>, vector<6x32xbf16>, vector<64x32xf32> -> vector<64x32xf32>
    %347 = arith.addf %339, %346 : vector<64x32xf32>
    %c1_309 = arith.constant 1 : index
    %c0_310 = arith.constant 0 : index
    %c0_311 = arith.constant 0 : index
    %348 = vector.load %arg9[%c1_309, %c0_310, %c0_311] : memref<2x1x32xf32, #tpu.memory_space<vmem>>, vector<1x1x32xf32>
    %349 = vector.shape_cast %348 : vector<1x1x32xf32> to vector<1x32xf32>
    %350 = vector.broadcast %349 : vector<1x32xf32> to vector<64x32xf32>
    %351 = arith.addf %347, %350 : vector<64x32xf32>
    %cst_312 = arith.constant 0.000000e+00 : f32
    %352 = vector.broadcast %cst_312 : f32 to vector<64x32xf32>
    %353 = arith.maximumf %351, %352 : vector<64x32xf32>
    %354 = arith.truncf %353 : vector<64x32xf32> to vector<64x32xbf16>
    %c1_313 = arith.constant 1 : index
    %c0_314 = arith.constant 0 : index
    %c0_315 = arith.constant 0 : index
    %355 = vector.load %arg10[%c1_313, %c0_314, %c0_315] : memref<2x32x32xbf16, #tpu.memory_space<vmem>>, vector<1x32x32xbf16>
    %356 = vector.shape_cast %355 : vector<1x32x32xbf16> to vector<32x32xbf16>
    %cst_316 = arith.constant dense<0.000000e+00> : vector<64x32xf32>
    %357 = tpu.matmul %354, %356, %cst_316 {dimension_numbers = #tpu.dot_dimension_numbers<[1], [0], [0], [1], [0, 0, 1, 1], [], []>} : vector<64x32xbf16>, vector<32x32xbf16>, vector<64x32xf32> -> vector<64x32xf32>
    %c1_317 = arith.constant 1 : index
    %c0_318 = arith.constant 0 : index
    %c0_319 = arith.constant 0 : index
    %358 = vector.load %arg11[%c1_317, %c0_318, %c0_319] : memref<2x1x32xf32, #tpu.memory_space<vmem>>, vector<1x1x32xf32>
    %359 = vector.shape_cast %358 : vector<1x1x32xf32> to vector<1x32xf32>
    %360 = vector.broadcast %359 : vector<1x32xf32> to vector<64x32xf32>
    %361 = arith.addf %357, %360 : vector<64x32xf32>
    %cst_320 = arith.constant 0.000000e+00 : f32
    %362 = vector.broadcast %cst_320 : f32 to vector<64x32xf32>
    %363 = arith.maximumf %361, %362 : vector<64x32xf32>
    %c9_321 = arith.constant 9 : index
    %c0_322 = arith.constant 0 : index
    %364 = vector.load %arg23[%c9_321, %c0_322] : memref<82x32xf32, #tpu.memory_space<vmem>>, vector<64x32xf32>
    tpu.vector_store %arg23[%c9_321, %c0_322], %363 {strides = array<i32>} : memref<82x32xf32, #tpu.memory_space<vmem>>, vector<64x32xf32>,
    %c0_323 = arith.constant 0 : index
    %c0_324 = arith.constant 0 : index
    %365 = vector.load %arg23[%c0_323, %c0_324] : memref<82x32xf32, #tpu.memory_space<vmem>>, vector<64x32xf32>
    %366 = vector.broadcast %24 : vector<64x1xf32> to vector<64x32xf32>
    %367 = arith.mulf %365, %366 : vector<64x32xf32>
    %368 = arith.truncf %367 : vector<64x32xf32> to vector<64x32xbf16>
    %c1_325 = arith.constant 1 : index
    %c0_326 = arith.constant 0 : index
    %c0_327 = arith.constant 0 : index
    %c0_328 = arith.constant 0 : index
    %369 = vector.load %arg12[%c1_325, %c0_326, %c0_327, %c0_328] : memref<2x9x32x6xbf16, #tpu.memory_space<vmem>>, vector<1x1x32x6xbf16>
    %370 = vector.shape_cast %369 : vector<1x1x32x6xbf16> to vector<32x6xbf16>
    %c1_329 = arith.constant 1 : index
    %c0_330 = arith.constant 0 : index
    %c0_331 = arith.constant 0 : index
    %c0_332 = arith.constant 0 : index
    %371 = vector.load %arg14[%c1_329, %c0_330, %c0_331, %c0_332] : memref<2x9x32x6xbf16, #tpu.memory_space<vmem>>, vector<1x1x32x6xbf16>
    %372 = vector.shape_cast %371 : vector<1x1x32x6xbf16> to vector<32x6xbf16>
    %cst_333 = arith.constant dense<0.000000e+00> : vector<64x6xf32>
    %373 = tpu.matmul %368, %370, %cst_333 {dimension_numbers = #tpu.dot_dimension_numbers<[1], [0], [0], [1], [0, 0, 1, 1], [], []>} : vector<64x32xbf16>, vector<32x6xbf16>, vector<64x6xf32> -> vector<64x6xf32>
    %cst_334 = arith.constant dense<0.000000e+00> : vector<64x6xf32>
    %374 = tpu.matmul %368, %372, %cst_334 {dimension_numbers = #tpu.dot_dimension_numbers<[1], [0], [0], [1], [0, 0, 1, 1], [], []>} : vector<64x32xbf16>, vector<32x6xbf16>, vector<64x6xf32> -> vector<64x6xf32>
    %c1_335 = arith.constant 1 : index
    %c0_336 = arith.constant 0 : index
    %375 = vector.load %arg23[%c1_335, %c0_336] : memref<82x32xf32, #tpu.memory_space<vmem>>, vector<64x32xf32>
    %376 = arith.truncf %375 : vector<64x32xf32> to vector<64x32xbf16>
    %c1_337 = arith.constant 1 : index
    %c1_338 = arith.constant 1 : index
    %c0_339 = arith.constant 0 : index
    %c0_340 = arith.constant 0 : index
    %377 = vector.load %arg12[%c1_337, %c1_338, %c0_339, %c0_340] : memref<2x9x32x6xbf16, #tpu.memory_space<vmem>>, vector<1x1x32x6xbf16>
    %378 = vector.shape_cast %377 : vector<1x1x32x6xbf16> to vector<32x6xbf16>
    %c1_341 = arith.constant 1 : index
    %c1_342 = arith.constant 1 : index
    %c0_343 = arith.constant 0 : index
    %c0_344 = arith.constant 0 : index
    %379 = vector.load %arg14[%c1_341, %c1_342, %c0_343, %c0_344] : memref<2x9x32x6xbf16, #tpu.memory_space<vmem>>, vector<1x1x32x6xbf16>
    %380 = vector.shape_cast %379 : vector<1x1x32x6xbf16> to vector<32x6xbf16>
    %cst_345 = arith.constant dense<0.000000e+00> : vector<64x6xf32>
    %381 = tpu.matmul %376, %378, %cst_345 {dimension_numbers = #tpu.dot_dimension_numbers<[1], [0], [0], [1], [0, 0, 1, 1], [], []>} : vector<64x32xbf16>, vector<32x6xbf16>, vector<64x6xf32> -> vector<64x6xf32>
    %cst_346 = arith.constant dense<0.000000e+00> : vector<64x6xf32>
    %382 = tpu.matmul %376, %380, %cst_346 {dimension_numbers = #tpu.dot_dimension_numbers<[1], [0], [0], [1], [0, 0, 1, 1], [], []>} : vector<64x32xbf16>, vector<32x6xbf16>, vector<64x6xf32> -> vector<64x6xf32>
    %383 = arith.addf %373, %381 : vector<64x6xf32>
    %384 = arith.addf %374, %382 : vector<64x6xf32>
    %c2_347 = arith.constant 2 : index
    %c0_348 = arith.constant 0 : index
    %385 = vector.load %arg23[%c2_347, %c0_348] : memref<82x32xf32, #tpu.memory_space<vmem>>, vector<64x32xf32>
    %386 = vector.broadcast %28 : vector<64x1xf32> to vector<64x32xf32>
    %387 = arith.mulf %385, %386 : vector<64x32xf32>
    %388 = arith.truncf %387 : vector<64x32xf32> to vector<64x32xbf16>
    %c1_349 = arith.constant 1 : index
    %c2_350 = arith.constant 2 : index
    %c0_351 = arith.constant 0 : index
    %c0_352 = arith.constant 0 : index
    %389 = vector.load %arg12[%c1_349, %c2_350, %c0_351, %c0_352] : memref<2x9x32x6xbf16, #tpu.memory_space<vmem>>, vector<1x1x32x6xbf16>
    %390 = vector.shape_cast %389 : vector<1x1x32x6xbf16> to vector<32x6xbf16>
    %c1_353 = arith.constant 1 : index
    %c2_354 = arith.constant 2 : index
    %c0_355 = arith.constant 0 : index
    %c0_356 = arith.constant 0 : index
    %391 = vector.load %arg14[%c1_353, %c2_354, %c0_355, %c0_356] : memref<2x9x32x6xbf16, #tpu.memory_space<vmem>>, vector<1x1x32x6xbf16>
    %392 = vector.shape_cast %391 : vector<1x1x32x6xbf16> to vector<32x6xbf16>
    %cst_357 = arith.constant dense<0.000000e+00> : vector<64x6xf32>
    %393 = tpu.matmul %388, %390, %cst_357 {dimension_numbers = #tpu.dot_dimension_numbers<[1], [0], [0], [1], [0, 0, 1, 1], [], []>} : vector<64x32xbf16>, vector<32x6xbf16>, vector<64x6xf32> -> vector<64x6xf32>
    %cst_358 = arith.constant dense<0.000000e+00> : vector<64x6xf32>
    %394 = tpu.matmul %388, %392, %cst_358 {dimension_numbers = #tpu.dot_dimension_numbers<[1], [0], [0], [1], [0, 0, 1, 1], [], []>} : vector<64x32xbf16>, vector<32x6xbf16>, vector<64x6xf32> -> vector<64x6xf32>
    %395 = arith.addf %383, %393 : vector<64x6xf32>
    %396 = arith.addf %384, %394 : vector<64x6xf32>
    %c8_359 = arith.constant 8 : index
    %c0_360 = arith.constant 0 : index
    %397 = vector.load %arg23[%c8_359, %c0_360] : memref<82x32xf32, #tpu.memory_space<vmem>>, vector<64x32xf32>
    %398 = vector.broadcast %24 : vector<64x1xf32> to vector<64x32xf32>
    %399 = arith.mulf %397, %398 : vector<64x32xf32>
    %400 = arith.truncf %399 : vector<64x32xf32> to vector<64x32xbf16>
    %c1_361 = arith.constant 1 : index
    %c3_362 = arith.constant 3 : index
    %c0_363 = arith.constant 0 : index
    %c0_364 = arith.constant 0 : index
    %401 = vector.load %arg12[%c1_361, %c3_362, %c0_363, %c0_364] : memref<2x9x32x6xbf16, #tpu.memory_space<vmem>>, vector<1x1x32x6xbf16>
    %402 = vector.shape_cast %401 : vector<1x1x32x6xbf16> to vector<32x6xbf16>
    %c1_365 = arith.constant 1 : index
    %c3_366 = arith.constant 3 : index
    %c0_367 = arith.constant 0 : index
    %c0_368 = arith.constant 0 : index
    %403 = vector.load %arg14[%c1_365, %c3_366, %c0_367, %c0_368] : memref<2x9x32x6xbf16, #tpu.memory_space<vmem>>, vector<1x1x32x6xbf16>
    %404 = vector.shape_cast %403 : vector<1x1x32x6xbf16> to vector<32x6xbf16>
    %cst_369 = arith.constant dense<0.000000e+00> : vector<64x6xf32>
    %405 = tpu.matmul %400, %402, %cst_369 {dimension_numbers = #tpu.dot_dimension_numbers<[1], [0], [0], [1], [0, 0, 1, 1], [], []>} : vector<64x32xbf16>, vector<32x6xbf16>, vector<64x6xf32> -> vector<64x6xf32>
    %cst_370 = arith.constant dense<0.000000e+00> : vector<64x6xf32>
    %406 = tpu.matmul %400, %404, %cst_370 {dimension_numbers = #tpu.dot_dimension_numbers<[1], [0], [0], [1], [0, 0, 1, 1], [], []>} : vector<64x32xbf16>, vector<32x6xbf16>, vector<64x6xf32> -> vector<64x6xf32>
    %407 = arith.addf %395, %405 : vector<64x6xf32>
    %408 = arith.addf %396, %406 : vector<64x6xf32>
    %c9_371 = arith.constant 9 : index
    %c0_372 = arith.constant 0 : index
    %409 = vector.load %arg23[%c9_371, %c0_372] : memref<82x32xf32, #tpu.memory_space<vmem>>, vector<64x32xf32>
    %410 = arith.truncf %409 : vector<64x32xf32> to vector<64x32xbf16>
    %c1_373 = arith.constant 1 : index
    %c4_374 = arith.constant 4 : index
    %c0_375 = arith.constant 0 : index
    %c0_376 = arith.constant 0 : index
    %411 = vector.load %arg12[%c1_373, %c4_374, %c0_375, %c0_376] : memref<2x9x32x6xbf16, #tpu.memory_space<vmem>>, vector<1x1x32x6xbf16>
    %412 = vector.shape_cast %411 : vector<1x1x32x6xbf16> to vector<32x6xbf16>
    %c1_377 = arith.constant 1 : index
    %c4_378 = arith.constant 4 : index
    %c0_379 = arith.constant 0 : index
    %c0_380 = arith.constant 0 : index
    %413 = vector.load %arg14[%c1_377, %c4_378, %c0_379, %c0_380] : memref<2x9x32x6xbf16, #tpu.memory_space<vmem>>, vector<1x1x32x6xbf16>
    %414 = vector.shape_cast %413 : vector<1x1x32x6xbf16> to vector<32x6xbf16>
    %cst_381 = arith.constant dense<0.000000e+00> : vector<64x6xf32>
    %415 = tpu.matmul %410, %412, %cst_381 {dimension_numbers = #tpu.dot_dimension_numbers<[1], [0], [0], [1], [0, 0, 1, 1], [], []>} : vector<64x32xbf16>, vector<32x6xbf16>, vector<64x6xf32> -> vector<64x6xf32>
    %cst_382 = arith.constant dense<0.000000e+00> : vector<64x6xf32>
    %416 = tpu.matmul %410, %414, %cst_382 {dimension_numbers = #tpu.dot_dimension_numbers<[1], [0], [0], [1], [0, 0, 1, 1], [], []>} : vector<64x32xbf16>, vector<32x6xbf16>, vector<64x6xf32> -> vector<64x6xf32>
    %417 = arith.addf %407, %415 : vector<64x6xf32>
    %418 = arith.addf %408, %416 : vector<64x6xf32>
    %c10_383 = arith.constant 10 : index
    %c0_384 = arith.constant 0 : index
    %419 = vector.load %arg23[%c10_383, %c0_384] : memref<82x32xf32, #tpu.memory_space<vmem>>, vector<64x32xf32>
    %420 = vector.broadcast %28 : vector<64x1xf32> to vector<64x32xf32>
    %421 = arith.mulf %419, %420 : vector<64x32xf32>
    %422 = arith.truncf %421 : vector<64x32xf32> to vector<64x32xbf16>
    %c1_385 = arith.constant 1 : index
    %c5_386 = arith.constant 5 : index
    %c0_387 = arith.constant 0 : index
    %c0_388 = arith.constant 0 : index
    %423 = vector.load %arg12[%c1_385, %c5_386, %c0_387, %c0_388] : memref<2x9x32x6xbf16, #tpu.memory_space<vmem>>, vector<1x1x32x6xbf16>
    %424 = vector.shape_cast %423 : vector<1x1x32x6xbf16> to vector<32x6xbf16>
    %c1_389 = arith.constant 1 : index
    %c5_390 = arith.constant 5 : index
    %c0_391 = arith.constant 0 : index
    %c0_392 = arith.constant 0 : index
    %425 = vector.load %arg14[%c1_389, %c5_390, %c0_391, %c0_392] : memref<2x9x32x6xbf16, #tpu.memory_space<vmem>>, vector<1x1x32x6xbf16>
    %426 = vector.shape_cast %425 : vector<1x1x32x6xbf16> to vector<32x6xbf16>
    %cst_393 = arith.constant dense<0.000000e+00> : vector<64x6xf32>
    %427 = tpu.matmul %422, %424, %cst_393 {dimension_numbers = #tpu.dot_dimension_numbers<[1], [0], [0], [1], [0, 0, 1, 1], [], []>} : vector<64x32xbf16>, vector<32x6xbf16>, vector<64x6xf32> -> vector<64x6xf32>
    %cst_394 = arith.constant dense<0.000000e+00> : vector<64x6xf32>
    %428 = tpu.matmul %422, %426, %cst_394 {dimension_numbers = #tpu.dot_dimension_numbers<[1], [0], [0], [1], [0, 0, 1, 1], [], []>} : vector<64x32xbf16>, vector<32x6xbf16>, vector<64x6xf32> -> vector<64x6xf32>
    %429 = arith.addf %417, %427 : vector<64x6xf32>
    %430 = arith.addf %418, %428 : vector<64x6xf32>
    %c16_395 = arith.constant 16 : index
    %c0_396 = arith.constant 0 : index
    %431 = vector.load %arg23[%c16_395, %c0_396] : memref<82x32xf32, #tpu.memory_space<vmem>>, vector<64x32xf32>
    %432 = vector.broadcast %24 : vector<64x1xf32> to vector<64x32xf32>
    %433 = arith.mulf %431, %432 : vector<64x32xf32>
    %434 = arith.truncf %433 : vector<64x32xf32> to vector<64x32xbf16>
    %c1_397 = arith.constant 1 : index
    %c6_398 = arith.constant 6 : index
    %c0_399 = arith.constant 0 : index
    %c0_400 = arith.constant 0 : index
    %435 = vector.load %arg12[%c1_397, %c6_398, %c0_399, %c0_400] : memref<2x9x32x6xbf16, #tpu.memory_space<vmem>>, vector<1x1x32x6xbf16>
    %436 = vector.shape_cast %435 : vector<1x1x32x6xbf16> to vector<32x6xbf16>
    %c1_401 = arith.constant 1 : index
    %c6_402 = arith.constant 6 : index
    %c0_403 = arith.constant 0 : index
    %c0_404 = arith.constant 0 : index
    %437 = vector.load %arg14[%c1_401, %c6_402, %c0_403, %c0_404] : memref<2x9x32x6xbf16, #tpu.memory_space<vmem>>, vector<1x1x32x6xbf16>
    %438 = vector.shape_cast %437 : vector<1x1x32x6xbf16> to vector<32x6xbf16>
    %cst_405 = arith.constant dense<0.000000e+00> : vector<64x6xf32>
    %439 = tpu.matmul %434, %436, %cst_405 {dimension_numbers = #tpu.dot_dimension_numbers<[1], [0], [0], [1], [0, 0, 1, 1], [], []>} : vector<64x32xbf16>, vector<32x6xbf16>, vector<64x6xf32> -> vector<64x6xf32>
    %cst_406 = arith.constant dense<0.000000e+00> : vector<64x6xf32>
    %440 = tpu.matmul %434, %438, %cst_406 {dimension_numbers = #tpu.dot_dimension_numbers<[1], [0], [0], [1], [0, 0, 1, 1], [], []>} : vector<64x32xbf16>, vector<32x6xbf16>, vector<64x6xf32> -> vector<64x6xf32>
    %441 = arith.addf %429, %439 : vector<64x6xf32>
    %442 = arith.addf %430, %440 : vector<64x6xf32>
    %c17_407 = arith.constant 17 : index
    %c0_408 = arith.constant 0 : index
    %443 = vector.load %arg23[%c17_407, %c0_408] : memref<82x32xf32, #tpu.memory_space<vmem>>, vector<64x32xf32>
    %444 = arith.truncf %443 : vector<64x32xf32> to vector<64x32xbf16>
    %c1_409 = arith.constant 1 : index
    %c7_410 = arith.constant 7 : index
    %c0_411 = arith.constant 0 : index
    %c0_412 = arith.constant 0 : index
    %445 = vector.load %arg12[%c1_409, %c7_410, %c0_411, %c0_412] : memref<2x9x32x6xbf16, #tpu.memory_space<vmem>>, vector<1x1x32x6xbf16>
    %446 = vector.shape_cast %445 : vector<1x1x32x6xbf16> to vector<32x6xbf16>
    %c1_413 = arith.constant 1 : index
    %c7_414 = arith.constant 7 : index
    %c0_415 = arith.constant 0 : index
    %c0_416 = arith.constant 0 : index
    %447 = vector.load %arg14[%c1_413, %c7_414, %c0_415, %c0_416] : memref<2x9x32x6xbf16, #tpu.memory_space<vmem>>, vector<1x1x32x6xbf16>
    %448 = vector.shape_cast %447 : vector<1x1x32x6xbf16> to vector<32x6xbf16>
    %cst_417 = arith.constant dense<0.000000e+00> : vector<64x6xf32>
    %449 = tpu.matmul %444, %446, %cst_417 {dimension_numbers = #tpu.dot_dimension_numbers<[1], [0], [0], [1], [0, 0, 1, 1], [], []>} : vector<64x32xbf16>, vector<32x6xbf16>, vector<64x6xf32> -> vector<64x6xf32>
    %cst_418 = arith.constant dense<0.000000e+00> : vector<64x6xf32>
    %450 = tpu.matmul %444, %448, %cst_418 {dimension_numbers = #tpu.dot_dimension_numbers<[1], [0], [0], [1], [0, 0, 1, 1], [], []>} : vector<64x32xbf16>, vector<32x6xbf16>, vector<64x6xf32> -> vector<64x6xf32>
    %451 = arith.addf %441, %449 : vector<64x6xf32>
    %452 = arith.addf %442, %450 : vector<64x6xf32>
    %c18_419 = arith.constant 18 : index
    %c0_420 = arith.constant 0 : index
    %453 = vector.load %arg23[%c18_419, %c0_420] : memref<82x32xf32, #tpu.memory_space<vmem>>, vector<64x32xf32>
    %454 = vector.broadcast %28 : vector<64x1xf32> to vector<64x32xf32>
    %455 = arith.mulf %453, %454 : vector<64x32xf32>
    %456 = arith.truncf %455 : vector<64x32xf32> to vector<64x32xbf16>
    %c1_421 = arith.constant 1 : index
    %c8_422 = arith.constant 8 : index
    %c0_423 = arith.constant 0 : index
    %c0_424 = arith.constant 0 : index
    %457 = vector.load %arg12[%c1_421, %c8_422, %c0_423, %c0_424] : memref<2x9x32x6xbf16, #tpu.memory_space<vmem>>, vector<1x1x32x6xbf16>
    %458 = vector.shape_cast %457 : vector<1x1x32x6xbf16> to vector<32x6xbf16>
    %c1_425 = arith.constant 1 : index
    %c8_426 = arith.constant 8 : index
    %c0_427 = arith.constant 0 : index
    %c0_428 = arith.constant 0 : index
    %459 = vector.load %arg14[%c1_425, %c8_426, %c0_427, %c0_428] : memref<2x9x32x6xbf16, #tpu.memory_space<vmem>>, vector<1x1x32x6xbf16>
    %460 = vector.shape_cast %459 : vector<1x1x32x6xbf16> to vector<32x6xbf16>
    %cst_429 = arith.constant dense<0.000000e+00> : vector<64x6xf32>
    %461 = tpu.matmul %456, %458, %cst_429 {dimension_numbers = #tpu.dot_dimension_numbers<[1], [0], [0], [1], [0, 0, 1, 1], [], []>} : vector<64x32xbf16>, vector<32x6xbf16>, vector<64x6xf32> -> vector<64x6xf32>
    %cst_430 = arith.constant dense<0.000000e+00> : vector<64x6xf32>
    %462 = tpu.matmul %456, %460, %cst_430 {dimension_numbers = #tpu.dot_dimension_numbers<[1], [0], [0], [1], [0, 0, 1, 1], [], []>} : vector<64x32xbf16>, vector<32x6xbf16>, vector<64x6xf32> -> vector<64x6xf32>
    %463 = arith.addf %451, %461 : vector<64x6xf32>
    %464 = arith.addf %452, %462 : vector<64x6xf32>
    %c1_431 = arith.constant 1 : index
    %c0_432 = arith.constant 0 : index
    %c0_433 = arith.constant 0 : index
    %465 = vector.load %arg13[%c1_431, %c0_432, %c0_433] : memref<2x1x6xf32, #tpu.memory_space<vmem>>, vector<1x1x6xf32>
    %466 = vector.shape_cast %465 : vector<1x1x6xf32> to vector<1x6xf32>
    %467 = vector.broadcast %466 : vector<1x6xf32> to vector<64x6xf32>
    %468 = arith.addf %463, %467 : vector<64x6xf32>
    %c1_434 = arith.constant 1 : index
    %c0_435 = arith.constant 0 : index
    %c0_436 = arith.constant 0 : index
    %469 = vector.load %arg15[%c1_434, %c0_435, %c0_436] : memref<2x1x6xf32, #tpu.memory_space<vmem>>, vector<1x1x6xf32>
    %470 = vector.shape_cast %469 : vector<1x1x6xf32> to vector<1x6xf32>
    %471 = vector.broadcast %470 : vector<1x6xf32> to vector<64x6xf32>
    %472 = arith.addf %464, %471 : vector<64x6xf32>
    %cst_437 = arith.constant 2.000000e+00 : f32
    %473 = vector.broadcast %cst_437 : f32 to vector<64x6xf32>
    %474 = arith.addf %472, %473 : vector<64x6xf32>
    %475 = arith.negf %474 : vector<64x6xf32>
    %476 = math.exp %475 : vector<64x6xf32>
    %cst_438 = arith.constant 1.000000e+00 : f32
    %477 = vector.broadcast %cst_438 : f32 to vector<64x6xf32>
    %478 = arith.addf %477, %476 : vector<64x6xf32>
    %479 = arith.divf %477, %478 : vector<64x6xf32>
    %480 = arith.addf %281, %468 : vector<64x6xf32>
    %481 = arith.mulf %480, %479 : vector<64x6xf32>
    %482 = math.log %479 : vector<64x6xf32>
    %cst_439 = arith.constant dense<0.000000e+00> : vector<64xf32>
    %483 = vector.multi_reduction <add>, %482, %cst_439 [1] : vector<64x6xf32> to vector<64xf32>
    %484 = vector.shape_cast %483 : vector<64xf32> to vector<64x1xf32>
    %485 = arith.addf %259, %484 : vector<64x1xf32>
    %c9_440 = arith.constant 9 : index
    %c0_441 = arith.constant 0 : index
    %486 = vector.load %arg22[%c9_440, %c0_441] : memref<82x6xf32, #tpu.memory_space<vmem>>, vector<64x6xf32>
    tpu.vector_store %arg22[%c9_440, %c0_441], %270 {strides = array<i32>} : memref<82x6xf32, #tpu.memory_space<vmem>>, vector<64x6xf32>,
    %c0_442 = arith.constant 0 : index
    %c0_443 = arith.constant 0 : index
    %487 = vector.load %arg22[%c0_442, %c0_443] : memref<82x6xf32, #tpu.memory_space<vmem>>, vector<64x6xf32>
    %488 = vector.broadcast %24 : vector<64x1xf32> to vector<64x6xf32>
    %489 = arith.mulf %487, %488 : vector<64x6xf32>
    %490 = arith.truncf %489 : vector<64x6xf32> to vector<64x6xbf16>
    %c0_444 = arith.constant 0 : index
    %c0_445 = arith.constant 0 : index
    %c0_446 = arith.constant 0 : index
    %491 = vector.load %arg16[%c0_444, %c0_445, %c0_446] : memref<9x6x6xbf16, #tpu.memory_space<vmem>>, vector<1x6x6xbf16>
    %492 = vector.shape_cast %491 : vector<1x6x6xbf16> to vector<6x6xbf16>
    %c0_447 = arith.constant 0 : index
    %c0_448 = arith.constant 0 : index
    %c0_449 = arith.constant 0 : index
    %493 = vector.load %arg18[%c0_447, %c0_448, %c0_449] : memref<9x6x6xbf16, #tpu.memory_space<vmem>>, vector<1x6x6xbf16>
    %494 = vector.shape_cast %493 : vector<1x6x6xbf16> to vector<6x6xbf16>
    %cst_450 = arith.constant dense<0.000000e+00> : vector<64x6xf32>
    %495 = tpu.matmul %490, %492, %cst_450 {dimension_numbers = #tpu.dot_dimension_numbers<[1], [0], [0], [1], [0, 0, 1, 1], [], []>} : vector<64x6xbf16>, vector<6x6xbf16>, vector<64x6xf32> -> vector<64x6xf32>
    %cst_451 = arith.constant dense<0.000000e+00> : vector<64x6xf32>
    %496 = tpu.matmul %490, %494, %cst_451 {dimension_numbers = #tpu.dot_dimension_numbers<[1], [0], [0], [1], [0, 0, 1, 1], [], []>} : vector<64x6xbf16>, vector<6x6xbf16>, vector<64x6xf32> -> vector<64x6xf32>
    %c1_452 = arith.constant 1 : index
    %c0_453 = arith.constant 0 : index
    %497 = vector.load %arg22[%c1_452, %c0_453] : memref<82x6xf32, #tpu.memory_space<vmem>>, vector<64x6xf32>
    %498 = arith.truncf %497 : vector<64x6xf32> to vector<64x6xbf16>
    %c1_454 = arith.constant 1 : index
    %c0_455 = arith.constant 0 : index
    %c0_456 = arith.constant 0 : index
    %499 = vector.load %arg16[%c1_454, %c0_455, %c0_456] : memref<9x6x6xbf16, #tpu.memory_space<vmem>>, vector<1x6x6xbf16>
    %500 = vector.shape_cast %499 : vector<1x6x6xbf16> to vector<6x6xbf16>
    %c1_457 = arith.constant 1 : index
    %c0_458 = arith.constant 0 : index
    %c0_459 = arith.constant 0 : index
    %501 = vector.load %arg18[%c1_457, %c0_458, %c0_459] : memref<9x6x6xbf16, #tpu.memory_space<vmem>>, vector<1x6x6xbf16>
    %502 = vector.shape_cast %501 : vector<1x6x6xbf16> to vector<6x6xbf16>
    %cst_460 = arith.constant dense<0.000000e+00> : vector<64x6xf32>
    %503 = tpu.matmul %498, %500, %cst_460 {dimension_numbers = #tpu.dot_dimension_numbers<[1], [0], [0], [1], [0, 0, 1, 1], [], []>} : vector<64x6xbf16>, vector<6x6xbf16>, vector<64x6xf32> -> vector<64x6xf32>
    %cst_461 = arith.constant dense<0.000000e+00> : vector<64x6xf32>
    %504 = tpu.matmul %498, %502, %cst_461 {dimension_numbers = #tpu.dot_dimension_numbers<[1], [0], [0], [1], [0, 0, 1, 1], [], []>} : vector<64x6xbf16>, vector<6x6xbf16>, vector<64x6xf32> -> vector<64x6xf32>
    %505 = arith.addf %495, %503 : vector<64x6xf32>
    %506 = arith.addf %496, %504 : vector<64x6xf32>
    %c2_462 = arith.constant 2 : index
    %c0_463 = arith.constant 0 : index
    %507 = vector.load %arg22[%c2_462, %c0_463] : memref<82x6xf32, #tpu.memory_space<vmem>>, vector<64x6xf32>
    %508 = vector.broadcast %28 : vector<64x1xf32> to vector<64x6xf32>
    %509 = arith.mulf %507, %508 : vector<64x6xf32>
    %510 = arith.truncf %509 : vector<64x6xf32> to vector<64x6xbf16>
    %c2_464 = arith.constant 2 : index
    %c0_465 = arith.constant 0 : index
    %c0_466 = arith.constant 0 : index
    %511 = vector.load %arg16[%c2_464, %c0_465, %c0_466] : memref<9x6x6xbf16, #tpu.memory_space<vmem>>, vector<1x6x6xbf16>
    %512 = vector.shape_cast %511 : vector<1x6x6xbf16> to vector<6x6xbf16>
    %c2_467 = arith.constant 2 : index
    %c0_468 = arith.constant 0 : index
    %c0_469 = arith.constant 0 : index
    %513 = vector.load %arg18[%c2_467, %c0_468, %c0_469] : memref<9x6x6xbf16, #tpu.memory_space<vmem>>, vector<1x6x6xbf16>
    %514 = vector.shape_cast %513 : vector<1x6x6xbf16> to vector<6x6xbf16>
    %cst_470 = arith.constant dense<0.000000e+00> : vector<64x6xf32>
    %515 = tpu.matmul %510, %512, %cst_470 {dimension_numbers = #tpu.dot_dimension_numbers<[1], [0], [0], [1], [0, 0, 1, 1], [], []>} : vector<64x6xbf16>, vector<6x6xbf16>, vector<64x6xf32> -> vector<64x6xf32>
    %cst_471 = arith.constant dense<0.000000e+00> : vector<64x6xf32>
    %516 = tpu.matmul %510, %514, %cst_471 {dimension_numbers = #tpu.dot_dimension_numbers<[1], [0], [0], [1], [0, 0, 1, 1], [], []>} : vector<64x6xbf16>, vector<6x6xbf16>, vector<64x6xf32> -> vector<64x6xf32>
    %517 = arith.addf %505, %515 : vector<64x6xf32>
    %518 = arith.addf %506, %516 : vector<64x6xf32>
    %c8_472 = arith.constant 8 : index
    %c0_473 = arith.constant 0 : index
    %519 = vector.load %arg22[%c8_472, %c0_473] : memref<82x6xf32, #tpu.memory_space<vmem>>, vector<64x6xf32>
    %520 = vector.broadcast %24 : vector<64x1xf32> to vector<64x6xf32>
    %521 = arith.mulf %519, %520 : vector<64x6xf32>
    %522 = arith.truncf %521 : vector<64x6xf32> to vector<64x6xbf16>
    %c3_474 = arith.constant 3 : index
    %c0_475 = arith.constant 0 : index
    %c0_476 = arith.constant 0 : index
    %523 = vector.load %arg16[%c3_474, %c0_475, %c0_476] : memref<9x6x6xbf16, #tpu.memory_space<vmem>>, vector<1x6x6xbf16>
    %524 = vector.shape_cast %523 : vector<1x6x6xbf16> to vector<6x6xbf16>
    %c3_477 = arith.constant 3 : index
    %c0_478 = arith.constant 0 : index
    %c0_479 = arith.constant 0 : index
    %525 = vector.load %arg18[%c3_477, %c0_478, %c0_479] : memref<9x6x6xbf16, #tpu.memory_space<vmem>>, vector<1x6x6xbf16>
    %526 = vector.shape_cast %525 : vector<1x6x6xbf16> to vector<6x6xbf16>
    %cst_480 = arith.constant dense<0.000000e+00> : vector<64x6xf32>
    %527 = tpu.matmul %522, %524, %cst_480 {dimension_numbers = #tpu.dot_dimension_numbers<[1], [0], [0], [1], [0, 0, 1, 1], [], []>} : vector<64x6xbf16>, vector<6x6xbf16>, vector<64x6xf32> -> vector<64x6xf32>
    %cst_481 = arith.constant dense<0.000000e+00> : vector<64x6xf32>
    %528 = tpu.matmul %522, %526, %cst_481 {dimension_numbers = #tpu.dot_dimension_numbers<[1], [0], [0], [1], [0, 0, 1, 1], [], []>} : vector<64x6xbf16>, vector<6x6xbf16>, vector<64x6xf32> -> vector<64x6xf32>
    %529 = arith.addf %517, %527 : vector<64x6xf32>
    %530 = arith.addf %518, %528 : vector<64x6xf32>
    %c9_482 = arith.constant 9 : index
    %c0_483 = arith.constant 0 : index
    %531 = vector.load %arg22[%c9_482, %c0_483] : memref<82x6xf32, #tpu.memory_space<vmem>>, vector<64x6xf32>
    %532 = arith.truncf %531 : vector<64x6xf32> to vector<64x6xbf16>
    %c4_484 = arith.constant 4 : index
    %c0_485 = arith.constant 0 : index
    %c0_486 = arith.constant 0 : index
    %533 = vector.load %arg16[%c4_484, %c0_485, %c0_486] : memref<9x6x6xbf16, #tpu.memory_space<vmem>>, vector<1x6x6xbf16>
    %534 = vector.shape_cast %533 : vector<1x6x6xbf16> to vector<6x6xbf16>
    %c4_487 = arith.constant 4 : index
    %c0_488 = arith.constant 0 : index
    %c0_489 = arith.constant 0 : index
    %535 = vector.load %arg18[%c4_487, %c0_488, %c0_489] : memref<9x6x6xbf16, #tpu.memory_space<vmem>>, vector<1x6x6xbf16>
    %536 = vector.shape_cast %535 : vector<1x6x6xbf16> to vector<6x6xbf16>
    %cst_490 = arith.constant dense<0.000000e+00> : vector<64x6xf32>
    %537 = tpu.matmul %532, %534, %cst_490 {dimension_numbers = #tpu.dot_dimension_numbers<[1], [0], [0], [1], [0, 0, 1, 1], [], []>} : vector<64x6xbf16>, vector<6x6xbf16>, vector<64x6xf32> -> vector<64x6xf32>
    %cst_491 = arith.constant dense<0.000000e+00> : vector<64x6xf32>
    %538 = tpu.matmul %532, %536, %cst_491 {dimension_numbers = #tpu.dot_dimension_numbers<[1], [0], [0], [1], [0, 0, 1, 1], [], []>} : vector<64x6xbf16>, vector<6x6xbf16>, vector<64x6xf32> -> vector<64x6xf32>
    %539 = arith.addf %529, %537 : vector<64x6xf32>
    %540 = arith.addf %530, %538 : vector<64x6xf32>
    %c10_492 = arith.constant 10 : index
    %c0_493 = arith.constant 0 : index
    %541 = vector.load %arg22[%c10_492, %c0_493] : memref<82x6xf32, #tpu.memory_space<vmem>>, vector<64x6xf32>
    %542 = vector.broadcast %28 : vector<64x1xf32> to vector<64x6xf32>
    %543 = arith.mulf %541, %542 : vector<64x6xf32>
    %544 = arith.truncf %543 : vector<64x6xf32> to vector<64x6xbf16>
    %c5_494 = arith.constant 5 : index
    %c0_495 = arith.constant 0 : index
    %c0_496 = arith.constant 0 : index
    %545 = vector.load %arg16[%c5_494, %c0_495, %c0_496] : memref<9x6x6xbf16, #tpu.memory_space<vmem>>, vector<1x6x6xbf16>
    %546 = vector.shape_cast %545 : vector<1x6x6xbf16> to vector<6x6xbf16>
    %c5_497 = arith.constant 5 : index
    %c0_498 = arith.constant 0 : index
    %c0_499 = arith.constant 0 : index
    %547 = vector.load %arg18[%c5_497, %c0_498, %c0_499] : memref<9x6x6xbf16, #tpu.memory_space<vmem>>, vector<1x6x6xbf16>
    %548 = vector.shape_cast %547 : vector<1x6x6xbf16> to vector<6x6xbf16>
    %cst_500 = arith.constant dense<0.000000e+00> : vector<64x6xf32>
    %549 = tpu.matmul %544, %546, %cst_500 {dimension_numbers = #tpu.dot_dimension_numbers<[1], [0], [0], [1], [0, 0, 1, 1], [], []>} : vector<64x6xbf16>, vector<6x6xbf16>, vector<64x6xf32> -> vector<64x6xf32>
    %cst_501 = arith.constant dense<0.000000e+00> : vector<64x6xf32>
    %550 = tpu.matmul %544, %548, %cst_501 {dimension_numbers = #tpu.dot_dimension_numbers<[1], [0], [0], [1], [0, 0, 1, 1], [], []>} : vector<64x6xbf16>, vector<6x6xbf16>, vector<64x6xf32> -> vector<64x6xf32>
    %551 = arith.addf %539, %549 : vector<64x6xf32>
    %552 = arith.addf %540, %550 : vector<64x6xf32>
    %c16_502 = arith.constant 16 : index
    %c0_503 = arith.constant 0 : index
    %553 = vector.load %arg22[%c16_502, %c0_503] : memref<82x6xf32, #tpu.memory_space<vmem>>, vector<64x6xf32>
    %554 = vector.broadcast %24 : vector<64x1xf32> to vector<64x6xf32>
    %555 = arith.mulf %553, %554 : vector<64x6xf32>
    %556 = arith.truncf %555 : vector<64x6xf32> to vector<64x6xbf16>
    %c6_504 = arith.constant 6 : index
    %c0_505 = arith.constant 0 : index
    %c0_506 = arith.constant 0 : index
    %557 = vector.load %arg16[%c6_504, %c0_505, %c0_506] : memref<9x6x6xbf16, #tpu.memory_space<vmem>>, vector<1x6x6xbf16>
    %558 = vector.shape_cast %557 : vector<1x6x6xbf16> to vector<6x6xbf16>
    %c6_507 = arith.constant 6 : index
    %c0_508 = arith.constant 0 : index
    %c0_509 = arith.constant 0 : index
    %559 = vector.load %arg18[%c6_507, %c0_508, %c0_509] : memref<9x6x6xbf16, #tpu.memory_space<vmem>>, vector<1x6x6xbf16>
    %560 = vector.shape_cast %559 : vector<1x6x6xbf16> to vector<6x6xbf16>
    %cst_510 = arith.constant dense<0.000000e+00> : vector<64x6xf32>
    %561 = tpu.matmul %556, %558, %cst_510 {dimension_numbers = #tpu.dot_dimension_numbers<[1], [0], [0], [1], [0, 0, 1, 1], [], []>} : vector<64x6xbf16>, vector<6x6xbf16>, vector<64x6xf32> -> vector<64x6xf32>
    %cst_511 = arith.constant dense<0.000000e+00> : vector<64x6xf32>
    %562 = tpu.matmul %556, %560, %cst_511 {dimension_numbers = #tpu.dot_dimension_numbers<[1], [0], [0], [1], [0, 0, 1, 1], [], []>} : vector<64x6xbf16>, vector<6x6xbf16>, vector<64x6xf32> -> vector<64x6xf32>
    %563 = arith.addf %551, %561 : vector<64x6xf32>
    %564 = arith.addf %552, %562 : vector<64x6xf32>
    %c17_512 = arith.constant 17 : index
    %c0_513 = arith.constant 0 : index
    %565 = vector.load %arg22[%c17_512, %c0_513] : memref<82x6xf32, #tpu.memory_space<vmem>>, vector<64x6xf32>
    %566 = arith.truncf %565 : vector<64x6xf32> to vector<64x6xbf16>
    %c7_514 = arith.constant 7 : index
    %c0_515 = arith.constant 0 : index
    %c0_516 = arith.constant 0 : index
    %567 = vector.load %arg16[%c7_514, %c0_515, %c0_516] : memref<9x6x6xbf16, #tpu.memory_space<vmem>>, vector<1x6x6xbf16>
    %568 = vector.shape_cast %567 : vector<1x6x6xbf16> to vector<6x6xbf16>
    %c7_517 = arith.constant 7 : index
    %c0_518 = arith.constant 0 : index
    %c0_519 = arith.constant 0 : index
    %569 = vector.load %arg18[%c7_517, %c0_518, %c0_519] : memref<9x6x6xbf16, #tpu.memory_space<vmem>>, vector<1x6x6xbf16>
    %570 = vector.shape_cast %569 : vector<1x6x6xbf16> to vector<6x6xbf16>
    %cst_520 = arith.constant dense<0.000000e+00> : vector<64x6xf32>
    %571 = tpu.matmul %566, %568, %cst_520 {dimension_numbers = #tpu.dot_dimension_numbers<[1], [0], [0], [1], [0, 0, 1, 1], [], []>} : vector<64x6xbf16>, vector<6x6xbf16>, vector<64x6xf32> -> vector<64x6xf32>
    %cst_521 = arith.constant dense<0.000000e+00> : vector<64x6xf32>
    %572 = tpu.matmul %566, %570, %cst_521 {dimension_numbers = #tpu.dot_dimension_numbers<[1], [0], [0], [1], [0, 0, 1, 1], [], []>} : vector<64x6xbf16>, vector<6x6xbf16>, vector<64x6xf32> -> vector<64x6xf32>
    %573 = arith.addf %563, %571 : vector<64x6xf32>
    %574 = arith.addf %564, %572 : vector<64x6xf32>
    %c18_522 = arith.constant 18 : index
    %c0_523 = arith.constant 0 : index
    %575 = vector.load %arg22[%c18_522, %c0_523] : memref<82x6xf32, #tpu.memory_space<vmem>>, vector<64x6xf32>
    %576 = vector.broadcast %28 : vector<64x1xf32> to vector<64x6xf32>
    %577 = arith.mulf %575, %576 : vector<64x6xf32>
    %578 = arith.truncf %577 : vector<64x6xf32> to vector<64x6xbf16>
    %c8_524 = arith.constant 8 : index
    %c0_525 = arith.constant 0 : index
    %c0_526 = arith.constant 0 : index
    %579 = vector.load %arg16[%c8_524, %c0_525, %c0_526] : memref<9x6x6xbf16, #tpu.memory_space<vmem>>, vector<1x6x6xbf16>
    %580 = vector.shape_cast %579 : vector<1x6x6xbf16> to vector<6x6xbf16>
    %c8_527 = arith.constant 8 : index
    %c0_528 = arith.constant 0 : index
    %c0_529 = arith.constant 0 : index
    %581 = vector.load %arg18[%c8_527, %c0_528, %c0_529] : memref<9x6x6xbf16, #tpu.memory_space<vmem>>, vector<1x6x6xbf16>
    %582 = vector.shape_cast %581 : vector<1x6x6xbf16> to vector<6x6xbf16>
    %cst_530 = arith.constant dense<0.000000e+00> : vector<64x6xf32>
    %583 = tpu.matmul %578, %580, %cst_530 {dimension_numbers = #tpu.dot_dimension_numbers<[1], [0], [0], [1], [0, 0, 1, 1], [], []>} : vector<64x6xbf16>, vector<6x6xbf16>, vector<64x6xf32> -> vector<64x6xf32>
    %cst_531 = arith.constant dense<0.000000e+00> : vector<64x6xf32>
    %584 = tpu.matmul %578, %582, %cst_531 {dimension_numbers = #tpu.dot_dimension_numbers<[1], [0], [0], [1], [0, 0, 1, 1], [], []>} : vector<64x6xbf16>, vector<6x6xbf16>, vector<64x6xf32> -> vector<64x6xf32>
    %585 = arith.addf %573, %583 : vector<64x6xf32>
    %586 = arith.addf %574, %584 : vector<64x6xf32>
    %c0_532 = arith.constant 0 : index
    %c0_533 = arith.constant 0 : index
    %587 = vector.load %arg17[%c0_532, %c0_533] : memref<1x6xf32, #tpu.memory_space<vmem>>, vector<1x6xf32>
    %588 = vector.broadcast %587 : vector<1x6xf32> to vector<64x6xf32>
    %589 = arith.addf %585, %588 : vector<64x6xf32>
    %c0_534 = arith.constant 0 : index
    %c0_535 = arith.constant 0 : index
    %590 = vector.load %arg19[%c0_534, %c0_535] : memref<1x6xf32, #tpu.memory_space<vmem>>, vector<1x6xf32>
    %591 = vector.broadcast %590 : vector<1x6xf32> to vector<64x6xf32>
    %592 = arith.addf %586, %591 : vector<64x6xf32>
    %593 = arith.subf %481, %589 : vector<64x6xf32>
    %cst_536 = arith.constant 2.000000e+00 : f32
    %594 = vector.broadcast %cst_536 : f32 to vector<64x6xf32>
    %595 = arith.mulf %594, %592 : vector<64x6xf32>
    %cst_537 = arith.constant 1.83787704 : f32
    %596 = vector.broadcast %cst_537 : f32 to vector<64x6xf32>
    %597 = arith.addf %596, %595 : vector<64x6xf32>
    %598 = arith.mulf %593, %593 : vector<64x6xf32>
    %cst_538 = arith.constant -2.000000e+00 : f32
    %599 = vector.broadcast %cst_538 : f32 to vector<64x6xf32>
    %600 = arith.mulf %599, %592 : vector<64x6xf32>
    %601 = math.exp %600 : vector<64x6xf32>
    %602 = arith.mulf %598, %601 : vector<64x6xf32>
    %603 = arith.addf %597, %602 : vector<64x6xf32>
    %cst_539 = arith.constant -5.000000e-01 : f32
    %604 = vector.broadcast %cst_539 : f32 to vector<64x6xf32>
    %605 = arith.mulf %604, %603 : vector<64x6xf32>
    %cst_540 = arith.constant dense<0.000000e+00> : vector<64xf32>
    %606 = vector.multi_reduction <add>, %605, %cst_540 [1] : vector<64x6xf32> to vector<64xf32>
    %607 = vector.shape_cast %606 : vector<64xf32> to vector<64x1xf32>
    %608 = arith.addf %485, %607 : vector<64x1xf32>
    %c0_541 = arith.constant 0 : index
    %c0_542 = arith.constant 0 : index
    %c0_543 = arith.constant 0 : index
    %609 = vector.load %arg20[%c0_541, %c0_542, %c0_543] : memref<1x64x6xf32, #tpu.memory_space<vmem>>, vector<1x64x6xf32>
    %610 = vector.shape_cast %609 : vector<1x64x6xf32> to vector<64x6xf32>
    %611 = vector.shape_cast %270 : vector<64x6xf32> to vector<1x64x6xf32>
    tpu.vector_store %arg20[%c0_541, %c0_542, %c0_543], %611 {strides = array<i32>} : memref<1x64x6xf32, #tpu.memory_space<vmem>>, vector<1x64x6xf32>,
    %cst_544 = arith.constant 1.000000e+00 : f32
    %612 = vector.broadcast %cst_544 : f32 to vector<1x64xf32>
    %cst_545 = arith.constant dense<0.000000e+00> : vector<1x1xf32>
    %613 = tpu.matmul %612, %608, %cst_545 {dimension_numbers = #tpu.dot_dimension_numbers<[1], [0], [0], [1], [0, 0, 1, 1], [], []>} : vector<1x64xf32>, vector<64x1xf32>, vector<1x1xf32> -> vector<1x1xf32>
    %c0_546 = arith.constant 0 : index
    %c0_547 = arith.constant 0 : index
    %c0_548 = arith.constant 0 : index
    %614 = vector.load %arg21[%c0_546, %c0_547, %c0_548] : memref<1x1x1xf32, #tpu.memory_space<vmem>>, vector<1x1x1xf32>
    %615 = vector.shape_cast %614 : vector<1x1x1xf32> to vector<1x1xf32>
    %616 = vector.shape_cast %613 : vector<1x1xf32> to vector<1x1x1xf32>
    tpu.vector_store %arg21[%c0_546, %c0_547, %c0_548], %616 {strides = array<i32>} : memref<1x1x1xf32, #tpu.memory_space<vmem>>, vector<1x1x1xf32>,
    return
  }
  func.func @transform_0(%arg0: i32) -> (i32, i32, i32, i32) {
    %c0_i32 = arith.constant 0 : i32
    %c0_i32_0 = arith.constant 0 : i32
    %c0_i32_1 = arith.constant 0 : i32
    %c0_i32_2 = arith.constant 0 : i32
    return %arg0, %c0_i32, %c0_i32_0, %c0_i32_1 : i32, i32, i32, i32
  }
  func.func @transform_1(%arg0: i32) -> (i32, i32, i32) {
    %c0_i32 = arith.constant 0 : i32
    %c0_i32_0 = arith.constant 0 : i32
    %c0_i32_1 = arith.constant 0 : i32
    %c0_i32_2 = arith.constant 0 : i32
    return %c0_i32, %c0_i32_0, %c0_i32_1 : i32, i32, i32
  }
  func.func @transform_2(%arg0: i32) -> (i32, i32, i32) {
    %c0_i32 = arith.constant 0 : i32
    %c0_i32_0 = arith.constant 0 : i32
    %c0_i32_1 = arith.constant 0 : i32
    %c0_i32_2 = arith.constant 0 : i32
    return %c0_i32, %c0_i32_0, %c0_i32_1 : i32, i32, i32
  }
  func.func @transform_3(%arg0: i32) -> (i32, i32, i32) {
    %c0_i32 = arith.constant 0 : i32
    %c0_i32_0 = arith.constant 0 : i32
    %c0_i32_1 = arith.constant 0 : i32
    %c0_i32_2 = arith.constant 0 : i32
    return %c0_i32, %c0_i32_0, %c0_i32_1 : i32, i32, i32
  }
  func.func @transform_4(%arg0: i32) -> (i32, i32, i32) {
    %c0_i32 = arith.constant 0 : i32
    %c0_i32_0 = arith.constant 0 : i32
    %c0_i32_1 = arith.constant 0 : i32
    %c0_i32_2 = arith.constant 0 : i32
    return %c0_i32, %c0_i32_0, %c0_i32_1 : i32, i32, i32
  }
  func.func @transform_5(%arg0: i32) -> (i32, i32, i32) {
    %c0_i32 = arith.constant 0 : i32
    %c0_i32_0 = arith.constant 0 : i32
    %c0_i32_1 = arith.constant 0 : i32
    %c0_i32_2 = arith.constant 0 : i32
    return %c0_i32, %c0_i32_0, %c0_i32_1 : i32, i32, i32
  }
  func.func @transform_6(%arg0: i32) -> (i32, i32, i32) {
    %c0_i32 = arith.constant 0 : i32
    %c0_i32_0 = arith.constant 0 : i32
    %c0_i32_1 = arith.constant 0 : i32
    %c0_i32_2 = arith.constant 0 : i32
    return %c0_i32, %c0_i32_0, %c0_i32_1 : i32, i32, i32
  }
  func.func @transform_7(%arg0: i32) -> (i32, i32, i32, i32) {
    %c0_i32 = arith.constant 0 : i32
    %c0_i32_0 = arith.constant 0 : i32
    %c0_i32_1 = arith.constant 0 : i32
    %c0_i32_2 = arith.constant 0 : i32
    %c0_i32_3 = arith.constant 0 : i32
    return %c0_i32, %c0_i32_0, %c0_i32_1, %c0_i32_2 : i32, i32, i32, i32
  }
  func.func @transform_8(%arg0: i32) -> (i32, i32, i32) {
    %c0_i32 = arith.constant 0 : i32
    %c0_i32_0 = arith.constant 0 : i32
    %c0_i32_1 = arith.constant 0 : i32
    %c0_i32_2 = arith.constant 0 : i32
    return %c0_i32, %c0_i32_0, %c0_i32_1 : i32, i32, i32
  }
  func.func @transform_9(%arg0: i32) -> (i32, i32, i32) {
    %c0_i32 = arith.constant 0 : i32
    %c0_i32_0 = arith.constant 0 : i32
    %c0_i32_1 = arith.constant 0 : i32
    %c0_i32_2 = arith.constant 0 : i32
    return %c0_i32, %c0_i32_0, %c0_i32_1 : i32, i32, i32
  }
  func.func @transform_10(%arg0: i32) -> (i32, i32, i32) {
    %c0_i32 = arith.constant 0 : i32
    %c0_i32_0 = arith.constant 0 : i32
    %c0_i32_1 = arith.constant 0 : i32
    %c0_i32_2 = arith.constant 0 : i32
    return %c0_i32, %c0_i32_0, %c0_i32_1 : i32, i32, i32
  }
  func.func @transform_11(%arg0: i32) -> (i32, i32, i32, i32) {
    %c0_i32 = arith.constant 0 : i32
    %c0_i32_0 = arith.constant 0 : i32
    %c0_i32_1 = arith.constant 0 : i32
    %c0_i32_2 = arith.constant 0 : i32
    %c0_i32_3 = arith.constant 0 : i32
    return %c0_i32, %c0_i32_0, %c0_i32_1, %c0_i32_2 : i32, i32, i32, i32
  }
  func.func @transform_12(%arg0: i32) -> (i32, i32, i32) {
    %c0_i32 = arith.constant 0 : i32
    %c0_i32_0 = arith.constant 0 : i32
    %c0_i32_1 = arith.constant 0 : i32
    %c0_i32_2 = arith.constant 0 : i32
    return %c0_i32, %c0_i32_0, %c0_i32_1 : i32, i32, i32
  }
  func.func @transform_13(%arg0: i32) -> (i32, i32, i32, i32) {
    %c0_i32 = arith.constant 0 : i32
    %c0_i32_0 = arith.constant 0 : i32
    %c0_i32_1 = arith.constant 0 : i32
    %c0_i32_2 = arith.constant 0 : i32
    %c0_i32_3 = arith.constant 0 : i32
    return %c0_i32, %c0_i32_0, %c0_i32_1, %c0_i32_2 : i32, i32, i32, i32
  }
  func.func @transform_14(%arg0: i32) -> (i32, i32, i32) {
    %c0_i32 = arith.constant 0 : i32
    %c0_i32_0 = arith.constant 0 : i32
    %c0_i32_1 = arith.constant 0 : i32
    %c0_i32_2 = arith.constant 0 : i32
    return %c0_i32, %c0_i32_0, %c0_i32_1 : i32, i32, i32
  }
  func.func @transform_15(%arg0: i32) -> (i32, i32, i32) {
    %c0_i32 = arith.constant 0 : i32
    %c0_i32_0 = arith.constant 0 : i32
    %c0_i32_1 = arith.constant 0 : i32
    %c0_i32_2 = arith.constant 0 : i32
    return %c0_i32, %c0_i32_0, %c0_i32_1 : i32, i32, i32
  }
  func.func @transform_16(%arg0: i32) -> (i32, i32) {
    %c0_i32 = arith.constant 0 : i32
    %c0_i32_0 = arith.constant 0 : i32
    %c0_i32_1 = arith.constant 0 : i32
    return %c0_i32, %c0_i32_0 : i32, i32
  }
  func.func @transform_17(%arg0: i32) -> (i32, i32, i32) {
    %c0_i32 = arith.constant 0 : i32
    %c0_i32_0 = arith.constant 0 : i32
    %c0_i32_1 = arith.constant 0 : i32
    %c0_i32_2 = arith.constant 0 : i32
    return %c0_i32, %c0_i32_0, %c0_i32_1 : i32, i32, i32
  }
  func.func @transform_18(%arg0: i32) -> (i32, i32) {
    %c0_i32 = arith.constant 0 : i32
    %c0_i32_0 = arith.constant 0 : i32
    %c0_i32_1 = arith.constant 0 : i32
    return %c0_i32, %c0_i32_0 : i32, i32
  }
  func.func @transform_19(%arg0: i32) -> (i32, i32, i32) {
    %c0_i32 = arith.constant 0 : i32
    %c0_i32_0 = arith.constant 0 : i32
    %c0_i32_1 = arith.constant 0 : i32
    return %arg0, %c0_i32, %c0_i32_0 : i32, i32, i32
  }
  func.func @transform_20(%arg0: i32) -> (i32, i32, i32) {
    %c0_i32 = arith.constant 0 : i32
    %c0_i32_0 = arith.constant 0 : i32
    %c0_i32_1 = arith.constant 0 : i32
    return %arg0, %c0_i32, %c0_i32_0 : i32, i32, i32
  }
}

module attributes {stable_mosaic.version = 11 : i64} {
  func.func @kernel(%arg0: i32, %arg1: memref<1x2x16x12xf32, #tpu.memory_space<vmem>>, %arg2: memref<2x12x12xf32, #tpu.memory_space<vmem>>, %arg3: memref<2x12x12xf32, #tpu.memory_space<vmem>>, %arg4: memref<2x12x12xf32, #tpu.memory_space<vmem>>, %arg5: memref<2x12x12xf32, #tpu.memory_space<vmem>>, %arg6: memref<2x1x12xf32, #tpu.memory_space<vmem>>, %arg7: memref<2x1x12xf32, #tpu.memory_space<vmem>>, %arg8: memref<2x9x12x32xbf16, #tpu.memory_space<vmem>>, %arg9: memref<2x1x32xf32, #tpu.memory_space<vmem>>, %arg10: memref<2x32x32xbf16, #tpu.memory_space<vmem>>, %arg11: memref<2x1x32xf32, #tpu.memory_space<vmem>>, %arg12: memref<2x9x32x12xbf16, #tpu.memory_space<vmem>>, %arg13: memref<2x1x12xf32, #tpu.memory_space<vmem>>, %arg14: memref<2x9x32x12xbf16, #tpu.memory_space<vmem>>, %arg15: memref<2x1x12xf32, #tpu.memory_space<vmem>>, %arg16: memref<1x2x16x12xf32, #tpu.memory_space<vmem>>, %arg17: memref<1x1x1xf32, #tpu.memory_space<vmem>>, %arg18: memref<26x12xf32, #tpu.memory_space<vmem>>, %arg19: memref<26x32xf32, #tpu.memory_space<vmem>>) attributes {dimension_semantics = [#tpu.dimension_semantics<parallel>], iteration_bounds = array<i64: 2>, scalar_prefetch = 0 : i64, scratch_operands = 2 : i64, tpu.core_type = #tpu.core_type<tc>, window_params = [{transform_indices = @transform_0, window_bounds = array<i64: 1, 2, 16, 12>}, {pipeline_mode = #tpu.pipeline_mode<synchronous>, transform_indices = @transform_1, window_bounds = array<i64: 2, 12, 12>}, {pipeline_mode = #tpu.pipeline_mode<synchronous>, transform_indices = @transform_2, window_bounds = array<i64: 2, 12, 12>}, {pipeline_mode = #tpu.pipeline_mode<synchronous>, transform_indices = @transform_3, window_bounds = array<i64: 2, 12, 12>}, {pipeline_mode = #tpu.pipeline_mode<synchronous>, transform_indices = @transform_4, window_bounds = array<i64: 2, 12, 12>}, {pipeline_mode = #tpu.pipeline_mode<synchronous>, transform_indices = @transform_5, window_bounds = array<i64: 2, 1, 12>}, {pipeline_mode = #tpu.pipeline_mode<synchronous>, transform_indices = @transform_6, window_bounds = array<i64: 2, 1, 12>}, {pipeline_mode = #tpu.pipeline_mode<synchronous>, transform_indices = @transform_7, window_bounds = array<i64: 2, 9, 12, 32>}, {pipeline_mode = #tpu.pipeline_mode<synchronous>, transform_indices = @transform_8, window_bounds = array<i64: 2, 1, 32>}, {pipeline_mode = #tpu.pipeline_mode<synchronous>, transform_indices = @transform_9, window_bounds = array<i64: 2, 32, 32>}, {pipeline_mode = #tpu.pipeline_mode<synchronous>, transform_indices = @transform_10, window_bounds = array<i64: 2, 1, 32>}, {pipeline_mode = #tpu.pipeline_mode<synchronous>, transform_indices = @transform_11, window_bounds = array<i64: 2, 9, 32, 12>}, {pipeline_mode = #tpu.pipeline_mode<synchronous>, transform_indices = @transform_12, window_bounds = array<i64: 2, 1, 12>}, {pipeline_mode = #tpu.pipeline_mode<synchronous>, transform_indices = @transform_13, window_bounds = array<i64: 2, 9, 32, 12>}, {pipeline_mode = #tpu.pipeline_mode<synchronous>, transform_indices = @transform_14, window_bounds = array<i64: 2, 1, 12>}, {transform_indices = @transform_15, window_bounds = array<i64: 1, 2, 16, 12>}, {transform_indices = @transform_16, window_bounds = array<i64: 1, 1, 1>}]} {
    %cst = arith.constant 0.000000e+00 : f32
    %0 = vector.broadcast %cst : f32 to vector<26x12xf32>
    %c0 = arith.constant 0 : index
    %c0_0 = arith.constant 0 : index
    %1 = vector.load %arg18[%c0, %c0_0] : memref<26x12xf32, #tpu.memory_space<vmem>>, vector<26x12xf32>
    tpu.vector_store %arg18[%c0, %c0_0], %0 {strides = array<i32>} : memref<26x12xf32, #tpu.memory_space<vmem>>, vector<26x12xf32>,
    %cst_1 = arith.constant 0.000000e+00 : f32
    %2 = vector.broadcast %cst_1 : f32 to vector<26x32xf32>
    %c0_2 = arith.constant 0 : index
    %c0_3 = arith.constant 0 : index
    %3 = vector.load %arg19[%c0_2, %c0_3] : memref<26x32xf32, #tpu.memory_space<vmem>>, vector<26x32xf32>
    tpu.vector_store %arg19[%c0_2, %c0_3], %2 {strides = array<i32>} : memref<26x32xf32, #tpu.memory_space<vmem>>, vector<26x32xf32>,
    %4 = tpu.iota {dimensions = array<i32: 0>} : vector<16x1xi32>
    %c4_i32 = arith.constant 4 : i32
    %c0_i32 = arith.constant 0 : i32
    %5 = arith.cmpi eq, %c4_i32, %c0_i32 : i32
    %c1_i32 = arith.constant 1 : i32
    %6 = arith.select %5, %c1_i32, %c4_i32 : i32
    %7 = vector.broadcast %6 : i32 to vector<16x1xi32>
    %8 = arith.remsi %4, %7 : vector<16x1xi32>
    %c0_i32_4 = arith.constant 0 : i32
    %9 = vector.broadcast %c0_i32_4 : i32 to vector<16x1xi32>
    %10 = arith.cmpi ne, %8, %9 : vector<16x1xi32>
    %c0_i32_5 = arith.constant 0 : i32
    %11 = vector.broadcast %c0_i32_5 : i32 to vector<16x1xi32>
    %12 = arith.cmpi slt, %8, %11 : vector<16x1xi32>
    %c0_i32_6 = arith.constant 0 : i32
    %13 = arith.cmpi slt, %6, %c0_i32_6 : i32
    %14 = vector.broadcast %13 : i1 to vector<16x1xi1>
    %15 = vector.broadcast %14 : vector<16x1xi1> to vector<16x1xi1>
    %16 = arith.xori %12, %15 : vector<16x1xi1>
    %17 = arith.andi %16, %10 : vector<16x1xi1>
    %18 = vector.broadcast %6 : i32 to vector<16x1xi32>
    %19 = arith.addi %8, %18 : vector<16x1xi32>
    %20 = arith.select %17, %19, %8 : vector<16x1xi1>, vector<16x1xi32>
    %c1_i32_7 = arith.constant 1 : i32
    %21 = vector.broadcast %c1_i32_7 : i32 to vector<16x1xi32>
    %22 = arith.cmpi sge, %20, %21 : vector<16x1xi32>
    %23 = arith.extui %22 : vector<16x1xi1> to vector<16x1xi32>
    %24 = arith.sitofp %23 : vector<16x1xi32> to vector<16x1xf32>
    %c2_i32 = arith.constant 2 : i32
    %25 = vector.broadcast %c2_i32 : i32 to vector<16x1xi32>
    %26 = arith.cmpi sle, %20, %25 : vector<16x1xi32>
    %27 = arith.extui %26 : vector<16x1xi1> to vector<16x1xi32>
    %28 = arith.sitofp %27 : vector<16x1xi32> to vector<16x1xf32>
    %c0_8 = arith.constant 0 : index
    %c0_9 = arith.constant 0 : index
    %c0_10 = arith.constant 0 : index
    %c0_11 = arith.constant 0 : index
    %29 = vector.load %arg1[%c0_8, %c0_9, %c0_10, %c0_11] : memref<1x2x16x12xf32, #tpu.memory_space<vmem>>, vector<1x1x16x12xf32>
    %30 = vector.shape_cast %29 : vector<1x1x16x12xf32> to vector<16x12xf32>
    %c0_12 = arith.constant 0 : index
    %c1 = arith.constant 1 : index
    %c0_13 = arith.constant 0 : index
    %c0_14 = arith.constant 0 : index
    %31 = vector.load %arg1[%c0_12, %c1, %c0_13, %c0_14] : memref<1x2x16x12xf32, #tpu.memory_space<vmem>>, vector<1x1x16x12xf32>
    %32 = vector.shape_cast %31 : vector<1x1x16x12xf32> to vector<16x12xf32>
    %cst_15 = arith.constant 0.000000e+00 : f32
    %33 = vector.broadcast %cst_15 : f32 to vector<16x1xf32>
    %c0_16 = arith.constant 0 : index
    %c0_17 = arith.constant 0 : index
    %c0_18 = arith.constant 0 : index
    %34 = vector.load %arg2[%c0_16, %c0_17, %c0_18] : memref<2x12x12xf32, #tpu.memory_space<vmem>>, vector<1x12x12xf32>
    %35 = vector.shape_cast %34 : vector<1x12x12xf32> to vector<12x12xf32>
    %cst_19 = arith.constant dense<0.000000e+00> : vector<16x12xf32>
    %36 = tpu.matmul %30, %35, %cst_19 {dimension_numbers = #tpu.dot_dimension_numbers<[1], [0], [0], [1], [0, 0, 1, 1], [], []>} : vector<16x12xf32>, vector<12x12xf32>, vector<16x12xf32> -> vector<16x12xf32>
    %c0_20 = arith.constant 0 : index
    %c0_21 = arith.constant 0 : index
    %c0_22 = arith.constant 0 : index
    %37 = vector.load %arg4[%c0_20, %c0_21, %c0_22] : memref<2x12x12xf32, #tpu.memory_space<vmem>>, vector<1x12x12xf32>
    %38 = vector.shape_cast %37 : vector<1x12x12xf32> to vector<12x12xf32>
    %cst_23 = arith.constant dense<0.000000e+00> : vector<16x12xf32>
    %39 = tpu.matmul %32, %38, %cst_23 {dimension_numbers = #tpu.dot_dimension_numbers<[1], [0], [0], [1], [0, 0, 1, 1], [], []>} : vector<16x12xf32>, vector<12x12xf32>, vector<16x12xf32> -> vector<16x12xf32>
    %40 = arith.addf %36, %39 : vector<16x12xf32>
    %c0_24 = arith.constant 0 : index
    %c0_25 = arith.constant 0 : index
    %c0_26 = arith.constant 0 : index
    %41 = vector.load %arg6[%c0_24, %c0_25, %c0_26] : memref<2x1x12xf32, #tpu.memory_space<vmem>>, vector<1x1x12xf32>
    %42 = vector.shape_cast %41 : vector<1x1x12xf32> to vector<1x12xf32>
    %43 = vector.broadcast %42 : vector<1x12xf32> to vector<16x12xf32>
    %44 = arith.addf %40, %43 : vector<16x12xf32>
    %c0_27 = arith.constant 0 : index
    %c0_28 = arith.constant 0 : index
    %c0_29 = arith.constant 0 : index
    %45 = vector.load %arg3[%c0_27, %c0_28, %c0_29] : memref<2x12x12xf32, #tpu.memory_space<vmem>>, vector<1x12x12xf32>
    %46 = vector.shape_cast %45 : vector<1x12x12xf32> to vector<12x12xf32>
    %cst_30 = arith.constant dense<0.000000e+00> : vector<16x12xf32>
    %47 = tpu.matmul %30, %46, %cst_30 {dimension_numbers = #tpu.dot_dimension_numbers<[1], [0], [0], [1], [0, 0, 1, 1], [], []>} : vector<16x12xf32>, vector<12x12xf32>, vector<16x12xf32> -> vector<16x12xf32>
    %c0_31 = arith.constant 0 : index
    %c0_32 = arith.constant 0 : index
    %c0_33 = arith.constant 0 : index
    %48 = vector.load %arg5[%c0_31, %c0_32, %c0_33] : memref<2x12x12xf32, #tpu.memory_space<vmem>>, vector<1x12x12xf32>
    %49 = vector.shape_cast %48 : vector<1x12x12xf32> to vector<12x12xf32>
    %cst_34 = arith.constant dense<0.000000e+00> : vector<16x12xf32>
    %50 = tpu.matmul %32, %49, %cst_34 {dimension_numbers = #tpu.dot_dimension_numbers<[1], [0], [0], [1], [0, 0, 1, 1], [], []>} : vector<16x12xf32>, vector<12x12xf32>, vector<16x12xf32> -> vector<16x12xf32>
    %51 = arith.addf %47, %50 : vector<16x12xf32>
    %c0_35 = arith.constant 0 : index
    %c0_36 = arith.constant 0 : index
    %c0_37 = arith.constant 0 : index
    %52 = vector.load %arg7[%c0_35, %c0_36, %c0_37] : memref<2x1x12xf32, #tpu.memory_space<vmem>>, vector<1x1x12xf32>
    %53 = vector.shape_cast %52 : vector<1x1x12xf32> to vector<1x12xf32>
    %54 = vector.broadcast %53 : vector<1x12xf32> to vector<16x12xf32>
    %55 = arith.addf %51, %54 : vector<16x12xf32>
    %c5 = arith.constant 5 : index
    %c0_38 = arith.constant 0 : index
    %56 = vector.load %arg18[%c5, %c0_38] : memref<26x12xf32, #tpu.memory_space<vmem>>, vector<16x12xf32>
    tpu.vector_store %arg18[%c5, %c0_38], %44 {strides = array<i32>} : memref<26x12xf32, #tpu.memory_space<vmem>>, vector<16x12xf32>,
    %c0_39 = arith.constant 0 : index
    %c0_40 = arith.constant 0 : index
    %57 = vector.load %arg18[%c0_39, %c0_40] : memref<26x12xf32, #tpu.memory_space<vmem>>, vector<16x12xf32>
    %58 = vector.broadcast %24 : vector<16x1xf32> to vector<16x12xf32>
    %59 = arith.mulf %57, %58 : vector<16x12xf32>
    %60 = arith.truncf %59 : vector<16x12xf32> to vector<16x12xbf16>
    %c0_41 = arith.constant 0 : index
    %c0_42 = arith.constant 0 : index
    %c0_43 = arith.constant 0 : index
    %c0_44 = arith.constant 0 : index
    %61 = vector.load %arg8[%c0_41, %c0_42, %c0_43, %c0_44] : memref<2x9x12x32xbf16, #tpu.memory_space<vmem>>, vector<1x1x12x32xbf16>
    %62 = vector.shape_cast %61 : vector<1x1x12x32xbf16> to vector<12x32xbf16>
    %cst_45 = arith.constant dense<0.000000e+00> : vector<16x32xf32>
    %63 = tpu.matmul %60, %62, %cst_45 {dimension_numbers = #tpu.dot_dimension_numbers<[1], [0], [0], [1], [0, 0, 1, 1], [], []>} : vector<16x12xbf16>, vector<12x32xbf16>, vector<16x32xf32> -> vector<16x32xf32>
    %c1_46 = arith.constant 1 : index
    %c0_47 = arith.constant 0 : index
    %64 = vector.load %arg18[%c1_46, %c0_47] : memref<26x12xf32, #tpu.memory_space<vmem>>, vector<16x12xf32>
    %65 = arith.truncf %64 : vector<16x12xf32> to vector<16x12xbf16>
    %c0_48 = arith.constant 0 : index
    %c1_49 = arith.constant 1 : index
    %c0_50 = arith.constant 0 : index
    %c0_51 = arith.constant 0 : index
    %66 = vector.load %arg8[%c0_48, %c1_49, %c0_50, %c0_51] : memref<2x9x12x32xbf16, #tpu.memory_space<vmem>>, vector<1x1x12x32xbf16>
    %67 = vector.shape_cast %66 : vector<1x1x12x32xbf16> to vector<12x32xbf16>
    %cst_52 = arith.constant dense<0.000000e+00> : vector<16x32xf32>
    %68 = tpu.matmul %65, %67, %cst_52 {dimension_numbers = #tpu.dot_dimension_numbers<[1], [0], [0], [1], [0, 0, 1, 1], [], []>} : vector<16x12xbf16>, vector<12x32xbf16>, vector<16x32xf32> -> vector<16x32xf32>
    %69 = arith.addf %63, %68 : vector<16x32xf32>
    %c2 = arith.constant 2 : index
    %c0_53 = arith.constant 0 : index
    %70 = vector.load %arg18[%c2, %c0_53] : memref<26x12xf32, #tpu.memory_space<vmem>>, vector<16x12xf32>
    %71 = vector.broadcast %28 : vector<16x1xf32> to vector<16x12xf32>
    %72 = arith.mulf %70, %71 : vector<16x12xf32>
    %73 = arith.truncf %72 : vector<16x12xf32> to vector<16x12xbf16>
    %c0_54 = arith.constant 0 : index
    %c2_55 = arith.constant 2 : index
    %c0_56 = arith.constant 0 : index
    %c0_57 = arith.constant 0 : index
    %74 = vector.load %arg8[%c0_54, %c2_55, %c0_56, %c0_57] : memref<2x9x12x32xbf16, #tpu.memory_space<vmem>>, vector<1x1x12x32xbf16>
    %75 = vector.shape_cast %74 : vector<1x1x12x32xbf16> to vector<12x32xbf16>
    %cst_58 = arith.constant dense<0.000000e+00> : vector<16x32xf32>
    %76 = tpu.matmul %73, %75, %cst_58 {dimension_numbers = #tpu.dot_dimension_numbers<[1], [0], [0], [1], [0, 0, 1, 1], [], []>} : vector<16x12xbf16>, vector<12x32xbf16>, vector<16x32xf32> -> vector<16x32xf32>
    %77 = arith.addf %69, %76 : vector<16x32xf32>
    %c4 = arith.constant 4 : index
    %c0_59 = arith.constant 0 : index
    %78 = vector.load %arg18[%c4, %c0_59] : memref<26x12xf32, #tpu.memory_space<vmem>>, vector<16x12xf32>
    %79 = vector.broadcast %24 : vector<16x1xf32> to vector<16x12xf32>
    %80 = arith.mulf %78, %79 : vector<16x12xf32>
    %81 = arith.truncf %80 : vector<16x12xf32> to vector<16x12xbf16>
    %c0_60 = arith.constant 0 : index
    %c3 = arith.constant 3 : index
    %c0_61 = arith.constant 0 : index
    %c0_62 = arith.constant 0 : index
    %82 = vector.load %arg8[%c0_60, %c3, %c0_61, %c0_62] : memref<2x9x12x32xbf16, #tpu.memory_space<vmem>>, vector<1x1x12x32xbf16>
    %83 = vector.shape_cast %82 : vector<1x1x12x32xbf16> to vector<12x32xbf16>
    %cst_63 = arith.constant dense<0.000000e+00> : vector<16x32xf32>
    %84 = tpu.matmul %81, %83, %cst_63 {dimension_numbers = #tpu.dot_dimension_numbers<[1], [0], [0], [1], [0, 0, 1, 1], [], []>} : vector<16x12xbf16>, vector<12x32xbf16>, vector<16x32xf32> -> vector<16x32xf32>
    %85 = arith.addf %77, %84 : vector<16x32xf32>
    %c5_64 = arith.constant 5 : index
    %c0_65 = arith.constant 0 : index
    %86 = vector.load %arg18[%c5_64, %c0_65] : memref<26x12xf32, #tpu.memory_space<vmem>>, vector<16x12xf32>
    %87 = arith.truncf %86 : vector<16x12xf32> to vector<16x12xbf16>
    %c0_66 = arith.constant 0 : index
    %c4_67 = arith.constant 4 : index
    %c0_68 = arith.constant 0 : index
    %c0_69 = arith.constant 0 : index
    %88 = vector.load %arg8[%c0_66, %c4_67, %c0_68, %c0_69] : memref<2x9x12x32xbf16, #tpu.memory_space<vmem>>, vector<1x1x12x32xbf16>
    %89 = vector.shape_cast %88 : vector<1x1x12x32xbf16> to vector<12x32xbf16>
    %cst_70 = arith.constant dense<0.000000e+00> : vector<16x32xf32>
    %90 = tpu.matmul %87, %89, %cst_70 {dimension_numbers = #tpu.dot_dimension_numbers<[1], [0], [0], [1], [0, 0, 1, 1], [], []>} : vector<16x12xbf16>, vector<12x32xbf16>, vector<16x32xf32> -> vector<16x32xf32>
    %91 = arith.addf %85, %90 : vector<16x32xf32>
    %c6 = arith.constant 6 : index
    %c0_71 = arith.constant 0 : index
    %92 = vector.load %arg18[%c6, %c0_71] : memref<26x12xf32, #tpu.memory_space<vmem>>, vector<16x12xf32>
    %93 = vector.broadcast %28 : vector<16x1xf32> to vector<16x12xf32>
    %94 = arith.mulf %92, %93 : vector<16x12xf32>
    %95 = arith.truncf %94 : vector<16x12xf32> to vector<16x12xbf16>
    %c0_72 = arith.constant 0 : index
    %c5_73 = arith.constant 5 : index
    %c0_74 = arith.constant 0 : index
    %c0_75 = arith.constant 0 : index
    %96 = vector.load %arg8[%c0_72, %c5_73, %c0_74, %c0_75] : memref<2x9x12x32xbf16, #tpu.memory_space<vmem>>, vector<1x1x12x32xbf16>
    %97 = vector.shape_cast %96 : vector<1x1x12x32xbf16> to vector<12x32xbf16>
    %cst_76 = arith.constant dense<0.000000e+00> : vector<16x32xf32>
    %98 = tpu.matmul %95, %97, %cst_76 {dimension_numbers = #tpu.dot_dimension_numbers<[1], [0], [0], [1], [0, 0, 1, 1], [], []>} : vector<16x12xbf16>, vector<12x32xbf16>, vector<16x32xf32> -> vector<16x32xf32>
    %99 = arith.addf %91, %98 : vector<16x32xf32>
    %c8 = arith.constant 8 : index
    %c0_77 = arith.constant 0 : index
    %100 = vector.load %arg18[%c8, %c0_77] : memref<26x12xf32, #tpu.memory_space<vmem>>, vector<16x12xf32>
    %101 = vector.broadcast %24 : vector<16x1xf32> to vector<16x12xf32>
    %102 = arith.mulf %100, %101 : vector<16x12xf32>
    %103 = arith.truncf %102 : vector<16x12xf32> to vector<16x12xbf16>
    %c0_78 = arith.constant 0 : index
    %c6_79 = arith.constant 6 : index
    %c0_80 = arith.constant 0 : index
    %c0_81 = arith.constant 0 : index
    %104 = vector.load %arg8[%c0_78, %c6_79, %c0_80, %c0_81] : memref<2x9x12x32xbf16, #tpu.memory_space<vmem>>, vector<1x1x12x32xbf16>
    %105 = vector.shape_cast %104 : vector<1x1x12x32xbf16> to vector<12x32xbf16>
    %cst_82 = arith.constant dense<0.000000e+00> : vector<16x32xf32>
    %106 = tpu.matmul %103, %105, %cst_82 {dimension_numbers = #tpu.dot_dimension_numbers<[1], [0], [0], [1], [0, 0, 1, 1], [], []>} : vector<16x12xbf16>, vector<12x32xbf16>, vector<16x32xf32> -> vector<16x32xf32>
    %107 = arith.addf %99, %106 : vector<16x32xf32>
    %c9 = arith.constant 9 : index
    %c0_83 = arith.constant 0 : index
    %108 = vector.load %arg18[%c9, %c0_83] : memref<26x12xf32, #tpu.memory_space<vmem>>, vector<16x12xf32>
    %109 = arith.truncf %108 : vector<16x12xf32> to vector<16x12xbf16>
    %c0_84 = arith.constant 0 : index
    %c7 = arith.constant 7 : index
    %c0_85 = arith.constant 0 : index
    %c0_86 = arith.constant 0 : index
    %110 = vector.load %arg8[%c0_84, %c7, %c0_85, %c0_86] : memref<2x9x12x32xbf16, #tpu.memory_space<vmem>>, vector<1x1x12x32xbf16>
    %111 = vector.shape_cast %110 : vector<1x1x12x32xbf16> to vector<12x32xbf16>
    %cst_87 = arith.constant dense<0.000000e+00> : vector<16x32xf32>
    %112 = tpu.matmul %109, %111, %cst_87 {dimension_numbers = #tpu.dot_dimension_numbers<[1], [0], [0], [1], [0, 0, 1, 1], [], []>} : vector<16x12xbf16>, vector<12x32xbf16>, vector<16x32xf32> -> vector<16x32xf32>
    %113 = arith.addf %107, %112 : vector<16x32xf32>
    %c10 = arith.constant 10 : index
    %c0_88 = arith.constant 0 : index
    %114 = vector.load %arg18[%c10, %c0_88] : memref<26x12xf32, #tpu.memory_space<vmem>>, vector<16x12xf32>
    %115 = vector.broadcast %28 : vector<16x1xf32> to vector<16x12xf32>
    %116 = arith.mulf %114, %115 : vector<16x12xf32>
    %117 = arith.truncf %116 : vector<16x12xf32> to vector<16x12xbf16>
    %c0_89 = arith.constant 0 : index
    %c8_90 = arith.constant 8 : index
    %c0_91 = arith.constant 0 : index
    %c0_92 = arith.constant 0 : index
    %118 = vector.load %arg8[%c0_89, %c8_90, %c0_91, %c0_92] : memref<2x9x12x32xbf16, #tpu.memory_space<vmem>>, vector<1x1x12x32xbf16>
    %119 = vector.shape_cast %118 : vector<1x1x12x32xbf16> to vector<12x32xbf16>
    %cst_93 = arith.constant dense<0.000000e+00> : vector<16x32xf32>
    %120 = tpu.matmul %117, %119, %cst_93 {dimension_numbers = #tpu.dot_dimension_numbers<[1], [0], [0], [1], [0, 0, 1, 1], [], []>} : vector<16x12xbf16>, vector<12x32xbf16>, vector<16x32xf32> -> vector<16x32xf32>
    %121 = arith.addf %113, %120 : vector<16x32xf32>
    %c0_94 = arith.constant 0 : index
    %c0_95 = arith.constant 0 : index
    %c0_96 = arith.constant 0 : index
    %122 = vector.load %arg9[%c0_94, %c0_95, %c0_96] : memref<2x1x32xf32, #tpu.memory_space<vmem>>, vector<1x1x32xf32>
    %123 = vector.shape_cast %122 : vector<1x1x32xf32> to vector<1x32xf32>
    %124 = vector.broadcast %123 : vector<1x32xf32> to vector<16x32xf32>
    %125 = arith.addf %121, %124 : vector<16x32xf32>
    %cst_97 = arith.constant 0.000000e+00 : f32
    %126 = vector.broadcast %cst_97 : f32 to vector<16x32xf32>
    %127 = arith.maximumf %125, %126 : vector<16x32xf32>
    %128 = arith.truncf %127 : vector<16x32xf32> to vector<16x32xbf16>
    %c0_98 = arith.constant 0 : index
    %c0_99 = arith.constant 0 : index
    %c0_100 = arith.constant 0 : index
    %129 = vector.load %arg10[%c0_98, %c0_99, %c0_100] : memref<2x32x32xbf16, #tpu.memory_space<vmem>>, vector<1x32x32xbf16>
    %130 = vector.shape_cast %129 : vector<1x32x32xbf16> to vector<32x32xbf16>
    %cst_101 = arith.constant dense<0.000000e+00> : vector<16x32xf32>
    %131 = tpu.matmul %128, %130, %cst_101 {dimension_numbers = #tpu.dot_dimension_numbers<[1], [0], [0], [1], [0, 0, 1, 1], [], []>} : vector<16x32xbf16>, vector<32x32xbf16>, vector<16x32xf32> -> vector<16x32xf32>
    %c0_102 = arith.constant 0 : index
    %c0_103 = arith.constant 0 : index
    %c0_104 = arith.constant 0 : index
    %132 = vector.load %arg11[%c0_102, %c0_103, %c0_104] : memref<2x1x32xf32, #tpu.memory_space<vmem>>, vector<1x1x32xf32>
    %133 = vector.shape_cast %132 : vector<1x1x32xf32> to vector<1x32xf32>
    %134 = vector.broadcast %133 : vector<1x32xf32> to vector<16x32xf32>
    %135 = arith.addf %131, %134 : vector<16x32xf32>
    %cst_105 = arith.constant 0.000000e+00 : f32
    %136 = vector.broadcast %cst_105 : f32 to vector<16x32xf32>
    %137 = arith.maximumf %135, %136 : vector<16x32xf32>
    %c5_106 = arith.constant 5 : index
    %c0_107 = arith.constant 0 : index
    %138 = vector.load %arg19[%c5_106, %c0_107] : memref<26x32xf32, #tpu.memory_space<vmem>>, vector<16x32xf32>
    tpu.vector_store %arg19[%c5_106, %c0_107], %137 {strides = array<i32>} : memref<26x32xf32, #tpu.memory_space<vmem>>, vector<16x32xf32>,
    %c0_108 = arith.constant 0 : index
    %c0_109 = arith.constant 0 : index
    %139 = vector.load %arg19[%c0_108, %c0_109] : memref<26x32xf32, #tpu.memory_space<vmem>>, vector<16x32xf32>
    %140 = vector.broadcast %24 : vector<16x1xf32> to vector<16x32xf32>
    %141 = arith.mulf %139, %140 : vector<16x32xf32>
    %142 = arith.truncf %141 : vector<16x32xf32> to vector<16x32xbf16>
    %c0_110 = arith.constant 0 : index
    %c0_111 = arith.constant 0 : index
    %c0_112 = arith.constant 0 : index
    %c0_113 = arith.constant 0 : index
    %143 = vector.load %arg12[%c0_110, %c0_111, %c0_112, %c0_113] : memref<2x9x32x12xbf16, #tpu.memory_space<vmem>>, vector<1x1x32x12xbf16>
    %144 = vector.shape_cast %143 : vector<1x1x32x12xbf16> to vector<32x12xbf16>
    %c0_114 = arith.constant 0 : index
    %c0_115 = arith.constant 0 : index
    %c0_116 = arith.constant 0 : index
    %c0_117 = arith.constant 0 : index
    %145 = vector.load %arg14[%c0_114, %c0_115, %c0_116, %c0_117] : memref<2x9x32x12xbf16, #tpu.memory_space<vmem>>, vector<1x1x32x12xbf16>
    %146 = vector.shape_cast %145 : vector<1x1x32x12xbf16> to vector<32x12xbf16>
    %cst_118 = arith.constant dense<0.000000e+00> : vector<16x12xf32>
    %147 = tpu.matmul %142, %144, %cst_118 {dimension_numbers = #tpu.dot_dimension_numbers<[1], [0], [0], [1], [0, 0, 1, 1], [], []>} : vector<16x32xbf16>, vector<32x12xbf16>, vector<16x12xf32> -> vector<16x12xf32>
    %cst_119 = arith.constant dense<0.000000e+00> : vector<16x12xf32>
    %148 = tpu.matmul %142, %146, %cst_119 {dimension_numbers = #tpu.dot_dimension_numbers<[1], [0], [0], [1], [0, 0, 1, 1], [], []>} : vector<16x32xbf16>, vector<32x12xbf16>, vector<16x12xf32> -> vector<16x12xf32>
    %c1_120 = arith.constant 1 : index
    %c0_121 = arith.constant 0 : index
    %149 = vector.load %arg19[%c1_120, %c0_121] : memref<26x32xf32, #tpu.memory_space<vmem>>, vector<16x32xf32>
    %150 = arith.truncf %149 : vector<16x32xf32> to vector<16x32xbf16>
    %c0_122 = arith.constant 0 : index
    %c1_123 = arith.constant 1 : index
    %c0_124 = arith.constant 0 : index
    %c0_125 = arith.constant 0 : index
    %151 = vector.load %arg12[%c0_122, %c1_123, %c0_124, %c0_125] : memref<2x9x32x12xbf16, #tpu.memory_space<vmem>>, vector<1x1x32x12xbf16>
    %152 = vector.shape_cast %151 : vector<1x1x32x12xbf16> to vector<32x12xbf16>
    %c0_126 = arith.constant 0 : index
    %c1_127 = arith.constant 1 : index
    %c0_128 = arith.constant 0 : index
    %c0_129 = arith.constant 0 : index
    %153 = vector.load %arg14[%c0_126, %c1_127, %c0_128, %c0_129] : memref<2x9x32x12xbf16, #tpu.memory_space<vmem>>, vector<1x1x32x12xbf16>
    %154 = vector.shape_cast %153 : vector<1x1x32x12xbf16> to vector<32x12xbf16>
    %cst_130 = arith.constant dense<0.000000e+00> : vector<16x12xf32>
    %155 = tpu.matmul %150, %152, %cst_130 {dimension_numbers = #tpu.dot_dimension_numbers<[1], [0], [0], [1], [0, 0, 1, 1], [], []>} : vector<16x32xbf16>, vector<32x12xbf16>, vector<16x12xf32> -> vector<16x12xf32>
    %cst_131 = arith.constant dense<0.000000e+00> : vector<16x12xf32>
    %156 = tpu.matmul %150, %154, %cst_131 {dimension_numbers = #tpu.dot_dimension_numbers<[1], [0], [0], [1], [0, 0, 1, 1], [], []>} : vector<16x32xbf16>, vector<32x12xbf16>, vector<16x12xf32> -> vector<16x12xf32>
    %157 = arith.addf %147, %155 : vector<16x12xf32>
    %158 = arith.addf %148, %156 : vector<16x12xf32>
    %c2_132 = arith.constant 2 : index
    %c0_133 = arith.constant 0 : index
    %159 = vector.load %arg19[%c2_132, %c0_133] : memref<26x32xf32, #tpu.memory_space<vmem>>, vector<16x32xf32>
    %160 = vector.broadcast %28 : vector<16x1xf32> to vector<16x32xf32>
    %161 = arith.mulf %159, %160 : vector<16x32xf32>
    %162 = arith.truncf %161 : vector<16x32xf32> to vector<16x32xbf16>
    %c0_134 = arith.constant 0 : index
    %c2_135 = arith.constant 2 : index
    %c0_136 = arith.constant 0 : index
    %c0_137 = arith.constant 0 : index
    %163 = vector.load %arg12[%c0_134, %c2_135, %c0_136, %c0_137] : memref<2x9x32x12xbf16, #tpu.memory_space<vmem>>, vector<1x1x32x12xbf16>
    %164 = vector.shape_cast %163 : vector<1x1x32x12xbf16> to vector<32x12xbf16>
    %c0_138 = arith.constant 0 : index
    %c2_139 = arith.constant 2 : index
    %c0_140 = arith.constant 0 : index
    %c0_141 = arith.constant 0 : index
    %165 = vector.load %arg14[%c0_138, %c2_139, %c0_140, %c0_141] : memref<2x9x32x12xbf16, #tpu.memory_space<vmem>>, vector<1x1x32x12xbf16>
    %166 = vector.shape_cast %165 : vector<1x1x32x12xbf16> to vector<32x12xbf16>
    %cst_142 = arith.constant dense<0.000000e+00> : vector<16x12xf32>
    %167 = tpu.matmul %162, %164, %cst_142 {dimension_numbers = #tpu.dot_dimension_numbers<[1], [0], [0], [1], [0, 0, 1, 1], [], []>} : vector<16x32xbf16>, vector<32x12xbf16>, vector<16x12xf32> -> vector<16x12xf32>
    %cst_143 = arith.constant dense<0.000000e+00> : vector<16x12xf32>
    %168 = tpu.matmul %162, %166, %cst_143 {dimension_numbers = #tpu.dot_dimension_numbers<[1], [0], [0], [1], [0, 0, 1, 1], [], []>} : vector<16x32xbf16>, vector<32x12xbf16>, vector<16x12xf32> -> vector<16x12xf32>
    %169 = arith.addf %157, %167 : vector<16x12xf32>
    %170 = arith.addf %158, %168 : vector<16x12xf32>
    %c4_144 = arith.constant 4 : index
    %c0_145 = arith.constant 0 : index
    %171 = vector.load %arg19[%c4_144, %c0_145] : memref<26x32xf32, #tpu.memory_space<vmem>>, vector<16x32xf32>
    %172 = vector.broadcast %24 : vector<16x1xf32> to vector<16x32xf32>
    %173 = arith.mulf %171, %172 : vector<16x32xf32>
    %174 = arith.truncf %173 : vector<16x32xf32> to vector<16x32xbf16>
    %c0_146 = arith.constant 0 : index
    %c3_147 = arith.constant 3 : index
    %c0_148 = arith.constant 0 : index
    %c0_149 = arith.constant 0 : index
    %175 = vector.load %arg12[%c0_146, %c3_147, %c0_148, %c0_149] : memref<2x9x32x12xbf16, #tpu.memory_space<vmem>>, vector<1x1x32x12xbf16>
    %176 = vector.shape_cast %175 : vector<1x1x32x12xbf16> to vector<32x12xbf16>
    %c0_150 = arith.constant 0 : index
    %c3_151 = arith.constant 3 : index
    %c0_152 = arith.constant 0 : index
    %c0_153 = arith.constant 0 : index
    %177 = vector.load %arg14[%c0_150, %c3_151, %c0_152, %c0_153] : memref<2x9x32x12xbf16, #tpu.memory_space<vmem>>, vector<1x1x32x12xbf16>
    %178 = vector.shape_cast %177 : vector<1x1x32x12xbf16> to vector<32x12xbf16>
    %cst_154 = arith.constant dense<0.000000e+00> : vector<16x12xf32>
    %179 = tpu.matmul %174, %176, %cst_154 {dimension_numbers = #tpu.dot_dimension_numbers<[1], [0], [0], [1], [0, 0, 1, 1], [], []>} : vector<16x32xbf16>, vector<32x12xbf16>, vector<16x12xf32> -> vector<16x12xf32>
    %cst_155 = arith.constant dense<0.000000e+00> : vector<16x12xf32>
    %180 = tpu.matmul %174, %178, %cst_155 {dimension_numbers = #tpu.dot_dimension_numbers<[1], [0], [0], [1], [0, 0, 1, 1], [], []>} : vector<16x32xbf16>, vector<32x12xbf16>, vector<16x12xf32> -> vector<16x12xf32>
    %181 = arith.addf %169, %179 : vector<16x12xf32>
    %182 = arith.addf %170, %180 : vector<16x12xf32>
    %c5_156 = arith.constant 5 : index
    %c0_157 = arith.constant 0 : index
    %183 = vector.load %arg19[%c5_156, %c0_157] : memref<26x32xf32, #tpu.memory_space<vmem>>, vector<16x32xf32>
    %184 = arith.truncf %183 : vector<16x32xf32> to vector<16x32xbf16>
    %c0_158 = arith.constant 0 : index
    %c4_159 = arith.constant 4 : index
    %c0_160 = arith.constant 0 : index
    %c0_161 = arith.constant 0 : index
    %185 = vector.load %arg12[%c0_158, %c4_159, %c0_160, %c0_161] : memref<2x9x32x12xbf16, #tpu.memory_space<vmem>>, vector<1x1x32x12xbf16>
    %186 = vector.shape_cast %185 : vector<1x1x32x12xbf16> to vector<32x12xbf16>
    %c0_162 = arith.constant 0 : index
    %c4_163 = arith.constant 4 : index
    %c0_164 = arith.constant 0 : index
    %c0_165 = arith.constant 0 : index
    %187 = vector.load %arg14[%c0_162, %c4_163, %c0_164, %c0_165] : memref<2x9x32x12xbf16, #tpu.memory_space<vmem>>, vector<1x1x32x12xbf16>
    %188 = vector.shape_cast %187 : vector<1x1x32x12xbf16> to vector<32x12xbf16>
    %cst_166 = arith.constant dense<0.000000e+00> : vector<16x12xf32>
    %189 = tpu.matmul %184, %186, %cst_166 {dimension_numbers = #tpu.dot_dimension_numbers<[1], [0], [0], [1], [0, 0, 1, 1], [], []>} : vector<16x32xbf16>, vector<32x12xbf16>, vector<16x12xf32> -> vector<16x12xf32>
    %cst_167 = arith.constant dense<0.000000e+00> : vector<16x12xf32>
    %190 = tpu.matmul %184, %188, %cst_167 {dimension_numbers = #tpu.dot_dimension_numbers<[1], [0], [0], [1], [0, 0, 1, 1], [], []>} : vector<16x32xbf16>, vector<32x12xbf16>, vector<16x12xf32> -> vector<16x12xf32>
    %191 = arith.addf %181, %189 : vector<16x12xf32>
    %192 = arith.addf %182, %190 : vector<16x12xf32>
    %c6_168 = arith.constant 6 : index
    %c0_169 = arith.constant 0 : index
    %193 = vector.load %arg19[%c6_168, %c0_169] : memref<26x32xf32, #tpu.memory_space<vmem>>, vector<16x32xf32>
    %194 = vector.broadcast %28 : vector<16x1xf32> to vector<16x32xf32>
    %195 = arith.mulf %193, %194 : vector<16x32xf32>
    %196 = arith.truncf %195 : vector<16x32xf32> to vector<16x32xbf16>
    %c0_170 = arith.constant 0 : index
    %c5_171 = arith.constant 5 : index
    %c0_172 = arith.constant 0 : index
    %c0_173 = arith.constant 0 : index
    %197 = vector.load %arg12[%c0_170, %c5_171, %c0_172, %c0_173] : memref<2x9x32x12xbf16, #tpu.memory_space<vmem>>, vector<1x1x32x12xbf16>
    %198 = vector.shape_cast %197 : vector<1x1x32x12xbf16> to vector<32x12xbf16>
    %c0_174 = arith.constant 0 : index
    %c5_175 = arith.constant 5 : index
    %c0_176 = arith.constant 0 : index
    %c0_177 = arith.constant 0 : index
    %199 = vector.load %arg14[%c0_174, %c5_175, %c0_176, %c0_177] : memref<2x9x32x12xbf16, #tpu.memory_space<vmem>>, vector<1x1x32x12xbf16>
    %200 = vector.shape_cast %199 : vector<1x1x32x12xbf16> to vector<32x12xbf16>
    %cst_178 = arith.constant dense<0.000000e+00> : vector<16x12xf32>
    %201 = tpu.matmul %196, %198, %cst_178 {dimension_numbers = #tpu.dot_dimension_numbers<[1], [0], [0], [1], [0, 0, 1, 1], [], []>} : vector<16x32xbf16>, vector<32x12xbf16>, vector<16x12xf32> -> vector<16x12xf32>
    %cst_179 = arith.constant dense<0.000000e+00> : vector<16x12xf32>
    %202 = tpu.matmul %196, %200, %cst_179 {dimension_numbers = #tpu.dot_dimension_numbers<[1], [0], [0], [1], [0, 0, 1, 1], [], []>} : vector<16x32xbf16>, vector<32x12xbf16>, vector<16x12xf32> -> vector<16x12xf32>
    %203 = arith.addf %191, %201 : vector<16x12xf32>
    %204 = arith.addf %192, %202 : vector<16x12xf32>
    %c8_180 = arith.constant 8 : index
    %c0_181 = arith.constant 0 : index
    %205 = vector.load %arg19[%c8_180, %c0_181] : memref<26x32xf32, #tpu.memory_space<vmem>>, vector<16x32xf32>
    %206 = vector.broadcast %24 : vector<16x1xf32> to vector<16x32xf32>
    %207 = arith.mulf %205, %206 : vector<16x32xf32>
    %208 = arith.truncf %207 : vector<16x32xf32> to vector<16x32xbf16>
    %c0_182 = arith.constant 0 : index
    %c6_183 = arith.constant 6 : index
    %c0_184 = arith.constant 0 : index
    %c0_185 = arith.constant 0 : index
    %209 = vector.load %arg12[%c0_182, %c6_183, %c0_184, %c0_185] : memref<2x9x32x12xbf16, #tpu.memory_space<vmem>>, vector<1x1x32x12xbf16>
    %210 = vector.shape_cast %209 : vector<1x1x32x12xbf16> to vector<32x12xbf16>
    %c0_186 = arith.constant 0 : index
    %c6_187 = arith.constant 6 : index
    %c0_188 = arith.constant 0 : index
    %c0_189 = arith.constant 0 : index
    %211 = vector.load %arg14[%c0_186, %c6_187, %c0_188, %c0_189] : memref<2x9x32x12xbf16, #tpu.memory_space<vmem>>, vector<1x1x32x12xbf16>
    %212 = vector.shape_cast %211 : vector<1x1x32x12xbf16> to vector<32x12xbf16>
    %cst_190 = arith.constant dense<0.000000e+00> : vector<16x12xf32>
    %213 = tpu.matmul %208, %210, %cst_190 {dimension_numbers = #tpu.dot_dimension_numbers<[1], [0], [0], [1], [0, 0, 1, 1], [], []>} : vector<16x32xbf16>, vector<32x12xbf16>, vector<16x12xf32> -> vector<16x12xf32>
    %cst_191 = arith.constant dense<0.000000e+00> : vector<16x12xf32>
    %214 = tpu.matmul %208, %212, %cst_191 {dimension_numbers = #tpu.dot_dimension_numbers<[1], [0], [0], [1], [0, 0, 1, 1], [], []>} : vector<16x32xbf16>, vector<32x12xbf16>, vector<16x12xf32> -> vector<16x12xf32>
    %215 = arith.addf %203, %213 : vector<16x12xf32>
    %216 = arith.addf %204, %214 : vector<16x12xf32>
    %c9_192 = arith.constant 9 : index
    %c0_193 = arith.constant 0 : index
    %217 = vector.load %arg19[%c9_192, %c0_193] : memref<26x32xf32, #tpu.memory_space<vmem>>, vector<16x32xf32>
    %218 = arith.truncf %217 : vector<16x32xf32> to vector<16x32xbf16>
    %c0_194 = arith.constant 0 : index
    %c7_195 = arith.constant 7 : index
    %c0_196 = arith.constant 0 : index
    %c0_197 = arith.constant 0 : index
    %219 = vector.load %arg12[%c0_194, %c7_195, %c0_196, %c0_197] : memref<2x9x32x12xbf16, #tpu.memory_space<vmem>>, vector<1x1x32x12xbf16>
    %220 = vector.shape_cast %219 : vector<1x1x32x12xbf16> to vector<32x12xbf16>
    %c0_198 = arith.constant 0 : index
    %c7_199 = arith.constant 7 : index
    %c0_200 = arith.constant 0 : index
    %c0_201 = arith.constant 0 : index
    %221 = vector.load %arg14[%c0_198, %c7_199, %c0_200, %c0_201] : memref<2x9x32x12xbf16, #tpu.memory_space<vmem>>, vector<1x1x32x12xbf16>
    %222 = vector.shape_cast %221 : vector<1x1x32x12xbf16> to vector<32x12xbf16>
    %cst_202 = arith.constant dense<0.000000e+00> : vector<16x12xf32>
    %223 = tpu.matmul %218, %220, %cst_202 {dimension_numbers = #tpu.dot_dimension_numbers<[1], [0], [0], [1], [0, 0, 1, 1], [], []>} : vector<16x32xbf16>, vector<32x12xbf16>, vector<16x12xf32> -> vector<16x12xf32>
    %cst_203 = arith.constant dense<0.000000e+00> : vector<16x12xf32>
    %224 = tpu.matmul %218, %222, %cst_203 {dimension_numbers = #tpu.dot_dimension_numbers<[1], [0], [0], [1], [0, 0, 1, 1], [], []>} : vector<16x32xbf16>, vector<32x12xbf16>, vector<16x12xf32> -> vector<16x12xf32>
    %225 = arith.addf %215, %223 : vector<16x12xf32>
    %226 = arith.addf %216, %224 : vector<16x12xf32>
    %c10_204 = arith.constant 10 : index
    %c0_205 = arith.constant 0 : index
    %227 = vector.load %arg19[%c10_204, %c0_205] : memref<26x32xf32, #tpu.memory_space<vmem>>, vector<16x32xf32>
    %228 = vector.broadcast %28 : vector<16x1xf32> to vector<16x32xf32>
    %229 = arith.mulf %227, %228 : vector<16x32xf32>
    %230 = arith.truncf %229 : vector<16x32xf32> to vector<16x32xbf16>
    %c0_206 = arith.constant 0 : index
    %c8_207 = arith.constant 8 : index
    %c0_208 = arith.constant 0 : index
    %c0_209 = arith.constant 0 : index
    %231 = vector.load %arg12[%c0_206, %c8_207, %c0_208, %c0_209] : memref<2x9x32x12xbf16, #tpu.memory_space<vmem>>, vector<1x1x32x12xbf16>
    %232 = vector.shape_cast %231 : vector<1x1x32x12xbf16> to vector<32x12xbf16>
    %c0_210 = arith.constant 0 : index
    %c8_211 = arith.constant 8 : index
    %c0_212 = arith.constant 0 : index
    %c0_213 = arith.constant 0 : index
    %233 = vector.load %arg14[%c0_210, %c8_211, %c0_212, %c0_213] : memref<2x9x32x12xbf16, #tpu.memory_space<vmem>>, vector<1x1x32x12xbf16>
    %234 = vector.shape_cast %233 : vector<1x1x32x12xbf16> to vector<32x12xbf16>
    %cst_214 = arith.constant dense<0.000000e+00> : vector<16x12xf32>
    %235 = tpu.matmul %230, %232, %cst_214 {dimension_numbers = #tpu.dot_dimension_numbers<[1], [0], [0], [1], [0, 0, 1, 1], [], []>} : vector<16x32xbf16>, vector<32x12xbf16>, vector<16x12xf32> -> vector<16x12xf32>
    %cst_215 = arith.constant dense<0.000000e+00> : vector<16x12xf32>
    %236 = tpu.matmul %230, %234, %cst_215 {dimension_numbers = #tpu.dot_dimension_numbers<[1], [0], [0], [1], [0, 0, 1, 1], [], []>} : vector<16x32xbf16>, vector<32x12xbf16>, vector<16x12xf32> -> vector<16x12xf32>
    %237 = arith.addf %225, %235 : vector<16x12xf32>
    %238 = arith.addf %226, %236 : vector<16x12xf32>
    %c0_216 = arith.constant 0 : index
    %c0_217 = arith.constant 0 : index
    %c0_218 = arith.constant 0 : index
    %239 = vector.load %arg13[%c0_216, %c0_217, %c0_218] : memref<2x1x12xf32, #tpu.memory_space<vmem>>, vector<1x1x12xf32>
    %240 = vector.shape_cast %239 : vector<1x1x12xf32> to vector<1x12xf32>
    %241 = vector.broadcast %240 : vector<1x12xf32> to vector<16x12xf32>
    %242 = arith.addf %237, %241 : vector<16x12xf32>
    %c0_219 = arith.constant 0 : index
    %c0_220 = arith.constant 0 : index
    %c0_221 = arith.constant 0 : index
    %243 = vector.load %arg15[%c0_219, %c0_220, %c0_221] : memref<2x1x12xf32, #tpu.memory_space<vmem>>, vector<1x1x12xf32>
    %244 = vector.shape_cast %243 : vector<1x1x12xf32> to vector<1x12xf32>
    %245 = vector.broadcast %244 : vector<1x12xf32> to vector<16x12xf32>
    %246 = arith.addf %238, %245 : vector<16x12xf32>
    %cst_222 = arith.constant 2.000000e+00 : f32
    %247 = vector.broadcast %cst_222 : f32 to vector<16x12xf32>
    %248 = arith.addf %246, %247 : vector<16x12xf32>
    %249 = arith.negf %248 : vector<16x12xf32>
    %250 = math.exp %249 : vector<16x12xf32>
    %cst_223 = arith.constant 1.000000e+00 : f32
    %251 = vector.broadcast %cst_223 : f32 to vector<16x12xf32>
    %252 = arith.addf %251, %250 : vector<16x12xf32>
    %253 = arith.divf %251, %252 : vector<16x12xf32>
    %254 = arith.addf %55, %242 : vector<16x12xf32>
    %255 = arith.mulf %254, %253 : vector<16x12xf32>
    %256 = math.log %253 : vector<16x12xf32>
    %cst_224 = arith.constant dense<0.000000e+00> : vector<16xf32>
    %257 = vector.multi_reduction <add>, %256, %cst_224 [1] : vector<16x12xf32> to vector<16xf32>
    %258 = vector.shape_cast %257 : vector<16xf32> to vector<16x1xf32>
    %259 = arith.addf %33, %258 : vector<16x1xf32>
    %c1_225 = arith.constant 1 : index
    %c0_226 = arith.constant 0 : index
    %c0_227 = arith.constant 0 : index
    %260 = vector.load %arg2[%c1_225, %c0_226, %c0_227] : memref<2x12x12xf32, #tpu.memory_space<vmem>>, vector<1x12x12xf32>
    %261 = vector.shape_cast %260 : vector<1x12x12xf32> to vector<12x12xf32>
    %cst_228 = arith.constant dense<0.000000e+00> : vector<16x12xf32>
    %262 = tpu.matmul %44, %261, %cst_228 {dimension_numbers = #tpu.dot_dimension_numbers<[1], [0], [0], [1], [0, 0, 1, 1], [], []>} : vector<16x12xf32>, vector<12x12xf32>, vector<16x12xf32> -> vector<16x12xf32>
    %c1_229 = arith.constant 1 : index
    %c0_230 = arith.constant 0 : index
    %c0_231 = arith.constant 0 : index
    %263 = vector.load %arg4[%c1_229, %c0_230, %c0_231] : memref<2x12x12xf32, #tpu.memory_space<vmem>>, vector<1x12x12xf32>
    %264 = vector.shape_cast %263 : vector<1x12x12xf32> to vector<12x12xf32>
    %cst_232 = arith.constant dense<0.000000e+00> : vector<16x12xf32>
    %265 = tpu.matmul %255, %264, %cst_232 {dimension_numbers = #tpu.dot_dimension_numbers<[1], [0], [0], [1], [0, 0, 1, 1], [], []>} : vector<16x12xf32>, vector<12x12xf32>, vector<16x12xf32> -> vector<16x12xf32>
    %266 = arith.addf %262, %265 : vector<16x12xf32>
    %c1_233 = arith.constant 1 : index
    %c0_234 = arith.constant 0 : index
    %c0_235 = arith.constant 0 : index
    %267 = vector.load %arg6[%c1_233, %c0_234, %c0_235] : memref<2x1x12xf32, #tpu.memory_space<vmem>>, vector<1x1x12xf32>
    %268 = vector.shape_cast %267 : vector<1x1x12xf32> to vector<1x12xf32>
    %269 = vector.broadcast %268 : vector<1x12xf32> to vector<16x12xf32>
    %270 = arith.addf %266, %269 : vector<16x12xf32>
    %c1_236 = arith.constant 1 : index
    %c0_237 = arith.constant 0 : index
    %c0_238 = arith.constant 0 : index
    %271 = vector.load %arg3[%c1_236, %c0_237, %c0_238] : memref<2x12x12xf32, #tpu.memory_space<vmem>>, vector<1x12x12xf32>
    %272 = vector.shape_cast %271 : vector<1x12x12xf32> to vector<12x12xf32>
    %cst_239 = arith.constant dense<0.000000e+00> : vector<16x12xf32>
    %273 = tpu.matmul %44, %272, %cst_239 {dimension_numbers = #tpu.dot_dimension_numbers<[1], [0], [0], [1], [0, 0, 1, 1], [], []>} : vector<16x12xf32>, vector<12x12xf32>, vector<16x12xf32> -> vector<16x12xf32>
    %c1_240 = arith.constant 1 : index
    %c0_241 = arith.constant 0 : index
    %c0_242 = arith.constant 0 : index
    %274 = vector.load %arg5[%c1_240, %c0_241, %c0_242] : memref<2x12x12xf32, #tpu.memory_space<vmem>>, vector<1x12x12xf32>
    %275 = vector.shape_cast %274 : vector<1x12x12xf32> to vector<12x12xf32>
    %cst_243 = arith.constant dense<0.000000e+00> : vector<16x12xf32>
    %276 = tpu.matmul %255, %275, %cst_243 {dimension_numbers = #tpu.dot_dimension_numbers<[1], [0], [0], [1], [0, 0, 1, 1], [], []>} : vector<16x12xf32>, vector<12x12xf32>, vector<16x12xf32> -> vector<16x12xf32>
    %277 = arith.addf %273, %276 : vector<16x12xf32>
    %c1_244 = arith.constant 1 : index
    %c0_245 = arith.constant 0 : index
    %c0_246 = arith.constant 0 : index
    %278 = vector.load %arg7[%c1_244, %c0_245, %c0_246] : memref<2x1x12xf32, #tpu.memory_space<vmem>>, vector<1x1x12xf32>
    %279 = vector.shape_cast %278 : vector<1x1x12xf32> to vector<1x12xf32>
    %280 = vector.broadcast %279 : vector<1x12xf32> to vector<16x12xf32>
    %281 = arith.addf %277, %280 : vector<16x12xf32>
    %c5_247 = arith.constant 5 : index
    %c0_248 = arith.constant 0 : index
    %282 = vector.load %arg18[%c5_247, %c0_248] : memref<26x12xf32, #tpu.memory_space<vmem>>, vector<16x12xf32>
    tpu.vector_store %arg18[%c5_247, %c0_248], %270 {strides = array<i32>} : memref<26x12xf32, #tpu.memory_space<vmem>>, vector<16x12xf32>,
    %c0_249 = arith.constant 0 : index
    %c0_250 = arith.constant 0 : index
    %283 = vector.load %arg18[%c0_249, %c0_250] : memref<26x12xf32, #tpu.memory_space<vmem>>, vector<16x12xf32>
    %284 = vector.broadcast %24 : vector<16x1xf32> to vector<16x12xf32>
    %285 = arith.mulf %283, %284 : vector<16x12xf32>
    %286 = arith.truncf %285 : vector<16x12xf32> to vector<16x12xbf16>
    %c1_251 = arith.constant 1 : index
    %c0_252 = arith.constant 0 : index
    %c0_253 = arith.constant 0 : index
    %c0_254 = arith.constant 0 : index
    %287 = vector.load %arg8[%c1_251, %c0_252, %c0_253, %c0_254] : memref<2x9x12x32xbf16, #tpu.memory_space<vmem>>, vector<1x1x12x32xbf16>
    %288 = vector.shape_cast %287 : vector<1x1x12x32xbf16> to vector<12x32xbf16>
    %cst_255 = arith.constant dense<0.000000e+00> : vector<16x32xf32>
    %289 = tpu.matmul %286, %288, %cst_255 {dimension_numbers = #tpu.dot_dimension_numbers<[1], [0], [0], [1], [0, 0, 1, 1], [], []>} : vector<16x12xbf16>, vector<12x32xbf16>, vector<16x32xf32> -> vector<16x32xf32>
    %c1_256 = arith.constant 1 : index
    %c0_257 = arith.constant 0 : index
    %290 = vector.load %arg18[%c1_256, %c0_257] : memref<26x12xf32, #tpu.memory_space<vmem>>, vector<16x12xf32>
    %291 = arith.truncf %290 : vector<16x12xf32> to vector<16x12xbf16>
    %c1_258 = arith.constant 1 : index
    %c1_259 = arith.constant 1 : index
    %c0_260 = arith.constant 0 : index
    %c0_261 = arith.constant 0 : index
    %292 = vector.load %arg8[%c1_258, %c1_259, %c0_260, %c0_261] : memref<2x9x12x32xbf16, #tpu.memory_space<vmem>>, vector<1x1x12x32xbf16>
    %293 = vector.shape_cast %292 : vector<1x1x12x32xbf16> to vector<12x32xbf16>
    %cst_262 = arith.constant dense<0.000000e+00> : vector<16x32xf32>
    %294 = tpu.matmul %291, %293, %cst_262 {dimension_numbers = #tpu.dot_dimension_numbers<[1], [0], [0], [1], [0, 0, 1, 1], [], []>} : vector<16x12xbf16>, vector<12x32xbf16>, vector<16x32xf32> -> vector<16x32xf32>
    %295 = arith.addf %289, %294 : vector<16x32xf32>
    %c2_263 = arith.constant 2 : index
    %c0_264 = arith.constant 0 : index
    %296 = vector.load %arg18[%c2_263, %c0_264] : memref<26x12xf32, #tpu.memory_space<vmem>>, vector<16x12xf32>
    %297 = vector.broadcast %28 : vector<16x1xf32> to vector<16x12xf32>
    %298 = arith.mulf %296, %297 : vector<16x12xf32>
    %299 = arith.truncf %298 : vector<16x12xf32> to vector<16x12xbf16>
    %c1_265 = arith.constant 1 : index
    %c2_266 = arith.constant 2 : index
    %c0_267 = arith.constant 0 : index
    %c0_268 = arith.constant 0 : index
    %300 = vector.load %arg8[%c1_265, %c2_266, %c0_267, %c0_268] : memref<2x9x12x32xbf16, #tpu.memory_space<vmem>>, vector<1x1x12x32xbf16>
    %301 = vector.shape_cast %300 : vector<1x1x12x32xbf16> to vector<12x32xbf16>
    %cst_269 = arith.constant dense<0.000000e+00> : vector<16x32xf32>
    %302 = tpu.matmul %299, %301, %cst_269 {dimension_numbers = #tpu.dot_dimension_numbers<[1], [0], [0], [1], [0, 0, 1, 1], [], []>} : vector<16x12xbf16>, vector<12x32xbf16>, vector<16x32xf32> -> vector<16x32xf32>
    %303 = arith.addf %295, %302 : vector<16x32xf32>
    %c4_270 = arith.constant 4 : index
    %c0_271 = arith.constant 0 : index
    %304 = vector.load %arg18[%c4_270, %c0_271] : memref<26x12xf32, #tpu.memory_space<vmem>>, vector<16x12xf32>
    %305 = vector.broadcast %24 : vector<16x1xf32> to vector<16x12xf32>
    %306 = arith.mulf %304, %305 : vector<16x12xf32>
    %307 = arith.truncf %306 : vector<16x12xf32> to vector<16x12xbf16>
    %c1_272 = arith.constant 1 : index
    %c3_273 = arith.constant 3 : index
    %c0_274 = arith.constant 0 : index
    %c0_275 = arith.constant 0 : index
    %308 = vector.load %arg8[%c1_272, %c3_273, %c0_274, %c0_275] : memref<2x9x12x32xbf16, #tpu.memory_space<vmem>>, vector<1x1x12x32xbf16>
    %309 = vector.shape_cast %308 : vector<1x1x12x32xbf16> to vector<12x32xbf16>
    %cst_276 = arith.constant dense<0.000000e+00> : vector<16x32xf32>
    %310 = tpu.matmul %307, %309, %cst_276 {dimension_numbers = #tpu.dot_dimension_numbers<[1], [0], [0], [1], [0, 0, 1, 1], [], []>} : vector<16x12xbf16>, vector<12x32xbf16>, vector<16x32xf32> -> vector<16x32xf32>
    %311 = arith.addf %303, %310 : vector<16x32xf32>
    %c5_277 = arith.constant 5 : index
    %c0_278 = arith.constant 0 : index
    %312 = vector.load %arg18[%c5_277, %c0_278] : memref<26x12xf32, #tpu.memory_space<vmem>>, vector<16x12xf32>
    %313 = arith.truncf %312 : vector<16x12xf32> to vector<16x12xbf16>
    %c1_279 = arith.constant 1 : index
    %c4_280 = arith.constant 4 : index
    %c0_281 = arith.constant 0 : index
    %c0_282 = arith.constant 0 : index
    %314 = vector.load %arg8[%c1_279, %c4_280, %c0_281, %c0_282] : memref<2x9x12x32xbf16, #tpu.memory_space<vmem>>, vector<1x1x12x32xbf16>
    %315 = vector.shape_cast %314 : vector<1x1x12x32xbf16> to vector<12x32xbf16>
    %cst_283 = arith.constant dense<0.000000e+00> : vector<16x32xf32>
    %316 = tpu.matmul %313, %315, %cst_283 {dimension_numbers = #tpu.dot_dimension_numbers<[1], [0], [0], [1], [0, 0, 1, 1], [], []>} : vector<16x12xbf16>, vector<12x32xbf16>, vector<16x32xf32> -> vector<16x32xf32>
    %317 = arith.addf %311, %316 : vector<16x32xf32>
    %c6_284 = arith.constant 6 : index
    %c0_285 = arith.constant 0 : index
    %318 = vector.load %arg18[%c6_284, %c0_285] : memref<26x12xf32, #tpu.memory_space<vmem>>, vector<16x12xf32>
    %319 = vector.broadcast %28 : vector<16x1xf32> to vector<16x12xf32>
    %320 = arith.mulf %318, %319 : vector<16x12xf32>
    %321 = arith.truncf %320 : vector<16x12xf32> to vector<16x12xbf16>
    %c1_286 = arith.constant 1 : index
    %c5_287 = arith.constant 5 : index
    %c0_288 = arith.constant 0 : index
    %c0_289 = arith.constant 0 : index
    %322 = vector.load %arg8[%c1_286, %c5_287, %c0_288, %c0_289] : memref<2x9x12x32xbf16, #tpu.memory_space<vmem>>, vector<1x1x12x32xbf16>
    %323 = vector.shape_cast %322 : vector<1x1x12x32xbf16> to vector<12x32xbf16>
    %cst_290 = arith.constant dense<0.000000e+00> : vector<16x32xf32>
    %324 = tpu.matmul %321, %323, %cst_290 {dimension_numbers = #tpu.dot_dimension_numbers<[1], [0], [0], [1], [0, 0, 1, 1], [], []>} : vector<16x12xbf16>, vector<12x32xbf16>, vector<16x32xf32> -> vector<16x32xf32>
    %325 = arith.addf %317, %324 : vector<16x32xf32>
    %c8_291 = arith.constant 8 : index
    %c0_292 = arith.constant 0 : index
    %326 = vector.load %arg18[%c8_291, %c0_292] : memref<26x12xf32, #tpu.memory_space<vmem>>, vector<16x12xf32>
    %327 = vector.broadcast %24 : vector<16x1xf32> to vector<16x12xf32>
    %328 = arith.mulf %326, %327 : vector<16x12xf32>
    %329 = arith.truncf %328 : vector<16x12xf32> to vector<16x12xbf16>
    %c1_293 = arith.constant 1 : index
    %c6_294 = arith.constant 6 : index
    %c0_295 = arith.constant 0 : index
    %c0_296 = arith.constant 0 : index
    %330 = vector.load %arg8[%c1_293, %c6_294, %c0_295, %c0_296] : memref<2x9x12x32xbf16, #tpu.memory_space<vmem>>, vector<1x1x12x32xbf16>
    %331 = vector.shape_cast %330 : vector<1x1x12x32xbf16> to vector<12x32xbf16>
    %cst_297 = arith.constant dense<0.000000e+00> : vector<16x32xf32>
    %332 = tpu.matmul %329, %331, %cst_297 {dimension_numbers = #tpu.dot_dimension_numbers<[1], [0], [0], [1], [0, 0, 1, 1], [], []>} : vector<16x12xbf16>, vector<12x32xbf16>, vector<16x32xf32> -> vector<16x32xf32>
    %333 = arith.addf %325, %332 : vector<16x32xf32>
    %c9_298 = arith.constant 9 : index
    %c0_299 = arith.constant 0 : index
    %334 = vector.load %arg18[%c9_298, %c0_299] : memref<26x12xf32, #tpu.memory_space<vmem>>, vector<16x12xf32>
    %335 = arith.truncf %334 : vector<16x12xf32> to vector<16x12xbf16>
    %c1_300 = arith.constant 1 : index
    %c7_301 = arith.constant 7 : index
    %c0_302 = arith.constant 0 : index
    %c0_303 = arith.constant 0 : index
    %336 = vector.load %arg8[%c1_300, %c7_301, %c0_302, %c0_303] : memref<2x9x12x32xbf16, #tpu.memory_space<vmem>>, vector<1x1x12x32xbf16>
    %337 = vector.shape_cast %336 : vector<1x1x12x32xbf16> to vector<12x32xbf16>
    %cst_304 = arith.constant dense<0.000000e+00> : vector<16x32xf32>
    %338 = tpu.matmul %335, %337, %cst_304 {dimension_numbers = #tpu.dot_dimension_numbers<[1], [0], [0], [1], [0, 0, 1, 1], [], []>} : vector<16x12xbf16>, vector<12x32xbf16>, vector<16x32xf32> -> vector<16x32xf32>
    %339 = arith.addf %333, %338 : vector<16x32xf32>
    %c10_305 = arith.constant 10 : index
    %c0_306 = arith.constant 0 : index
    %340 = vector.load %arg18[%c10_305, %c0_306] : memref<26x12xf32, #tpu.memory_space<vmem>>, vector<16x12xf32>
    %341 = vector.broadcast %28 : vector<16x1xf32> to vector<16x12xf32>
    %342 = arith.mulf %340, %341 : vector<16x12xf32>
    %343 = arith.truncf %342 : vector<16x12xf32> to vector<16x12xbf16>
    %c1_307 = arith.constant 1 : index
    %c8_308 = arith.constant 8 : index
    %c0_309 = arith.constant 0 : index
    %c0_310 = arith.constant 0 : index
    %344 = vector.load %arg8[%c1_307, %c8_308, %c0_309, %c0_310] : memref<2x9x12x32xbf16, #tpu.memory_space<vmem>>, vector<1x1x12x32xbf16>
    %345 = vector.shape_cast %344 : vector<1x1x12x32xbf16> to vector<12x32xbf16>
    %cst_311 = arith.constant dense<0.000000e+00> : vector<16x32xf32>
    %346 = tpu.matmul %343, %345, %cst_311 {dimension_numbers = #tpu.dot_dimension_numbers<[1], [0], [0], [1], [0, 0, 1, 1], [], []>} : vector<16x12xbf16>, vector<12x32xbf16>, vector<16x32xf32> -> vector<16x32xf32>
    %347 = arith.addf %339, %346 : vector<16x32xf32>
    %c1_312 = arith.constant 1 : index
    %c0_313 = arith.constant 0 : index
    %c0_314 = arith.constant 0 : index
    %348 = vector.load %arg9[%c1_312, %c0_313, %c0_314] : memref<2x1x32xf32, #tpu.memory_space<vmem>>, vector<1x1x32xf32>
    %349 = vector.shape_cast %348 : vector<1x1x32xf32> to vector<1x32xf32>
    %350 = vector.broadcast %349 : vector<1x32xf32> to vector<16x32xf32>
    %351 = arith.addf %347, %350 : vector<16x32xf32>
    %cst_315 = arith.constant 0.000000e+00 : f32
    %352 = vector.broadcast %cst_315 : f32 to vector<16x32xf32>
    %353 = arith.maximumf %351, %352 : vector<16x32xf32>
    %354 = arith.truncf %353 : vector<16x32xf32> to vector<16x32xbf16>
    %c1_316 = arith.constant 1 : index
    %c0_317 = arith.constant 0 : index
    %c0_318 = arith.constant 0 : index
    %355 = vector.load %arg10[%c1_316, %c0_317, %c0_318] : memref<2x32x32xbf16, #tpu.memory_space<vmem>>, vector<1x32x32xbf16>
    %356 = vector.shape_cast %355 : vector<1x32x32xbf16> to vector<32x32xbf16>
    %cst_319 = arith.constant dense<0.000000e+00> : vector<16x32xf32>
    %357 = tpu.matmul %354, %356, %cst_319 {dimension_numbers = #tpu.dot_dimension_numbers<[1], [0], [0], [1], [0, 0, 1, 1], [], []>} : vector<16x32xbf16>, vector<32x32xbf16>, vector<16x32xf32> -> vector<16x32xf32>
    %c1_320 = arith.constant 1 : index
    %c0_321 = arith.constant 0 : index
    %c0_322 = arith.constant 0 : index
    %358 = vector.load %arg11[%c1_320, %c0_321, %c0_322] : memref<2x1x32xf32, #tpu.memory_space<vmem>>, vector<1x1x32xf32>
    %359 = vector.shape_cast %358 : vector<1x1x32xf32> to vector<1x32xf32>
    %360 = vector.broadcast %359 : vector<1x32xf32> to vector<16x32xf32>
    %361 = arith.addf %357, %360 : vector<16x32xf32>
    %cst_323 = arith.constant 0.000000e+00 : f32
    %362 = vector.broadcast %cst_323 : f32 to vector<16x32xf32>
    %363 = arith.maximumf %361, %362 : vector<16x32xf32>
    %c5_324 = arith.constant 5 : index
    %c0_325 = arith.constant 0 : index
    %364 = vector.load %arg19[%c5_324, %c0_325] : memref<26x32xf32, #tpu.memory_space<vmem>>, vector<16x32xf32>
    tpu.vector_store %arg19[%c5_324, %c0_325], %363 {strides = array<i32>} : memref<26x32xf32, #tpu.memory_space<vmem>>, vector<16x32xf32>,
    %c0_326 = arith.constant 0 : index
    %c0_327 = arith.constant 0 : index
    %365 = vector.load %arg19[%c0_326, %c0_327] : memref<26x32xf32, #tpu.memory_space<vmem>>, vector<16x32xf32>
    %366 = vector.broadcast %24 : vector<16x1xf32> to vector<16x32xf32>
    %367 = arith.mulf %365, %366 : vector<16x32xf32>
    %368 = arith.truncf %367 : vector<16x32xf32> to vector<16x32xbf16>
    %c1_328 = arith.constant 1 : index
    %c0_329 = arith.constant 0 : index
    %c0_330 = arith.constant 0 : index
    %c0_331 = arith.constant 0 : index
    %369 = vector.load %arg12[%c1_328, %c0_329, %c0_330, %c0_331] : memref<2x9x32x12xbf16, #tpu.memory_space<vmem>>, vector<1x1x32x12xbf16>
    %370 = vector.shape_cast %369 : vector<1x1x32x12xbf16> to vector<32x12xbf16>
    %c1_332 = arith.constant 1 : index
    %c0_333 = arith.constant 0 : index
    %c0_334 = arith.constant 0 : index
    %c0_335 = arith.constant 0 : index
    %371 = vector.load %arg14[%c1_332, %c0_333, %c0_334, %c0_335] : memref<2x9x32x12xbf16, #tpu.memory_space<vmem>>, vector<1x1x32x12xbf16>
    %372 = vector.shape_cast %371 : vector<1x1x32x12xbf16> to vector<32x12xbf16>
    %cst_336 = arith.constant dense<0.000000e+00> : vector<16x12xf32>
    %373 = tpu.matmul %368, %370, %cst_336 {dimension_numbers = #tpu.dot_dimension_numbers<[1], [0], [0], [1], [0, 0, 1, 1], [], []>} : vector<16x32xbf16>, vector<32x12xbf16>, vector<16x12xf32> -> vector<16x12xf32>
    %cst_337 = arith.constant dense<0.000000e+00> : vector<16x12xf32>
    %374 = tpu.matmul %368, %372, %cst_337 {dimension_numbers = #tpu.dot_dimension_numbers<[1], [0], [0], [1], [0, 0, 1, 1], [], []>} : vector<16x32xbf16>, vector<32x12xbf16>, vector<16x12xf32> -> vector<16x12xf32>
    %c1_338 = arith.constant 1 : index
    %c0_339 = arith.constant 0 : index
    %375 = vector.load %arg19[%c1_338, %c0_339] : memref<26x32xf32, #tpu.memory_space<vmem>>, vector<16x32xf32>
    %376 = arith.truncf %375 : vector<16x32xf32> to vector<16x32xbf16>
    %c1_340 = arith.constant 1 : index
    %c1_341 = arith.constant 1 : index
    %c0_342 = arith.constant 0 : index
    %c0_343 = arith.constant 0 : index
    %377 = vector.load %arg12[%c1_340, %c1_341, %c0_342, %c0_343] : memref<2x9x32x12xbf16, #tpu.memory_space<vmem>>, vector<1x1x32x12xbf16>
    %378 = vector.shape_cast %377 : vector<1x1x32x12xbf16> to vector<32x12xbf16>
    %c1_344 = arith.constant 1 : index
    %c1_345 = arith.constant 1 : index
    %c0_346 = arith.constant 0 : index
    %c0_347 = arith.constant 0 : index
    %379 = vector.load %arg14[%c1_344, %c1_345, %c0_346, %c0_347] : memref<2x9x32x12xbf16, #tpu.memory_space<vmem>>, vector<1x1x32x12xbf16>
    %380 = vector.shape_cast %379 : vector<1x1x32x12xbf16> to vector<32x12xbf16>
    %cst_348 = arith.constant dense<0.000000e+00> : vector<16x12xf32>
    %381 = tpu.matmul %376, %378, %cst_348 {dimension_numbers = #tpu.dot_dimension_numbers<[1], [0], [0], [1], [0, 0, 1, 1], [], []>} : vector<16x32xbf16>, vector<32x12xbf16>, vector<16x12xf32> -> vector<16x12xf32>
    %cst_349 = arith.constant dense<0.000000e+00> : vector<16x12xf32>
    %382 = tpu.matmul %376, %380, %cst_349 {dimension_numbers = #tpu.dot_dimension_numbers<[1], [0], [0], [1], [0, 0, 1, 1], [], []>} : vector<16x32xbf16>, vector<32x12xbf16>, vector<16x12xf32> -> vector<16x12xf32>
    %383 = arith.addf %373, %381 : vector<16x12xf32>
    %384 = arith.addf %374, %382 : vector<16x12xf32>
    %c2_350 = arith.constant 2 : index
    %c0_351 = arith.constant 0 : index
    %385 = vector.load %arg19[%c2_350, %c0_351] : memref<26x32xf32, #tpu.memory_space<vmem>>, vector<16x32xf32>
    %386 = vector.broadcast %28 : vector<16x1xf32> to vector<16x32xf32>
    %387 = arith.mulf %385, %386 : vector<16x32xf32>
    %388 = arith.truncf %387 : vector<16x32xf32> to vector<16x32xbf16>
    %c1_352 = arith.constant 1 : index
    %c2_353 = arith.constant 2 : index
    %c0_354 = arith.constant 0 : index
    %c0_355 = arith.constant 0 : index
    %389 = vector.load %arg12[%c1_352, %c2_353, %c0_354, %c0_355] : memref<2x9x32x12xbf16, #tpu.memory_space<vmem>>, vector<1x1x32x12xbf16>
    %390 = vector.shape_cast %389 : vector<1x1x32x12xbf16> to vector<32x12xbf16>
    %c1_356 = arith.constant 1 : index
    %c2_357 = arith.constant 2 : index
    %c0_358 = arith.constant 0 : index
    %c0_359 = arith.constant 0 : index
    %391 = vector.load %arg14[%c1_356, %c2_357, %c0_358, %c0_359] : memref<2x9x32x12xbf16, #tpu.memory_space<vmem>>, vector<1x1x32x12xbf16>
    %392 = vector.shape_cast %391 : vector<1x1x32x12xbf16> to vector<32x12xbf16>
    %cst_360 = arith.constant dense<0.000000e+00> : vector<16x12xf32>
    %393 = tpu.matmul %388, %390, %cst_360 {dimension_numbers = #tpu.dot_dimension_numbers<[1], [0], [0], [1], [0, 0, 1, 1], [], []>} : vector<16x32xbf16>, vector<32x12xbf16>, vector<16x12xf32> -> vector<16x12xf32>
    %cst_361 = arith.constant dense<0.000000e+00> : vector<16x12xf32>
    %394 = tpu.matmul %388, %392, %cst_361 {dimension_numbers = #tpu.dot_dimension_numbers<[1], [0], [0], [1], [0, 0, 1, 1], [], []>} : vector<16x32xbf16>, vector<32x12xbf16>, vector<16x12xf32> -> vector<16x12xf32>
    %395 = arith.addf %383, %393 : vector<16x12xf32>
    %396 = arith.addf %384, %394 : vector<16x12xf32>
    %c4_362 = arith.constant 4 : index
    %c0_363 = arith.constant 0 : index
    %397 = vector.load %arg19[%c4_362, %c0_363] : memref<26x32xf32, #tpu.memory_space<vmem>>, vector<16x32xf32>
    %398 = vector.broadcast %24 : vector<16x1xf32> to vector<16x32xf32>
    %399 = arith.mulf %397, %398 : vector<16x32xf32>
    %400 = arith.truncf %399 : vector<16x32xf32> to vector<16x32xbf16>
    %c1_364 = arith.constant 1 : index
    %c3_365 = arith.constant 3 : index
    %c0_366 = arith.constant 0 : index
    %c0_367 = arith.constant 0 : index
    %401 = vector.load %arg12[%c1_364, %c3_365, %c0_366, %c0_367] : memref<2x9x32x12xbf16, #tpu.memory_space<vmem>>, vector<1x1x32x12xbf16>
    %402 = vector.shape_cast %401 : vector<1x1x32x12xbf16> to vector<32x12xbf16>
    %c1_368 = arith.constant 1 : index
    %c3_369 = arith.constant 3 : index
    %c0_370 = arith.constant 0 : index
    %c0_371 = arith.constant 0 : index
    %403 = vector.load %arg14[%c1_368, %c3_369, %c0_370, %c0_371] : memref<2x9x32x12xbf16, #tpu.memory_space<vmem>>, vector<1x1x32x12xbf16>
    %404 = vector.shape_cast %403 : vector<1x1x32x12xbf16> to vector<32x12xbf16>
    %cst_372 = arith.constant dense<0.000000e+00> : vector<16x12xf32>
    %405 = tpu.matmul %400, %402, %cst_372 {dimension_numbers = #tpu.dot_dimension_numbers<[1], [0], [0], [1], [0, 0, 1, 1], [], []>} : vector<16x32xbf16>, vector<32x12xbf16>, vector<16x12xf32> -> vector<16x12xf32>
    %cst_373 = arith.constant dense<0.000000e+00> : vector<16x12xf32>
    %406 = tpu.matmul %400, %404, %cst_373 {dimension_numbers = #tpu.dot_dimension_numbers<[1], [0], [0], [1], [0, 0, 1, 1], [], []>} : vector<16x32xbf16>, vector<32x12xbf16>, vector<16x12xf32> -> vector<16x12xf32>
    %407 = arith.addf %395, %405 : vector<16x12xf32>
    %408 = arith.addf %396, %406 : vector<16x12xf32>
    %c5_374 = arith.constant 5 : index
    %c0_375 = arith.constant 0 : index
    %409 = vector.load %arg19[%c5_374, %c0_375] : memref<26x32xf32, #tpu.memory_space<vmem>>, vector<16x32xf32>
    %410 = arith.truncf %409 : vector<16x32xf32> to vector<16x32xbf16>
    %c1_376 = arith.constant 1 : index
    %c4_377 = arith.constant 4 : index
    %c0_378 = arith.constant 0 : index
    %c0_379 = arith.constant 0 : index
    %411 = vector.load %arg12[%c1_376, %c4_377, %c0_378, %c0_379] : memref<2x9x32x12xbf16, #tpu.memory_space<vmem>>, vector<1x1x32x12xbf16>
    %412 = vector.shape_cast %411 : vector<1x1x32x12xbf16> to vector<32x12xbf16>
    %c1_380 = arith.constant 1 : index
    %c4_381 = arith.constant 4 : index
    %c0_382 = arith.constant 0 : index
    %c0_383 = arith.constant 0 : index
    %413 = vector.load %arg14[%c1_380, %c4_381, %c0_382, %c0_383] : memref<2x9x32x12xbf16, #tpu.memory_space<vmem>>, vector<1x1x32x12xbf16>
    %414 = vector.shape_cast %413 : vector<1x1x32x12xbf16> to vector<32x12xbf16>
    %cst_384 = arith.constant dense<0.000000e+00> : vector<16x12xf32>
    %415 = tpu.matmul %410, %412, %cst_384 {dimension_numbers = #tpu.dot_dimension_numbers<[1], [0], [0], [1], [0, 0, 1, 1], [], []>} : vector<16x32xbf16>, vector<32x12xbf16>, vector<16x12xf32> -> vector<16x12xf32>
    %cst_385 = arith.constant dense<0.000000e+00> : vector<16x12xf32>
    %416 = tpu.matmul %410, %414, %cst_385 {dimension_numbers = #tpu.dot_dimension_numbers<[1], [0], [0], [1], [0, 0, 1, 1], [], []>} : vector<16x32xbf16>, vector<32x12xbf16>, vector<16x12xf32> -> vector<16x12xf32>
    %417 = arith.addf %407, %415 : vector<16x12xf32>
    %418 = arith.addf %408, %416 : vector<16x12xf32>
    %c6_386 = arith.constant 6 : index
    %c0_387 = arith.constant 0 : index
    %419 = vector.load %arg19[%c6_386, %c0_387] : memref<26x32xf32, #tpu.memory_space<vmem>>, vector<16x32xf32>
    %420 = vector.broadcast %28 : vector<16x1xf32> to vector<16x32xf32>
    %421 = arith.mulf %419, %420 : vector<16x32xf32>
    %422 = arith.truncf %421 : vector<16x32xf32> to vector<16x32xbf16>
    %c1_388 = arith.constant 1 : index
    %c5_389 = arith.constant 5 : index
    %c0_390 = arith.constant 0 : index
    %c0_391 = arith.constant 0 : index
    %423 = vector.load %arg12[%c1_388, %c5_389, %c0_390, %c0_391] : memref<2x9x32x12xbf16, #tpu.memory_space<vmem>>, vector<1x1x32x12xbf16>
    %424 = vector.shape_cast %423 : vector<1x1x32x12xbf16> to vector<32x12xbf16>
    %c1_392 = arith.constant 1 : index
    %c5_393 = arith.constant 5 : index
    %c0_394 = arith.constant 0 : index
    %c0_395 = arith.constant 0 : index
    %425 = vector.load %arg14[%c1_392, %c5_393, %c0_394, %c0_395] : memref<2x9x32x12xbf16, #tpu.memory_space<vmem>>, vector<1x1x32x12xbf16>
    %426 = vector.shape_cast %425 : vector<1x1x32x12xbf16> to vector<32x12xbf16>
    %cst_396 = arith.constant dense<0.000000e+00> : vector<16x12xf32>
    %427 = tpu.matmul %422, %424, %cst_396 {dimension_numbers = #tpu.dot_dimension_numbers<[1], [0], [0], [1], [0, 0, 1, 1], [], []>} : vector<16x32xbf16>, vector<32x12xbf16>, vector<16x12xf32> -> vector<16x12xf32>
    %cst_397 = arith.constant dense<0.000000e+00> : vector<16x12xf32>
    %428 = tpu.matmul %422, %426, %cst_397 {dimension_numbers = #tpu.dot_dimension_numbers<[1], [0], [0], [1], [0, 0, 1, 1], [], []>} : vector<16x32xbf16>, vector<32x12xbf16>, vector<16x12xf32> -> vector<16x12xf32>
    %429 = arith.addf %417, %427 : vector<16x12xf32>
    %430 = arith.addf %418, %428 : vector<16x12xf32>
    %c8_398 = arith.constant 8 : index
    %c0_399 = arith.constant 0 : index
    %431 = vector.load %arg19[%c8_398, %c0_399] : memref<26x32xf32, #tpu.memory_space<vmem>>, vector<16x32xf32>
    %432 = vector.broadcast %24 : vector<16x1xf32> to vector<16x32xf32>
    %433 = arith.mulf %431, %432 : vector<16x32xf32>
    %434 = arith.truncf %433 : vector<16x32xf32> to vector<16x32xbf16>
    %c1_400 = arith.constant 1 : index
    %c6_401 = arith.constant 6 : index
    %c0_402 = arith.constant 0 : index
    %c0_403 = arith.constant 0 : index
    %435 = vector.load %arg12[%c1_400, %c6_401, %c0_402, %c0_403] : memref<2x9x32x12xbf16, #tpu.memory_space<vmem>>, vector<1x1x32x12xbf16>
    %436 = vector.shape_cast %435 : vector<1x1x32x12xbf16> to vector<32x12xbf16>
    %c1_404 = arith.constant 1 : index
    %c6_405 = arith.constant 6 : index
    %c0_406 = arith.constant 0 : index
    %c0_407 = arith.constant 0 : index
    %437 = vector.load %arg14[%c1_404, %c6_405, %c0_406, %c0_407] : memref<2x9x32x12xbf16, #tpu.memory_space<vmem>>, vector<1x1x32x12xbf16>
    %438 = vector.shape_cast %437 : vector<1x1x32x12xbf16> to vector<32x12xbf16>
    %cst_408 = arith.constant dense<0.000000e+00> : vector<16x12xf32>
    %439 = tpu.matmul %434, %436, %cst_408 {dimension_numbers = #tpu.dot_dimension_numbers<[1], [0], [0], [1], [0, 0, 1, 1], [], []>} : vector<16x32xbf16>, vector<32x12xbf16>, vector<16x12xf32> -> vector<16x12xf32>
    %cst_409 = arith.constant dense<0.000000e+00> : vector<16x12xf32>
    %440 = tpu.matmul %434, %438, %cst_409 {dimension_numbers = #tpu.dot_dimension_numbers<[1], [0], [0], [1], [0, 0, 1, 1], [], []>} : vector<16x32xbf16>, vector<32x12xbf16>, vector<16x12xf32> -> vector<16x12xf32>
    %441 = arith.addf %429, %439 : vector<16x12xf32>
    %442 = arith.addf %430, %440 : vector<16x12xf32>
    %c9_410 = arith.constant 9 : index
    %c0_411 = arith.constant 0 : index
    %443 = vector.load %arg19[%c9_410, %c0_411] : memref<26x32xf32, #tpu.memory_space<vmem>>, vector<16x32xf32>
    %444 = arith.truncf %443 : vector<16x32xf32> to vector<16x32xbf16>
    %c1_412 = arith.constant 1 : index
    %c7_413 = arith.constant 7 : index
    %c0_414 = arith.constant 0 : index
    %c0_415 = arith.constant 0 : index
    %445 = vector.load %arg12[%c1_412, %c7_413, %c0_414, %c0_415] : memref<2x9x32x12xbf16, #tpu.memory_space<vmem>>, vector<1x1x32x12xbf16>
    %446 = vector.shape_cast %445 : vector<1x1x32x12xbf16> to vector<32x12xbf16>
    %c1_416 = arith.constant 1 : index
    %c7_417 = arith.constant 7 : index
    %c0_418 = arith.constant 0 : index
    %c0_419 = arith.constant 0 : index
    %447 = vector.load %arg14[%c1_416, %c7_417, %c0_418, %c0_419] : memref<2x9x32x12xbf16, #tpu.memory_space<vmem>>, vector<1x1x32x12xbf16>
    %448 = vector.shape_cast %447 : vector<1x1x32x12xbf16> to vector<32x12xbf16>
    %cst_420 = arith.constant dense<0.000000e+00> : vector<16x12xf32>
    %449 = tpu.matmul %444, %446, %cst_420 {dimension_numbers = #tpu.dot_dimension_numbers<[1], [0], [0], [1], [0, 0, 1, 1], [], []>} : vector<16x32xbf16>, vector<32x12xbf16>, vector<16x12xf32> -> vector<16x12xf32>
    %cst_421 = arith.constant dense<0.000000e+00> : vector<16x12xf32>
    %450 = tpu.matmul %444, %448, %cst_421 {dimension_numbers = #tpu.dot_dimension_numbers<[1], [0], [0], [1], [0, 0, 1, 1], [], []>} : vector<16x32xbf16>, vector<32x12xbf16>, vector<16x12xf32> -> vector<16x12xf32>
    %451 = arith.addf %441, %449 : vector<16x12xf32>
    %452 = arith.addf %442, %450 : vector<16x12xf32>
    %c10_422 = arith.constant 10 : index
    %c0_423 = arith.constant 0 : index
    %453 = vector.load %arg19[%c10_422, %c0_423] : memref<26x32xf32, #tpu.memory_space<vmem>>, vector<16x32xf32>
    %454 = vector.broadcast %28 : vector<16x1xf32> to vector<16x32xf32>
    %455 = arith.mulf %453, %454 : vector<16x32xf32>
    %456 = arith.truncf %455 : vector<16x32xf32> to vector<16x32xbf16>
    %c1_424 = arith.constant 1 : index
    %c8_425 = arith.constant 8 : index
    %c0_426 = arith.constant 0 : index
    %c0_427 = arith.constant 0 : index
    %457 = vector.load %arg12[%c1_424, %c8_425, %c0_426, %c0_427] : memref<2x9x32x12xbf16, #tpu.memory_space<vmem>>, vector<1x1x32x12xbf16>
    %458 = vector.shape_cast %457 : vector<1x1x32x12xbf16> to vector<32x12xbf16>
    %c1_428 = arith.constant 1 : index
    %c8_429 = arith.constant 8 : index
    %c0_430 = arith.constant 0 : index
    %c0_431 = arith.constant 0 : index
    %459 = vector.load %arg14[%c1_428, %c8_429, %c0_430, %c0_431] : memref<2x9x32x12xbf16, #tpu.memory_space<vmem>>, vector<1x1x32x12xbf16>
    %460 = vector.shape_cast %459 : vector<1x1x32x12xbf16> to vector<32x12xbf16>
    %cst_432 = arith.constant dense<0.000000e+00> : vector<16x12xf32>
    %461 = tpu.matmul %456, %458, %cst_432 {dimension_numbers = #tpu.dot_dimension_numbers<[1], [0], [0], [1], [0, 0, 1, 1], [], []>} : vector<16x32xbf16>, vector<32x12xbf16>, vector<16x12xf32> -> vector<16x12xf32>
    %cst_433 = arith.constant dense<0.000000e+00> : vector<16x12xf32>
    %462 = tpu.matmul %456, %460, %cst_433 {dimension_numbers = #tpu.dot_dimension_numbers<[1], [0], [0], [1], [0, 0, 1, 1], [], []>} : vector<16x32xbf16>, vector<32x12xbf16>, vector<16x12xf32> -> vector<16x12xf32>
    %463 = arith.addf %451, %461 : vector<16x12xf32>
    %464 = arith.addf %452, %462 : vector<16x12xf32>
    %c1_434 = arith.constant 1 : index
    %c0_435 = arith.constant 0 : index
    %c0_436 = arith.constant 0 : index
    %465 = vector.load %arg13[%c1_434, %c0_435, %c0_436] : memref<2x1x12xf32, #tpu.memory_space<vmem>>, vector<1x1x12xf32>
    %466 = vector.shape_cast %465 : vector<1x1x12xf32> to vector<1x12xf32>
    %467 = vector.broadcast %466 : vector<1x12xf32> to vector<16x12xf32>
    %468 = arith.addf %463, %467 : vector<16x12xf32>
    %c1_437 = arith.constant 1 : index
    %c0_438 = arith.constant 0 : index
    %c0_439 = arith.constant 0 : index
    %469 = vector.load %arg15[%c1_437, %c0_438, %c0_439] : memref<2x1x12xf32, #tpu.memory_space<vmem>>, vector<1x1x12xf32>
    %470 = vector.shape_cast %469 : vector<1x1x12xf32> to vector<1x12xf32>
    %471 = vector.broadcast %470 : vector<1x12xf32> to vector<16x12xf32>
    %472 = arith.addf %464, %471 : vector<16x12xf32>
    %cst_440 = arith.constant 2.000000e+00 : f32
    %473 = vector.broadcast %cst_440 : f32 to vector<16x12xf32>
    %474 = arith.addf %472, %473 : vector<16x12xf32>
    %475 = arith.negf %474 : vector<16x12xf32>
    %476 = math.exp %475 : vector<16x12xf32>
    %cst_441 = arith.constant 1.000000e+00 : f32
    %477 = vector.broadcast %cst_441 : f32 to vector<16x12xf32>
    %478 = arith.addf %477, %476 : vector<16x12xf32>
    %479 = arith.divf %477, %478 : vector<16x12xf32>
    %480 = arith.addf %281, %468 : vector<16x12xf32>
    %481 = arith.mulf %480, %479 : vector<16x12xf32>
    %482 = math.log %479 : vector<16x12xf32>
    %cst_442 = arith.constant dense<0.000000e+00> : vector<16xf32>
    %483 = vector.multi_reduction <add>, %482, %cst_442 [1] : vector<16x12xf32> to vector<16xf32>
    %484 = vector.shape_cast %483 : vector<16xf32> to vector<16x1xf32>
    %485 = arith.addf %259, %484 : vector<16x1xf32>
    %c0_443 = arith.constant 0 : index
    %c0_444 = arith.constant 0 : index
    %c0_445 = arith.constant 0 : index
    %c0_446 = arith.constant 0 : index
    %486 = vector.load %arg16[%c0_443, %c0_444, %c0_445, %c0_446] : memref<1x2x16x12xf32, #tpu.memory_space<vmem>>, vector<1x1x16x12xf32>
    %487 = vector.shape_cast %486 : vector<1x1x16x12xf32> to vector<16x12xf32>
    %488 = vector.shape_cast %270 : vector<16x12xf32> to vector<1x1x16x12xf32>
    tpu.vector_store %arg16[%c0_443, %c0_444, %c0_445, %c0_446], %488 {strides = array<i32>} : memref<1x2x16x12xf32, #tpu.memory_space<vmem>>, vector<1x1x16x12xf32>,
    %c0_447 = arith.constant 0 : index
    %c1_448 = arith.constant 1 : index
    %c0_449 = arith.constant 0 : index
    %c0_450 = arith.constant 0 : index
    %489 = vector.load %arg16[%c0_447, %c1_448, %c0_449, %c0_450] : memref<1x2x16x12xf32, #tpu.memory_space<vmem>>, vector<1x1x16x12xf32>
    %490 = vector.shape_cast %489 : vector<1x1x16x12xf32> to vector<16x12xf32>
    %491 = vector.shape_cast %481 : vector<16x12xf32> to vector<1x1x16x12xf32>
    tpu.vector_store %arg16[%c0_447, %c1_448, %c0_449, %c0_450], %491 {strides = array<i32>} : memref<1x2x16x12xf32, #tpu.memory_space<vmem>>, vector<1x1x16x12xf32>,
    %cst_451 = arith.constant 1.000000e+00 : f32
    %492 = vector.broadcast %cst_451 : f32 to vector<1x16xf32>
    %cst_452 = arith.constant dense<0.000000e+00> : vector<1x1xf32>
    %493 = tpu.matmul %492, %485, %cst_452 {dimension_numbers = #tpu.dot_dimension_numbers<[1], [0], [0], [1], [0, 0, 1, 1], [], []>} : vector<1x16xf32>, vector<16x1xf32>, vector<1x1xf32> -> vector<1x1xf32>
    %c0_453 = arith.constant 0 : index
    %c0_454 = arith.constant 0 : index
    %c0_455 = arith.constant 0 : index
    %494 = vector.load %arg17[%c0_453, %c0_454, %c0_455] : memref<1x1x1xf32, #tpu.memory_space<vmem>>, vector<1x1x1xf32>
    %495 = vector.shape_cast %494 : vector<1x1x1xf32> to vector<1x1xf32>
    %496 = vector.shape_cast %493 : vector<1x1xf32> to vector<1x1x1xf32>
    tpu.vector_store %arg17[%c0_453, %c0_454, %c0_455], %496 {strides = array<i32>} : memref<1x1x1xf32, #tpu.memory_space<vmem>>, vector<1x1x1xf32>,
    return
  }
  func.func @transform_0(%arg0: i32) -> (i32, i32, i32, i32) {
    %c0_i32 = arith.constant 0 : i32
    %c0_i32_0 = arith.constant 0 : i32
    %c0_i32_1 = arith.constant 0 : i32
    %c0_i32_2 = arith.constant 0 : i32
    return %arg0, %c0_i32, %c0_i32_0, %c0_i32_1 : i32, i32, i32, i32
  }
  func.func @transform_1(%arg0: i32) -> (i32, i32, i32) {
    %c0_i32 = arith.constant 0 : i32
    %c0_i32_0 = arith.constant 0 : i32
    %c0_i32_1 = arith.constant 0 : i32
    %c0_i32_2 = arith.constant 0 : i32
    return %c0_i32, %c0_i32_0, %c0_i32_1 : i32, i32, i32
  }
  func.func @transform_2(%arg0: i32) -> (i32, i32, i32) {
    %c0_i32 = arith.constant 0 : i32
    %c0_i32_0 = arith.constant 0 : i32
    %c0_i32_1 = arith.constant 0 : i32
    %c0_i32_2 = arith.constant 0 : i32
    return %c0_i32, %c0_i32_0, %c0_i32_1 : i32, i32, i32
  }
  func.func @transform_3(%arg0: i32) -> (i32, i32, i32) {
    %c0_i32 = arith.constant 0 : i32
    %c0_i32_0 = arith.constant 0 : i32
    %c0_i32_1 = arith.constant 0 : i32
    %c0_i32_2 = arith.constant 0 : i32
    return %c0_i32, %c0_i32_0, %c0_i32_1 : i32, i32, i32
  }
  func.func @transform_4(%arg0: i32) -> (i32, i32, i32) {
    %c0_i32 = arith.constant 0 : i32
    %c0_i32_0 = arith.constant 0 : i32
    %c0_i32_1 = arith.constant 0 : i32
    %c0_i32_2 = arith.constant 0 : i32
    return %c0_i32, %c0_i32_0, %c0_i32_1 : i32, i32, i32
  }
  func.func @transform_5(%arg0: i32) -> (i32, i32, i32) {
    %c0_i32 = arith.constant 0 : i32
    %c0_i32_0 = arith.constant 0 : i32
    %c0_i32_1 = arith.constant 0 : i32
    %c0_i32_2 = arith.constant 0 : i32
    return %c0_i32, %c0_i32_0, %c0_i32_1 : i32, i32, i32
  }
  func.func @transform_6(%arg0: i32) -> (i32, i32, i32) {
    %c0_i32 = arith.constant 0 : i32
    %c0_i32_0 = arith.constant 0 : i32
    %c0_i32_1 = arith.constant 0 : i32
    %c0_i32_2 = arith.constant 0 : i32
    return %c0_i32, %c0_i32_0, %c0_i32_1 : i32, i32, i32
  }
  func.func @transform_7(%arg0: i32) -> (i32, i32, i32, i32) {
    %c0_i32 = arith.constant 0 : i32
    %c0_i32_0 = arith.constant 0 : i32
    %c0_i32_1 = arith.constant 0 : i32
    %c0_i32_2 = arith.constant 0 : i32
    %c0_i32_3 = arith.constant 0 : i32
    return %c0_i32, %c0_i32_0, %c0_i32_1, %c0_i32_2 : i32, i32, i32, i32
  }
  func.func @transform_8(%arg0: i32) -> (i32, i32, i32) {
    %c0_i32 = arith.constant 0 : i32
    %c0_i32_0 = arith.constant 0 : i32
    %c0_i32_1 = arith.constant 0 : i32
    %c0_i32_2 = arith.constant 0 : i32
    return %c0_i32, %c0_i32_0, %c0_i32_1 : i32, i32, i32
  }
  func.func @transform_9(%arg0: i32) -> (i32, i32, i32) {
    %c0_i32 = arith.constant 0 : i32
    %c0_i32_0 = arith.constant 0 : i32
    %c0_i32_1 = arith.constant 0 : i32
    %c0_i32_2 = arith.constant 0 : i32
    return %c0_i32, %c0_i32_0, %c0_i32_1 : i32, i32, i32
  }
  func.func @transform_10(%arg0: i32) -> (i32, i32, i32) {
    %c0_i32 = arith.constant 0 : i32
    %c0_i32_0 = arith.constant 0 : i32
    %c0_i32_1 = arith.constant 0 : i32
    %c0_i32_2 = arith.constant 0 : i32
    return %c0_i32, %c0_i32_0, %c0_i32_1 : i32, i32, i32
  }
  func.func @transform_11(%arg0: i32) -> (i32, i32, i32, i32) {
    %c0_i32 = arith.constant 0 : i32
    %c0_i32_0 = arith.constant 0 : i32
    %c0_i32_1 = arith.constant 0 : i32
    %c0_i32_2 = arith.constant 0 : i32
    %c0_i32_3 = arith.constant 0 : i32
    return %c0_i32, %c0_i32_0, %c0_i32_1, %c0_i32_2 : i32, i32, i32, i32
  }
  func.func @transform_12(%arg0: i32) -> (i32, i32, i32) {
    %c0_i32 = arith.constant 0 : i32
    %c0_i32_0 = arith.constant 0 : i32
    %c0_i32_1 = arith.constant 0 : i32
    %c0_i32_2 = arith.constant 0 : i32
    return %c0_i32, %c0_i32_0, %c0_i32_1 : i32, i32, i32
  }
  func.func @transform_13(%arg0: i32) -> (i32, i32, i32, i32) {
    %c0_i32 = arith.constant 0 : i32
    %c0_i32_0 = arith.constant 0 : i32
    %c0_i32_1 = arith.constant 0 : i32
    %c0_i32_2 = arith.constant 0 : i32
    %c0_i32_3 = arith.constant 0 : i32
    return %c0_i32, %c0_i32_0, %c0_i32_1, %c0_i32_2 : i32, i32, i32, i32
  }
  func.func @transform_14(%arg0: i32) -> (i32, i32, i32) {
    %c0_i32 = arith.constant 0 : i32
    %c0_i32_0 = arith.constant 0 : i32
    %c0_i32_1 = arith.constant 0 : i32
    %c0_i32_2 = arith.constant 0 : i32
    return %c0_i32, %c0_i32_0, %c0_i32_1 : i32, i32, i32
  }
  func.func @transform_15(%arg0: i32) -> (i32, i32, i32, i32) {
    %c0_i32 = arith.constant 0 : i32
    %c0_i32_0 = arith.constant 0 : i32
    %c0_i32_1 = arith.constant 0 : i32
    %c0_i32_2 = arith.constant 0 : i32
    return %arg0, %c0_i32, %c0_i32_0, %c0_i32_1 : i32, i32, i32, i32
  }
  func.func @transform_16(%arg0: i32) -> (i32, i32, i32) {
    %c0_i32 = arith.constant 0 : i32
    %c0_i32_0 = arith.constant 0 : i32
    %c0_i32_1 = arith.constant 0 : i32
    return %arg0, %c0_i32, %c0_i32_0 : i32, i32, i32
  }
}

</mosaic_0001>

<bundles_post_ra>
// kernel: flownet_encode.3
= control target key start
LH: loop header
LB: loop body
LE: loop exit
PB: predicated region body
PF: predicated region fallthrough
CT: control target
= control target key end

     0   :  { %s6445_s21 = smov 0   ;;  %s7339_s0 = inlined_call_operand.vmem [shape: f32[2,2,16,12], index: 0, kind: input, shape index: {}]   ;;  %s7340_s1 = inlined_call_operand.vmem [shape: f32[2,12,12], index: 1, kind: input, shape index: {}]   ;;  %s7341_s2 = inlined_call_operand.vmem [shape: f32[2,12,12], index: 2, kind: input, shape index: {}]   ;;  %s7342_s3 = inlined_call_operand.vmem [shape: f32[2,12,12], index: 3, kind: input, shape index: {}]   ;;  %s7343_s4 = inlined_call_operand.vmem [shape: f32[2,12,12], index: 4, kind: input, shape index: {}]   ;;  %s7344_s5 = inlined_call_operand.vmem [shape: f32[2,1,12], index: 5, kind: input, shape index: {}]   ;;  %s7345_s6 = inlined_call_operand.vmem [shape: f32[2,1,12], index: 6, kind: input, shape index: {}]   ;;  %s7346_s7 = inlined_call_operand.vmem [shape: bf16[2,9,12,32], index: 7, kind: input, shape index: {}]   ;;  %s7347_s8 = inlined_call_operand.vmem [shape: f32[2,1,32], index: 8, kind: input, shape index: {}]   ;;  %s7348_s9 = inlined_call_operand.vmem [shape: bf16[2,32,32], index: 9, kind: input, shape index: {}]   ;;  %s7349_s10 = inlined_call_operand.vmem [shape: f32[2,1,32], index: 10, kind: input, shape index: {}]   ;;  %s7350_s11 = inlined_call_operand.vmem [shape: bf16[2,9,32,12], index: 11, kind: input, shape index: {}]   ;;  %s7351_s12 = inlined_call_operand.vmem [shape: f32[2,1,12], index: 12, kind: input, shape index: {}]   ;;  %s7352_s13 = inlined_call_operand.vmem [shape: bf16[2,9,32,12], index: 13, kind: input, shape index: {}]   ;;  %s7353_s14 = inlined_call_operand.vmem [shape: f32[2,1,12], index: 14, kind: input, shape index: {}]   ;;  %s7354_s15 = inlined_call_operand.vmem [shape: f32[2,2,16,12], index: 15, kind: output, shape index: {0}]   ;;  %s7355_s16 = inlined_call_operand.vmem [shape: f32[2,1,1], index: 16, kind: output, shape index: {1}]  }
   0x1   :  { %7356 = sst [smem:[#allocation4_spill]] %s7339_s0 }
   0x2 LB: > { %s5097_s22 = sadd.s32 4294967295, %s6353_s21   ;;  %p5101_p0 = scmp.ge.s32.totalorder %s6353_s21, 1  ;;  %s6353_s21 = sphi %s6445_s21, %s27_s21  }
   0x3   : > { %p465_p1 = scmp.lt.s32.totalorder %s6353_s21, 3 }
   0x5   : > { %p466_p2 = pnand %p5101_p0, %p465_p1 }
   0x6   : > { %v590_v0 = vld [vmem:[%s7342_s3] sm:$0xff] (!%p466_p2)  ;;  %v591_v1 = vld [vmem:[%s7342_s3 + $0x8] sm:$0xf] (!%p466_p2)  ;;  %vm598_vm0 = vcmask (!%p466_p2), 1043456   ;;  %p518_p3 = scmp.lt.s32.totalorder (!%p466_p2), %s5097_s22, 1  ;;  %vm6355_vm1 = vmmov (!%p466_p2), 1   ;;  %v544_v22 = vlaneseq (!%p466_p2) }
   0x7   : > { %469 = sbr.rel (%p466_p2) target bundleno = 2449 (0x991), region = 80  ;;  %v6157_v2 = vpack.c.bf16 (!%p466_p2), %v591_v1, %v590_v0  ;;  %vm6459_vm2 = vmpackc.low (!%p466_p2), %vm598_vm0, %vm6355_vm1  ;;  %vm532_vm3 = vcmask (!%p466_p2), 97280   ;;  %v588_v4 = vld [vmem:[%s7340_s1] sm:$0xff] (!%p466_p2)  ;;  %v589_v5 = vld [vmem:[%s7340_s1 + $0x8] sm:$0xf] (!%p466_p2)  ;;  %v6356_v9 = vmov (!%p466_p2), 0.0  }
   0x8   : > { %v6163_v6 = vpack.c.bf16 (!%p466_p2), %v589_v5, %v588_v4  ;;  %v772_v7 = vld [vmem:[%s7343_s4] sm:$0xff] (!%p466_p2)  ;;  %v773_v8 = vld [vmem:[%s7343_s4 + $0x8] sm:$0xf] (!%p466_p2)  ;;  %534 = vst.msk [vmem:[#allocation2 + $0x8] sm:$0xff] (!%p466_p2), %vm532_vm3, %v6356_v9  ;;  %535 = vst.msk [vmem:[#allocation2 + $0x10] sm:$0xff] (!%p466_p2), %vm532_vm3, %v6356_v9  ;;  %s7359_s25 = sld [smem:[#allocation4_spill]] (!%p466_p2) }
   0x9   : > { %533 = vst.msk [vmem:[#allocation2] sm:$0xff] (!%p466_p2), %vm532_vm3, %v6356_v9  ;;  %6159 = vmatprep.subr.msk.bf16.mxu0 (!%p466_p2), %vm6459_vm2, %v6157_v2  ;;  %v6169_v10 = vpack.c.bf16 (!%p466_p2), %v773_v8, %v772_v7  ;;  %v770_v15 = vld [vmem:[%s7341_s2] sm:$0xff] (!%p466_p2)  ;;  %v771_v16 = vld [vmem:[%s7341_s2 + $0x8] sm:$0xf] (!%p466_p2)  ;;  %vm962_vm4 = vcmask (!%p466_p2), 1045504   ;;  %vm6357_vm5 = vmmov (!%p466_p2), 0  }
   0xa   : > { %6162 = vmatpush3.bf16.msk.msra.mxu0 (!%p466_p2), %vm6459_vm2, %v6157_v2  ;;  %v6175_v17 = vpack.c.bf16 (!%p466_p2), %v771_v16, %v770_v15  ;;  %v6229_v18 = vld [vmem:[%s7346_s7 + $0x8] sm:$0x3f] (!%p466_p2)   ;;  %v6230_v19 = vld [vmem:[%s7346_s7] sm:$0x3f] (!%p466_p2)   ;;  %vm536_vm6 = vcmask (!%p466_p2), 91136   ;;  %v545_v23 = vshrl.u32 (!%p466_p2), %v544_v22, 7 }
   0xb   : > { %6165 = vmatprep.subr.msk.bf16.mxu0 (!%p466_p2), %vm6459_vm2, %v6163_v6  ;;  %6171 = vmatprep.subr.msk.bf16.mxu1 (!%p466_p2), %vm6459_vm2, %v6169_v10  ;;  %v964_v20 = vsel (!%p466_p2), %vm962_vm4, %v6229_v18, 0  ;;  %v1016_v21 = vsel (!%p466_p2), %vm962_vm4, %v6230_v19, 0  ;;  %537 = vst.msk [vmem:[#allocation2 + $0x18] sm:$0x3] (!%p466_p2), %vm536_vm6, %v6356_v9  ;;  %v5118_v24 = vld [vmem:[%s7344_s5] ss:$0 sm:$0xff] (!%p466_p2) }
   0xc   : > { %6174 = vmatpush3.bf16.msk.msra.mxu1 (!%p466_p2), %vm6459_vm2, %v6169_v10  ;;  %v546_v25 = vadd.s32 (!%p466_p2), 8, %v545_v23  ;;  %v551_v30 = vand.u32 (!%p466_p2), 3, %v545_v23  ;;  %v6231_v32 = vld [vmem:[%s7346_s7 + $0x10] sm:$0x3f] (!%p466_p2)   ;;  %v6232_v35 = vld [vmem:[%s7346_s7 + $0x18] sm:$0x3f] (!%p466_p2)  }
   0xd   : > { %6177 = vmatprep.subr.msk.bf16.mxu1 (!%p466_p2), %vm6459_vm2, %v6175_v17  ;;  %v1076_v42 = vsel (!%p466_p2), %vm962_vm4, %v6231_v32, 0  ;;  %v1138_v49 = vsel (!%p466_p2), %vm962_vm4, %v6232_v35, 0  ;;  %v6233_v54 = vld [vmem:[%s7346_s7 + $0x20] sm:$0x3f] (!%p466_p2)   ;;  %v6234_v57 = vld [vmem:[%s7346_s7 + $0x28] sm:$0x3f] (!%p466_p2)  }
   0xe   : > { %s7361_s22 = smov (!%p518_p3, %s5097_s22), 1  ;;  %v558_v31 = vand.u32 3, %v546_v25  ;;  %vm571_vm7 = vcmp.ge.s32.totalorder %v551_v30, 1  ;;  %vm577_vm9 = vcmp.le.s32.totalorder %v551_v30, 2  ;;  %v1198_v59 = vsel %vm962_vm4, %v6233_v54, 0 }
   0xf   : > { %s5495_s20 = sshll.u32 %s7361_s22, 5  ;;  %v6551_v33 = vsel %vm571_vm7, 1.0, %v6356_v9  ;;  %v6566_v44 = vsel %vm577_vm9, 1.0, %v6356_v9  ;;  %v1260_v61 = vsel %vm962_vm4, %v6234_v57, 0  ;;  %v6235_v0 = vld [vmem:[%s7346_s7 + $0x30] sm:$0x3f]   ;;  %s530_s19 = scalar_lea.vmem %s7355_s16, %s7361_s22 }
  0x10   : > { %s522_s26 = scalar_lea.vmem %s7359_s25, %s5495_s20  ;;  %vm572_vm8 = vcmp.ge.s32.totalorder %v558_v31, 1  ;;  %vm578_vm10 = vcmp.le.s32.totalorder %v558_v31, 2  ;;  %v1322_v8 = vsel %vm962_vm4, %v6235_v0, 0  ;;  %v6237_v15 = vld [vmem:[%s7346_s7 + $0x40] sm:$0x3f]   ;;  %vm538_vm11 = vcmask 261120   ;;  %s6984_s29 = scalar_lea.vmem %s7354_s15, %s5495_s20 }
  0x11   : > { %v5110_v11 = vld [vmem:[%s522_s26 + $0x10] sm:$0xff]  ;;  %v5111_v12 = vld [vmem:[%s522_s26 + $0x18] sm:$0xff]  ;;  %v583_v13 = vld [vmem:[%s522_s26] sm:$0xff]  ;;  %v6554_v34 = vsel %vm572_vm8, 1.0, %v6356_v9  ;;  %v6569_v45 = vsel %vm578_vm10, 1.0, %v6356_v9  ;;  %v1444_v18 = vsel %vm962_vm4, %v6237_v15, 0 }
  0x12   : > { %5686 = vmatprep.mubr.msk.f32.mxu0 %vm532_vm3, %v5110_v11  ;;  %5700 = vmatprep.mubr.msk.f32.mxu1 %vm532_vm3, %v5110_v11  ;;  %v584_v14 = vld [vmem:[%s522_s26 + $0x8] sm:$0xff]  ;;  %539 = vst.msk [vmem:[#allocation3] sm:$0xff] %vm538_vm11, %v6356_v9  ;;  %540 = vst.msk [vmem:[#allocation3 + $0x8] sm:$0xff] %vm538_vm11, %v6356_v9  ;;  %vm542_vm12 = vcmask 254976   ;;  %vm4941_vm13 = vcmask 130048   ;;  %vm5015_vm14 = vcmask 0  }
  0x13   : > { %5687 = vmatmul.mubr.msk.f32.vlgmr.msra.gmra.mrb[0].mxu0 %vm532_vm3, %v5111_v12  ;;  %5701 = vmatmul.mubr.msk.f32.vlgmr.msra.gmra.mrb[0].mxu1 %vm532_vm3, %v5111_v12  ;;  %541 = vst.msk [vmem:[#allocation3 + $0x10] sm:$0xff] %vm538_vm11, %v6356_v9 }
  0x14   : > { %6168 = vmatpush3.bf16.msk.msra.mxu0 %vm6459_vm2, %v6163_v6  ;;  %5693 = vmatprep.mubr.msk.f32.mxu0 %vm532_vm3, %v583_v13  ;;  %v6236_v6 = vld [vmem:[%s7346_s7 + $0x38] sm:$0x3f]   ;;  %543 = vst.msk [vmem:[#allocation3 + $0x18] sm:$0x3] %vm542_vm12, %v6356_v9 }
  0x15   : > { %5710 = vmatprep.subr.bf16.mxu0 %v6356_v9  ;;  %5707 = vmatprep.mubr.msk.f32.mxu1 %vm532_vm3, %v583_v13  ;;  %v1382_v12 = vsel %vm962_vm4, %v6236_v6, 0 }
  0x16   : > { %6180 = vmatpush3.bf16.msk.msra.mxu1 %vm6459_vm2, %v6175_v17 }
  0x17   : > { %5716 = vmatprep.subr.bf16.mxu1 %v6356_v9 }
  0x1b   : > { %5694 = vmatmul.mubr.msk.f32.vlgmr.msra.gmra.mrb[0].mxu0 %vm532_vm3, %v584_v14  ;;  %5708 = vmatmul.mubr.msk.f32.vlgmr.msra.gmra.mrb[0].mxu1 %vm532_vm3, %v584_v14 }
  0x1c   : > { %5712 = vmatprep.mubr.msk.bf16.mxu0 %vm6357_vm5, %v6356_v9  ;;  %5711 = vmatpush3.bf16.msra.mxu0 %v964_v20 }
  0x1d   : > { %5717 = vmatpush3.bf16.msra.mxu1 %v1016_v21  ;;  %5718 = vmatprep.mubr.msk.bf16.mxu1 %vm6357_vm5, %v6356_v9 }
  0x1e   : > { %5722 = vmatprep.subr.bf16.mxu0 %v6356_v9  ;;  %5728 = vmatprep.subr.bf16.mxu1 %v6356_v9 }
  0xee   : > { %v5695_v26 = vpop.f32.mrb[0].mxu0 }
  0xef   : > { %v6539_v27 = vadd.f32 %v5695_v26, %v5118_v24  ;;  %v752_v28 = vpop.f32.mrb[1].mxu0  ;;  %v6238_v26 = vld [vmem:[%s7348_s9] sm:$0xff]  }
  0xf0   : > { %v6541_v29 = vadd.f32 %v5118_v24, %v752_v28  ;;  %v6641_v24 = vpop.f32.mrb[0].mxu1  ;;  %v6239_v28 = vld [vmem:[%s7348_s9 + $0x8] sm:$0xff]  }
  0xf1   : > { %940 = vst.msk [vmem:[#allocation2 + $0xd] sm:$0xff] %vm532_vm3, %v6539_v27  ;;  %v6643_v25 = vpop.f32.mrb[1].mxu1 }
  0xf2   : > { %939 = vst.msk [vmem:[#allocation2 + $0x5] sm:$0xff] %vm532_vm3, %v6541_v29 }
  0xf8   : > { %v1244_v63 = vld [vmem:[#allocation2 + $0xe] sm:$0xff] }
  0xf9   : > { %v948_v36 = vld [vmem:[#allocation2 + $0x1] sm:$0xff]  ;;  %v6559_v37 = vld [vmem:[#allocation2 + $0x9] sm:$0xff]  ;;  %v1246_v5 = vmul.f32 %v6569_v45, %v1244_v63  ;;  %v1368_v17 = vld [vmem:[#allocation2 + $0x11] sm:$0xff] }
  0xfa   : > { %v941_v38 = vld [vmem:[#allocation2] sm:$0xff]  ;;  %v950_v39 = vpack.c.bf16 %v6559_v37, %v948_v36  ;;  %v942_v40 = vld [vmem:[#allocation2 + $0x8] sm:$0xff]  ;;  %v1306_v10 = vld [vmem:[#allocation2 + $0x10] sm:$0xff]  ;;  %v1369_v20 = vpack.c.bf16 %v1368_v17, %v6559_v37 }
  0xfb   : > { %v943_v41 = vmul.f32 %v6551_v33, %v941_v38  ;;  %v944_v43 = vmul.f32 %v6554_v34, %v942_v40  ;;  %v1059_v46 = vld [vmem:[#allocation2 + $0x2] sm:$0xff]  ;;  %v6571_v47 = vld [vmem:[#allocation2 + $0xa] sm:$0xff]  ;;  %v1307_v13 = vmul.f32 %v6551_v33, %v942_v40  ;;  %v1308_v14 = vmul.f32 %v6554_v34, %v1306_v10  ;;  %v1428_v19 = vld [vmem:[#allocation2 + $0x12] sm:$0xff] }
  0xfc   : > { %5713 = vmatmul.mubr.msk.bf16.vlgmr.msra.gmra.mrb[4].mxu0 %vm532_vm3, %v950_v39  ;;  %v1061_v50 = vmul.f32 %v6566_v44, %v1059_v46  ;;  %v1062_v51 = vmul.f32 %v6569_v45, %v6571_v47  ;;  %v1121_v52 = vld [vmem:[#allocation2 + $0x4] sm:$0xff]  ;;  %v1122_v53 = vld [vmem:[#allocation2 + $0xc] sm:$0xff]  ;;  %v1429_v21 = vmul.f32 %v6566_v44, %v6571_v47  ;;  %v1430_v22 = vmul.f32 %v6569_v45, %v1428_v19  ;;  %v5160_v19 = vld [vmem:[%s7347_s8] ss:$0 sm:$0xff] }
  0xfd   : > { %v945_v48 = vpack.c.bf16 %v944_v43, %v943_v41  ;;  %5723 = vmatpush3.bf16.msra.mxu0 %v1076_v42  ;;  %5724 = vmatprep.mubr.msk.bf16.mxu0 %vm6357_vm5, %v6356_v9  ;;  %v1123_v55 = vmul.f32 %v6551_v33, %v1121_v52  ;;  %v1124_v56 = vmul.f32 %v6554_v34, %v1122_v53  ;;  %v1243_v62 = vld [vmem:[#allocation2 + $0x6] sm:$0xff] }
  0xfe   : > { %5734 = vmatprep.subr.bf16.mxu0 %v6356_v9  ;;  %v1063_v58 = vpack.c.bf16 %v1062_v51, %v1061_v50  ;;  %v1183_v1 = vld [vmem:[#allocation2 + $0x5] sm:$0xff]  ;;  %v1184_v2 = vld [vmem:[#allocation2 + $0xd] sm:$0xff]  ;;  %v1245_v4 = vmul.f32 %v6566_v44, %v1243_v62  ;;  %v1309_v16 = vpack.c.bf16 %v1308_v14, %v1307_v13  ;;  %v1431_v23 = vpack.c.bf16 %v1430_v22, %v1429_v21 }
  0xff   : > { %5719 = vmatmul.mubr.msk.bf16.vlgmr.msra.gmra.mrb[4].mxu1 %vm532_vm3, %v945_v48  ;;  %v1125_v60 = vpack.c.bf16 %v1124_v56, %v1123_v55  ;;  %v1185_v7 = vpack.c.bf16 %v1184_v2, %v1183_v1 }
 0x100   : > { %5729 = vmatpush3.bf16.msra.mxu1 %v1138_v49  ;;  %5730 = vmatprep.mubr.msk.bf16.mxu1 %vm6357_vm5, %v6356_v9  ;;  %v1247_v11 = vpack.c.bf16 %v1246_v5, %v1245_v4 }
 0x101   : > { %5740 = vmatprep.subr.bf16.mxu1 %v6356_v9 }
 0x104   : > { %5725 = vmatmul.mubr.msk.bf16.vlgmr.msra.gmra.mrb[8].mxu0 %vm532_vm3, %v1063_v58 }
 0x105   : > { %5735 = vmatpush3.bf16.msra.mxu0 %v1198_v59  ;;  %5736 = vmatprep.mubr.msk.bf16.mxu0 %vm6357_vm5, %v6356_v9 }
 0x106   : > { %5746 = vmatprep.subr.bf16.mxu0 %v6356_v9 }
 0x107   : > { %5731 = vmatmul.mubr.msk.bf16.vlgmr.msra.gmra.mrb[8].mxu1 %vm532_vm3, %v1125_v60 }
 0x108   : > { %5741 = vmatpush3.bf16.msra.mxu1 %v1260_v61  ;;  %5742 = vmatprep.mubr.msk.bf16.mxu1 %vm6357_vm5, %v6356_v9 }
 0x109   : > { %5752 = vmatprep.subr.bf16.mxu1 %v6356_v9 }
 0x10c   : > { %5737 = vmatmul.mubr.msk.bf16.vlgmr.msra.gmra.mrb[12].mxu0 %vm532_vm3, %v1185_v7 }
 0x10d   : > { %5747 = vmatpush3.bf16.msra.mxu0 %v1322_v8  ;;  %5748 = vmatprep.mubr.msk.bf16.mxu0 %vm6357_vm5, %v6356_v9 }
 0x10e   : > { %5758 = vmatprep.subr.bf16.mxu0 %v6356_v9 }
 0x10f   : > { %5743 = vmatmul.mubr.msk.bf16.vlgmr.msra.gmra.mrb[12].mxu1 %vm532_vm3, %v1247_v11 }
 0x110   : > { %5753 = vmatpush3.bf16.msra.mxu1 %v1382_v12  ;;  %5754 = vmatprep.mubr.msk.bf16.mxu1 %vm6357_vm5, %v6356_v9 }
 0x111   : > { %5764 = vmatprep.subr.bf16.mxu1 %v6356_v9 }
 0x114   : > { %5749 = vmatmul.mubr.msk.bf16.vlgmr.msra.gmra.mrb[16].mxu0 %vm532_vm3, %v1309_v16 }
 0x115   : > { %5759 = vmatpush3.bf16.msra.mxu0 %v1444_v18  ;;  %5760 = vmatprep.mubr.msk.bf16.mxu0 %vm6357_vm5, %v6356_v9 }
 0x116   : > { %5772 = vmatprep.subr.bf16.mxu0 %v6356_v9 }
 0x117   : > { %5755 = vmatmul.mubr.msk.bf16.vlgmr.msra.gmra.mrb[16].mxu1 %vm532_vm3, %v1369_v20 }
 0x118   : > { %5768 = vmatprep.mubr.msk.bf16.mxu1 %vm6357_vm5, %v6356_v9  ;;  %5765 = vmatpush3.bf16.msra.mxu1 %v6238_v26 }
 0x119   : > { %5766 = vmatprep.subr.bf16.mxu1 %v6356_v9 }
 0x11c   : > { %5761 = vmatmul.mubr.msk.bf16.vlgmr.msra.gmra.mrb[20].mxu0 %vm532_vm3, %v1431_v23  ;;  %5767 = vmatpush3.bf16.msra.mxu1 %v6239_v28 }
 0x11d   : > { %5776 = vmatprep.mubr.msk.bf16.mxu0 %vm6357_vm5, %v6356_v9  ;;  %5780 = vmatprep.subr.bf16.mxu1 %v6356_v9 }
 0x1cf   : > { %v1000_v30 = vpop.f32.mrb[4].mxu0 }
 0x1d0   : > { %v5714_v31 = vpop.f32.mrb[5].mxu0 }
 0x1d1   : > { %v1003_v32 = vpop.f32.mrb[6].mxu0 }
 0x1d2   : > { %v1052_v35 = vpop.f32.mrb[4].mxu1  ;;  %v5715_v36 = vpop.f32.mrb[7].mxu0 }
 0x1d3   : > { %v1053_v37 = vadd.f32 %v1052_v35, %v1000_v30  ;;  %v5720_v38 = vpop.f32.mrb[5].mxu1  ;;  %v6240_v36 = vld [vmem:[%s7350_s11 + $0x10] sm:$0xff]  }
 0x1d4   : > { %v1055_v39 = vpop.f32.mrb[6].mxu1  ;;  %5773 = vmatpush3.bf16.msra.mxu0 %v6240_v36  ;;  %v6242_v38 = vld [vmem:[%s7350_s11 + $0x18] sm:$0xff]  }
 0x1d5   : > { %v1056_v40 = vadd.f32 %v1055_v39, %v1003_v32  ;;  %v5721_v41 = vpop.f32.mrb[7].mxu1  ;;  %v6243_v39 = vld [vmem:[%s7352_s13 + $0x18] sm:$0xff]   ;;  %5774 = vmatprep.subr.bf16.mxu0 %v6356_v9 }
 0x1d6   : > { %v6262_v36 = vld [vmem:[%s7350_s11 + $0x58] sm:$0xff]  }
 0x1d7   : > { %v1112_v42 = vpop.f32.mrb[8].mxu0 }
 0x1d8   : > { %v1119_v43 = vadd.f32 %v1112_v42, %v1053_v37  ;;  %v5726_v46 = vpop.f32.mrb[9].mxu0  ;;  %v6241_v37 = vld [vmem:[%s7352_s13 + $0x10] sm:$0xff]   ;;  %5775 = vmatpush3.bf16.msra.mxu0 %v6242_v38 }
 0x1d9   : > { %v1115_v47 = vpop.f32.mrb[10].mxu0  ;;  %5788 = vmatprep.subr.bf16.mxu0 %v6356_v9 }
 0x1da   : > { %v1120_v48 = vadd.f32 %v1115_v47, %v1056_v40  ;;  %v1174_v49 = vpop.f32.mrb[8].mxu1  ;;  %v5727_v50 = vpop.f32.mrb[11].mxu0  ;;  %v5161_v40 = vld [vmem:[%s7349_s10] ss:$0 sm:$0xff] }
 0x1db   : > { %v1181_v51 = vadd.f32 %v1174_v49, %v1119_v43  ;;  %v5732_v52 = vpop.f32.mrb[9].mxu1 }
 0x1dc   : > { %v1177_v53 = vpop.f32.mrb[10].mxu1 }
 0x1dd   : > { %v1182_v54 = vadd.f32 %v1177_v53, %v1120_v48  ;;  %v5733_v55 = vpop.f32.mrb[11].mxu1 }
 0x1df   : > { %v1234_v56 = vpop.f32.mrb[12].mxu0 }
 0x1e0   : > { %v1241_v57 = vadd.f32 %v1234_v56, %v1181_v51  ;;  %v5738_v58 = vpop.f32.mrb[13].mxu0  ;;  %v6244_v51 = vld [vmem:[%s7350_s11] sm:$0xff]  }
 0x1e1   : > { %v1237_v59 = vpop.f32.mrb[14].mxu0  ;;  %v6247_v58 = vld [vmem:[%s7352_s13 + $0x8] sm:$0xff]  }
 0x1e2   : > { %v1242_v60 = vadd.f32 %v1237_v59, %v1182_v54  ;;  %v1296_v61 = vpop.f32.mrb[12].mxu1  ;;  %v5739_v62 = vpop.f32.mrb[15].mxu0  ;;  %v6245_v54 = vld [vmem:[%s7352_s13] sm:$0xff]  }
 0x1e3   : > { %v1303_v63 = vadd.f32 %v1296_v61, %v1241_v57  ;;  %v5744_v0 = vpop.f32.mrb[13].mxu1  ;;  %v6246_v57 = vld [vmem:[%s7350_s11 + $0x8] sm:$0xff]   ;;  %v6248_v62 = vld [vmem:[%s7350_s11 + $0x20] sm:$0xff]  }
 0x1e4   : > { %v1299_v1 = vpop.f32.mrb[14].mxu1 }
 0x1e5   : > { %v1304_v2 = vadd.f32 %v1299_v1, %v1242_v60  ;;  %v5745_v4 = vpop.f32.mrb[15].mxu1 }
 0x1e6   : > { %v6251_v4 = vld [vmem:[%s7352_s13 + $0x28] sm:$0xff]  }
 0x1e7   : > { %v1358_v5 = vpop.f32.mrb[16].mxu0 }
 0x1e8   : > { %v1365_v6 = vadd.f32 %v1358_v5, %v1303_v63  ;;  %v5750_v7 = vpop.f32.mrb[17].mxu0  ;;  %v6249_v63 = vld [vmem:[%s7352_s13 + $0x20] sm:$0xff]  }
 0x1e9   : > { %v1361_v8 = vpop.f32.mrb[18].mxu0 }
 0x1ea   : > { %v1366_v10 = vadd.f32 %v1361_v8, %v1304_v2  ;;  %v1418_v11 = vpop.f32.mrb[16].mxu1  ;;  %v5751_v12 = vpop.f32.mrb[19].mxu0  ;;  %v6250_v2 = vld [vmem:[%s7350_s11 + $0x28] sm:$0xff]   ;;  %v6252_v8 = vld [vmem:[%s7350_s11 + $0x30] sm:$0xff]  }
 0x1eb   : > { %v1425_v13 = vadd.f32 %v1418_v11, %v1365_v6  ;;  %v5756_v14 = vpop.f32.mrb[17].mxu1 }
 0x1ec   : > { %v1421_v15 = vpop.f32.mrb[18].mxu1  ;;  %v6255_v14 = vld [vmem:[%s7352_s13 + $0x38] sm:$0xff]  }
 0x1ed   : > { %v1426_v16 = vadd.f32 %v1421_v15, %v1366_v10  ;;  %v5757_v17 = vpop.f32.mrb[19].mxu1  ;;  %v6253_v10 = vld [vmem:[%s7352_s13 + $0x30] sm:$0xff]  }
 0x1ef   : > { %v1480_v18 = vpop.f32.mrb[20].mxu0 }
 0x1f0   : > { %v1487_v20 = vadd.f32 %v1480_v18, %v1425_v13  ;;  %v5762_v21 = vpop.f32.mrb[21].mxu0  ;;  %v6254_v13 = vld [vmem:[%s7350_s11 + $0x38] sm:$0xff]   ;;  %v6256_v18 = vld [vmem:[%s7350_s11 + $0x40] sm:$0xff]  }
 0x1f1   : > { %v1483_v22 = vpop.f32.mrb[22].mxu0  ;;  %v6258_v21 = vld [vmem:[%s7350_s11 + $0x48] sm:$0xff]  }
 0x1f2   : > { %v1496_v23 = vadd.f32 %v5160_v19, %v1487_v20  ;;  %v1488_v26 = vadd.f32 %v1483_v22, %v1426_v16  ;;  %v5763_v28 = vpop.f32.mrb[23].mxu0  ;;  %v6259_v22 = vld [vmem:[%s7352_s13 + $0x48] sm:$0xff]  }
 0x1f3   : > { %v6260_v28 = vld [vmem:[%s7350_s11 + $0x50] sm:$0xff]  }
 0x1f4   : > { %v1497_v30 = vadd.f32 %v5160_v19, %v1488_v26  ;;  %v1498_v31 = vmax.f32 %v1496_v23, 0.0  ;;  %v6257_v19 = vld [vmem:[%s7352_s13 + $0x40] sm:$0xff]  }
 0x1f6   : > { %v1499_v32 = vmax.f32 %v1497_v30, 0.0  ;;  %v6261_v30 = vld [vmem:[%s7352_s13 + $0x50] sm:$0xff]  }
 0x1f8   : > { %v1500_v35 = vpack.c.bf16 %v1499_v32, %v1498_v31 }
 0x1fa   : > { %5769 = vmatmul.mubr.msk.bf16.vlgmr.msra.gmra.mrb[20].mxu1 %vm538_vm11, %v1500_v35 }
 0x1fb   : > { %5784 = vmatprep.mubr.msk.bf16.mxu1 %vm6357_vm5, %v6356_v9  ;;  %5781 = vmatpush3.bf16.msra.mxu1 %v6241_v37  ;;  %v6263_v37 = vld [vmem:[%s7352_s13 + $0x58] sm:$0xff]  }
 0x1fc   : > { %5782 = vmatprep.subr.bf16.mxu1 %v6356_v9 }
 0x1ff   : > { %5783 = vmatpush3.bf16.msra.mxu1 %v6243_v39 }
 0x200   : > { %5796 = vmatprep.subr.bf16.mxu1 %v6356_v9 }
 0x2cd   : > { %v1561_v41 = vpop.f32.mrb[20].mxu1 }
 0x2ce   : > { %v1562_v42 = vadd.f32 %v5161_v40, %v1561_v41  ;;  %v5770_v43 = vpop.f32.mrb[21].mxu1  ;;  %v6265_v41 = vld [vmem:[%s7352_s13 + $0x60] sm:$0xff]  }
 0x2cf   : > { %v1564_v46 = vpop.f32.mrb[22].mxu1 }
 0x2d0   : > { %v1568_v47 = vmax.f32 %v1562_v42, 0.0  ;;  %v1565_v48 = vadd.f32 %v5161_v40, %v1564_v46  ;;  %v5771_v49 = vpop.f32.mrb[23].mxu1  ;;  %v6264_v40 = vld [vmem:[%s7350_s11 + $0x60] sm:$0xff]   ;;  %v6266_v46 = vld [vmem:[%s7350_s11 + $0x68] sm:$0xff]  }
 0x2d2   : > { %1570 = vst.msk [vmem:[#allocation3 + $0x5] sm:$0xff] %vm538_vm11, %v1568_v47  ;;  %v1569_v50 = vmax.f32 %v1565_v48, 0.0  ;;  %v6267_v47 = vld [vmem:[%s7352_s13 + $0x68] sm:$0xff]  }
 0x2d4   : > { %1571 = vst.msk [vmem:[#allocation3 + $0xd] sm:$0xff] %vm538_vm11, %v1569_v50  ;;  %v6268_v50 = vld [vmem:[%s7350_s11 + $0x70] sm:$0xff]  }
 0x2d9   : > { %v1585_v52 = vld [vmem:[#allocation3 + $0x1] sm:$0xff] }
 0x2da   : > { %v1572_v59 = vld [vmem:[#allocation3] sm:$0xff] }
 0x2db   : > { %v6690_v53 = vld [vmem:[#allocation3 + $0x9] sm:$0xff]  ;;  %v1574_v61 = vmul.f32 %v6551_v33, %v1572_v59 }
 0x2dc   : > { %v1587_v55 = vpack.c.bf16 %v6690_v53, %v1585_v52  ;;  %v6696_v56 = vld [vmem:[#allocation3 + $0x8] sm:$0xff]  ;;  %v2327_v43 = vld [vmem:[#allocation3 + $0x10] sm:$0xff] }
 0x2dd   : > { %v1575_v60 = vmul.f32 %v6554_v34, %v6696_v56  ;;  %v6723_v1 = vld [vmem:[#allocation3 + $0xa] sm:$0xff]  ;;  %v1816_v5 = vld [vmem:[#allocation3 + $0x2] sm:$0xff]  ;;  %v2328_v48 = vmul.f32 %v6551_v33, %v6696_v56  ;;  %v2329_v49 = vmul.f32 %v6554_v34, %v2327_v43 }
 0x2de   : > { %5777 = vmatmul.mubr.msk.bf16.vlgmr.msra.gmra.mrb[24].mxu0 %vm538_vm11, %v1587_v55  ;;  %5785 = vmatmul.mubr.msk.bf16.vlgmr.msra.gmra.mrb[24].mxu1 %vm538_vm11, %v1587_v55  ;;  %v1819_v6 = vmul.f32 %v6569_v45, %v6723_v1  ;;  %v1818_v7 = vmul.f32 %v6566_v44, %v1816_v5  ;;  %v1945_v12 = vld [vmem:[#allocation3 + $0xc] sm:$0xff]  ;;  %v1944_v15 = vld [vmem:[#allocation3 + $0x4] sm:$0xff]  ;;  %v6271_v55 = vld [vmem:[%s7352_s13 + $0x78] sm:$0xff]  }
 0x2df   : > { %5789 = vmatpush3.bf16.msra.mxu0 %v6244_v51  ;;  %5797 = vmatpush3.bf16.msra.mxu1 %v6245_v54  ;;  %v1576_v0 = vpack.c.bf16 %v1575_v60, %v1574_v61  ;;  %v1947_v16 = vmul.f32 %v6554_v34, %v1945_v12  ;;  %v1946_v17 = vmul.f32 %v6551_v33, %v1944_v15  ;;  %v2073_v23 = vld [vmem:[#allocation3 + $0xd] sm:$0xff]  ;;  %v2072_v26 = vld [vmem:[#allocation3 + $0x5] sm:$0xff]  ;;  %v6270_v54 = vld [vmem:[%s7350_s11 + $0x78] sm:$0xff]  }
 0x2e0   : > { %5790 = vmatprep.subr.bf16.mxu0 %v6356_v9  ;;  %5798 = vmatprep.subr.bf16.mxu1 %v6356_v9  ;;  %v1820_v11 = vpack.c.bf16 %v1819_v6, %v1818_v7  ;;  %v2074_v31 = vpack.c.bf16 %v2073_v23, %v2072_v26  ;;  %v2198_v32 = vld [vmem:[#allocation3 + $0x6] sm:$0xff]  ;;  %v2199_v35 = vld [vmem:[#allocation3 + $0xe] sm:$0xff]  ;;  %v2330_v52 = vpack.c.bf16 %v2329_v49, %v2328_v48  ;;  %v5302_v6 = vld [vmem:[%s7343_s4 + $0x18] sm:$0xf] }
 0x2e1   : > { %5792 = vmatprep.mubr.msk.bf16.mxu0 %vm6357_vm5, %v6356_v9  ;;  %5800 = vmatprep.mubr.msk.bf16.mxu1 %vm6357_vm5, %v6356_v9  ;;  %v1948_v20 = vpack.c.bf16 %v1947_v16, %v1946_v17  ;;  %v2200_v38 = vmul.f32 %v6566_v44, %v2198_v32  ;;  %v2201_v39 = vmul.f32 %v6569_v45, %v2199_v35  ;;  %v6269_v51 = vld [vmem:[%s7352_s13 + $0x70] sm:$0xff]   ;;  %v6274_v61 = vld [vmem:[%s7350_s11 + $0x88] sm:$0xff]  }
 0x2e2   : > { %v2455_v56 = vld [vmem:[#allocation3 + $0x11] sm:$0xff] }
 0x2e3   : > { %5791 = vmatpush3.bf16.msra.mxu0 %v6246_v57  ;;  %5799 = vmatpush3.bf16.msra.mxu1 %v6247_v58  ;;  %v2202_v42 = vpack.c.bf16 %v2201_v39, %v2200_v38  ;;  %v6272_v57 = vld [vmem:[%s7350_s11 + $0x80] sm:$0xff]   ;;  %v2456_v59 = vpack.c.bf16 %v2455_v56, %v6690_v53  ;;  %v2581_v60 = vld [vmem:[#allocation3 + $0x12] sm:$0xff]  ;;  %v2582_v53 = vmul.f32 %v6566_v44, %v6723_v1 }
 0x2e4   : > { %5804 = vmatprep.subr.bf16.mxu0 %v6356_v9  ;;  %5812 = vmatprep.subr.bf16.mxu1 %v6356_v9  ;;  %v6273_v58 = vld [vmem:[%s7352_s13 + $0x80] sm:$0xff]   ;;  %v5290_v1 = vld [vmem:[%s7342_s3 + $0x18] sm:$0xf] }
 0x2e6   : > { %5793 = vmatmul.mubr.msk.bf16.vlgmr.msra.gmra.mrb[28].mxu0 %vm538_vm11, %v1576_v0  ;;  %5801 = vmatmul.mubr.msk.bf16.vlgmr.msra.gmra.mrb[28].mxu1 %vm538_vm11, %v1576_v0 }
 0x2e7   : > { %5805 = vmatpush3.bf16.msra.mxu0 %v6248_v62  ;;  %5813 = vmatpush3.bf16.msra.mxu1 %v6249_v63  ;;  %v6275_v62 = vld [vmem:[%s7352_s13 + $0x88] sm:$0xff]   ;;  %v2583_v63 = vmul.f32 %v6569_v45, %v2581_v60 }
 0x2e8   : > { %5806 = vmatprep.subr.bf16.mxu0 %v6356_v9  ;;  %5814 = vmatprep.subr.bf16.mxu1 %v6356_v9 }
 0x2e9   : > { %5808 = vmatprep.mubr.msk.bf16.mxu0 %vm6357_vm5, %v6356_v9  ;;  %5816 = vmatprep.mubr.msk.bf16.mxu1 %vm6357_vm5, %v6356_v9  ;;  %v2584_v0 = vpack.c.bf16 %v2583_v63, %v2582_v53 }
 0x2eb   : > { %5807 = vmatpush3.bf16.msra.mxu0 %v6250_v2  ;;  %5815 = vmatpush3.bf16.msra.mxu1 %v6251_v4  ;;  %v5289_v2 = vld [vmem:[%s7342_s3 + $0x10] sm:$0xff] }
 0x2ec   : > { %5820 = vmatprep.subr.bf16.mxu0 %v6356_v9  ;;  %5828 = vmatprep.subr.bf16.mxu1 %v6356_v9  ;;  %v5301_v4 = vld [vmem:[%s7343_s4 + $0x10] sm:$0xff]  ;;  %v6181_v5 = vpack.c.bf16 %v5290_v1, %v5289_v2 }
 0x2ed   : > { %v6193_v7 = vpack.c.bf16 %v5302_v6, %v5301_v4 }
 0x2ee   : > { %5809 = vmatmul.mubr.msk.bf16.vlgmr.msra.gmra.mrb[32].mxu0 %vm538_vm11, %v1820_v11  ;;  %5817 = vmatmul.mubr.msk.bf16.vlgmr.msra.gmra.mrb[32].mxu1 %vm538_vm11, %v1820_v11  ;;  %v5299_v11 = vld [vmem:[%s7341_s2 + $0x10] sm:$0xff] }
 0x2ef   : > { %5821 = vmatpush3.bf16.msra.mxu0 %v6252_v8  ;;  %5829 = vmatpush3.bf16.msra.mxu1 %v6253_v10  ;;  %v5287_v8 = vld [vmem:[%s7340_s1 + $0x10] sm:$0xff]  ;;  %v5288_v10 = vld [vmem:[%s7340_s1 + $0x18] sm:$0xf] }
 0x2f0   : > { %5822 = vmatprep.subr.bf16.mxu0 %v6356_v9  ;;  %5830 = vmatprep.subr.bf16.mxu1 %v6356_v9  ;;  %v6916_v12 = vpack.c.bf16 %v5288_v10, %v5287_v8 }
 0x2f1   : > { %5824 = vmatprep.mubr.msk.bf16.mxu0 %vm6357_vm5, %v6356_v9  ;;  %5832 = vmatprep.mubr.msk.bf16.mxu1 %vm6357_vm5, %v6356_v9 }
 0x2f3   : > { %5823 = vmatpush3.bf16.msra.mxu0 %v6254_v13  ;;  %5831 = vmatpush3.bf16.msra.mxu1 %v6255_v14  ;;  %v5300_v13 = vld [vmem:[%s7341_s2 + $0x18] sm:$0xf] }
 0x2f4   : > { %5836 = vmatprep.subr.bf16.mxu0 %v6356_v9  ;;  %5844 = vmatprep.subr.bf16.mxu1 %v6356_v9  ;;  %v6921_v14 = vpack.c.bf16 %v5300_v13, %v5299_v11 }
 0x2f6   : > { %5825 = vmatmul.mubr.msk.bf16.vlgmr.msra.gmra.mrb[36].mxu0 %vm538_vm11, %v1948_v20  ;;  %5833 = vmatmul.mubr.msk.bf16.vlgmr.msra.gmra.mrb[36].mxu1 %vm538_vm11, %v1948_v20 }
 0x2f7   : > { %5837 = vmatpush3.bf16.msra.mxu0 %v6256_v18  ;;  %5845 = vmatpush3.bf16.msra.mxu1 %v6257_v19 }
 0x2f8   : > { %5838 = vmatprep.subr.bf16.mxu0 %v6356_v9  ;;  %5846 = vmatprep.subr.bf16.mxu1 %v6356_v9 }
 0x2f9   : > { %5840 = vmatprep.mubr.msk.bf16.mxu0 %vm6357_vm5, %v6356_v9  ;;  %5848 = vmatprep.mubr.msk.bf16.mxu1 %vm6357_vm5, %v6356_v9 }
 0x2fb   : > { %5839 = vmatpush3.bf16.msra.mxu0 %v6258_v21  ;;  %5847 = vmatpush3.bf16.msra.mxu1 %v6259_v22 }
 0x2fc   : > { %5852 = vmatprep.subr.bf16.mxu0 %v6356_v9  ;;  %5860 = vmatprep.subr.bf16.mxu1 %v6356_v9 }
 0x2fe   : > { %5841 = vmatmul.mubr.msk.bf16.vlgmr.msra.gmra.mrb[40].mxu0 %vm538_vm11, %v2074_v31  ;;  %5849 = vmatmul.mubr.msk.bf16.vlgmr.msra.gmra.mrb[40].mxu1 %vm538_vm11, %v2074_v31 }
 0x2ff   : > { %5853 = vmatpush3.bf16.msra.mxu0 %v6260_v28  ;;  %5861 = vmatpush3.bf16.msra.mxu1 %v6261_v30 }
 0x300   : > { %5854 = vmatprep.subr.bf16.mxu0 %v6356_v9  ;;  %5862 = vmatprep.subr.bf16.mxu1 %v6356_v9 }
 0x301   : > { %5856 = vmatprep.mubr.msk.bf16.mxu0 %vm6357_vm5, %v6356_v9  ;;  %5864 = vmatprep.mubr.msk.bf16.mxu1 %vm6357_vm5, %v6356_v9 }
 0x303   : > { %5855 = vmatpush3.bf16.msra.mxu0 %v6262_v36  ;;  %5863 = vmatpush3.bf16.msra.mxu1 %v6263_v37 }
 0x304   : > { %5868 = vmatprep.subr.bf16.mxu0 %v6356_v9  ;;  %5876 = vmatprep.subr.bf16.mxu1 %v6356_v9 }
 0x306   : > { %5857 = vmatmul.mubr.msk.bf16.vlgmr.msra.gmra.mrb[44].mxu0 %vm538_vm11, %v2202_v42  ;;  %5865 = vmatmul.mubr.msk.bf16.vlgmr.msra.gmra.mrb[44].mxu1 %vm538_vm11, %v2202_v42 }
 0x307   : > { %5869 = vmatpush3.bf16.msra.mxu0 %v6264_v40  ;;  %5877 = vmatpush3.bf16.msra.mxu1 %v6265_v41 }
 0x308   : > { %5870 = vmatprep.subr.bf16.mxu0 %v6356_v9  ;;  %5878 = vmatprep.subr.bf16.mxu1 %v6356_v9 }
 0x309   : > { %5872 = vmatprep.mubr.msk.bf16.mxu0 %vm6357_vm5, %v6356_v9  ;;  %5880 = vmatprep.mubr.msk.bf16.mxu1 %vm6357_vm5, %v6356_v9 }
 0x30b   : > { %5871 = vmatpush3.bf16.msra.mxu0 %v6266_v46  ;;  %5879 = vmatpush3.bf16.msra.mxu1 %v6267_v47 }
 0x30c   : > { %5884 = vmatprep.subr.bf16.mxu0 %v6356_v9  ;;  %5892 = vmatprep.subr.bf16.mxu1 %v6356_v9 }
 0x30e   : > { %5873 = vmatmul.mubr.msk.bf16.vlgmr.msra.gmra.mrb[48].mxu0 %vm538_vm11, %v2330_v52  ;;  %5881 = vmatmul.mubr.msk.bf16.vlgmr.msra.gmra.mrb[48].mxu1 %vm538_vm11, %v2330_v52 }
 0x30f   : > { %5885 = vmatpush3.bf16.msra.mxu0 %v6268_v50  ;;  %5893 = vmatpush3.bf16.msra.mxu1 %v6269_v51 }
 0x310   : > { %5886 = vmatprep.subr.bf16.mxu0 %v6356_v9  ;;  %5894 = vmatprep.subr.bf16.mxu1 %v6356_v9 }
 0x311   : > { %5888 = vmatprep.mubr.msk.bf16.mxu0 %vm6357_vm5, %v6356_v9  ;;  %5896 = vmatprep.mubr.msk.bf16.mxu1 %vm6357_vm5, %v6356_v9 }
 0x313   : > { %5887 = vmatpush3.bf16.msra.mxu0 %v6270_v54  ;;  %5895 = vmatpush3.bf16.msra.mxu1 %v6271_v55 }
 0x314   : > { %5900 = vmatprep.subr.bf16.mxu0 %v6356_v9  ;;  %5908 = vmatprep.subr.bf16.mxu1 %v6356_v9 }
 0x316   : > { %5889 = vmatmul.mubr.msk.bf16.vlgmr.msra.gmra.mrb[52].mxu0 %vm538_vm11, %v2456_v59  ;;  %5897 = vmatmul.mubr.msk.bf16.vlgmr.msra.gmra.mrb[52].mxu1 %vm538_vm11, %v2456_v59 }
 0x317   : > { %5901 = vmatpush3.bf16.msra.mxu0 %v6272_v57  ;;  %5909 = vmatpush3.bf16.msra.mxu1 %v6273_v58 }
 0x318   : > { %5902 = vmatprep.subr.bf16.mxu0 %v6356_v9  ;;  %5910 = vmatprep.subr.bf16.mxu1 %v6356_v9 }
 0x319   : > { %5904 = vmatprep.mubr.msk.bf16.mxu0 %vm6357_vm5, %v6356_v9  ;;  %5912 = vmatprep.mubr.msk.bf16.mxu1 %vm6357_vm5, %v6356_v9 }
 0x31b   : > { %5903 = vmatpush3.bf16.msra.mxu0 %v6274_v61  ;;  %5911 = vmatpush3.bf16.msra.mxu1 %v6275_v62 }
 0x31c   : > { %6183 = vmatprep.subr.msk.bf16.mxu0 %vm6459_vm2, %v6181_v5  ;;  %6195 = vmatprep.subr.msk.bf16.mxu1 %vm6459_vm2, %v6193_v7 }
 0x31e   : > { %5905 = vmatmul.mubr.msk.bf16.vlgmr.msra.gmra.mrb[56].mxu0 %vm538_vm11, %v2584_v0  ;;  %5913 = vmatmul.mubr.msk.bf16.vlgmr.msra.gmra.mrb[56].mxu1 %vm538_vm11, %v2584_v0 }
 0x31f   : > { %6186 = vmatpush3.bf16.msk.msra.mxu0 %vm6459_vm2, %v6181_v5  ;;  %6198 = vmatpush3.bf16.msk.msra.mxu1 %vm6459_vm2, %v6193_v7 }
 0x320   : > { %6189 = vmatprep.subr.msk.bf16.mxu0 %vm6459_vm2, %v6916_v12  ;;  %6201 = vmatprep.subr.msk.bf16.mxu1 %vm6459_vm2, %v6921_v14 }
 0x3b1   : > { %v1647_v15 = vpop.f32.mrb[24].mxu0  ;;  %v1700_v16 = vpop.f32.mrb[24].mxu1 }
 0x3b2   : > { %v5778_v17 = vpop.f32.mrb[25].mxu0  ;;  %v5786_v18 = vpop.f32.mrb[25].mxu1 }
 0x3b3   : > { %v1650_v19 = vpop.f32.mrb[26].mxu0  ;;  %v1703_v20 = vpop.f32.mrb[26].mxu1 }
 0x3b4   : > { %v5779_v21 = vpop.f32.mrb[27].mxu0  ;;  %v5787_v22 = vpop.f32.mrb[27].mxu1 }
 0x3b9   : > { %v1756_v23 = vpop.f32.mrb[28].mxu0  ;;  %v1809_v26 = vpop.f32.mrb[28].mxu1 }
 0x3ba   : > { %v1757_v28 = vadd.f32 %v1756_v23, %v1647_v15  ;;  %v1810_v30 = vadd.f32 %v1809_v26, %v1700_v16  ;;  %v5794_v31 = vpop.f32.mrb[29].mxu0  ;;  %v5802_v32 = vpop.f32.mrb[29].mxu1 }
 0x3bb   : > { %v1759_v35 = vpop.f32.mrb[30].mxu0  ;;  %v1812_v36 = vpop.f32.mrb[30].mxu1 }
 0x3bc   : > { %v1760_v37 = vadd.f32 %v1759_v35, %v1650_v19  ;;  %v1813_v38 = vadd.f32 %v1812_v36, %v1703_v20  ;;  %v5795_v39 = vpop.f32.mrb[31].mxu0  ;;  %v5803_v40 = vpop.f32.mrb[31].mxu1 }
 0x3c1   : > { %v1880_v41 = vpop.f32.mrb[32].mxu0  ;;  %v1933_v42 = vpop.f32.mrb[32].mxu1 }
 0x3c2   : > { %v1940_v43 = vadd.f32 %v1880_v41, %v1757_v28  ;;  %v1942_v46 = vadd.f32 %v1933_v42, %v1810_v30  ;;  %v5810_v47 = vpop.f32.mrb[33].mxu0  ;;  %v5818_v48 = vpop.f32.mrb[33].mxu1 }
 0x3c3   : > { %v1883_v49 = vpop.f32.mrb[34].mxu0  ;;  %v1936_v50 = vpop.f32.mrb[34].mxu1 }
 0x3c4   : > { %v1941_v51 = vadd.f32 %v1883_v49, %v1760_v37  ;;  %v1943_v52 = vadd.f32 %v1936_v50, %v1813_v38  ;;  %v5811_v54 = vpop.f32.mrb[35].mxu0  ;;  %v5819_v55 = vpop.f32.mrb[35].mxu1 }
 0x3c9   : > { %v2008_v56 = vpop.f32.mrb[36].mxu0  ;;  %v2061_v57 = vpop.f32.mrb[36].mxu1 }
 0x3ca   : > { %v2068_v58 = vadd.f32 %v2008_v56, %v1940_v43  ;;  %v2070_v59 = vadd.f32 %v2061_v57, %v1942_v46  ;;  %v5826_v60 = vpop.f32.mrb[37].mxu0  ;;  %v5834_v61 = vpop.f32.mrb[37].mxu1 }
 0x3cb   : > { %v2011_v62 = vpop.f32.mrb[38].mxu0  ;;  %v2064_v53 = vpop.f32.mrb[38].mxu1 }
 0x3cc   : > { %v2069_v63 = vadd.f32 %v2011_v62, %v1941_v51  ;;  %v2071_v0 = vadd.f32 %v2064_v53, %v1943_v52  ;;  %v5827_v2 = vpop.f32.mrb[39].mxu0  ;;  %v5835_v1 = vpop.f32.mrb[39].mxu1 }
 0x3cd   : > { %v5283_v2 = vld [vmem:[%s7351_s12] ss:$0 sm:$0xff] }
 0x3d1   : > { %v2134_v4 = vpop.f32.mrb[40].mxu0  ;;  %v2187_v5 = vpop.f32.mrb[40].mxu1 }
 0x3d2   : > { %v2194_v6 = vadd.f32 %v2134_v4, %v2068_v58  ;;  %v2196_v7 = vadd.f32 %v2187_v5, %v2070_v59  ;;  %v5842_v8 = vpop.f32.mrb[41].mxu0  ;;  %v5850_v10 = vpop.f32.mrb[41].mxu1  ;;  %v5284_v4 = vld [vmem:[%s7353_s14] ss:$0 sm:$0xff] }
 0x3d3   : > { %v2137_v11 = vpop.f32.mrb[42].mxu0  ;;  %v2190_v13 = vpop.f32.mrb[42].mxu1 }
 0x3d4   : > { %v2195_v15 = vadd.f32 %v2137_v11, %v2069_v63  ;;  %v2197_v16 = vadd.f32 %v2190_v13, %v2071_v0  ;;  %v5843_v17 = vpop.f32.mrb[43].mxu0  ;;  %v5851_v18 = vpop.f32.mrb[43].mxu1  ;;  %v5125_v63 = vld [vmem:[%s7345_s6] ss:$0 sm:$0xff] }
 0x3d5   : > { %v937_v10 = vadd.f32 %v5125_v63, %v6643_v25 }
 0x3d9   : > { %v2262_v19 = vpop.f32.mrb[44].mxu0  ;;  %v2315_v20 = vpop.f32.mrb[44].mxu1 }
 0x3da   : > { %v2322_v21 = vadd.f32 %v2262_v19, %v2194_v6  ;;  %v2324_v22 = vadd.f32 %v2315_v20, %v2196_v7  ;;  %v5858_v23 = vpop.f32.mrb[45].mxu0  ;;  %v5866_v26 = vpop.f32.mrb[45].mxu1 }
 0x3db   : > { %v2265_v28 = vpop.f32.mrb[46].mxu0  ;;  %v2318_v30 = vpop.f32.mrb[46].mxu1 }
 0x3dc   : > { %v2323_v31 = vadd.f32 %v2265_v28, %v2195_v15  ;;  %v2325_v32 = vadd.f32 %v2318_v30, %v2197_v16  ;;  %v5859_v35 = vpop.f32.mrb[47].mxu0  ;;  %v5867_v36 = vpop.f32.mrb[47].mxu1 }
 0x3e1   : > { %v2390_v37 = vpop.f32.mrb[48].mxu0  ;;  %v2443_v38 = vpop.f32.mrb[48].mxu1 }
 0x3e2   : > { %v2450_v39 = vadd.f32 %v2390_v37, %v2322_v21  ;;  %v2452_v40 = vadd.f32 %v2443_v38, %v2324_v22  ;;  %v5874_v41 = vpop.f32.mrb[49].mxu0  ;;  %v5882_v42 = vpop.f32.mrb[49].mxu1  ;;  %v938_v21 = vadd.f32 %v6641_v24, %v5125_v63 }
 0x3e3   : > { %v2393_v43 = vpop.f32.mrb[50].mxu0  ;;  %v2446_v46 = vpop.f32.mrb[50].mxu1 }
 0x3e4   : > { %v2451_v47 = vadd.f32 %v2393_v43, %v2323_v31  ;;  %v2453_v48 = vadd.f32 %v2446_v46, %v2325_v32  ;;  %v5875_v49 = vpop.f32.mrb[51].mxu0  ;;  %v5883_v50 = vpop.f32.mrb[51].mxu1 }
 0x3e5   : > { %v5298_v49 = vld [vmem:[%s7344_s5 + $0x1] ss:$0 sm:$0xff] }
 0x3e9   : > { %v2516_v51 = vpop.f32.mrb[52].mxu0  ;;  %v2569_v52 = vpop.f32.mrb[52].mxu1 }
 0x3ea   : > { %v2576_v54 = vadd.f32 %v2516_v51, %v2450_v39  ;;  %v2578_v55 = vadd.f32 %v2569_v52, %v2452_v40  ;;  %v5890_v56 = vpop.f32.mrb[53].mxu0  ;;  %v5898_v57 = vpop.f32.mrb[53].mxu1 }
 0x3eb   : > { %v2519_v58 = vpop.f32.mrb[54].mxu0  ;;  %v2572_v59 = vpop.f32.mrb[54].mxu1  ;;  %v6278_v57 = vld [vmem:[%s7346_s7 + $0x58] sm:$0x3f]  }
 0x3ec   : > { %v2577_v60 = vadd.f32 %v2519_v58, %v2451_v47  ;;  %v2579_v61 = vadd.f32 %v2572_v59, %v2453_v48  ;;  %v5891_v62 = vpop.f32.mrb[55].mxu0  ;;  %v5899_v53 = vpop.f32.mrb[55].mxu1  ;;  %v6279_v58 = vld [vmem:[%s7346_s7 + $0x60] sm:$0x3f]  }
 0x3f1   : > { %v2644_v0 = vpop.f32.mrb[56].mxu0  ;;  %v2697_v1 = vpop.f32.mrb[56].mxu1 }
 0x3f2   : > { %v2704_v5 = vadd.f32 %v2644_v0, %v2576_v54  ;;  %v2706_v6 = vadd.f32 %v2697_v1, %v2578_v55  ;;  %v5906_v7 = vpop.f32.mrb[57].mxu0  ;;  %v5914_v8 = vpop.f32.mrb[57].mxu1  ;;  %v3249_v0 = vsel %vm962_vm4, %v6278_v57, 0 }
 0x3f3   : > { %v2647_v11 = vpop.f32.mrb[58].mxu0  ;;  %v2700_v13 = vpop.f32.mrb[58].mxu1 }
 0x3f4   : > { %v2715_v15 = vadd.f32 %v5283_v2, %v2704_v5  ;;  %v2724_v16 = vadd.f32 %v5284_v4, %v2706_v6  ;;  %v2705_v17 = vadd.f32 %v2647_v11, %v2577_v60  ;;  %v2707_v18 = vadd.f32 %v2700_v13, %v2579_v61  ;;  %v5907_v19 = vpop.f32.mrb[59].mxu0  ;;  %v5915_v20 = vpop.f32.mrb[59].mxu1  ;;  %v6280_v13 = vld [vmem:[%s7346_s7 + $0x68] sm:$0x3f]  }
 0x3f5   : > { %v3311_v6 = vsel %vm962_vm4, %v6279_v58, 0  ;;  %v3371_v19 = vsel %vm962_vm4, %v6280_v13, 0 }
 0x3f6   : > { %v2740_v22 = vadd.f32 %v2715_v15, %v937_v10  ;;  %v2726_v23 = vadd.f32 2.0, %v2724_v16  ;;  %v2716_v26 = vadd.f32 %v5283_v2, %v2705_v17  ;;  %v2725_v28 = vadd.f32 %v5284_v4, %v2707_v18  ;;  %v6281_v17 = vld [vmem:[%s7346_s7 + $0x70] sm:$0x3f]  }
 0x3f8   : > { %v5285_v30 = vmul.f32 -1.442695, %v2726_v23  ;;  %v2741_v31 = vadd.f32 %v2716_v26, %v938_v21  ;;  %v2727_v32 = vadd.f32 2.0, %v2725_v28  ;;  %v3433_v21 = vsel %vm962_vm4, %v6281_v17, 0  ;;  %v6282_v26 = vld [vmem:[%s7346_s7 + $0x78] sm:$0x3f]  }
 0x3fa   : > { %6323 = vpow2.f32 %v5285_v30  ;;  %v5286_v35 = vmul.f32 -1.442695, %v2727_v32 }
 0x3fc   : > { %6325 = vpow2.f32 %v5286_v35  ;;  %v6283_v35 = vld [vmem:[%s7346_s7 + $0x80] sm:$0x3f]  }
 0x404   : > { %v6324_v25 = vpop.eup %6323 }
 0x405   : > { %v2734_v36 = vadd.f32 1.0, %v6324_v25 }
 0x406   : > { %v6326_v37 = vpop.eup %6325 }
 0x407   : > { %6327 = vrcp.f32 %v2734_v36  ;;  %v2735_v38 = vadd.f32 1.0, %v6326_v37  ;;  %v3495_v36 = vsel %vm962_vm4, %v6282_v26, 0 }
 0x409   : > { %6329 = vrcp.f32 %v2735_v38 }
 0x411   : > { %v6328_v39 = vpop.eup %6327 }
 0x412   : > { %v2742_v40 = vmul.f32 %v6328_v39, %v2740_v22  ;;  %6331 = vlog2.f32 %v6328_v39  ;;  %v3555_v39 = vsel %vm962_vm4, %v6283_v35, 0 }
 0x413   : > { %v6330_v24 = vpop.eup %6329 }
 0x414   : > { %5920 = vmatprep.mubr.msk.f32.mxu0 %vm532_vm3, %v2742_v40  ;;  %5934 = vmatprep.mubr.msk.f32.mxu1 %vm532_vm3, %v2742_v40  ;;  %v2743_v41 = vmul.f32 %v6330_v24, %v2741_v31  ;;  %6333 = vlog2.f32 %v6330_v24 }
 0x416   : > { %5921 = vmatmul.mubr.msk.f32.vlgmr.msra.gmra.mrb[2].mxu0 %vm532_vm3, %v2743_v41  ;;  %5935 = vmatmul.mubr.msk.f32.vlgmr.msra.gmra.mrb[2].mxu1 %vm532_vm3, %v2743_v41  ;;  %v6284_v41 = vld [vmem:[%s7346_s7 + $0x88] sm:$0x3f]  }
 0x417   : > { %5927 = vmatprep.mubr.msk.f32.mxu0 %vm532_vm3, %v6541_v29  ;;  %5941 = vmatprep.mubr.msk.f32.mxu1 %vm532_vm3, %v6541_v29 }
 0x418   : > { %6192 = vmatpush3.bf16.msk.msra.mxu0 %vm6459_vm2, %v6916_v12  ;;  %6204 = vmatpush3.bf16.msk.msra.mxu1 %vm6459_vm2, %v6921_v14  ;;  %v6276_v14 = vld [vmem:[%s7346_s7 + $0x50] sm:$0x3f]  }
 0x419   : > { %5944 = vmatprep.subr.bf16.mxu0 %v6356_v9  ;;  %5950 = vmatprep.subr.bf16.mxu1 %v6356_v9  ;;  %v3137_v47 = vsel %vm962_vm4, %v6276_v14, 0 }
 0x41c   : > { %v6332_v42 = vpop.eup %6331 }
 0x41d   : > { %v2745_v43 = vmul.f32 0.6931472, %v6332_v42 }
 0x41e   : > { %v6334_v46 = vpop.eup %6333  ;;  %5928 = vmatmul.mubr.msk.f32.vlgmr.msra.gmra.mrb[2].mxu0 %vm532_vm3, %v6539_v27  ;;  %5942 = vmatmul.mubr.msk.f32.vlgmr.msra.gmra.mrb[2].mxu1 %vm532_vm3, %v6539_v27  ;;  %v6277_v27 = vld [vmem:[%s7346_s7 + $0x48] sm:$0x3f]  }
 0x41f   : > { %v2748_v29 = vsel %vm532_vm3, %v2745_v43, 0.0  ;;  %v2747_v12 = vmul.f32 0.6931472, %v6334_v46  ;;  %5946 = vmatprep.mubr.msk.bf16.mxu0 %vm6357_vm5, %v6356_v9  ;;  %5952 = vmatprep.mubr.msk.bf16.mxu1 %vm6357_vm5, %v6356_v9  ;;  %v3189_v48 = vsel %vm962_vm4, %v6277_v27, 0  ;;  %v3617_v46 = vsel %vm962_vm4, %v6284_v41, 0 }
 0x420   : > { %2749 = vadd.xlane.f32.xlu0 %v2748_v29  ;;  %5945 = vmatpush3.bf16.msra.mxu0 %v3137_v47  ;;  %v6285_v47 = vld [vmem:[%s7348_s9 + $0x10] sm:$0xff]  }
 0x421   : > { %v2751_v3 = vsel %vm532_vm3, %v2747_v12, 0.0  ;;  %5951 = vmatpush3.bf16.msra.mxu1 %v3189_v48  ;;  %5956 = vmatprep.subr.bf16.mxu0 %v6356_v9  ;;  %v6286_v48 = vld [vmem:[%s7348_s9 + $0x18] sm:$0xff]  }
 0x422   : > { %5962 = vmatprep.subr.bf16.mxu1 %v6356_v9 }
 0x424   : > { %2752 = vadd.xlane.f32.xlu0 %v2751_v3 }
 0x4f1   : > { %v5929_v50 = vpop.f32.mrb[2].mxu0  ;;  %v6986_v51 = vpop.f32.mrb[2].mxu1 }
 0x4f2   : > { %v2939_v52 = vadd.f32 %v5929_v50, %v5298_v49  ;;  %v2921_v54 = vpop.f32.mrb[3].mxu0  ;;  %v6988_v55 = vpop.f32.mrb[3].mxu1 }
 0x4f3   : > { %v2938_v56 = vadd.f32 %v5298_v49, %v2921_v54 }
 0x4f4   : > { %4937 = vst.msk [vmem:[%s6984_s29 + $0x8] sm:$0xff] %vm532_vm3, %v2939_v52  ;;  %3113 = vst.msk [vmem:[#allocation2 + $0xd] sm:$0xff] %vm532_vm3, %v2939_v52 }
 0x4f5   : > { %4936 = vst.msk [vmem:[%s6984_s29] sm:$0xff] %vm532_vm3, %v2938_v56  ;;  %3112 = vst.msk [vmem:[#allocation2 + $0x5] sm:$0xff] %vm532_vm3, %v2938_v56 }
 0x4fb   : > { %v3417_v23 = vld [vmem:[#allocation2 + $0xe] sm:$0xff] }
 0x4fc   : > { %v3122_v59 = vld [vmem:[#allocation2 + $0x1] sm:$0xff]  ;;  %v7002_v60 = vld [vmem:[#allocation2 + $0x9] sm:$0xff]  ;;  %v3419_v32 = vmul.f32 %v6569_v45, %v3417_v23  ;;  %v3541_v43 = vld [vmem:[#allocation2 + $0x11] sm:$0xff] }
 0x4fd   : > { %v3114_v61 = vld [vmem:[#allocation2] sm:$0xff]  ;;  %v3124_v62 = vpack.c.bf16 %v7002_v60, %v3122_v59  ;;  %v3115_v53 = vld [vmem:[#allocation2 + $0x8] sm:$0xff]  ;;  %v3479_v37 = vld [vmem:[#allocation2 + $0x10] sm:$0xff]  ;;  %v3542_v12 = vpack.c.bf16 %v3541_v43, %v7002_v60 }
 0x4fe   : > { %v3116_v63 = vmul.f32 %v6551_v33, %v3114_v61  ;;  %v3117_v2 = vmul.f32 %v6554_v34, %v3115_v53  ;;  %v3232_v1 = vld [vmem:[#allocation2 + $0x2] sm:$0xff]  ;;  %v7008_v4 = vld [vmem:[#allocation2 + $0xa] sm:$0xff]  ;;  %v3480_v40 = vmul.f32 %v6551_v33, %v3115_v53  ;;  %v3481_v24 = vmul.f32 %v6554_v34, %v3479_v37  ;;  %v3601_v29 = vld [vmem:[#allocation2 + $0x12] sm:$0xff] }
 0x4ff   : > { %5947 = vmatmul.mubr.msk.bf16.vlgmr.msra.gmra.mrb[60].mxu0 %vm532_vm3, %v3124_v62  ;;  %v3234_v7 = vmul.f32 %v6566_v44, %v3232_v1  ;;  %v3235_v8 = vmul.f32 %v6569_v45, %v7008_v4  ;;  %v3294_v10 = vld [vmem:[#allocation2 + $0x4] sm:$0xff]  ;;  %v3295_v11 = vld [vmem:[#allocation2 + $0xc] sm:$0xff]  ;;  %v3602_v3 = vmul.f32 %v6566_v44, %v7008_v4  ;;  %v3603_v14 = vmul.f32 %v6569_v45, %v3601_v29 }
 0x500   : > { %v3118_v5 = vpack.c.bf16 %v3117_v2, %v3116_v63  ;;  %5957 = vmatpush3.bf16.msra.mxu0 %v3249_v0  ;;  %5958 = vmatprep.mubr.msk.bf16.mxu0 %vm6357_vm5, %v6356_v9  ;;  %v3296_v15 = vmul.f32 %v6551_v33, %v3294_v10  ;;  %v3297_v16 = vmul.f32 %v6554_v34, %v3295_v11  ;;  %v3416_v22 = vld [vmem:[#allocation2 + $0x6] sm:$0xff] }
 0x501   : > { %5968 = vmatprep.subr.bf16.mxu0 %v6356_v9  ;;  %v3236_v18 = vpack.c.bf16 %v3235_v8, %v3234_v7  ;;  %v3356_v28 = vld [vmem:[#allocation2 + $0x5] sm:$0xff]  ;;  %v3357_v30 = vld [vmem:[#allocation2 + $0xd] sm:$0xff]  ;;  %v3418_v31 = vmul.f32 %v6566_v44, %v3416_v22  ;;  %v3482_v42 = vpack.c.bf16 %v3481_v24, %v3480_v40  ;;  %v3604_v27 = vpack.c.bf16 %v3603_v14, %v3602_v3 }
 0x502   : > { %5953 = vmatmul.mubr.msk.bf16.vlgmr.msra.gmra.mrb[60].mxu1 %vm532_vm3, %v3118_v5  ;;  %v3298_v20 = vpack.c.bf16 %v3297_v16, %v3296_v15  ;;  %v3358_v25 = vpack.c.bf16 %v3357_v30, %v3356_v28 }
 0x503   : > { %5963 = vmatpush3.bf16.msra.mxu1 %v3311_v6  ;;  %5964 = vmatprep.mubr.msk.bf16.mxu1 %vm6357_vm5, %v6356_v9  ;;  %v3420_v38 = vpack.c.bf16 %v3419_v32, %v3418_v31 }
 0x504   : > { %5974 = vmatprep.subr.bf16.mxu1 %v6356_v9 }
 0x507   : > { %5959 = vmatmul.mubr.msk.bf16.vlgmr.msra.gmra.mrb[64].mxu0 %vm532_vm3, %v3236_v18 }
 0x508   : > { %5969 = vmatpush3.bf16.msra.mxu0 %v3371_v19  ;;  %5970 = vmatprep.mubr.msk.bf16.mxu0 %vm6357_vm5, %v6356_v9 }
 0x509   : > { %5980 = vmatprep.subr.bf16.mxu0 %v6356_v9 }
 0x50a   : > { %5965 = vmatmul.mubr.msk.bf16.vlgmr.msra.gmra.mrb[64].mxu1 %vm532_vm3, %v3298_v20 }
 0x50b   : > { %5975 = vmatpush3.bf16.msra.mxu1 %v3433_v21  ;;  %5976 = vmatprep.mubr.msk.bf16.mxu1 %vm6357_vm5, %v6356_v9 }
 0x50c   : > { %5986 = vmatprep.subr.bf16.mxu1 %v6356_v9 }
 0x50f   : > { %5971 = vmatmul.mubr.msk.bf16.vlgmr.msra.gmra.mrb[68].mxu0 %vm532_vm3, %v3358_v25 }
 0x510   : > { %5981 = vmatpush3.bf16.msra.mxu0 %v3495_v36  ;;  %5982 = vmatprep.mubr.msk.bf16.mxu0 %vm6357_vm5, %v6356_v9 }
 0x511   : > { %5992 = vmatprep.subr.bf16.mxu0 %v6356_v9 }
 0x512   : > { %5977 = vmatmul.mubr.msk.bf16.vlgmr.msra.gmra.mrb[68].mxu1 %vm532_vm3, %v3420_v38 }
 0x513   : > { %5987 = vmatpush3.bf16.msra.mxu1 %v3555_v39  ;;  %5988 = vmatprep.mubr.msk.bf16.mxu1 %vm6357_vm5, %v6356_v9 }
 0x514   : > { %5998 = vmatprep.subr.bf16.mxu1 %v6356_v9 }
 0x517   : > { %5983 = vmatmul.mubr.msk.bf16.vlgmr.msra.gmra.mrb[72].mxu0 %vm532_vm3, %v3482_v42  ;;  %v5348_v42 = vld [vmem:[%s7347_s8 + $0x1] ss:$0 sm:$0xff] }
 0x518   : > { %5993 = vmatpush3.bf16.msra.mxu0 %v3617_v46  ;;  %5994 = vmatprep.mubr.msk.bf16.mxu0 %vm6357_vm5, %v6356_v9 }
 0x519   : > { %6006 = vmatprep.subr.bf16.mxu0 %v6356_v9 }
 0x51a   : > { %5989 = vmatmul.mubr.msk.bf16.vlgmr.msra.gmra.mrb[72].mxu1 %vm532_vm3, %v3542_v12 }
 0x51b   : > { %6002 = vmatprep.mubr.msk.bf16.mxu1 %vm6357_vm5, %v6356_v9  ;;  %5999 = vmatpush3.bf16.msra.mxu1 %v6285_v47 }
 0x51c   : > { %6000 = vmatprep.subr.bf16.mxu1 %v6356_v9 }
 0x51f   : > { %5995 = vmatmul.mubr.msk.bf16.vlgmr.msra.gmra.mrb[76].mxu0 %vm532_vm3, %v3604_v27  ;;  %6001 = vmatpush3.bf16.msra.mxu1 %v6286_v48 }
 0x520   : > { %6010 = vmatprep.mubr.msk.bf16.mxu0 %vm6357_vm5, %v6356_v9  ;;  %6014 = vmatprep.subr.bf16.mxu1 %v6356_v9 }
 0x5d2   : > { %v3173_v49 = vpop.f32.mrb[60].mxu0 }
 0x5d3   : > { %v5948_v50 = vpop.f32.mrb[61].mxu0 }
 0x5d4   : > { %v3176_v52 = vpop.f32.mrb[62].mxu0  ;;  %v6287_v50 = vld [vmem:[%s7350_s11 + $0xa0] sm:$0xff]  }
 0x5d5   : > { %v3225_v54 = vpop.f32.mrb[60].mxu1  ;;  %v5949_v56 = vpop.f32.mrb[63].mxu0  ;;  %6007 = vmatpush3.bf16.msra.mxu0 %v6287_v50 }
 0x5d6   : > { %v3226_v57 = vadd.f32 %v3225_v54, %v3173_v49  ;;  %v5954_v58 = vpop.f32.mrb[61].mxu1  ;;  %v6289_v54 = vld [vmem:[%s7350_s11 + $0xa8] sm:$0xff]   ;;  %6008 = vmatprep.subr.bf16.mxu0 %v6356_v9 }
 0x5d7   : > { %v3228_v59 = vpop.f32.mrb[62].mxu1  ;;  %v6290_v56 = vld [vmem:[%s7352_s13 + $0xa8] sm:$0xff]  }
 0x5d8   : > { %v3229_v60 = vadd.f32 %v3228_v59, %v3176_v52  ;;  %v5955_v61 = vpop.f32.mrb[63].mxu1  ;;  %v6288_v52 = vld [vmem:[%s7352_s13 + $0xa0] sm:$0xff]  }
 0x5d9   : > { %6009 = vmatpush3.bf16.msra.mxu0 %v6289_v54  ;;  %v6312_v54 = vld [vmem:[%s7352_s13 + $0xf0] sm:$0xff]  }
 0x5da   : > { %v3285_v62 = vpop.f32.mrb[64].mxu0  ;;  %6022 = vmatprep.subr.bf16.mxu0 %v6356_v9 }
 0x5db   : > { %v3292_v53 = vadd.f32 %v3285_v62, %v3226_v57  ;;  %v5960_v63 = vpop.f32.mrb[65].mxu0  ;;  %v5354_v57 = vld [vmem:[%s7349_s10 + $0x1] ss:$0 sm:$0xff] }
 0x5dc   : > { %v3288_v0 = vpop.f32.mrb[66].mxu0 }
 0x5dd   : > { %v3293_v2 = vadd.f32 %v3288_v0, %v3229_v60  ;;  %v3347_v1 = vpop.f32.mrb[64].mxu1  ;;  %v5961_v4 = vpop.f32.mrb[67].mxu0 }
 0x5de   : > { %v3354_v5 = vadd.f32 %v3347_v1, %v3292_v53  ;;  %v5966_v6 = vpop.f32.mrb[65].mxu1 }
 0x5df   : > { %v3350_v7 = vpop.f32.mrb[66].mxu1 }
 0x5e0   : > { %v3355_v8 = vadd.f32 %v3350_v7, %v3293_v2  ;;  %v5967_v10 = vpop.f32.mrb[67].mxu1  ;;  %v6291_v2 = vld [vmem:[%s7350_s11 + $0x90] sm:$0xff]  }
 0x5e1   : > { %v6294_v10 = vld [vmem:[%s7352_s13 + $0x98] sm:$0xff]  }
 0x5e2   : > { %v3407_v11 = vpop.f32.mrb[68].mxu0 }
 0x5e3   : > { %v3414_v13 = vadd.f32 %v3407_v11, %v3354_v5  ;;  %v5972_v15 = vpop.f32.mrb[69].mxu0  ;;  %v6292_v5 = vld [vmem:[%s7352_s13 + $0x90] sm:$0xff]  }
 0x5e4   : > { %v3410_v16 = vpop.f32.mrb[70].mxu0 }
 0x5e5   : > { %v3415_v17 = vadd.f32 %v3410_v16, %v3355_v8  ;;  %v3469_v18 = vpop.f32.mrb[68].mxu1  ;;  %v5973_v19 = vpop.f32.mrb[71].mxu0  ;;  %v6293_v8 = vld [vmem:[%s7350_s11 + $0x98] sm:$0xff]   ;;  %v6295_v16 = vld [vmem:[%s7350_s11 + $0xb0] sm:$0xff]  }
 0x5e6   : > { %v3476_v20 = vadd.f32 %v3469_v18, %v3414_v13  ;;  %v5978_v21 = vpop.f32.mrb[69].mxu1 }
 0x5e7   : > { %v3472_v22 = vpop.f32.mrb[70].mxu1  ;;  %v6298_v21 = vld [vmem:[%s7352_s13 + $0xb8] sm:$0xff]  }
 0x5e8   : > { %v3477_v23 = vadd.f32 %v3472_v22, %v3415_v17  ;;  %v5979_v26 = vpop.f32.mrb[71].mxu1  ;;  %v6296_v17 = vld [vmem:[%s7352_s13 + $0xb0] sm:$0xff]  }
 0x5ea   : > { %v3531_v28 = vpop.f32.mrb[72].mxu0 }
 0x5eb   : > { %v3538_v30 = vadd.f32 %v3531_v28, %v3476_v20  ;;  %v5984_v31 = vpop.f32.mrb[73].mxu0  ;;  %v6297_v20 = vld [vmem:[%s7350_s11 + $0xb8] sm:$0xff]   ;;  %v6299_v28 = vld [vmem:[%s7350_s11 + $0xc0] sm:$0xff]  }
 0x5ec   : > { %v3534_v32 = vpop.f32.mrb[74].mxu0 }
 0x5ed   : > { %v3539_v35 = vadd.f32 %v3534_v32, %v3477_v23  ;;  %v3591_v25 = vpop.f32.mrb[72].mxu1  ;;  %v5985_v36 = vpop.f32.mrb[75].mxu0 }
 0x5ee   : > { %v3598_v37 = vadd.f32 %v3591_v25, %v3538_v30  ;;  %v5990_v38 = vpop.f32.mrb[73].mxu1  ;;  %v6300_v30 = vld [vmem:[%s7352_s13 + $0xc0] sm:$0xff]   ;;  %v6302_v25 = vld [vmem:[%s7352_s13 + $0xc8] sm:$0xff]  }
 0x5ef   : > { %v3594_v39 = vpop.f32.mrb[74].mxu1 }
 0x5f0   : > { %v3599_v40 = vadd.f32 %v3594_v39, %v3539_v35  ;;  %v5991_v24 = vpop.f32.mrb[75].mxu1  ;;  %v6301_v35 = vld [vmem:[%s7350_s11 + $0xc8] sm:$0xff]   ;;  %v6303_v39 = vld [vmem:[%s7350_s11 + $0xd0] sm:$0xff]  }
 0x5f2   : > { %v3653_v41 = vpop.f32.mrb[76].mxu0 }
 0x5f3   : > { %v3660_v43 = vadd.f32 %v3653_v41, %v3598_v37  ;;  %v5996_v46 = vpop.f32.mrb[77].mxu0  ;;  %v6305_v41 = vld [vmem:[%s7350_s11 + $0xd8] sm:$0xff]  }
 0x5f4   : > { %v3656_v29 = vpop.f32.mrb[78].mxu0 }
 0x5f5   : > { %v3670_v12 = vadd.f32 %v5348_v42, %v3660_v43  ;;  %v3661_v3 = vadd.f32 %v3656_v29, %v3599_v40  ;;  %v5997_v14 = vpop.f32.mrb[79].mxu0  ;;  %v6304_v40 = vld [vmem:[%s7352_s13 + $0xd0] sm:$0xff]   ;;  %v6307_v29 = vld [vmem:[%s7350_s11 + $0xe0] sm:$0xff]  }
 0x5f7   : > { %v3671_v27 = vadd.f32 %v5348_v42, %v3661_v3  ;;  %v3672_v47 = vmax.f32 %v3670_v12, 0.0  ;;  %v6306_v42 = vld [vmem:[%s7352_s13 + $0xd8] sm:$0xff]   ;;  %v6308_v12 = vld [vmem:[%s7352_s13 + $0xe0] sm:$0xff]  }
 0x5f9   : > { %v3673_v48 = vmax.f32 %v3671_v27, 0.0 }
 0x5fb   : > { %v3674_v49 = vpack.c.bf16 %v3673_v48, %v3672_v47  ;;  %v6309_v47 = vld [vmem:[%s7350_s11 + $0xe8] sm:$0xff]  }
 0x5fc   : > { %v6310_v48 = vld [vmem:[%s7352_s13 + $0xe8] sm:$0xff]  }
 0x5fd   : > { %6003 = vmatmul.mubr.msk.bf16.vlgmr.msra.gmra.mrb[76].mxu1 %vm538_vm11, %v3674_v49 }
 0x5fe   : > { %6018 = vmatprep.mubr.msk.bf16.mxu1 %vm6357_vm5, %v6356_v9  ;;  %6015 = vmatpush3.bf16.msra.mxu1 %v6288_v52  ;;  %v6311_v52 = vld [vmem:[%s7350_s11 + $0xf0] sm:$0xff]  }
 0x5ff   : > { %6016 = vmatprep.subr.bf16.mxu1 %v6356_v9 }
 0x602   : > { %6017 = vmatpush3.bf16.msra.mxu1 %v6290_v56 }
 0x603   : > { %6030 = vmatprep.subr.bf16.mxu1 %v6356_v9 }
 0x6d0   : > { %v3737_v58 = vpop.f32.mrb[76].mxu1 }
 0x6d1   : > { %v3738_v59 = vadd.f32 %v5354_v57, %v3737_v58  ;;  %v6004_v60 = vpop.f32.mrb[77].mxu1  ;;  %v6313_v58 = vld [vmem:[%s7350_s11 + $0xf8] sm:$0xff]  }
 0x6d2   : > { %v3740_v61 = vpop.f32.mrb[78].mxu1 }
 0x6d3   : > { %v3744_v62 = vmax.f32 %v3738_v59, 0.0  ;;  %v3741_v53 = vadd.f32 %v5354_v57, %v3740_v61  ;;  %v6005_v63 = vpop.f32.mrb[79].mxu1  ;;  %v6314_v59 = vld [vmem:[%s7352_s13 + $0xf8] sm:$0xff]  }
 0x6d5   : > { %3746 = vst.msk [vmem:[#allocation3 + $0x5] sm:$0xff] %vm538_vm11, %v3744_v62  ;;  %v3745_v0 = vmax.f32 %v3741_v53, 0.0  ;;  %v6315_v62 = vld [vmem:[%s7350_s11 + $0x100] sm:$0xff]  }
 0x6d6   : > { %v6316_v53 = vld [vmem:[%s7352_s13 + $0x100] sm:$0xff]  }
 0x6d7   : > { %3747 = vst.msk [vmem:[#allocation3 + $0xd] sm:$0xff] %vm538_vm11, %v3745_v0 }
 0x6dc   : > { %v3763_v1 = vld [vmem:[#allocation3 + $0x1] sm:$0xff] }
 0x6dd   : > { %v3748_v11 = vld [vmem:[#allocation3] sm:$0xff] }
 0x6de   : > { %v7116_v4 = vld [vmem:[#allocation3 + $0x9] sm:$0xff]  ;;  %v3750_v15 = vmul.f32 %v6551_v33, %v3748_v11  ;;  %v4633_v0 = vld [vmem:[#allocation3 + $0x11] sm:$0xff] }
 0x6df   : > { %v3765_v6 = vpack.c.bf16 %v7116_v4, %v3763_v1  ;;  %v7122_v7 = vld [vmem:[#allocation3 + $0x8] sm:$0xff]  ;;  %v4505_v57 = vld [vmem:[#allocation3 + $0x10] sm:$0xff] }
 0x6e0   : > { %v3751_v13 = vmul.f32 %v6554_v34, %v7122_v7  ;;  %v7149_v19 = vld [vmem:[#allocation3 + $0xa] sm:$0xff]  ;;  %v3994_v22 = vld [vmem:[#allocation3 + $0x2] sm:$0xff]  ;;  %v4506_v60 = vmul.f32 %v6551_v33, %v7122_v7  ;;  %v4507_v61 = vmul.f32 %v6554_v34, %v4505_v57  ;;  %v6321_v7 = vld [vmem:[%s7350_s11 + $0x118] sm:$0xff]  }
 0x6e1   : > { %6011 = vmatmul.mubr.msk.bf16.vlgmr.msra.gmra.mrb[80].mxu0 %vm538_vm11, %v3765_v6  ;;  %6019 = vmatmul.mubr.msk.bf16.vlgmr.msra.gmra.mrb[80].mxu1 %vm538_vm11, %v3765_v6  ;;  %v3997_v23 = vmul.f32 %v6569_v45, %v7149_v19  ;;  %v3996_v26 = vmul.f32 %v6566_v44, %v3994_v22  ;;  %v4123_v32 = vld [vmem:[#allocation3 + $0xc] sm:$0xff]  ;;  %v4122_v36 = vld [vmem:[#allocation3 + $0x4] sm:$0xff] }
 0x6e2   : > { %6023 = vmatpush3.bf16.msra.mxu0 %v6291_v2  ;;  %6031 = vmatpush3.bf16.msra.mxu1 %v6292_v5  ;;  %v3752_v18 = vpack.c.bf16 %v3751_v13, %v3750_v15  ;;  %v4125_v37 = vmul.f32 %v6554_v34, %v4123_v32  ;;  %v4124_v38 = vmul.f32 %v6551_v33, %v4122_v36  ;;  %v4251_v43 = vld [vmem:[#allocation3 + $0xd] sm:$0xff]  ;;  %v4250_v46 = vld [vmem:[#allocation3 + $0x5] sm:$0xff] }
 0x6e3   : > { %6024 = vmatprep.subr.bf16.mxu0 %v6356_v9  ;;  %6032 = vmatprep.subr.bf16.mxu1 %v6356_v9  ;;  %v3998_v31 = vpack.c.bf16 %v3997_v23, %v3996_v26  ;;  %v4252_v3 = vpack.c.bf16 %v4251_v43, %v4250_v46  ;;  %v4376_v14 = vld [vmem:[#allocation3 + $0x6] sm:$0xff]  ;;  %v4377_v27 = vld [vmem:[#allocation3 + $0xe] sm:$0xff]  ;;  %v4508_v63 = vpack.c.bf16 %v4507_v61, %v4506_v60 }
 0x6e4   : > { %6026 = vmatprep.mubr.msk.bf16.mxu0 %vm6357_vm5, %v6356_v9  ;;  %6034 = vmatprep.mubr.msk.bf16.mxu1 %vm6357_vm5, %v6356_v9  ;;  %v4126_v24 = vpack.c.bf16 %v4125_v37, %v4124_v38  ;;  %v4378_v49 = vmul.f32 %v6566_v44, %v4376_v14  ;;  %v4379_v50 = vmul.f32 %v6569_v45, %v4377_v27  ;;  %v6317_v33 = vld [vmem:[%s7350_s11 + $0x108] sm:$0xff]   ;;  %v6319_v2 = vld [vmem:[%s7350_s11 + $0x110] sm:$0xff]  }
 0x6e5   : > { %v6318_v34 = vld [vmem:[%s7352_s13 + $0x108] sm:$0xff]   ;;  %v6320_v1 = vld [vmem:[%s7352_s13 + $0x110] sm:$0xff]   ;;  %v4634_v5 = vpack.c.bf16 %v4633_v0, %v7116_v4  ;;  %v4760_v4 = vmul.f32 %v6566_v44, %v7149_v19 }
 0x6e6   : > { %6025 = vmatpush3.bf16.msra.mxu0 %v6293_v8  ;;  %6033 = vmatpush3.bf16.msra.mxu1 %v6294_v10  ;;  %v4380_v56 = vpack.c.bf16 %v4379_v50, %v4378_v49  ;;  %v4759_v6 = vld [vmem:[#allocation3 + $0x12] sm:$0xff] }
 0x6e7   : > { %6038 = vmatprep.subr.bf16.mxu0 %v6356_v9  ;;  %6046 = vmatprep.subr.bf16.mxu1 %v6356_v9  ;;  %v6322_v8 = vld [vmem:[%s7352_s13 + $0x118] sm:$0xff]   ;;  %v4761_v10 = vmul.f32 %v6569_v45, %v4759_v6 }
 0x6e9   : > { %6027 = vmatmul.mubr.msk.bf16.vlgmr.msra.gmra.mrb[84].mxu0 %vm538_vm11, %v3752_v18  ;;  %6035 = vmatmul.mubr.msk.bf16.vlgmr.msra.gmra.mrb[84].mxu1 %vm538_vm11, %v3752_v18  ;;  %v4762_v11 = vpack.c.bf16 %v4761_v10, %v4760_v4 }
 0x6ea   : > { %6039 = vmatpush3.bf16.msra.mxu0 %v6295_v16  ;;  %6047 = vmatpush3.bf16.msra.mxu1 %v6296_v17 }
 0x6eb   : > { %6040 = vmatprep.subr.bf16.mxu0 %v6356_v9  ;;  %6048 = vmatprep.subr.bf16.mxu1 %v6356_v9 }
 0x6ec   : > { %6042 = vmatprep.mubr.msk.bf16.mxu0 %vm6357_vm5, %v6356_v9  ;;  %6050 = vmatprep.mubr.msk.bf16.mxu1 %vm6357_vm5, %v6356_v9 }
 0x6ee   : > { %6041 = vmatpush3.bf16.msra.mxu0 %v6297_v20  ;;  %6049 = vmatpush3.bf16.msra.mxu1 %v6298_v21 }
 0x6ef   : > { %6054 = vmatprep.subr.bf16.mxu0 %v6356_v9  ;;  %6062 = vmatprep.subr.bf16.mxu1 %v6356_v9 }
 0x6f1   : > { %6043 = vmatmul.mubr.msk.bf16.vlgmr.msra.gmra.mrb[88].mxu0 %vm538_vm11, %v3998_v31  ;;  %6051 = vmatmul.mubr.msk.bf16.vlgmr.msra.gmra.mrb[88].mxu1 %vm538_vm11, %v3998_v31 }
 0x6f2   : > { %6055 = vmatpush3.bf16.msra.mxu0 %v6299_v28  ;;  %6063 = vmatpush3.bf16.msra.mxu1 %v6300_v30 }
 0x6f3   : > { %6056 = vmatprep.subr.bf16.mxu0 %v6356_v9  ;;  %6064 = vmatprep.subr.bf16.mxu1 %v6356_v9 }
 0x6f4   : > { %6058 = vmatprep.mubr.msk.bf16.mxu0 %vm6357_vm5, %v6356_v9  ;;  %6066 = vmatprep.mubr.msk.bf16.mxu1 %vm6357_vm5, %v6356_v9 }
 0x6f6   : > { %6057 = vmatpush3.bf16.msra.mxu0 %v6301_v35  ;;  %6065 = vmatpush3.bf16.msra.mxu1 %v6302_v25 }
 0x6f7   : > { %6070 = vmatprep.subr.bf16.mxu0 %v6356_v9  ;;  %6078 = vmatprep.subr.bf16.mxu1 %v6356_v9 }
 0x6f9   : > { %6059 = vmatmul.mubr.msk.bf16.vlgmr.msra.gmra.mrb[92].mxu0 %vm538_vm11, %v4126_v24  ;;  %6067 = vmatmul.mubr.msk.bf16.vlgmr.msra.gmra.mrb[92].mxu1 %vm538_vm11, %v4126_v24 }
 0x6fa   : > { %6071 = vmatpush3.bf16.msra.mxu0 %v6303_v39  ;;  %6079 = vmatpush3.bf16.msra.mxu1 %v6304_v40 }
 0x6fb   : > { %6072 = vmatprep.subr.bf16.mxu0 %v6356_v9  ;;  %6080 = vmatprep.subr.bf16.mxu1 %v6356_v9 }
 0x6fc   : > { %6074 = vmatprep.mubr.msk.bf16.mxu0 %vm6357_vm5, %v6356_v9  ;;  %6082 = vmatprep.mubr.msk.bf16.mxu1 %vm6357_vm5, %v6356_v9 }
 0x6fe   : > { %6073 = vmatpush3.bf16.msra.mxu0 %v6305_v41  ;;  %6081 = vmatpush3.bf16.msra.mxu1 %v6306_v42 }
 0x6ff   : > { %6086 = vmatprep.subr.bf16.mxu0 %v6356_v9  ;;  %6094 = vmatprep.subr.bf16.mxu1 %v6356_v9 }
 0x701   : > { %6075 = vmatmul.mubr.msk.bf16.vlgmr.msra.gmra.mrb[96].mxu0 %vm538_vm11, %v4252_v3  ;;  %6083 = vmatmul.mubr.msk.bf16.vlgmr.msra.gmra.mrb[96].mxu1 %vm538_vm11, %v4252_v3 }
 0x702   : > { %6087 = vmatpush3.bf16.msra.mxu0 %v6307_v29  ;;  %6095 = vmatpush3.bf16.msra.mxu1 %v6308_v12 }
 0x703   : > { %6088 = vmatprep.subr.bf16.mxu0 %v6356_v9  ;;  %6096 = vmatprep.subr.bf16.mxu1 %v6356_v9 }
 0x704   : > { %6090 = vmatprep.mubr.msk.bf16.mxu0 %vm6357_vm5, %v6356_v9  ;;  %6098 = vmatprep.mubr.msk.bf16.mxu1 %vm6357_vm5, %v6356_v9 }
 0x706   : > { %6089 = vmatpush3.bf16.msra.mxu0 %v6309_v47  ;;  %6097 = vmatpush3.bf16.msra.mxu1 %v6310_v48 }
 0x707   : > { %6102 = vmatprep.subr.bf16.mxu0 %v6356_v9  ;;  %6110 = vmatprep.subr.bf16.mxu1 %v6356_v9 }
 0x709   : > { %6091 = vmatmul.mubr.msk.bf16.vlgmr.msra.gmra.mrb[100].mxu0 %vm538_vm11, %v4380_v56  ;;  %6099 = vmatmul.mubr.msk.bf16.vlgmr.msra.gmra.mrb[100].mxu1 %vm538_vm11, %v4380_v56 }
 0x70a   : > { %6103 = vmatpush3.bf16.msra.mxu0 %v6311_v52  ;;  %6111 = vmatpush3.bf16.msra.mxu1 %v6312_v54 }
 0x70b   : > { %6104 = vmatprep.subr.bf16.mxu0 %v6356_v9  ;;  %6112 = vmatprep.subr.bf16.mxu1 %v6356_v9 }
 0x70c   : > { %6106 = vmatprep.mubr.msk.bf16.mxu0 %vm6357_vm5, %v6356_v9  ;;  %6114 = vmatprep.mubr.msk.bf16.mxu1 %vm6357_vm5, %v6356_v9 }
 0x70e   : > { %6105 = vmatpush3.bf16.msra.mxu0 %v6313_v58  ;;  %6113 = vmatpush3.bf16.msra.mxu1 %v6314_v59 }
 0x70f   : > { %6118 = vmatprep.subr.bf16.mxu0 %v6356_v9  ;;  %6126 = vmatprep.subr.bf16.mxu1 %v6356_v9 }
 0x711   : > { %6107 = vmatmul.mubr.msk.bf16.vlgmr.msra.gmra.mrb[104].mxu0 %vm538_vm11, %v4508_v63  ;;  %6115 = vmatmul.mubr.msk.bf16.vlgmr.msra.gmra.mrb[104].mxu1 %vm538_vm11, %v4508_v63 }
 0x712   : > { %6119 = vmatpush3.bf16.msra.mxu0 %v6315_v62  ;;  %6127 = vmatpush3.bf16.msra.mxu1 %v6316_v53 }
 0x713   : > { %6120 = vmatprep.subr.bf16.mxu0 %v6356_v9  ;;  %6128 = vmatprep.subr.bf16.mxu1 %v6356_v9 }
 0x714   : > { %6122 = vmatprep.mubr.msk.bf16.mxu0 %vm6357_vm5, %v6356_v9  ;;  %6130 = vmatprep.mubr.msk.bf16.mxu1 %vm6357_vm5, %v6356_v9 }
 0x716   : > { %6121 = vmatpush3.bf16.msra.mxu0 %v6317_v33  ;;  %6129 = vmatpush3.bf16.msra.mxu1 %v6318_v34 }
 0x717   : > { %6134 = vmatprep.subr.bf16.mxu0 %v6356_v9  ;;  %6142 = vmatprep.subr.bf16.mxu1 %v6356_v9 }
 0x719   : > { %6123 = vmatmul.mubr.msk.bf16.vlgmr.msra.gmra.mrb[108].mxu0 %vm538_vm11, %v4634_v5  ;;  %6131 = vmatmul.mubr.msk.bf16.vlgmr.msra.gmra.mrb[108].mxu1 %vm538_vm11, %v4634_v5 }
 0x71a   : > { %6135 = vmatpush3.bf16.msra.mxu0 %v6319_v2  ;;  %6143 = vmatpush3.bf16.msra.mxu1 %v6320_v1 }
 0x71b   : > { %6136 = vmatprep.subr.bf16.mxu0 %v6356_v9  ;;  %6144 = vmatprep.subr.bf16.mxu1 %v6356_v9 }
 0x71c   : > { %6138 = vmatprep.mubr.msk.bf16.mxu0 %vm6357_vm5, %v6356_v9  ;;  %6146 = vmatprep.mubr.msk.bf16.mxu1 %vm6357_vm5, %v6356_v9 }
 0x71e   : > { %6137 = vmatpush3.bf16.msra.mxu0 %v6321_v7  ;;  %6145 = vmatpush3.bf16.msra.mxu1 %v6322_v8 }
 0x721   : > { %6139 = vmatmul.mubr.msk.bf16.vlgmr.msra.gmra.mrb[112].mxu0 %vm538_vm11, %v4762_v11  ;;  %6147 = vmatmul.mubr.msk.bf16.vlgmr.msra.gmra.mrb[112].mxu1 %vm538_vm11, %v4762_v11 }
 0x722   : > { %6154 = vmatprep.mubr.msk.f32.mxu0 %vm6357_vm5, %v6356_v9 }
 0x7b4   : > { %v3825_v13 = vpop.f32.mrb[80].mxu0  ;;  %v3878_v44 = vpop.f32.mrb[80].mxu1 }
 0x7b5   : > { %v6012_v15 = vpop.f32.mrb[81].mxu0  ;;  %v6020_v45 = vpop.f32.mrb[81].mxu1 }
 0x7b6   : > { %v3828_v16 = vpop.f32.mrb[82].mxu0  ;;  %v3881_v17 = vpop.f32.mrb[82].mxu1 }
 0x7b7   : > { %v6013_v18 = vpop.f32.mrb[83].mxu0  ;;  %v6021_v19 = vpop.f32.mrb[83].mxu1 }
 0x7bc   : > { %v3934_v20 = vpop.f32.mrb[84].mxu0  ;;  %v3987_v21 = vpop.f32.mrb[84].mxu1 }
 0x7bd   : > { %v3935_v22 = vadd.f32 %v3934_v20, %v3825_v13  ;;  %v3988_v23 = vadd.f32 %v3987_v21, %v3878_v44  ;;  %v6028_v26 = vpop.f32.mrb[85].mxu0  ;;  %v6036_v28 = vpop.f32.mrb[85].mxu1 }
 0x7be   : > { %v3937_v30 = vpop.f32.mrb[86].mxu0  ;;  %v3990_v31 = vpop.f32.mrb[86].mxu1 }
 0x7bf   : > { %v3938_v32 = vadd.f32 %v3937_v30, %v3828_v16  ;;  %v3991_v35 = vadd.f32 %v3990_v31, %v3881_v17  ;;  %v6029_v25 = vpop.f32.mrb[87].mxu0  ;;  %v6037_v9 = vpop.f32.mrb[87].mxu1 }
 0x7c4   : > { %v4058_v36 = vpop.f32.mrb[88].mxu0  ;;  %v4111_v37 = vpop.f32.mrb[88].mxu1 }
 0x7c5   : > { %v4118_v38 = vadd.f32 %v4058_v36, %v3935_v22  ;;  %v4120_v39 = vadd.f32 %v4111_v37, %v3988_v23  ;;  %v6044_v40 = vpop.f32.mrb[89].mxu0  ;;  %v6052_v24 = vpop.f32.mrb[89].mxu1 }
 0x7c6   : > { %v4061_v41 = vpop.f32.mrb[90].mxu0  ;;  %v4114_v42 = vpop.f32.mrb[90].mxu1 }
 0x7c7   : > { %v4119_v43 = vadd.f32 %v4061_v41, %v3938_v32  ;;  %v4121_v46 = vadd.f32 %v4114_v42, %v3991_v35  ;;  %v6045_v29 = vpop.f32.mrb[91].mxu0  ;;  %v6053_v12 = vpop.f32.mrb[91].mxu1 }
 0x7c8   : > { %v5310_v29 = vld [vmem:[%s7345_s6 + $0x1] ss:$0 sm:$0xff] }
 0x7cc   : > { %v4186_v3 = vpop.f32.mrb[92].mxu0  ;;  %v4239_v14 = vpop.f32.mrb[92].mxu1 }
 0x7cd   : > { %v4246_v27 = vadd.f32 %v4186_v3, %v4118_v38  ;;  %v4248_v47 = vadd.f32 %v4239_v14, %v4120_v39  ;;  %v6060_v48 = vpop.f32.mrb[93].mxu0  ;;  %v6068_v49 = vpop.f32.mrb[93].mxu1  ;;  %v5485_v3 = vld [vmem:[%s7351_s12 + $0x1] ss:$0 sm:$0xff] }
 0x7ce   : > { %v4189_v50 = vpop.f32.mrb[94].mxu0  ;;  %v4242_v52 = vpop.f32.mrb[94].mxu1 }
 0x7cf   : > { %v4247_v54 = vadd.f32 %v4189_v50, %v4119_v43  ;;  %v4249_v56 = vadd.f32 %v4242_v52, %v4121_v46  ;;  %v6061_v57 = vpop.f32.mrb[95].mxu0  ;;  %v6069_v58 = vpop.f32.mrb[95].mxu1  ;;  %v3110_v52 = vadd.f32 %v5310_v29, %v6988_v55 }
 0x7d4   : > { %v4312_v59 = vpop.f32.mrb[96].mxu0  ;;  %v4365_v60 = vpop.f32.mrb[96].mxu1 }
 0x7d5   : > { %v4372_v61 = vadd.f32 %v4312_v59, %v4246_v27  ;;  %v4374_v62 = vadd.f32 %v4365_v60, %v4248_v47  ;;  %v6076_v53 = vpop.f32.mrb[97].mxu0  ;;  %v6084_v63 = vpop.f32.mrb[97].mxu1  ;;  %v5487_v27 = vld [vmem:[%s7353_s14 + $0x1] ss:$0 sm:$0xff] }
 0x7d6   : > { %v4315_v33 = vpop.f32.mrb[98].mxu0  ;;  %v4368_v34 = vpop.f32.mrb[98].mxu1  ;;  %v3111_v53 = vadd.f32 %v6986_v51, %v5310_v29 }
 0x7d7   : > { %v4373_v0 = vadd.f32 %v4315_v33, %v4247_v54  ;;  %v4375_v2 = vadd.f32 %v4368_v34, %v4249_v56  ;;  %v6077_v1 = vpop.f32.mrb[99].mxu0  ;;  %v6085_v5 = vpop.f32.mrb[99].mxu1 }
 0x7dc   : > { %v4440_v6 = vpop.f32.mrb[100].mxu0  ;;  %v4493_v7 = vpop.f32.mrb[100].mxu1 }
 0x7dd   : > { %v4500_v8 = vadd.f32 %v4440_v6, %v4372_v61  ;;  %v4502_v4 = vadd.f32 %v4493_v7, %v4374_v62  ;;  %v6092_v10 = vpop.f32.mrb[101].mxu0  ;;  %v6100_v11 = vpop.f32.mrb[101].mxu1 }
 0x7de   : > { %v4443_v13 = vpop.f32.mrb[102].mxu0  ;;  %v4496_v44 = vpop.f32.mrb[102].mxu1 }
 0x7df   : > { %v4501_v15 = vadd.f32 %v4443_v13, %v4373_v0  ;;  %v4503_v45 = vadd.f32 %v4496_v44, %v4375_v2  ;;  %v6093_v16 = vpop.f32.mrb[103].mxu0  ;;  %v6101_v17 = vpop.f32.mrb[103].mxu1 }
 0x7e4   : > { %v4568_v18 = vpop.f32.mrb[104].mxu0  ;;  %v4621_v19 = vpop.f32.mrb[104].mxu1 }
 0x7e5   : > { %v4628_v20 = vadd.f32 %v4568_v18, %v4500_v8  ;;  %v4630_v21 = vadd.f32 %v4621_v19, %v4502_v4  ;;  %v6108_v22 = vpop.f32.mrb[105].mxu0  ;;  %v6116_v23 = vpop.f32.mrb[105].mxu1  ;;  %v6358_v19 = vmov 0.0|0.0  }
 0x7e6   : > { %v4571_v26 = vpop.f32.mrb[106].mxu0  ;;  %v4624_v28 = vpop.f32.mrb[106].mxu1  ;;  %6205 = vmatprep.subr.bf16.mxu0 %v6358_v19 }
 0x7e7   : > { %v4629_v30 = vadd.f32 %v4571_v26, %v4501_v15  ;;  %v4631_v31 = vadd.f32 %v4624_v28, %v4503_v45  ;;  %v6109_v32 = vpop.f32.mrb[107].mxu0  ;;  %v6117_v35 = vpop.f32.mrb[107].mxu1 }
 0x7ec   : > { %v4694_v25 = vpop.f32.mrb[108].mxu0  ;;  %v4747_v9 = vpop.f32.mrb[108].mxu1 }
 0x7ed   : > { %v4754_v36 = vadd.f32 %v4694_v25, %v4628_v20  ;;  %v4756_v37 = vadd.f32 %v4747_v9, %v4630_v21  ;;  %v6124_v38 = vpop.f32.mrb[109].mxu0  ;;  %v6132_v39 = vpop.f32.mrb[109].mxu1 }
 0x7ee   : > { %v4697_v40 = vpop.f32.mrb[110].mxu0  ;;  %v4750_v24 = vpop.f32.mrb[110].mxu1 }
 0x7ef   : > { %v4755_v41 = vadd.f32 %v4697_v40, %v4629_v30  ;;  %v4757_v42 = vadd.f32 %v4750_v24, %v4631_v31  ;;  %v6125_v43 = vpop.f32.mrb[111].mxu0  ;;  %v6133_v46 = vpop.f32.mrb[111].mxu1  ;;  %v6359_v31 = vmov 1.0  }
 0x7f0   : > { %v2750_v20 = vpop.xlane.xlu0 %2749 }
 0x7f4   : > { %v4822_v12 = vpop.f32.mrb[112].mxu0  ;;  %v4875_v14 = vpop.f32.mrb[112].mxu1 }
 0x7f5   : > { %v4882_v47 = vadd.f32 %v4822_v12, %v4754_v36  ;;  %v4884_v48 = vadd.f32 %v4875_v14, %v4756_v37  ;;  %v6140_v49 = vpop.f32.mrb[113].mxu0  ;;  %v6148_v50 = vpop.f32.mrb[113].mxu1 }
 0x7f6   : > { %v4825_v54 = vpop.f32.mrb[114].mxu0  ;;  %v4878_v56 = vpop.f32.mrb[114].mxu1 }
 0x7f7   : > { %v4894_v57 = vadd.f32 %v5485_v3, %v4882_v47  ;;  %v4904_v58 = vadd.f32 %v5487_v27, %v4884_v48  ;;  %v4883_v59 = vadd.f32 %v4825_v54, %v4755_v41  ;;  %v4885_v60 = vadd.f32 %v4878_v56, %v4757_v42  ;;  %v6141_v61 = vpop.f32.mrb[115].mxu0  ;;  %v6149_v62 = vpop.f32.mrb[115].mxu1 }
 0x7f8   : > { %v2753_v22 = vpop.xlane.xlu0 %2752 }
 0x7f9   : > { %v4920_v63 = vadd.f32 %v4894_v57, %v3110_v52  ;;  %v4906_v33 = vadd.f32 2.0, %v4904_v58  ;;  %v4895_v34 = vadd.f32 %v5485_v3, %v4883_v59  ;;  %v4905_v0 = vadd.f32 %v5487_v27, %v4885_v60 }
 0x7fb   : > { %v5488_v2 = vmul.f32 -1.442695, %v4906_v33  ;;  %v4921_v1 = vadd.f32 %v4895_v34, %v3111_v53  ;;  %v4907_v5 = vadd.f32 2.0, %v4905_v0 }
 0x7fd   : > { %6335 = vpow2.f32 %v5488_v2  ;;  %v5489_v55 = vmul.f32 -1.442695, %v4907_v5 }
 0x7ff   : > { %6337 = vpow2.f32 %v5489_v55 }
 0x807   : > { %v6336_v6 = vpop.eup %6335 }
 0x808   : > { %v4914_v7 = vadd.f32 1.0, %v6336_v6 }
 0x809   : > { %v6338_v8 = vpop.eup %6337 }
 0x80a   : > { %6339 = vrcp.f32 %v4914_v7  ;;  %v4915_v4 = vadd.f32 1.0, %v6338_v8 }
 0x80c   : > { %6341 = vrcp.f32 %v4915_v4 }
 0x814   : > { %v6340_v10 = vpop.eup %6339 }
 0x815   : > { %v4922_v51 = vmul.f32 %v6340_v10, %v4920_v63  ;;  %6343 = vlog2.f32 %v6340_v10 }
 0x816   : > { %v6342_v11 = vpop.eup %6341 }
 0x817   : > { %5490 = vst.msk [vmem:[%s6984_s29 + $0x10] sm:$0xff] %vm532_vm3, %v4922_v51  ;;  %v4923_v13 = vmul.f32 %v6342_v11, %v4921_v1  ;;  %6345 = vlog2.f32 %v6342_v11 }
 0x819   : > { %5491 = vst.msk [vmem:[%s6984_s29 + $0x18] sm:$0xff] %vm532_vm3, %v4923_v13 }
 0x81f   : > { %v6344_v44 = vpop.eup %6343 }
 0x820   : > { %v4925_v15 = vmul.f32 0.6931472, %v6344_v44 }
 0x821   : > { %v6346_v45 = vpop.eup %6345 }
 0x822   : > { %v4928_v16 = vsel %vm532_vm3, %v4925_v15, 0.0  ;;  %v4927_v17 = vmul.f32 0.6931472, %v6346_v45 }
 0x823   : > { %4929 = vadd.xlane.f32.xlu1 %v4928_v16 }
 0x824   : > { %v4931_v18 = vsel %vm532_vm3, %v4927_v17, 0.0 }
 0x827   : > { %4932 = vadd.xlane.f32.xlu1 %v4931_v18 }
 0x8b0   : > { %v4930_v21 = vpop.xlane.xlu1 %4929 }
 0x8b1   : > { %v4934_v26 = vadd.f32 %v4930_v21, %v2750_v20 }
 0x8b4   : > { %v4933_v23 = vpop.xlane.xlu1 %4932 }
 0x8b5   : > { %v4935_v28 = vadd.f32 %v4933_v23, %v2753_v22 }
 0x8b7   : > { %v6206_v30 = vpack.c.bf16 %v4935_v28, %v4934_v26 }
 0x8b9   : > { %6207 = vmatpush3.bf16.msra.mxu0 %v6206_v30 }
 0x8bc   : > { %6155 = vmatmul.mubr.msk.f32.vlgmr.msra.gmra.mrb[116].mxu0 %vm4941_vm13, %v6359_v31 }
 0x98f   : > { %v5011_v32 = vpop.f32.mrb[116].mxu0 }
 0x990   : > { %5016 = vst.msk [vmem:[%s530_s19] sm:$0x1] %vm5015_vm14, %v5011_v32  ;;  %v6156_v35 = vpop.f32.mrb[117].mxu0 }
 0x991 PF: > { %s27_s21 = sadd.s32 1, %s6353_s21  }
 0x992   : > { %p24_p4 = scmp.ge.s32.totalorder %s27_s21, 4  }
 0x994   :  { %26 = sbr.rel (!%p24_p4) target bundleno = 2 (0x2), region = 186 }

// kernel: flownet_encode.2
= control target key start
LH: loop header
LB: loop body
LE: loop exit
PB: predicated region body
PF: predicated region fallthrough
CT: control target
= control target key end

     0   :  { %s15551_s0 = inlined_call_operand.vmem [shape: f32[2,2,64,6], index: 0, kind: input, shape index: {}]   ;;  %s15552_s1 = inlined_call_operand.vmem [shape: f32[2,6,6], index: 1, kind: input, shape index: {}]   ;;  %s15553_s2 = inlined_call_operand.vmem [shape: f32[2,6,6], index: 2, kind: input, shape index: {}]   ;;  %s15554_s3 = inlined_call_operand.vmem [shape: f32[2,6,6], index: 3, kind: input, shape index: {}]   ;;  %s15555_s4 = inlined_call_operand.vmem [shape: f32[2,6,6], index: 4, kind: input, shape index: {}]   ;;  %s15556_s5 = inlined_call_operand.vmem [shape: f32[2,1,6], index: 5, kind: input, shape index: {}]   ;;  %s15557_s6 = inlined_call_operand.vmem [shape: f32[2,1,6], index: 6, kind: input, shape index: {}]   ;;  %s15558_s7 = inlined_call_operand.vmem [shape: bf16[2,9,6,32], index: 7, kind: input, shape index: {}]   ;;  %s15559_s8 = inlined_call_operand.vmem [shape: f32[2,1,32], index: 8, kind: input, shape index: {}]   ;;  %s15560_s9 = inlined_call_operand.vmem [shape: bf16[2,32,32], index: 9, kind: input, shape index: {}]   ;;  %s15561_s10 = inlined_call_operand.vmem [shape: f32[2,1,32], index: 10, kind: input, shape index: {}]   ;;  %s15562_s11 = inlined_call_operand.vmem [shape: bf16[2,9,32,6], index: 11, kind: input, shape index: {}]   ;;  %s15563_s12 = inlined_call_operand.vmem [shape: f32[2,1,6], index: 12, kind: input, shape index: {}]   ;;  %s15564_s13 = inlined_call_operand.vmem [shape: bf16[2,9,32,6], index: 13, kind: input, shape index: {}]   ;;  %s15565_s14 = inlined_call_operand.vmem [shape: f32[2,1,6], index: 14, kind: input, shape index: {}]   ;;  %s15566_s15 = inlined_call_operand.vmem [shape: bf16[9,6,6], index: 15, kind: input, shape index: {}]   ;;  %s15567_s16 = inlined_call_operand.vmem [shape: f32[1,6], index: 16, kind: input, shape index: {}]   ;;  %s15568_s17 = inlined_call_operand.vmem [shape: bf16[9,6,6], index: 17, kind: input, shape index: {}]   ;;  %s15569_s18 = inlined_call_operand.vmem [shape: f32[1,6], index: 18, kind: input, shape index: {}]   ;;  %s15570_s19 = inlined_call_operand.vmem [shape: f32[2,64,6], index: 19, kind: output, shape index: {0}]   ;;  %s15571_s20 = inlined_call_operand.vmem [shape: f32[2,1,1], index: 20, kind: output, shape index: {1}]  }
   0x1   :  { %15637 = sst [smem:[#allocation58_spill]] %s15551_s0 }
   0x2   :  { %15638 = sst [smem:[#allocation59_spill]] %s15552_s1  ;;  %s13068_s1 = smov 0  }
   0x3   :  { %15639 = sst [smem:[#allocation60_spill]] %s15553_s2 }
   0x4   :  { %15640 = sst [smem:[#allocation61_spill]] %s15554_s3 }
   0x5   :  { %15641 = sst [smem:[#allocation62_spill]] %s15555_s4 }
   0x6 LB: > { %s10028_s22 = sadd.s32 4294967295, %s12957_s1   ;;  %p10032_p0 = scmp.ge.s32.totalorder %s12957_s1, 1  ;;  %s12957_s1 = sphi %s13068_s1, %s31_s1  }
   0x7   : > { %p565_p1 = scmp.lt.s32.totalorder %s12957_s1, 3 }
   0x9   : > { %p566_p2 = pnand %p10032_p0, %p565_p1 }
   0xb   : > { %569 = sbr.rel (%p566_p2) target bundleno = 3105 (0xc21), region = 96 }
  0x12   : > { %s15642_s2 = sld [smem:[#allocation61_spill]]  ;;  %vm862_vm0 = vcmask 1045504   ;;  %s15643_s26 = sld [smem:[#allocation59_spill]]  ;;  %vm640_vm1 = vcmask 48128   ;;  %v15580_v18 = vmov 0.0   ;;  %vm1406_vm2 = vcmask 1042432  }
  0x13   : > { %p626_p3 = scmp.lt.s32.totalorder %s10028_s22, 1  ;;  %s15644_s29 = sld [smem:[#allocation58_spill]]  ;;  %643 = vst.msk [vmem:[#allocation2 + $0x10] sm:$0xff] %vm640_vm1, %v15580_v18  ;;  %644 = vst.msk [vmem:[#allocation2 + $0x18] sm:$0xff] %vm640_vm1, %v15580_v18  ;;  %v10099_v19 = vld [vmem:[%s15558_s7 + $0x4] sm:$0x7]  ;;  %v666_v28 = vlaneseq }
  0x14   : > { %641 = vst.msk [vmem:[#allocation2] sm:$0xff] %vm640_vm1, %v15580_v18  ;;  %642 = vst.msk [vmem:[#allocation2 + $0x8] sm:$0xff] %vm640_vm1, %v15580_v18  ;;  %v1408_v20 = vsel %vm1406_vm2, %v10099_v19, 0  ;;  %v1379_v21 = vld [vmem:[%s15558_s7] sm:$0x7]  ;;  %vm651_vm3 = vcmask 41984  }
  0x15   : > { %s15791_s22 = smov (!%p626_p3, %s10028_s22), 1  ;;  %645 = vst.msk [vmem:[#allocation2 + $0x20] sm:$0xff] %vm640_vm1, %v15580_v18  ;;  %646 = vst.msk [vmem:[#allocation2 + $0x28] sm:$0xff] %vm640_vm1, %v15580_v18  ;;  %v10079_v24 = vld [vmem:[%s15556_s5] ss:$0 sm:$0xff]  ;;  %v13193_v37 = vshrl.u32 %v666_v28, 7 }
  0x16   : > { %s10721_s27 = sshll.u32 %s15791_s22, 7  ;;  %647 = vst.msk [vmem:[#allocation2 + $0x30] sm:$0xff] %vm640_vm1, %v15580_v18  ;;  %648 = vst.msk [vmem:[#allocation2 + $0x38] sm:$0xff] %vm640_vm1, %v15580_v18  ;;  %s15649_s23 = sld [smem:[#allocation60_spill]] }
  0x17   : > { %649 = vst.msk [vmem:[#allocation2 + $0x40] sm:$0xff] %vm640_vm1, %v15580_v18  ;;  %650 = vst.msk [vmem:[#allocation2 + $0x48] sm:$0xff] %vm640_vm1, %v15580_v18  ;;  %v13204_v46 = vadd.s32 8, %v13193_v37  ;;  %v679_v57 = vand.u32 7, %v13193_v37  ;;  %v13227_v63 = vadd.s32 24, %v13193_v37  ;;  %s10722_s3 = sshll.u32 %s15791_s22, 6 }
  0x18   : > { %v837_v0 = vld [vmem:[%s15642_s2] sm:$0x3f]  ;;  %652 = vst.msk [vmem:[#allocation2 + $0x50] sm:$0x3] %vm651_vm3, %v15580_v18  ;;  %s14170_s0 = scalar_lea.vmem %s15570_s19, %s10722_s3 }
  0x19   : > { %v836_v1 = vld [vmem:[%s15643_s26] sm:$0x3f]  ;;  %11212 = vmatprep.subr.msk.mxu1 %vm862_vm0, %v837_v0  ;;  %s630_s30 = scalar_lea.vmem %s15644_s29, %s10721_s27  ;;  %v686_v58 = vand.u32 7, %v13204_v46  ;;  %vm771_vm4 = vcmp.ge.s32.totalorder %v679_v57, 1  ;;  %v15578_v28 = vand.u32 7, %v13227_v63  ;;  %vm795_vm11 = vcmp.le.s32.totalorder %v679_v57, 6  ;;  %s638_s29 = scalar_lea.vmem %s15571_s20, %s15791_s22 }
  0x1a   : > { %11226 = vmatprep.subr.msk.mxu0 %vm862_vm0, %v836_v1  ;;  %11213 = vmatpush3.msk.msra.mxu1 %vm862_vm0, %v837_v0  ;;  %v10053_v2 = vld [vmem:[%s630_s30 + $0x40] sm:$0xff]  ;;  %v13094_v4 = vld [vmem:[%s630_s30 + $0x48] sm:$0xff]  ;;  %v13101_v6 = vld [vmem:[%s630_s30 + $0x50] sm:$0xff] }
  0x1b   : > { %11227 = vmatpush3.msk.msra.mxu0 %vm862_vm0, %v836_v1  ;;  %v13092_v3 = vld [vmem:[%s630_s30] sm:$0xff]  ;;  %11214 = vmatprep.mubr.msk.f32.mxu1 %vm640_vm1, %v10053_v2  ;;  %v13099_v5 = vld [vmem:[%s630_s30 + $0x8] sm:$0xff]  ;;  %v13103_v7 = vld [vmem:[%s630_s30 + $0x10] sm:$0xff]  ;;  %vm772_vm5 = vcmp.ge.s32.totalorder %v686_v58, 1  ;;  %vm774_vm6 = vcmp.ge.s32.totalorder %v15578_v28, 1  ;;  %vm796_vm12 = vcmp.le.s32.totalorder %v686_v58, 6 }
  0x1c   : > { %11228 = vmatprep.mubr.msk.f32.mxu0 %vm640_vm1, %v13092_v3  ;;  %11215 = vmatmul.mubr.msk.f32.vlgmr.msra.gmra.mrb[0].mxu1 %vm640_vm1, %v13094_v4  ;;  %v13113_v8 = vld [vmem:[%s630_s30 + $0x58] sm:$0xff]  ;;  %v13117_v10 = vld [vmem:[%s630_s30 + $0x60] sm:$0xff]  ;;  %v13121_v12 = vld [vmem:[%s630_s30 + $0x68] sm:$0xff] }
  0x1d   : > { %11229 = vmatmul.mubr.msk.f32.vlgmr.msra.gmra.mrb[0].mxu0 %vm640_vm1, %v13099_v5  ;;  %11217 = vmatprep.mubr.msk.f32.mxu1 %vm640_vm1, %v13101_v6  ;;  %v13115_v9 = vld [vmem:[%s630_s30 + $0x18] sm:$0xff]  ;;  %v13119_v11 = vld [vmem:[%s630_s30 + $0x20] sm:$0xff]  ;;  %v13123_v13 = vld [vmem:[%s630_s30 + $0x28] sm:$0xff] }
  0x1e   : > { %11231 = vmatprep.mubr.msk.f32.mxu0 %vm640_vm1, %v13103_v7  ;;  %v13129_v14 = vld [vmem:[%s630_s30 + $0x70] sm:$0xff]  ;;  %v13137_v16 = vld [vmem:[%s630_s30 + $0x78] sm:$0xff]  ;;  %12715 = vmatprep.subr.msk.bf16.mxu0 %vm1406_vm2, %v10099_v19  ;;  %v1380_v49 = vld [vmem:[#allocation2 + $0x1] sm:$0xff] }
  0x1f   : > { %v13131_v15 = vld [vmem:[%s630_s30 + $0x30] sm:$0xff]  ;;  %v13139_v17 = vld [vmem:[%s630_s30 + $0x38] sm:$0xff]  ;;  %11269 = vmatpush3.bf16.msra.mxu0 %v1408_v20  ;;  %v1488_v20 = vsel %vm1406_vm2, %v1379_v21, 0  ;;  %s15648_s30 = sld [smem:[#allocation62_spill]]  ;;  %v12763_v28 = vld [vmem:[%s15560_s9] sm:$0xff]  }
  0x20   : > { %11218 = vmatmul.mubr.msk.f32.gmra.mrb[2].mxu1 %vm640_vm1, %v13113_v8  ;;  %12716 = vmatprep.subr.msk.bf16.mxu0 %vm1406_vm2, %v1379_v21  ;;  %v1359_v21 = vld [vmem:[#allocation2] sm:$0xff] }
  0x21   : > { %11232 = vmatmul.mubr.msk.f32.gmra.mrb[2].mxu0 %vm640_vm1, %v13115_v9  ;;  %11220 = vmatprep.mubr.msk.f32.mxu1 %vm640_vm1, %v13117_v10 }
  0x22   : > { %11234 = vmatprep.mubr.msk.f32.mxu0 %vm640_vm1, %v13119_v11 }
  0x24   : > { %11221 = vmatmul.mubr.msk.f32.gmra.mrb[4].mxu1 %vm640_vm1, %v13121_v12 }
  0x25   : > { %11235 = vmatmul.mubr.msk.f32.gmra.mrb[4].mxu0 %vm640_vm1, %v13123_v13  ;;  %11223 = vmatprep.mubr.msk.f32.mxu1 %vm640_vm1, %v13129_v14 }
  0x26   : > { %11237 = vmatprep.mubr.msk.f32.mxu0 %vm640_vm1, %v13131_v15 }
  0x28   : > { %11224 = vmatmul.mubr.msk.f32.gmra.mrb[6].mxu1 %vm640_vm1, %v13137_v16 }
  0x29   : > { %11238 = vmatmul.mubr.msk.f32.gmra.mrb[6].mxu0 %vm640_vm1, %v13139_v17  ;;  %11242 = vmatprep.mubr.msk.f32.mxu1 %vm640_vm1, %v10053_v2  ;;  %v13240_v2 = vadd.s32 40, %v13193_v37 }
  0xef   : > { %v11216_v22 = vpop.f32.mrb[0].mxu1 }
  0xf0   : > { %v11230_v23 = vpop.f32.mrb[0].mxu0  ;;  %v932_v26 = vpop.f32.mrb[1].mxu1 }
  0xf1   : > { %v1070_v25 = vadd.f32 %v11230_v23, %v11216_v22  ;;  %v1064_v27 = vpop.f32.mrb[1].mxu0  ;;  %v13250_v22 = vadd.s32 16, %v13193_v37  ;;  %v10108_v23 = vld [vmem:[%s15558_s7 + $0x8] sm:$0x7] }
  0xf2   : > { %v1065_v29 = vadd.f32 %v1064_v27, %v932_v26  ;;  %v13264_v26 = vsel %vm772_vm5, 1.0, %v15580_v18 }
  0xf3   : > { %v13187_v30 = vadd.f32 %v10079_v24, %v1070_v25  ;;  %v11219_v32 = vpop.f32.mrb[2].mxu1  ;;  %v13261_v25 = vsel %vm771_vm4, 1.0, %v15580_v18 }
  0xf4   : > { %v13189_v31 = vadd.f32 %v10079_v24, %v1065_v29  ;;  %v11233_v33 = vpop.f32.mrb[2].mxu0  ;;  %v942_v35 = vpop.f32.mrb[3].mxu1 }
  0xf5   : > { %1352 = vst.msk [vmem:[#allocation2 + $0x11] sm:$0xff] %vm640_vm1, %v13187_v30  ;;  %v1080_v34 = vadd.f32 %v11233_v33, %v11219_v32  ;;  %v1074_v36 = vpop.f32.mrb[3].mxu0  ;;  %v15576_v33 = vand.u32 7, %v13240_v2 }
  0xf6   : > { %1351 = vst.msk [vmem:[#allocation2 + $0x9] sm:$0xff] %vm640_vm1, %v13189_v31  ;;  %v1075_v38 = vadd.f32 %v1074_v36, %v942_v35  ;;  %v15579_v35 = vand.u32 7, %v13250_v22  ;;  %v1367_v36 = vmul.f32 %v13261_v25, %v1359_v21 }
  0xf7   : > { %v13197_v39 = vadd.f32 %v10079_v24, %v1080_v34  ;;  %v11222_v41 = vpop.f32.mrb[4].mxu1  ;;  %vm776_vm7 = vcmp.ge.s32.totalorder %v15576_v33, 1 }
  0xf8   : > { %v13199_v40 = vadd.f32 %v10079_v24, %v1075_v38  ;;  %v11236_v42 = vpop.f32.mrb[4].mxu0  ;;  %v952_v44 = vpop.f32.mrb[5].mxu1  ;;  %vm773_vm8 = vcmp.ge.s32.totalorder %v15579_v35, 1 }
  0xf9   : > { %1354 = vst.msk [vmem:[#allocation2 + $0x21] sm:$0xff] %vm640_vm1, %v13197_v39  ;;  %v1090_v43 = vadd.f32 %v11236_v42, %v11222_v41  ;;  %v1084_v45 = vpop.f32.mrb[5].mxu0  ;;  %v13289_v42 = vadd.s32 56, %v13193_v37 }
  0xfa   : > { %1353 = vst.msk [vmem:[#allocation2 + $0x19] sm:$0xff] %vm640_vm1, %v13199_v40  ;;  %v1085_v47 = vadd.f32 %v1084_v45, %v952_v44 }
  0xfb   : > { %v13208_v48 = vadd.f32 %v10079_v24, %v1090_v43  ;;  %v11225_v51 = vpop.f32.mrb[6].mxu1 }
  0xfc   : > { %v13210_v50 = vadd.f32 %v10079_v24, %v1085_v47  ;;  %v11239_v52 = vpop.f32.mrb[6].mxu0  ;;  %v962_v54 = vpop.f32.mrb[7].mxu1  ;;  %v13231_v0 = vld [vmem:[#allocation2 + $0x11] sm:$0xff]  ;;  %v13304_v47 = vadd.s32 48, %v13193_v37 }
  0xfd   : > { %15645 = vst [vmem:[#allocation4_spill] sm:$0xff] %v13208_v48  ;;  %1356 = vst.msk [vmem:[#allocation2 + $0x31] sm:$0xff] %vm640_vm1, %v13208_v48  ;;  %v1100_v53 = vadd.f32 %v11239_v52, %v11225_v51  ;;  %v1094_v55 = vpop.f32.mrb[7].mxu0  ;;  %v13214_v56 = vld [vmem:[#allocation2 + $0x9] sm:$0xff]  ;;  %v13307_v51 = vsel %vm774_vm6, 1.0, %v15580_v18 }
  0xfe   : > { %1355 = vst.msk [vmem:[#allocation2 + $0x29] sm:$0xff] %vm640_vm1, %v13210_v50  ;;  %v1095_v59 = vadd.f32 %v1094_v55, %v962_v54  ;;  %v1388_v60 = vpack.c.bf16 %v13214_v56, %v1380_v49  ;;  %v13266_v27 = vld [vmem:[#allocation2 + $0x8] sm:$0xff]  ;;  %v15582_v55 = vand.u32 7, %v13289_v42  ;;  %v15585_v33 = vand.u32 7, %v13304_v47 }
  0xff   : > { %v13221_v61 = vadd.f32 %v10079_v24, %v1100_v53  ;;  %v1368_v38 = vmul.f32 %v13264_v26, %v13266_v27  ;;  %v13316_v53 = vsel %vm776_vm7, 1.0, %v15580_v18  ;;  %vm653_vm7 = vcmask 261120  }
 0x100   : > { %v13223_v62 = vadd.f32 %v10079_v24, %v1095_v59  ;;  %11270 = vmatprep.mubr.msk.bf16.mxu0 %vm640_vm1, %v1388_v60  ;;  %v13256_v24 = vadd.s32 32, %v13193_v37  ;;  %v13269_v29 = vld [vmem:[#allocation2 + $0x21] sm:$0xff]  ;;  %v13326_v60 = vsel %vm773_vm8, 1.0, %v15580_v18  ;;  %vm778_vm10 = vcmp.ge.s32.totalorder %v15582_v55, 1 }
 0x101   : > { %15646 = vst [vmem:[#allocation5_spill] sm:$0xff] %v13221_v61  ;;  %1358 = vst.msk [vmem:[#allocation2 + $0x41] sm:$0xff] %vm640_vm1, %v13221_v61  ;;  %v13233_v1 = vld [vmem:[#allocation2 + $0x19] sm:$0xff]  ;;  %v1375_v49 = vpack.c.bf16 %v1368_v38, %v1367_v36  ;;  %v1590_v55 = vsel %vm1406_vm2, %v10108_v23, 0  ;;  %vm777_vm13 = vcmp.ge.s32.totalorder %v15585_v33, 1  ;;  %v15650_v61 = vmov 0.0  }
 0x102   : > { %15647 = vst [vmem:[#allocation6_spill] sm:$0xff] %v13223_v62  ;;  %1357 = vst.msk [vmem:[#allocation2 + $0x39] sm:$0xff] %vm640_vm1, %v13223_v62  ;;  %v13246_v19 = vpack.c.bf16 %v13233_v1, %v13231_v0  ;;  %v15577_v41 = vand.u32 7, %v13256_v24  ;;  %v13309_v52 = vld [vmem:[#allocation2 + $0x18] sm:$0xff]  ;;  %v1119_v59 = vld [vmem:[%s15648_s30] sm:$0x3f] }
 0x103   : > { %v1370_v21 = vmul.f32 %v13307_v51, %v13309_v52  ;;  %v13335_v38 = vld [vmem:[#allocation2 + $0x20] sm:$0xff]  ;;  %11240 = vmatprep.subr.msk.mxu1 %vm862_vm0, %v1119_v59  ;;  %v13368_v37 = vsel %vm778_vm10, 1.0, %v15650_v61  ;;  %v13377_v46 = vsel %vm795_vm11, 1.0, %v15650_v61  ;;  %v13380_v58 = vsel %vm796_vm12, 1.0, %v15650_v61  ;;  %654 = vst.msk [vmem:[#allocation3] sm:$0xff] %vm653_vm7, %v15650_v61  ;;  %655 = vst.msk [vmem:[#allocation3 + $0x8] sm:$0xff] %vm653_vm7, %v15650_v61 }
 0x104   : > { %11271 = vmatmul.mubr.msk.bf16.vlgmr.msra.gmra.mrb[8].mxu0 %vm640_vm1, %v13246_v19  ;;  %v13291_v43 = vld [vmem:[#allocation2 + $0x31] sm:$0xff]  ;;  %vm775_vm9 = vcmp.ge.s32.totalorder %v15577_v41, 1  ;;  %11241 = vmatpush3.msk.msra.mxu1 %vm862_vm0, %v1119_v59  ;;  %v15653_v33 = vand.u32 7, %v13256_v24  ;;  %656 = vst.msk [vmem:[#allocation3 + $0x10] sm:$0xff] %vm653_vm7, %v15650_v61  ;;  %657 = vst.msk [vmem:[#allocation3 + $0x18] sm:$0xff] %vm653_vm7, %v15650_v61  ;;  %vm664_vm8 = vcmask 254976  }
 0x105   : > { %11279 = vmatpush3.bf16.msra.mxu0 %v1488_v20  ;;  %v13271_v32 = vld [vmem:[#allocation2 + $0x29] sm:$0xff]  ;;  %v13333_v36 = vsel %vm775_vm9, 1.0, %v15580_v18  ;;  %11243 = vmatmul.mubr.msk.f32.vlgmr.msra.gmra.mrb[8].mxu1 %vm640_vm1, %v13094_v4  ;;  %658 = vst.msk [vmem:[#allocation3 + $0x20] sm:$0xff] %vm653_vm7, %v15650_v61  ;;  %659 = vst.msk [vmem:[#allocation3 + $0x28] sm:$0xff] %vm653_vm7, %v15650_v61 }
 0x106   : > { %v13276_v34 = vpack.c.bf16 %v13271_v32, %v13269_v29  ;;  %12717 = vmatprep.subr.msk.bf16.mxu0 %vm1406_vm2, %v10108_v23  ;;  %v13318_v54 = vld [vmem:[#allocation2 + $0x28] sm:$0xff]  ;;  %v13328_v20 = vld [vmem:[#allocation2 + $0x10] sm:$0xff]  ;;  %v1371_v18 = vmul.f32 %v13333_v36, %v13335_v38  ;;  %11245 = vmatprep.mubr.msk.f32.mxu1 %vm640_vm1, %v13101_v6  ;;  %vm799_vm3 = vcmp.le.s32.totalorder %v15653_v33, 6  ;;  %660 = vst.msk [vmem:[#allocation3 + $0x30] sm:$0xff] %vm653_vm7, %v15650_v61  ;;  %661 = vst.msk [vmem:[#allocation3 + $0x38] sm:$0xff] %vm653_vm7, %v15650_v61 }
 0x107   : > { %v1372_v41 = vmul.f32 %v13316_v53, %v13318_v54  ;;  %v1369_v35 = vmul.f32 %v13326_v60, %v13328_v20  ;;  %v10113_v6 = vld [vmem:[%s15558_s7 + $0xc] sm:$0x7]  ;;  %v1555_v23 = vld [vmem:[#allocation2 + $0x2] sm:$0xff]  ;;  %662 = vst.msk [vmem:[#allocation3 + $0x40] sm:$0xff] %vm653_vm7, %v15650_v61  ;;  %663 = vst.msk [vmem:[#allocation3 + $0x48] sm:$0xff] %vm653_vm7, %v15650_v61 }
 0x108   : > { %11274 = vmatprep.mubr.msk.bf16.mxu0 %vm640_vm1, %v13276_v34  ;;  %v13433_v33 = vld [vmem:[#allocation2 + $0x2a] sm:$0xff]  ;;  %665 = vst.msk [vmem:[#allocation3 + $0x50] sm:$0x3] %vm664_vm8, %v15650_v61 }
 0x109   : > { %v13293_v44 = vld [vmem:[#allocation2 + $0x39] sm:$0xff]  ;;  %v1376_v59 = vpack.c.bf16 %v1370_v21, %v1369_v35  ;;  %v1377_v4 = vpack.c.bf16 %v1372_v41, %v1371_v18  ;;  %v13382_v18 = vld [vmem:[#allocation2 + $0xa] sm:$0xff]  ;;  %11246 = vmatmul.mubr.msk.f32.gmra.mrb[10].mxu1 %vm640_vm1, %v13113_v8  ;;  %v13388_v35 = vsel %vm777_vm13, 1.0, %v15650_v61 }
 0x10a   : > { %v13299_v45 = vpack.c.bf16 %v13293_v44, %v13291_v43  ;;  %v13370_v57 = vld [vmem:[#allocation2 + $0x38] sm:$0xff]  ;;  %v13390_v41 = vld [vmem:[#allocation2 + $0x30] sm:$0xff]  ;;  %11248 = vmatprep.mubr.msk.f32.mxu1 %vm640_vm1, %v13117_v10  ;;  %v1564_v8 = vmul.f32 %v13380_v58, %v13382_v18  ;;  %v15654_v10 = vand.u32 7, %v13240_v2  ;;  %v13426_v2 = vsel %vm799_vm3, 1.0, %v15650_v61 }
 0x10b   : > { %v1374_v21 = vmul.f32 %v13368_v37, %v13370_v57 }
 0x10c   : > { %11275 = vmatmul.mubr.msk.bf16.gmra.mrb[12].mxu0 %vm640_vm1, %v13299_v45  ;;  %vm800_vm4 = vcmp.le.s32.totalorder %v15654_v10, 6 }
 0x10d   : > { %11280 = vmatprep.mubr.msk.bf16.mxu0 %vm640_vm1, %v1375_v49  ;;  %v1118_v49 = vld [vmem:[%s15649_s23] sm:$0x3f]  ;;  %11249 = vmatmul.mubr.msk.f32.gmra.mrb[12].mxu1 %vm640_vm1, %v13121_v12  ;;  %v13429_v24 = vsel %vm800_vm4, 1.0, %v15650_v61 }
 0x10e   : > { %11254 = vmatprep.subr.msk.mxu1 %vm862_vm0, %v1118_v49  ;;  %11251 = vmatprep.mubr.msk.f32.mxu1 %vm640_vm1, %v13129_v14  ;;  %v13422_v12 = vld [vmem:[#allocation2 + $0x1a] sm:$0xff]  ;;  %v13431_v14 = vld [vmem:[#allocation2 + $0x22] sm:$0xff] }
 0x10f   : > { %11255 = vmatpush3.msk.msra.mxu1 %vm862_vm0, %v1118_v49  ;;  %v1563_v49 = vmul.f32 %v13377_v46, %v1555_v23 }
 0x110   : > { %11358 = vmatprep.subr.bf16.mxu1 %v12763_v28 }
 0x111   : > { %v1571_v62 = vpack.c.bf16 %v1564_v8, %v1563_v49  ;;  %11252 = vmatmul.mubr.msk.f32.gmra.mrb[14].mxu1 %vm640_vm1, %v13137_v16  ;;  %v1567_v8 = vmul.f32 %v13426_v2, %v13431_v14  ;;  %v15656_v16 = vand.u32 7, %v13289_v42  ;;  %v13465_v42 = vld [vmem:[#allocation2 + $0x3a] sm:$0xff] }
 0x112   : > { %11256 = vmatprep.mubr.msk.f32.mxu1 %vm640_vm1, %v13092_v3 }
 0x113   : > { %vm802_vm6 = vcmp.le.s32.totalorder %v15656_v16, 6 }
 0x114   : > { %11281 = vmatmul.mubr.msk.bf16.vlgmr.msra.gmra.mrb[8].mxu0 %vm640_vm1, %v1376_v59  ;;  %v15651_v59 = vand.u32 7, %v13250_v22 }
 0x115   : > { %11284 = vmatprep.mubr.msk.bf16.mxu0 %vm640_vm1, %v1377_v4  ;;  %11289 = vmatpush3.bf16.msra.mxu0 %v1590_v55  ;;  %v1373_v55 = vmul.f32 %v13388_v35, %v13390_v41  ;;  %v15652_v4 = vand.u32 7, %v13227_v63 }
 0x116   : > { %12718 = vmatprep.subr.msk.bf16.mxu0 %vm1406_vm2, %v10113_v6  ;;  %vm797_vm14 = vcmp.le.s32.totalorder %v15651_v59, 6  ;;  %v13420_v59 = vld [vmem:[#allocation2 + $0x12] sm:$0xff]  ;;  %11257 = vmatmul.mubr.msk.f32.vlgmr.msra.gmra.mrb[8].mxu1 %vm640_vm1, %v13099_v5 }
 0x117   : > { %vm798_vm15 = vcmp.le.s32.totalorder %v15652_v4, 6  ;;  %v1378_v23 = vpack.c.bf16 %v1374_v21, %v1373_v55  ;;  %v13415_v22 = vsel %vm797_vm14, 1.0, %v15650_v61  ;;  %v1568_v55 = vmul.f32 %v13429_v24, %v13433_v33  ;;  %11259 = vmatprep.mubr.msk.f32.mxu1 %vm640_vm1, %v13103_v7  ;;  %11359 = vmatpush3.bf16.msra.mxu1 %v12763_v28  ;;  %v10118_v5 = vld [vmem:[%s15558_s7 + $0x10] sm:$0x7] }
 0x118   : > { %v13418_v63 = vsel %vm798_vm15, 1.0, %v15650_v61  ;;  %v1565_v21 = vmul.f32 %v13415_v22, %v13420_v59  ;;  %v15655_v4 = vand.u32 7, %v13304_v47  ;;  %v13461_v47 = vsel %vm802_vm6, 1.0, %v15650_v61 }
 0x119   : > { %v1566_v49 = vmul.f32 %v13418_v63, %v13422_v12  ;;  %v1573_v10 = vpack.c.bf16 %v1568_v55, %v1567_v8  ;;  %v1570_v28 = vmul.f32 %v13461_v47, %v13465_v42  ;;  %v1802_v55 = vsel %vm1406_vm2, %v10118_v5, 0 }
 0x11a   : > { %vm801_vm5 = vcmp.le.s32.totalorder %v15655_v4, 6  ;;  %v13463_v4 = vld [vmem:[#allocation2 + $0x32] sm:$0xff]  ;;  %11260 = vmatmul.mubr.msk.f32.gmra.mrb[10].mxu1 %vm640_vm1, %v13115_v9  ;;  %v1674_v9 = vmul.f32 %v13264_v26, %v13328_v20 }
 0x11b   : > { %v1572_v3 = vpack.c.bf16 %v1566_v49, %v1565_v21  ;;  %11262 = vmatprep.mubr.msk.f32.mxu1 %vm640_vm1, %v13119_v11  ;;  %v1675_v11 = vmul.f32 %v13326_v60, %v13309_v52 }
 0x11c   : > { %11285 = vmatmul.mubr.msk.bf16.gmra.mrb[12].mxu0 %vm640_vm1, %v1378_v23  ;;  %v13458_v23 = vsel %vm801_vm5, 1.0, %v15650_v61 }
 0x11d   : > { %11290 = vmatprep.mubr.msk.bf16.mxu0 %vm640_vm1, %v1571_v62  ;;  %v1700_v62 = vsel %vm1406_vm2, %v10113_v6, 0  ;;  %v1569_v7 = vmul.f32 %v13458_v23, %v13463_v4  ;;  %v1673_v6 = vmul.f32 %v13261_v25, %v13266_v27  ;;  %v1676_v27 = vmul.f32 %v13307_v51, %v13335_v38 }
 0x11e   : > { %11263 = vmatmul.mubr.msk.f32.gmra.mrb[12].mxu1 %vm640_vm1, %v13123_v13  ;;  %v1677_v13 = vmul.f32 %v13333_v36, %v13318_v54 }
 0x11f   : > { %11265 = vmatprep.mubr.msk.f32.mxu1 %vm640_vm1, %v13131_v15  ;;  %v1574_v21 = vpack.c.bf16 %v1570_v28, %v1569_v7  ;;  %v1681_v49 = vpack.c.bf16 %v1674_v9, %v1673_v6  ;;  %v1678_v15 = vmul.f32 %v13316_v53, %v13390_v41  ;;  %v1682_v8 = vpack.c.bf16 %v1676_v27, %v1675_v11 }
 0x120   : > { %v1784_v28 = vpack.c.bf16 %v13269_v29, %v13233_v1  ;;  %v1785_v9 = vpack.c.bf16 %v13291_v43, %v13271_v32  ;;  %v1885_v1 = vmul.f32 %v13377_v46, %v13382_v18  ;;  %v1888_v43 = vmul.f32 %v13418_v63, %v13431_v14 }
 0x121   : > { %v1683_v16 = vpack.c.bf16 %v1678_v15, %v1677_v13  ;;  %v1887_v11 = vmul.f32 %v13415_v22, %v13422_v12  ;;  %v1889_v27 = vmul.f32 %v13426_v2, %v13433_v33  ;;  %v1884_v15 = vld [vmem:[#allocation2 + $0x42] sm:$0xff] }
 0x122   : > { %11266 = vmatmul.mubr.msk.f32.gmra.mrb[14].mxu1 %vm640_vm1, %v13139_v17  ;;  %v10123_v17 = vld [vmem:[%s15558_s7 + $0x14] sm:$0x7] }
 0x123   : > { %v1912_v6 = vsel %vm1406_vm2, %v10123_v17, 0  ;;  %v1894_v18 = vpack.c.bf16 %v1888_v43, %v1887_v11 }
 0x124   : > { %11291 = vmatmul.mubr.msk.bf16.vlgmr.msra.gmra.mrb[8].mxu0 %vm640_vm1, %v1572_v3  ;;  %v1672_v3 = vld [vmem:[#allocation2 + $0x40] sm:$0xff] }
 0x125   : > { %11294 = vmatprep.mubr.msk.bf16.mxu0 %vm640_vm1, %v1573_v10  ;;  %11299 = vmatpush3.bf16.msra.mxu0 %v1700_v62  ;;  %v1679_v62 = vmul.f32 %v13388_v35, %v13370_v57  ;;  %v1680_v10 = vmul.f32 %v13368_v37, %v1672_v3 }
 0x126   : > { %12719 = vmatprep.subr.msk.bf16.mxu0 %vm1406_vm2, %v10118_v5  ;;  %v1783_v5 = vpack.c.bf16 %v13231_v0, %v13214_v56  ;;  %v1782_v56 = vld [vmem:[#allocation2 + $0x41] sm:$0xff]  ;;  %v1886_v0 = vmul.f32 %v13380_v58, %v13420_v59 }
 0x127   : > { %v1684_v7 = vpack.c.bf16 %v1680_v10, %v1679_v62  ;;  %v1786_v29 = vpack.c.bf16 %v1782_v56, %v13293_v44  ;;  %v1995_v62 = vmul.f32 %v13261_v25, %v13328_v20 }
 0x128   : > { %v1893_v32 = vpack.c.bf16 %v1886_v0, %v1885_v1  ;;  %v1994_v0 = vld [vmem:[#allocation2 + $0x48] sm:$0xff]  ;;  %v10138_v1 = vld [vmem:[%s15558_s7 + $0x20] sm:$0x7] }
 0x12c   : > { %11295 = vmatmul.mubr.msk.bf16.gmra.mrb[12].mxu0 %vm640_vm1, %v1574_v21  ;;  %v10128_v21 = vld [vmem:[%s15558_s7 + $0x18] sm:$0x7] }
 0x12d   : > { %11300 = vmatprep.mubr.msk.bf16.mxu0 %vm640_vm1, %v1681_v49  ;;  %v1890_v49 = vmul.f32 %v13429_v24, %v13463_v4  ;;  %v2022_v44 = vsel %vm1406_vm2, %v10128_v21, 0 }
 0x12f   : > { %v1895_v13 = vpack.c.bf16 %v1890_v49, %v1889_v27  ;;  %v2213_v27 = vmul.f32 %v13458_v23, %v1884_v15 }
 0x134   : > { %11301 = vmatmul.mubr.msk.bf16.vlgmr.msra.gmra.mrb[8].mxu0 %vm640_vm1, %v1682_v8  ;;  %v10133_v8 = vld [vmem:[%s15558_s7 + $0x1c] sm:$0x7] }
 0x135   : > { %11304 = vmatprep.mubr.msk.bf16.mxu0 %vm640_vm1, %v1683_v16  ;;  %11309 = vmatpush3.bf16.msra.mxu0 %v1802_v55  ;;  %v1891_v55 = vmul.f32 %v13458_v23, %v13465_v42  ;;  %v1892_v16 = vmul.f32 %v13461_v47, %v1884_v15  ;;  %v2124_v20 = vsel %vm1406_vm2, %v10133_v8, 0 }
 0x136   : > { %12720 = vmatprep.subr.msk.bf16.mxu0 %vm1406_vm2, %v10123_v17  ;;  %v1996_v17 = vmul.f32 %v13264_v26, %v13309_v52  ;;  %v1999_v52 = vmul.f32 %v13333_v36, %v13390_v41  ;;  %v2234_v41 = vsel %vm1406_vm2, %v10138_v1, 0 }
 0x137   : > { %v1896_v10 = vpack.c.bf16 %v1892_v16, %v1891_v55 }
 0x13c   : > { %11305 = vmatmul.mubr.msk.bf16.gmra.mrb[12].mxu0 %vm640_vm1, %v1684_v7  ;;  %v2003_v7 = vpack.c.bf16 %v1996_v17, %v1995_v62  ;;  %v10143_v17 = vld [vmem:[%s15559_s8] ss:$0 sm:$0xff] }
 0x13d   : > { %11310 = vmatprep.mubr.msk.bf16.mxu0 %vm640_vm1, %v1783_v5  ;;  %v1998_v5 = vmul.f32 %v13307_v51, %v13318_v54  ;;  %v2001_v54 = vmul.f32 %v13388_v35, %v1672_v3  ;;  %v2104_v3 = vld [vmem:[#allocation2 + $0x49] sm:$0xff] }
 0x13e   : > { %v2108_v43 = vpack.c.bf16 %v2104_v3, %v1782_v56  ;;  %v2206_v56 = vld [vmem:[#allocation2 + $0x4a] sm:$0xff] }
 0x144   : > { %11311 = vmatmul.mubr.msk.bf16.vlgmr.msra.gmra.mrb[8].mxu0 %vm640_vm1, %v1784_v28  ;;  %v2000_v28 = vmul.f32 %v13316_v53, %v13370_v57 }
 0x145   : > { %11314 = vmatprep.mubr.msk.bf16.mxu0 %vm640_vm1, %v1785_v9  ;;  %11319 = vmatpush3.bf16.msra.mxu0 %v1912_v6  ;;  %v1997_v6 = vmul.f32 %v13326_v60, %v13335_v38  ;;  %v2002_v38 = vmul.f32 %v13368_v37, %v1994_v0 }
 0x146   : > { %12721 = vmatprep.subr.msk.bf16.mxu0 %vm1406_vm2, %v10128_v21  ;;  %v2005_v21 = vpack.c.bf16 %v2000_v28, %v1999_v52 }
 0x147   : > { %v2004_v9 = vpack.c.bf16 %v1998_v5, %v1997_v6  ;;  %v2006_v57 = vpack.c.bf16 %v2002_v38, %v2001_v54 }
 0x14c   : > { %11315 = vmatmul.mubr.msk.bf16.gmra.mrb[12].mxu0 %vm640_vm1, %v1786_v29  ;;  %v2207_v29 = vmul.f32 %v13377_v46, %v13420_v59  ;;  %v2212_v59 = vmul.f32 %v13429_v24, %v13465_v42 }
 0x14d   : > { %11320 = vmatprep.mubr.msk.bf16.mxu0 %vm640_vm1, %v1893_v32  ;;  %v2208_v32 = vmul.f32 %v13380_v58, %v13422_v12 }
 0x14f   : > { %v2215_v49 = vpack.c.bf16 %v2208_v32, %v2207_v29 }
 0x154   : > { %11321 = vmatmul.mubr.msk.bf16.vlgmr.msra.gmra.mrb[8].mxu0 %vm640_vm1, %v1894_v18 }
 0x155   : > { %11324 = vmatprep.mubr.msk.bf16.mxu0 %vm640_vm1, %v1895_v13  ;;  %11329 = vmatpush3.bf16.msra.mxu0 %v2022_v44 }
 0x156   : > { %12722 = vmatprep.subr.msk.bf16.mxu0 %vm1406_vm2, %v10133_v8 }
 0x15c   : > { %11325 = vmatmul.mubr.msk.bf16.gmra.mrb[12].mxu0 %vm640_vm1, %v1896_v10 }
 0x15d   : > { %11330 = vmatprep.mubr.msk.bf16.mxu0 %vm640_vm1, %v2003_v7 }
 0x164   : > { %11331 = vmatmul.mubr.msk.bf16.vlgmr.msra.gmra.mrb[8].mxu0 %vm640_vm1, %v2004_v9 }
 0x165   : > { %11334 = vmatprep.mubr.msk.bf16.mxu0 %vm640_vm1, %v2005_v21  ;;  %11339 = vmatpush3.bf16.msra.mxu0 %v2124_v20 }
 0x166   : > { %12723 = vmatprep.subr.msk.bf16.mxu0 %vm1406_vm2, %v10138_v1 }
 0x16c   : > { %11335 = vmatmul.mubr.msk.bf16.gmra.mrb[12].mxu0 %vm640_vm1, %v2006_v57 }
 0x16d   : > { %11340 = vmatprep.mubr.msk.bf16.mxu0 %vm640_vm1, %v13246_v19  ;;  %v2209_v19 = vmul.f32 %v13415_v22, %v13431_v14  ;;  %v2214_v14 = vmul.f32 %v13461_v47, %v2206_v56 }
 0x16f   : > { %v2218_v18 = vpack.c.bf16 %v2214_v14, %v2213_v27  ;;  %v12765_v27 = vld [vmem:[%s15562_s11 + $0x10] sm:$0xff]   ;;  %v12766_v14 = vld [vmem:[%s15562_s11 + $0x18] sm:$0xff]  }
 0x174   : > { %11341 = vmatmul.mubr.msk.bf16.vlgmr.msra.gmra.mrb[8].mxu0 %vm640_vm1, %v13276_v34  ;;  %v2210_v34 = vmul.f32 %v13418_v63, %v13433_v33  ;;  %v12764_v33 = vld [vmem:[%s15560_s9 + $0x8] sm:$0xff]  }
 0x175   : > { %11344 = vmatprep.mubr.msk.bf16.mxu0 %vm640_vm1, %v13299_v45  ;;  %11349 = vmatpush3.bf16.msra.mxu0 %v2234_v41  ;;  %v2211_v45 = vmul.f32 %v13426_v2, %v13463_v4 }
 0x176   : > { %v2216_v11 = vpack.c.bf16 %v2210_v34, %v2209_v19  ;;  %11360 = vmatprep.subr.bf16.mxu1 %v12764_v33 }
 0x177   : > { %v2217_v12 = vpack.c.bf16 %v2212_v59, %v2211_v45  ;;  %11361 = vmatpush3.bf16.msra.mxu1 %v12764_v33  ;;  %v10144_v33 = vld [vmem:[%s15561_s10] ss:$0 sm:$0xff] }
 0x178   : > { %11370 = vmatprep.subr.bf16.mxu1 %v12765_v27 }
 0x17c   : > { %11345 = vmatmul.mubr.msk.bf16.gmra.mrb[12].mxu0 %vm640_vm1, %v2108_v43 }
 0x17d   : > { %11350 = vmatprep.mubr.msk.bf16.mxu0 %vm640_vm1, %v2215_v49 }
 0x184   : > { %11351 = vmatmul.mubr.msk.bf16.vlgmr.msra.gmra.mrb[8].mxu0 %vm640_vm1, %v2216_v11 }
 0x185   : > { %11354 = vmatprep.mubr.msk.bf16.mxu0 %vm640_vm1, %v2217_v12 }
 0x18c   : > { %11355 = vmatmul.mubr.msk.bf16.gmra.mrb[12].mxu0 %vm640_vm1, %v2218_v18  ;;  %v12767_v18 = vld [vmem:[%s15564_s13 + $0x10] sm:$0xff]  }
 0x1e9   : > { %v13624_v4 = vpop.f32.mrb[8].mxu1 }
 0x1ea   : > { %v13626_v42 = vpop.f32.mrb[9].mxu1 }
 0x1ed   : > { %v13628_v44 = vpop.f32.mrb[10].mxu1 }
 0x1ee   : > { %v13630_v13 = vpop.f32.mrb[11].mxu1 }
 0x1f1   : > { %v13632_v15 = vpop.f32.mrb[12].mxu1 }
 0x1f2   : > { %v13634_v8 = vpop.f32.mrb[13].mxu1 }
 0x1f5   : > { %v13636_v55 = vpop.f32.mrb[14].mxu1 }
 0x1f6   : > { %v13638_v16 = vpop.f32.mrb[15].mxu1 }
 0x257   : > { %v11352_v62 = vpop.f32.mrb[8].mxu0 }
 0x258   : > { %v2318_v10 = vadd.f32 %v11352_v62, %v10143_v17  ;;  %v2270_v7 = vpop.f32.mrb[9].mxu0 }
 0x259   : > { %v2316_v5 = vadd.f32 %v10143_v17, %v2270_v7  ;;  %v11353_v28 = vpop.f32.mrb[10].mxu0 }
 0x25a   : > { %v2319_v6 = vadd.f32 %v11353_v28, %v10143_v17  ;;  %v2273_v52 = vpop.f32.mrb[11].mxu0  ;;  %v2326_v20 = vmax.f32 %v2318_v10, 0.0 }
 0x25b   : > { %v2317_v9 = vadd.f32 %v10143_v17, %v2273_v52  ;;  %v2324_v0 = vmax.f32 %v2316_v5, 0.0 }
 0x25c   : > { %v2327_v21 = vmax.f32 %v2319_v6, 0.0 }
 0x25d   : > { %v2325_v1 = vmax.f32 %v2317_v9, 0.0 }
 0x25e   : > { %v2333_v54 = vpack.c.bf16 %v2327_v21, %v2326_v20 }
 0x25f   : > { %v2332_v38 = vpack.c.bf16 %v2325_v1, %v2324_v0  ;;  %v11356_v57 = vpop.f32.mrb[12].mxu0 }
 0x260   : > { %v2322_v41 = vadd.f32 %v11356_v57, %v10143_v17  ;;  %v2286_v3 = vpop.f32.mrb[13].mxu0 }
 0x261   : > { %v2320_v29 = vadd.f32 %v10143_v17, %v2286_v3  ;;  %v11357_v32 = vpop.f32.mrb[14].mxu0  ;;  %11362 = vmatprep.mubr.msk.bf16.mxu1 %vm653_vm7, %v2332_v38 }
 0x262   : > { %v2323_v43 = vadd.f32 %v11357_v32, %v10143_v17  ;;  %v2289_v49 = vpop.f32.mrb[15].mxu0  ;;  %11363 = vmatmul.mubr.msk.bf16.vlgmr.msra.gmra.mrb[16].mxu1 %vm653_vm7, %v2333_v54  ;;  %v2330_v34 = vmax.f32 %v2322_v41, 0.0 }
 0x263   : > { %v2321_v19 = vadd.f32 %v10143_v17, %v2289_v49  ;;  %v2328_v59 = vmax.f32 %v2320_v29, 0.0  ;;  %11371 = vmatpush3.bf16.msra.mxu1 %v12765_v27 }
 0x264   : > { %v2331_v45 = vmax.f32 %v2323_v43, 0.0  ;;  %11372 = vmatprep.subr.bf16.mxu1 %v12766_v14  ;;  %v2480_v43 = vld [vmem:[#allocation3 + $0x1] sm:$0xff] }
 0x265   : > { %v2329_v11 = vmax.f32 %v2321_v19, 0.0 }
 0x266   : > { %v2335_v12 = vpack.c.bf16 %v2331_v45, %v2330_v34 }
 0x267   : > { %v2334_v56 = vpack.c.bf16 %v2329_v11, %v2328_v59  ;;  %11373 = vmatpush3.bf16.msra.mxu1 %v12766_v14  ;;  %v12768_v14 = vld [vmem:[%s15564_s13 + $0x18] sm:$0xff]  }
 0x268   : > { %11382 = vmatprep.subr.bf16.mxu1 %v12767_v18 }
 0x269   : > { %11366 = vmatprep.mubr.msk.bf16.mxu1 %vm653_vm7, %v2334_v56 }
 0x26a   : > { %11367 = vmatmul.mubr.msk.bf16.gmra.mrb[20].mxu1 %vm653_vm7, %v2335_v12 }
 0x335   : > { %v11364_v17 = vpop.f32.mrb[16].mxu1 }
 0x336   : > { %v2414_v62 = vadd.f32 %v11364_v17, %v10144_v33  ;;  %v2405_v10 = vpop.f32.mrb[17].mxu1 }
 0x337   : > { %v2406_v7 = vadd.f32 %v10144_v33, %v2405_v10  ;;  %v11365_v5 = vpop.f32.mrb[18].mxu1 }
 0x338   : > { %v2438_v28 = vmax.f32 %v2414_v62, 0.0  ;;  %v2417_v6 = vadd.f32 %v11365_v5, %v10144_v33  ;;  %v2408_v52 = vpop.f32.mrb[19].mxu1 }
 0x339   : > { %v2436_v9 = vmax.f32 %v2406_v7, 0.0  ;;  %v2409_v20 = vadd.f32 %v10144_v33, %v2408_v52 }
 0x33a   : > { %2446 = vst.msk [vmem:[#allocation3 + $0x19] sm:$0xff] %vm653_vm7, %v2438_v28  ;;  %v2439_v21 = vmax.f32 %v2417_v6, 0.0  ;;  %v12770_v28 = vld [vmem:[%s15562_s11 + $0x8] sm:$0xff]   ;;  %v2452_v6 = vld [vmem:[#allocation3] sm:$0xff] }
 0x33b   : > { %2444 = vst.msk [vmem:[#allocation3 + $0x9] sm:$0xff] %vm653_vm7, %v2436_v9  ;;  %v2437_v0 = vmax.f32 %v2409_v20, 0.0  ;;  %v12771_v9 = vld [vmem:[%s15564_s13] sm:$0xff]   ;;  %v2460_v20 = vmul.f32 %v13261_v25, %v2452_v6  ;;  %v12774_v6 = vld [vmem:[%s15562_s11 + $0x28] sm:$0xff]  }
 0x33c   : > { %2447 = vst.msk [vmem:[#allocation3 + $0x21] sm:$0xff] %vm653_vm7, %v2439_v21 }
 0x33d   : > { %2445 = vst.msk [vmem:[#allocation3 + $0x11] sm:$0xff] %vm653_vm7, %v2437_v0  ;;  %v11368_v1 = vpop.f32.mrb[20].mxu1 }
 0x33e   : > { %v2430_v54 = vadd.f32 %v11368_v1, %v10144_v33  ;;  %v2421_v38 = vpop.f32.mrb[21].mxu1 }
 0x33f   : > { %v2422_v57 = vadd.f32 %v10144_v33, %v2421_v38  ;;  %v11369_v41 = vpop.f32.mrb[22].mxu1 }
 0x340   : > { %v2442_v3 = vmax.f32 %v2430_v54, 0.0  ;;  %v2433_v29 = vadd.f32 %v11369_v41, %v10144_v33  ;;  %v2424_v32 = vpop.f32.mrb[23].mxu1 }
 0x341   : > { %v2440_v49 = vmax.f32 %v2422_v57, 0.0  ;;  %v2425_v19 = vadd.f32 %v10144_v33, %v2424_v32  ;;  %v13672_v56 = vld [vmem:[#allocation3 + $0x19] sm:$0xff]  ;;  %v12769_v33 = vld [vmem:[%s15562_s11] sm:$0xff]  }
 0x342   : > { %2450 = vst.msk [vmem:[#allocation3 + $0x39] sm:$0xff] %vm653_vm7, %v2442_v3  ;;  %v2443_v34 = vmax.f32 %v2433_v29, 0.0  ;;  %v13665_v45 = vld [vmem:[#allocation3 + $0x9] sm:$0xff] }
 0x343   : > { %2448 = vst.msk [vmem:[#allocation3 + $0x29] sm:$0xff] %vm653_vm7, %v2440_v49  ;;  %v2441_v59 = vmax.f32 %v2425_v19, 0.0  ;;  %v2488_v11 = vpack.c.bf16 %v13665_v45, %v2480_v43  ;;  %v13688_v17 = vld [vmem:[#allocation3 + $0x21] sm:$0xff]  ;;  %v12772_v49 = vld [vmem:[%s15564_s13 + $0x8] sm:$0xff]  }
 0x344   : > { %2451 = vst.msk [vmem:[#allocation3 + $0x41] sm:$0xff] %vm653_vm7, %v2443_v34  ;;  %v13670_v12 = vld [vmem:[#allocation3 + $0x11] sm:$0xff]  ;;  %v13714_v52 = vld [vmem:[#allocation3 + $0x8] sm:$0xff]  ;;  %v13737_v3 = vld [vmem:[#allocation3 + $0x20] sm:$0xff] }
 0x345   : > { %2449 = vst.msk [vmem:[#allocation3 + $0x31] sm:$0xff] %vm653_vm7, %v2441_v59  ;;  %11374 = vmatprep.mubr.msk.bf16.mxu1 %vm653_vm7, %v2488_v11  ;;  %v13678_v27 = vpack.c.bf16 %v13672_v56, %v13670_v12  ;;  %v2461_v21 = vmul.f32 %v13264_v26, %v13714_v52  ;;  %v13724_v1 = vld [vmem:[#allocation3 + $0x10] sm:$0xff]  ;;  %v13726_v54 = vld [vmem:[#allocation3 + $0x18] sm:$0xff]  ;;  %v2464_v32 = vmul.f32 %v13333_v36, %v13737_v3 }
 0x346   : > { %v2462_v57 = vmul.f32 %v13326_v60, %v13724_v1  ;;  %v2463_v41 = vmul.f32 %v13307_v51, %v13726_v54 }
 0x347   : > { %11375 = vmatmul.mubr.msk.bf16.vlgmr.msra.gmra.mrb[24].mxu1 %vm653_vm7, %v13678_v27  ;;  %v2468_v0 = vpack.c.bf16 %v2461_v21, %v2460_v20  ;;  %v2834_v20 = vld [vmem:[#allocation3 + $0x2] sm:$0xff] }
 0x348   : > { %11383 = vmatpush3.bf16.msra.mxu1 %v12767_v18  ;;  %v2469_v43 = vpack.c.bf16 %v2463_v41, %v2462_v57  ;;  %v12775_v21 = vld [vmem:[%s15564_s13 + $0x20] sm:$0xff]   ;;  %v2842_v57 = vmul.f32 %v13377_v46, %v2834_v20 }
 0x349   : > { %11384 = vmatprep.subr.bf16.mxu1 %v12768_v14  ;;  %v13698_v5 = vld [vmem:[#allocation3 + $0x39] sm:$0xff] }
 0x34a   : > { %v13690_v62 = vld [vmem:[#allocation3 + $0x29] sm:$0xff] }
 0x34b   : > { %v13694_v10 = vpack.c.bf16 %v13690_v62, %v13688_v17  ;;  %v13730_v38 = vld [vmem:[#allocation3 + $0x28] sm:$0xff] }
 0x34c   : > { %v13696_v7 = vld [vmem:[#allocation3 + $0x31] sm:$0xff]  ;;  %11385 = vmatpush3.bf16.msra.mxu1 %v12768_v14  ;;  %v2465_v29 = vmul.f32 %v13316_v53, %v13730_v38 }
 0x34d   : > { %11378 = vmatprep.mubr.msk.bf16.mxu1 %vm653_vm7, %v13694_v10  ;;  %v13704_v18 = vpack.c.bf16 %v13698_v5, %v13696_v7  ;;  %11394 = vmatprep.subr.bf16.mxu1 %v12769_v33  ;;  %v13746_v34 = vld [vmem:[#allocation3 + $0x30] sm:$0xff]  ;;  %v13748_v59 = vld [vmem:[#allocation3 + $0x38] sm:$0xff] }
 0x34e   : > { %v2470_v19 = vpack.c.bf16 %v2465_v29, %v2464_v32  ;;  %v2467_v14 = vmul.f32 %v13368_v37, %v13748_v59  ;;  %v13774_v29 = vld [vmem:[#allocation3 + $0x12] sm:$0xff]  ;;  %v13776_v32 = vld [vmem:[#allocation3 + $0x1a] sm:$0xff] }
 0x34f   : > { %11379 = vmatmul.mubr.msk.bf16.gmra.mrb[28].mxu1 %vm653_vm7, %v13704_v18 }
 0x350   : > { %11386 = vmatprep.mubr.msk.bf16.mxu1 %vm653_vm7, %v2488_v11  ;;  %v2466_v11 = vmul.f32 %v13388_v35, %v13746_v34 }
 0x357   : > { %11387 = vmatmul.mubr.msk.bf16.vlgmr.msra.gmra.mrb[32].mxu1 %vm653_vm7, %v13678_v27 }
 0x358   : > { %11390 = vmatprep.mubr.msk.bf16.mxu1 %vm653_vm7, %v13694_v10  ;;  %11395 = vmatpush3.bf16.msra.mxu1 %v12769_v33  ;;  %v12773_v33 = vld [vmem:[%s15562_s11 + $0x20] sm:$0xff]  }
 0x359   : > { %11396 = vmatprep.subr.bf16.mxu1 %v12770_v28 }
 0x35c   : > { %11397 = vmatpush3.bf16.msra.mxu1 %v12770_v28  ;;  %v2471_v28 = vpack.c.bf16 %v2467_v14, %v2466_v11  ;;  %v13786_v11 = vld [vmem:[#allocation3 + $0x22] sm:$0xff] }
 0x35d   : > { %11406 = vmatprep.subr.bf16.mxu1 %v12771_v9 }
 0x35f   : > { %11391 = vmatmul.mubr.msk.bf16.gmra.mrb[36].mxu1 %vm653_vm7, %v13704_v18 }
 0x360   : > { %11398 = vmatprep.mubr.msk.bf16.mxu1 %vm653_vm7, %v2468_v0 }
 0x367   : > { %11399 = vmatmul.mubr.msk.bf16.vlgmr.msra.gmra.mrb[24].mxu1 %vm653_vm7, %v2469_v43 }
 0x368   : > { %11402 = vmatprep.mubr.msk.bf16.mxu1 %vm653_vm7, %v2470_v19  ;;  %11407 = vmatpush3.bf16.msra.mxu1 %v12771_v9  ;;  %v13765_v9 = vld [vmem:[#allocation3 + $0xa] sm:$0xff] }
 0x369   : > { %11408 = vmatprep.subr.bf16.mxu1 %v12772_v49 }
 0x36c   : > { %11409 = vmatpush3.bf16.msra.mxu1 %v12772_v49  ;;  %v2844_v49 = vmul.f32 %v13415_v22, %v13774_v29 }
 0x36d   : > { %11418 = vmatprep.subr.bf16.mxu1 %v12773_v33 }
 0x36f   : > { %11403 = vmatmul.mubr.msk.bf16.gmra.mrb[28].mxu1 %vm653_vm7, %v2471_v28 }
 0x370   : > { %11410 = vmatprep.mubr.msk.bf16.mxu1 %vm653_vm7, %v2468_v0  ;;  %v2843_v0 = vmul.f32 %v13380_v58, %v13765_v9 }
 0x372   : > { %v2850_v41 = vpack.c.bf16 %v2843_v0, %v2842_v57  ;;  %v13795_v0 = vld [vmem:[#allocation3 + $0x32] sm:$0xff]  ;;  %v13797_v57 = vld [vmem:[#allocation3 + $0x3a] sm:$0xff] }
 0x373   : > { %v2848_v61 = vmul.f32 %v13458_v23, %v13795_v0 }
 0x377   : > { %11411 = vmatmul.mubr.msk.bf16.vlgmr.msra.gmra.mrb[32].mxu1 %vm653_vm7, %v2469_v43  ;;  %v13779_v43 = vld [vmem:[#allocation3 + $0x2a] sm:$0xff] }
 0x378   : > { %11414 = vmatprep.mubr.msk.bf16.mxu1 %vm653_vm7, %v2470_v19  ;;  %11419 = vmatpush3.bf16.msra.mxu1 %v12773_v33  ;;  %v2845_v19 = vmul.f32 %v13418_v63, %v13776_v32  ;;  %v2847_v14 = vmul.f32 %v13429_v24, %v13779_v43  ;;  %v2846_v33 = vmul.f32 %v13426_v2, %v13786_v11 }
 0x379   : > { %11420 = vmatprep.subr.bf16.mxu1 %v12774_v6 }
 0x37a   : > { %v2852_v20 = vpack.c.bf16 %v2847_v14, %v2846_v33  ;;  %v12779_v33 = vld [vmem:[%s15564_s13 + $0x30] sm:$0xff]  }
 0x37c   : > { %11421 = vmatpush3.bf16.msra.mxu1 %v12774_v6  ;;  %v2851_v6 = vpack.c.bf16 %v2845_v19, %v2844_v49  ;;  %v2849_v49 = vmul.f32 %v13461_v47, %v13797_v57  ;;  %v12777_v19 = vld [vmem:[%s15562_s11 + $0x30] sm:$0xff]  }
 0x37d   : > { %11430 = vmatprep.subr.bf16.mxu1 %v12775_v21 }
 0x37e   : > { %v2853_v14 = vpack.c.bf16 %v2849_v49, %v2848_v61  ;;  %v3055_v61 = vmul.f32 %v13264_v26, %v13724_v1  ;;  %v3059_v49 = vmul.f32 %v13316_v53, %v13746_v34 }
 0x37f   : > { %11415 = vmatmul.mubr.msk.bf16.gmra.mrb[36].mxu1 %vm653_vm7, %v2471_v28  ;;  %v12776_v28 = vld [vmem:[%s15564_s13 + $0x28] sm:$0xff]  }
 0x380   : > { %11422 = vmatprep.mubr.msk.bf16.mxu1 %vm653_vm7, %v2850_v41 }
 0x387   : > { %11423 = vmatmul.mubr.msk.bf16.vlgmr.msra.gmra.mrb[24].mxu1 %vm653_vm7, %v2851_v6 }
 0x388   : > { %11426 = vmatprep.mubr.msk.bf16.mxu1 %vm653_vm7, %v2852_v20  ;;  %11431 = vmatpush3.bf16.msra.mxu1 %v12775_v21  ;;  %v12778_v21 = vld [vmem:[%s15562_s11 + $0x38] sm:$0xff]  }
 0x389   : > { %11432 = vmatprep.subr.bf16.mxu1 %v12776_v28 }
 0x38c   : > { %11433 = vmatpush3.bf16.msra.mxu1 %v12776_v28 }
 0x38d   : > { %11442 = vmatprep.subr.bf16.mxu1 %v12777_v19 }
 0x38f   : > { %11427 = vmatmul.mubr.msk.bf16.gmra.mrb[28].mxu1 %vm653_vm7, %v2853_v14 }
 0x390   : > { %11434 = vmatprep.mubr.msk.bf16.mxu1 %vm653_vm7, %v2850_v41  ;;  %v3054_v41 = vmul.f32 %v13261_v25, %v13714_v52  ;;  %v12780_v52 = vld [vmem:[%s15564_s13 + $0x38] sm:$0xff]  }
 0x392   : > { %v3062_v28 = vpack.c.bf16 %v3055_v61, %v3054_v41  ;;  %v13835_v61 = vld [vmem:[#allocation3 + $0x40] sm:$0xff]  ;;  %v3060_v41 = vmul.f32 %v13388_v35, %v13748_v59 }
 0x393   : > { %v3061_v48 = vmul.f32 %v13368_v37, %v13835_v61 }
 0x397   : > { %11435 = vmatmul.mubr.msk.bf16.vlgmr.msra.gmra.mrb[32].mxu1 %vm653_vm7, %v2851_v6  ;;  %v3056_v6 = vmul.f32 %v13326_v60, %v13726_v54 }
 0x398   : > { %11438 = vmatprep.mubr.msk.bf16.mxu1 %vm653_vm7, %v2852_v20  ;;  %11443 = vmatpush3.bf16.msra.mxu1 %v12777_v19  ;;  %v3057_v20 = vmul.f32 %v13307_v51, %v13737_v3  ;;  %v3058_v19 = vmul.f32 %v13333_v36, %v13730_v38 }
 0x399   : > { %11444 = vmatprep.subr.bf16.mxu1 %v12778_v21 }
 0x39c   : > { %11445 = vmatpush3.bf16.msra.mxu1 %v12778_v21  ;;  %v3063_v21 = vpack.c.bf16 %v3057_v20, %v3056_v6  ;;  %v12781_v6 = vld [vmem:[%s15562_s11 + $0x40] sm:$0xff]   ;;  %v3065_v20 = vpack.c.bf16 %v3061_v48, %v3060_v41  ;;  %v3266_v48 = vpack.c.bf16 %v13670_v12, %v13665_v45  ;;  %v12785_v45 = vld [vmem:[%s15562_s11 + $0x50] sm:$0xff]   ;;  %v3474_v41 = vmul.f32 %v13426_v2, %v13779_v43 }
 0x39d   : > { %11454 = vmatprep.subr.bf16.mxu1 %v12779_v33  ;;  %v13872_v12 = vld [vmem:[#allocation3 + $0x41] sm:$0xff] }
 0x39f   : > { %11439 = vmatmul.mubr.msk.bf16.gmra.mrb[36].mxu1 %vm653_vm7, %v2853_v14  ;;  %v3064_v14 = vpack.c.bf16 %v3059_v49, %v3058_v19  ;;  %v12783_v49 = vld [vmem:[%s15564_s13 + $0x40] sm:$0xff]   ;;  %v12784_v19 = vld [vmem:[%s15564_s13 + $0x48] sm:$0xff]  }
 0x3a0   : > { %11446 = vmatprep.mubr.msk.bf16.mxu1 %vm653_vm7, %v3062_v28 }
 0x3a7   : > { %11447 = vmatmul.mubr.msk.bf16.vlgmr.msra.gmra.mrb[24].mxu1 %vm653_vm7, %v3063_v21 }
 0x3a8   : > { %11450 = vmatprep.mubr.msk.bf16.mxu1 %vm653_vm7, %v3064_v14  ;;  %11455 = vmatpush3.bf16.msra.mxu1 %v12779_v33  ;;  %v12782_v33 = vld [vmem:[%s15562_s11 + $0x48] sm:$0xff]  }
 0x3a9   : > { %11456 = vmatprep.subr.bf16.mxu1 %v12780_v52 }
 0x3ac   : > { %11457 = vmatpush3.bf16.msra.mxu1 %v12780_v52 }
 0x3ad   : > { %11466 = vmatprep.subr.bf16.mxu1 %v12781_v6 }
 0x3af   : > { %11451 = vmatmul.mubr.msk.bf16.gmra.mrb[28].mxu1 %vm653_vm7, %v3065_v20 }
 0x3b0   : > { %11458 = vmatprep.mubr.msk.bf16.mxu1 %vm653_vm7, %v3062_v28  ;;  %v3267_v28 = vpack.c.bf16 %v13688_v17, %v13672_v56  ;;  %v3269_v56 = vpack.c.bf16 %v13872_v12, %v13698_v5  ;;  %v12786_v17 = vld [vmem:[%s15562_s11 + $0x58] sm:$0xff]   ;;  %v3471_v5 = vmul.f32 %v13380_v58, %v13774_v29 }
 0x3b7   : > { %11459 = vmatmul.mubr.msk.bf16.vlgmr.msra.gmra.mrb[32].mxu1 %vm653_vm7, %v3063_v21  ;;  %v3268_v21 = vpack.c.bf16 %v13696_v7, %v13690_v62  ;;  %v12787_v62 = vld [vmem:[%s15564_s13 + $0x50] sm:$0xff]   ;;  %v3470_v7 = vmul.f32 %v13377_v46, %v13765_v9  ;;  %v3472_v9 = vmul.f32 %v13415_v22, %v13776_v32 }
 0x3b8   : > { %11462 = vmatprep.mubr.msk.bf16.mxu1 %vm653_vm7, %v3064_v14  ;;  %11467 = vmatpush3.bf16.msra.mxu1 %v12781_v6  ;;  %v3473_v14 = vmul.f32 %v13418_v63, %v13786_v11  ;;  %v3475_v6 = vmul.f32 %v13429_v24, %v13795_v0 }
 0x3b9   : > { %11468 = vmatprep.subr.bf16.mxu1 %v12782_v33  ;;  %v3478_v52 = vpack.c.bf16 %v3471_v5, %v3470_v7  ;;  %v3683_v7 = vmul.f32 %v13264_v26, %v13726_v54 }
 0x3bc   : > { %11469 = vmatpush3.bf16.msra.mxu1 %v12782_v33  ;;  %v12788_v33 = vld [vmem:[%s15564_s13 + $0x58] sm:$0xff]  }
 0x3bd   : > { %11478 = vmatprep.subr.bf16.mxu1 %v12783_v49 }
 0x3bf   : > { %11463 = vmatmul.mubr.msk.bf16.gmra.mrb[36].mxu1 %vm653_vm7, %v3065_v20  ;;  %v3479_v20 = vpack.c.bf16 %v3473_v14, %v3472_v9  ;;  %v3686_v14 = vmul.f32 %v13333_v36, %v13746_v34 }
 0x3c0   : > { %11470 = vmatprep.mubr.msk.bf16.mxu1 %vm653_vm7, %v3266_v48 }
 0x3c7   : > { %11471 = vmatmul.mubr.msk.bf16.vlgmr.msra.gmra.mrb[24].mxu1 %vm653_vm7, %v3267_v28 }
 0x3c8   : > { %11474 = vmatprep.mubr.msk.bf16.mxu1 %vm653_vm7, %v3268_v21  ;;  %11479 = vmatpush3.bf16.msra.mxu1 %v12783_v49  ;;  %v3480_v49 = vpack.c.bf16 %v3475_v6, %v3474_v41  ;;  %v3687_v41 = vmul.f32 %v13316_v53, %v13748_v59  ;;  %v12792_v6 = vld [vmem:[%s15564_s13 + $0x68] sm:$0xff]  }
 0x3c9   : > { %11480 = vmatprep.subr.bf16.mxu1 %v12784_v19 }
 0x3ca   : > { %v3692_v9 = vpack.c.bf16 %v3687_v41, %v3686_v14  ;;  %v10323_v14 = vld [vmem:[%s15563_s12] ss:$0 sm:$0xff] }
 0x3cb   : > { %v10098_v41 = vld [vmem:[%s15557_s6] ss:$0 sm:$0xff] }
 0x3cc   : > { %11481 = vmatpush3.bf16.msra.mxu1 %v12784_v19 }
 0x3cd   : > { %11490 = vmatprep.subr.bf16.mxu1 %v12785_v45 }
 0x3cf   : > { %11475 = vmatmul.mubr.msk.bf16.gmra.mrb[28].mxu1 %vm653_vm7, %v3269_v56 }
 0x3d0   : > { %11482 = vmatprep.mubr.msk.bf16.mxu1 %vm653_vm7, %v3266_v48  ;;  %v13903_v48 = vld [vmem:[#allocation3 + $0x42] sm:$0xff] }
 0x3d1   : > { %v3477_v19 = vmul.f32 %v13461_v47, %v13903_v48 }
 0x3d7   : > { %11483 = vmatmul.mubr.msk.bf16.vlgmr.msra.gmra.mrb[32].mxu1 %vm653_vm7, %v3267_v28  ;;  %v3476_v28 = vmul.f32 %v13458_v23, %v13797_v57 }
 0x3d8   : > { %11486 = vmatprep.mubr.msk.bf16.mxu1 %vm653_vm7, %v3268_v21  ;;  %11491 = vmatpush3.bf16.msra.mxu1 %v12785_v45  ;;  %v12789_v21 = vld [vmem:[%s15562_s11 + $0x60] sm:$0xff]  }
 0x3d9   : > { %11492 = vmatprep.subr.bf16.mxu1 %v12786_v17  ;;  %v3481_v45 = vpack.c.bf16 %v3477_v19, %v3476_v28  ;;  %v12797_v28 = vld [vmem:[%s15562_s11 + $0x80] sm:$0xff]  }
 0x3da   : > { %v3893_v19 = vld [vmem:[#allocation3 + $0x49] sm:$0xff] }
 0x3dc   : > { %11493 = vmatpush3.bf16.msra.mxu1 %v12786_v17  ;;  %v12791_v17 = vld [vmem:[%s15564_s13 + $0x60] sm:$0xff]  }
 0x3dd   : > { %11502 = vmatprep.subr.bf16.mxu1 %v12787_v62 }
 0x3df   : > { %11487 = vmatmul.mubr.msk.bf16.gmra.mrb[36].mxu1 %vm653_vm7, %v3269_v56  ;;  %v12790_v56 = vld [vmem:[%s15562_s11 + $0x68] sm:$0xff]  }
 0x3e0   : > { %11494 = vmatprep.mubr.msk.bf16.mxu1 %vm653_vm7, %v3478_v52 }
 0x3e7   : > { %11495 = vmatmul.mubr.msk.bf16.vlgmr.msra.gmra.mrb[24].mxu1 %vm653_vm7, %v3479_v20 }
 0x3e8   : > { %11498 = vmatprep.mubr.msk.bf16.mxu1 %vm653_vm7, %v3480_v49  ;;  %11503 = vmatpush3.bf16.msra.mxu1 %v12787_v62  ;;  %v3682_v62 = vmul.f32 %v13261_v25, %v13724_v1  ;;  %v3684_v1 = vmul.f32 %v13326_v60, %v13737_v3  ;;  %v12793_v3 = vld [vmem:[%s15562_s11 + $0x70] sm:$0xff]  }
 0x3e9   : > { %11504 = vmatprep.subr.bf16.mxu1 %v12788_v33 }
 0x3ea   : > { %v3690_v5 = vpack.c.bf16 %v3683_v7, %v3682_v62  ;;  %v4103_v62 = vmul.f32 %v13429_v24, %v13797_v57  ;;  %v12800_v7 = vld [vmem:[%s15564_s13 + $0x88] sm:$0xff]  }
 0x3eb   : > { %v10334_v57 = vld [vmem:[%s15642_s2 + $0x8] sm:$0x3f] }
 0x3ec   : > { %11505 = vmatpush3.bf16.msra.mxu1 %v12788_v33  ;;  %v12794_v33 = vld [vmem:[%s15562_s11 + $0x78] sm:$0xff]   ;;  %11586 = vmatprep.subr.msk.mxu0 %vm862_vm0, %v10334_v57 }
 0x3ed   : > { %11514 = vmatprep.subr.bf16.mxu1 %v12789_v21  ;;  %11587 = vmatpush3.msk.msra.mxu0 %vm862_vm0, %v10334_v57 }
 0x3ef   : > { %11499 = vmatmul.mubr.msk.bf16.gmra.mrb[28].mxu1 %vm653_vm7, %v3481_v45 }
 0x3f0   : > { %11506 = vmatprep.mubr.msk.bf16.mxu1 %vm653_vm7, %v3478_v52  ;;  %v3685_v52 = vmul.f32 %v13307_v51, %v13730_v38  ;;  %v3688_v38 = vmul.f32 %v13388_v35, %v13835_v61  ;;  %v12795_v61 = vld [vmem:[%s15564_s13 + $0x70] sm:$0xff]  }
 0x3f2   : > { %v3691_v54 = vpack.c.bf16 %v3685_v52, %v3684_v1  ;;  %v4097_v52 = vld [vmem:[#allocation3 + $0x4a] sm:$0xff] }
 0x3f7   : > { %11507 = vmatmul.mubr.msk.bf16.vlgmr.msra.gmra.mrb[32].mxu1 %vm653_vm7, %v3479_v20  ;;  %v3681_v20 = vld [vmem:[#allocation3 + $0x48] sm:$0xff] }
 0x3f8   : > { %11510 = vmatprep.mubr.msk.bf16.mxu1 %vm653_vm7, %v3480_v49  ;;  %11515 = vmatpush3.bf16.msra.mxu1 %v12789_v21  ;;  %v3689_v34 = vmul.f32 %v13368_v37, %v3681_v20  ;;  %v12796_v49 = vld [vmem:[%s15564_s13 + $0x78] sm:$0xff]   ;;  %v3897_v21 = vpack.c.bf16 %v3893_v19, %v13872_v12  ;;  %v12799_v12 = vld [vmem:[%s15564_s13 + $0x80] sm:$0xff]   ;;  %v1343_v20 = vadd.f32 %v10098_v41, %v13626_v42 }
 0x3f9   : > { %11516 = vmatprep.subr.bf16.mxu1 %v12790_v56  ;;  %v1349_v42 = vadd.f32 %v10098_v41, %v13638_v16 }
 0x3fa   : > { %v3693_v59 = vpack.c.bf16 %v3689_v34, %v3688_v38 }
 0x3fc   : > { %11517 = vmatpush3.bf16.msra.mxu1 %v12790_v56  ;;  %v4098_v56 = vmul.f32 %v13377_v46, %v13774_v29  ;;  %v4100_v29 = vmul.f32 %v13415_v22, %v13786_v11 }
 0x3fd   : > { %11526 = vmatprep.subr.bf16.mxu1 %v12791_v17 }
 0x3ff   : > { %11511 = vmatmul.mubr.msk.bf16.gmra.mrb[36].mxu1 %vm653_vm7, %v3481_v45  ;;  %v12798_v45 = vld [vmem:[%s15562_s11 + $0x88] sm:$0xff]  }
 0x400   : > { %11518 = vmatprep.mubr.msk.bf16.mxu1 %vm653_vm7, %v3690_v5 }
 0x407   : > { %11519 = vmatmul.mubr.msk.bf16.vlgmr.msra.gmra.mrb[24].mxu1 %vm653_vm7, %v3691_v54 }
 0x408   : > { %11522 = vmatprep.mubr.msk.bf16.mxu1 %vm653_vm7, %v3692_v9  ;;  %11527 = vmatpush3.bf16.msra.mxu1 %v12791_v17 }
 0x409   : > { %11528 = vmatprep.subr.bf16.mxu1 %v12792_v6 }
 0x40c   : > { %11529 = vmatpush3.bf16.msra.mxu1 %v12792_v6 }
 0x40d   : > { %11538 = vmatprep.subr.bf16.mxu1 %v12793_v3 }
 0x40f   : > { %11523 = vmatmul.mubr.msk.bf16.gmra.mrb[28].mxu1 %vm653_vm7, %v3693_v59 }
 0x410   : > { %11530 = vmatprep.mubr.msk.bf16.mxu1 %vm653_vm7, %v3690_v5 }
 0x417   : > { %11531 = vmatmul.mubr.msk.bf16.vlgmr.msra.gmra.mrb[32].mxu1 %vm653_vm7, %v3691_v54  ;;  %v1345_v54 = vadd.f32 %v10098_v41, %v13630_v13 }
 0x418   : > { %11534 = vmatprep.mubr.msk.bf16.mxu1 %vm653_vm7, %v3692_v9  ;;  %11539 = vmatpush3.bf16.msra.mxu1 %v12793_v3  ;;  %v1346_v3 = vadd.f32 %v13628_v44, %v10098_v41  ;;  %v1347_v44 = vadd.f32 %v10098_v41, %v13634_v8  ;;  %v10324_v8 = vld [vmem:[%s15565_s14] ss:$0 sm:$0xff] }
 0x419   : > { %11540 = vmatprep.subr.bf16.mxu1 %v12794_v33 }
 0x41c   : > { %11541 = vmatpush3.bf16.msra.mxu1 %v12794_v33 }
 0x41d   : > { %11550 = vmatprep.subr.bf16.mxu1 %v12795_v61 }
 0x41f   : > { %11535 = vmatmul.mubr.msk.bf16.gmra.mrb[36].mxu1 %vm653_vm7, %v3693_v59 }
 0x420   : > { %11542 = vmatprep.mubr.msk.bf16.mxu1 %vm653_vm7, %v13678_v27 }
 0x427   : > { %11543 = vmatmul.mubr.msk.bf16.vlgmr.msra.gmra.mrb[24].mxu1 %vm653_vm7, %v13694_v10 }
 0x428   : > { %11546 = vmatprep.mubr.msk.bf16.mxu1 %vm653_vm7, %v13704_v18  ;;  %11551 = vmatpush3.bf16.msra.mxu1 %v12795_v61 }
 0x429   : > { %11552 = vmatprep.subr.bf16.mxu1 %v12796_v49 }
 0x42c   : > { %11553 = vmatpush3.bf16.msra.mxu1 %v12796_v49  ;;  %v1344_v49 = vadd.f32 %v13624_v4, %v10098_v41 }
 0x42d   : > { %11562 = vmatprep.subr.bf16.mxu1 %v12797_v28 }
 0x42f   : > { %11547 = vmatmul.mubr.msk.bf16.gmra.mrb[28].mxu1 %vm653_vm7, %v3897_v21 }
 0x430   : > { %11554 = vmatprep.mubr.msk.bf16.mxu1 %vm653_vm7, %v13678_v27  ;;  %v4099_v27 = vmul.f32 %v13380_v58, %v13776_v32 }
 0x432   : > { %v4106_v17 = vpack.c.bf16 %v4099_v27, %v4098_v56 }
 0x437   : > { %11555 = vmatmul.mubr.msk.bf16.vlgmr.msra.gmra.mrb[32].mxu1 %vm653_vm7, %v13694_v10  ;;  %v4101_v10 = vmul.f32 %v13418_v63, %v13779_v43  ;;  %v4104_v43 = vmul.f32 %v13458_v23, %v13903_v48  ;;  %v14021_v48 = vld [vmem:[%s15643_s26 + $0x8] sm:$0x3f] }
 0x438   : > { %11558 = vmatprep.mubr.msk.bf16.mxu1 %vm653_vm7, %v13704_v18  ;;  %11563 = vmatpush3.bf16.msra.mxu1 %v12797_v28  ;;  %v4102_v18 = vmul.f32 %v13426_v2, %v13795_v0  ;;  %v4105_v0 = vmul.f32 %v13461_v47, %v4097_v52 }
 0x439   : > { %11564 = vmatprep.subr.bf16.mxu1 %v12798_v45  ;;  %v4107_v32 = vpack.c.bf16 %v4101_v10, %v4100_v29  ;;  %11600 = vmatprep.subr.msk.mxu0 %vm862_vm0, %v14021_v48  ;;  %v1350_v10 = vadd.f32 %v13636_v55, %v10098_v41  ;;  %v1348_v29 = vadd.f32 %v13632_v15, %v10098_v41 }
 0x43a   : > { %v4108_v5 = vpack.c.bf16 %v4103_v62, %v4102_v18  ;;  %v4109_v11 = vpack.c.bf16 %v4105_v0, %v4104_v43 }
 0x43c   : > { %11565 = vmatpush3.bf16.msra.mxu1 %v12798_v45 }
 0x43d   : > { %11574 = vmatprep.subr.bf16.mxu1 %v12799_v12 }
 0x43f   : > { %11559 = vmatmul.mubr.msk.bf16.gmra.mrb[36].mxu1 %vm653_vm7, %v3897_v21 }
 0x440   : > { %11566 = vmatprep.mubr.msk.bf16.mxu1 %vm653_vm7, %v4106_v17 }
 0x447   : > { %11567 = vmatmul.mubr.msk.bf16.vlgmr.msra.gmra.mrb[24].mxu1 %vm653_vm7, %v4107_v32 }
 0x448   : > { %11570 = vmatprep.mubr.msk.bf16.mxu1 %vm653_vm7, %v4108_v5  ;;  %11575 = vmatpush3.bf16.msra.mxu1 %v12799_v12 }
 0x449   : > { %11576 = vmatprep.subr.bf16.mxu1 %v12800_v7 }
 0x44c   : > { %11577 = vmatpush3.bf16.msra.mxu1 %v12800_v7 }
 0x44f   : > { %11571 = vmatmul.mubr.msk.bf16.gmra.mrb[28].mxu1 %vm653_vm7, %v4109_v11 }
 0x450   : > { %11578 = vmatprep.mubr.msk.bf16.mxu1 %vm653_vm7, %v4106_v17 }
 0x457   : > { %11579 = vmatmul.mubr.msk.bf16.vlgmr.msra.gmra.mrb[32].mxu1 %vm653_vm7, %v4107_v32 }
 0x458   : > { %11582 = vmatprep.mubr.msk.bf16.mxu1 %vm653_vm7, %v4108_v5 }
 0x45f   : > { %11583 = vmatmul.mubr.msk.bf16.gmra.mrb[36].mxu1 %vm653_vm7, %v4109_v11 }
 0x51a   : > { %v11568_v1 = vpop.f32.mrb[24].mxu1 }
 0x51b   : > { %v4311_v6 = vadd.f32 %v11568_v1, %v10323_v14  ;;  %v4178_v9 = vpop.f32.mrb[25].mxu1 }
 0x51c   : > { %v4309_v38 = vadd.f32 %v10323_v14, %v4178_v9  ;;  %v11569_v34 = vpop.f32.mrb[26].mxu1 }
 0x51d   : > { %v14034_v59 = vadd.f32 %v4311_v6, %v1345_v54  ;;  %v4312_v33 = vadd.f32 %v11569_v34, %v10323_v14  ;;  %v4181_v61 = vpop.f32.mrb[27].mxu1 }
 0x51e   : > { %v14037_v28 = vadd.f32 %v4309_v38, %v1343_v20  ;;  %v4310_v19 = vadd.f32 %v10323_v14, %v4181_v61 }
 0x51f   : > { %v14039_v21 = vadd.f32 %v4312_v33, %v1346_v3 }
 0x520   : > { %v14041_v13 = vadd.f32 %v4310_v19, %v1344_v49 }
 0x522   : > { %v11572_v45 = vpop.f32.mrb[28].mxu1 }
 0x523   : > { %v4315_v12 = vadd.f32 %v11572_v45, %v10323_v14  ;;  %v4194_v56 = vpop.f32.mrb[29].mxu1 }
 0x524   : > { %v4313_v27 = vadd.f32 %v10323_v14, %v4194_v56  ;;  %v11573_v17 = vpop.f32.mrb[30].mxu1 }
 0x525   : > { %v14046_v18 = vadd.f32 %v4315_v12, %v1349_v42  ;;  %v4316_v4 = vadd.f32 %v11573_v17, %v10323_v14  ;;  %v4197_v62 = vpop.f32.mrb[31].mxu1 }
 0x526   : > { %v14049_v32 = vadd.f32 %v4313_v27, %v1347_v44  ;;  %v4314_v7 = vadd.f32 %v10323_v14, %v4197_v62 }
 0x527   : > { %v14051_v5 = vadd.f32 %v4316_v4, %v1350_v10 }
 0x528   : > { %v14053_v16 = vadd.f32 %v4314_v7, %v1348_v29 }
 0x52a   : > { %v11580_v52 = vpop.f32.mrb[32].mxu1 }
 0x52b   : > { %v4326_v43 = vadd.f32 %v11580_v52, %v10324_v8  ;;  %v4255_v55 = vpop.f32.mrb[33].mxu1 }
 0x52c   : > { %v4324_v0 = vadd.f32 %v10324_v8, %v4255_v55  ;;  %v11581_v11 = vpop.f32.mrb[34].mxu1 }
 0x52d   : > { %v4334_v57 = vadd.f32 2.0, %v4326_v43  ;;  %v4327_v1 = vadd.f32 %v11581_v11, %v10324_v8  ;;  %v4258_v54 = vpop.f32.mrb[35].mxu1 }
 0x52e   : > { %v4332_v15 = vadd.f32 2.0, %v4324_v0  ;;  %v4325_v41 = vadd.f32 %v10324_v8, %v4258_v54 }
 0x52f   : > { %v10327_v6 = vmul.f32 -1.442695, %v4334_v57  ;;  %v4335_v14 = vadd.f32 2.0, %v4327_v1 }
 0x530   : > { %v10325_v9 = vmul.f32 -1.442695, %v4332_v15  ;;  %v4333_v20 = vadd.f32 2.0, %v4325_v41 }
 0x531   : > { %12839 = vpow2.f32 %v10327_v6  ;;  %v10328_v38 = vmul.f32 -1.442695, %v4335_v14 }
 0x532   : > { %12841 = vpow2.f32 %v10325_v9  ;;  %v10326_v34 = vmul.f32 -1.442695, %v4333_v20  ;;  %v11584_v3 = vpop.f32.mrb[36].mxu1 }
 0x533   : > { %12843 = vpow2.f32 %v10328_v38  ;;  %v4330_v33 = vadd.f32 %v11584_v3, %v10324_v8  ;;  %v4271_v61 = vpop.f32.mrb[37].mxu1 }
 0x534   : > { %12845 = vpow2.f32 %v10326_v34  ;;  %v4328_v49 = vadd.f32 %v10324_v8, %v4271_v61  ;;  %v11585_v19 = vpop.f32.mrb[38].mxu1 }
 0x535   : > { %v4338_v45 = vadd.f32 2.0, %v4330_v33  ;;  %v4331_v42 = vadd.f32 %v11585_v19, %v10324_v8  ;;  %v4274_v12 = vpop.f32.mrb[39].mxu1 }
 0x536   : > { %v4336_v56 = vadd.f32 2.0, %v4328_v49  ;;  %v4329_v44 = vadd.f32 %v10324_v8, %v4274_v12 }
 0x537   : > { %v10331_v27 = vmul.f32 -1.442695, %v4338_v45  ;;  %v4339_v17 = vadd.f32 2.0, %v4331_v42 }
 0x538   : > { %v10329_v10 = vmul.f32 -1.442695, %v4336_v56  ;;  %v4337_v4 = vadd.f32 2.0, %v4329_v44 }
 0x539   : > { %12847 = vpow2.f32 %v10331_v27  ;;  %v10332_v62 = vmul.f32 -1.442695, %v4339_v17 }
 0x53a   : > { %12849 = vpow2.f32 %v10329_v10  ;;  %v10330_v29 = vmul.f32 -1.442695, %v4337_v4 }
 0x53b   : > { %v12840_v7 = vpop.eup %12839  ;;  %12851 = vpow2.f32 %v10332_v62 }
 0x53c   : > { %v12842_v52 = vpop.eup %12841  ;;  %v4366_v43 = vadd.f32 1.0, %v12840_v7  ;;  %12853 = vpow2.f32 %v10330_v29 }
 0x53d   : > { %v12844_v55 = vpop.eup %12843  ;;  %v4364_v0 = vadd.f32 1.0, %v12842_v52 }
 0x53e   : > { %v12846_v11 = vpop.eup %12845  ;;  %12855 = vrcp.f32 %v4366_v43  ;;  %v4367_v57 = vadd.f32 1.0, %v12844_v55  ;;  %v10355_v55 = vld [vmem:[%s15649_s23 + $0x8] sm:$0x3f] }
 0x53f   : > { %12857 = vrcp.f32 %v4364_v0  ;;  %v4365_v8 = vadd.f32 1.0, %v12846_v11 }
 0x540   : > { %12859 = vrcp.f32 %v4367_v57 }
 0x541   : > { %12861 = vrcp.f32 %v4365_v8 }
 0x543   : > { %v12848_v1 = vpop.eup %12847 }
 0x544   : > { %v12850_v54 = vpop.eup %12849  ;;  %v4370_v15 = vadd.f32 1.0, %v12848_v1 }
 0x545   : > { %v12852_v41 = vpop.eup %12851  ;;  %v4368_v6 = vadd.f32 1.0, %v12850_v54 }
 0x546   : > { %v12854_v14 = vpop.eup %12853  ;;  %12863 = vrcp.f32 %v4370_v15  ;;  %v4371_v9 = vadd.f32 1.0, %v12852_v41 }
 0x547   : > { %12865 = vrcp.f32 %v4368_v6  ;;  %v4369_v20 = vadd.f32 1.0, %v12854_v14 }
 0x548   : > { %v12856_v38 = vpop.eup %12855  ;;  %12867 = vrcp.f32 %v4371_v9  ;;  %v15657_v9 = vld [vmem:[#allocation4_spill] sm:$0xff] }
 0x549   : > { %v12858_v34 = vpop.eup %12857  ;;  %12869 = vrcp.f32 %v4369_v20  ;;  %v14059_v3 = vmul.f32 %v12856_v38, %v14034_v59  ;;  %v10356_v59 = vld [vmem:[%s15648_s30 + $0x8] sm:$0x3f] }
 0x54a   : > { %v12860_v33 = vpop.eup %12859  ;;  %v14062_v61 = vmul.f32 %v12858_v34, %v14037_v28  ;;  %12871 = vlog2.f32 %v12856_v38  ;;  %v15658_v38 = vld [vmem:[#allocation6_spill] sm:$0xff] }
 0x54b   : > { %v12862_v49 = vpop.eup %12861  ;;  %v14065_v19 = vmul.f32 %v12860_v33, %v14039_v21  ;;  %12873 = vlog2.f32 %v12860_v33 }
 0x54c   : > { %v14068_v45 = vmul.f32 %v12862_v49, %v14041_v13  ;;  %11588 = vmatprep.mubr.msk.f32.mxu0 %vm640_vm1, %v14062_v61  ;;  %12875 = vlog2.f32 %v12858_v34  ;;  %v15659_v34 = vld [vmem:[#allocation5_spill] sm:$0xff] }
 0x54d   : > { %12877 = vlog2.f32 %v12862_v49 }
 0x54e   : > { %11589 = vmatmul.mubr.msk.f32.vlgmr.msra.gmra.mrb[16].mxu0 %vm640_vm1, %v14068_v45 }
 0x54f   : > { %11591 = vmatprep.mubr.msk.f32.mxu0 %vm640_vm1, %v14059_v3  ;;  %11601 = vmatpush3.msk.msra.mxu0 %vm862_vm0, %v14021_v48 }
 0x550   : > { %v12864_v28 = vpop.eup %12863  ;;  %11614 = vmatprep.subr.msk.mxu0 %vm862_vm0, %v10356_v59 }
 0x551   : > { %v12866_v21 = vpop.eup %12865  ;;  %v14083_v13 = vmul.f32 %v12864_v28, %v14046_v18  ;;  %12879 = vlog2.f32 %v12864_v28 }
 0x552   : > { %v12868_v42 = vpop.eup %12867  ;;  %11592 = vmatmul.mubr.msk.f32.gmra.mrb[18].mxu0 %vm640_vm1, %v14065_v19  ;;  %v4400_v12 = vmul.f32 %v12866_v21, %v14049_v32 }
 0x553   : > { %v12870_v56 = vpop.eup %12869  ;;  %v4403_v44 = vmul.f32 %v12868_v42, %v14051_v5  ;;  %12881 = vlog2.f32 %v12868_v42  ;;  %v14186_v42 = vld [vmem:[#allocation2 + $0x1] sm:$0xff] }
 0x554   : > { %v12872_v27 = vpop.eup %12871  ;;  %11594 = vmatprep.mubr.msk.f32.mxu0 %vm640_vm1, %v4400_v12  ;;  %v4401_v48 = vmul.f32 %v12870_v56, %v14053_v16  ;;  %12883 = vlog2.f32 %v12870_v56  ;;  %15660 = vst [vmem:[#allocation4_spill] sm:$0xff] %v14186_v42 }
 0x555   : > { %v12874_v17 = vpop.eup %12873  ;;  %v4409_v18 = vmul.f32 0.6931472, %v12872_v27  ;;  %12885 = vlog2.f32 %v12866_v21 }
 0x556   : > { %v12876_v10 = vpop.eup %12875  ;;  %11595 = vmatmul.mubr.msk.f32.gmra.mrb[20].mxu0 %vm640_vm1, %v4401_v48  ;;  %v4411_v4 = vmul.f32 0.6931472, %v12874_v17 }
 0x557   : > { %v4426_v32 = vsel %vm640_vm1, %v4409_v18, 0.0  ;;  %11597 = vmatprep.mubr.msk.f32.mxu0 %vm640_vm1, %v14083_v13  ;;  %v4405_v5 = vmul.f32 0.6931472, %v12876_v10  ;;  %v12878_v62 = vpop.eup %12877 }
 0x558   : > { %4427 = vadd.xlane.f32.xlu0 %v4426_v32  ;;  %v4429_v29 = vsel %vm640_vm1, %v4411_v4, 0.0  ;;  %v4407_v7 = vmul.f32 0.6931472, %v12878_v62 }
 0x559   : > { %4430 = vadd.xlane.f32.xlu1 %v4429_v29  ;;  %v4420_v16 = vsel %vm640_vm1, %v4405_v5, 0.0 }
 0x55a   : > { %11598 = vmatmul.mubr.msk.f32.gmra.mrb[22].mxu0 %vm640_vm1, %v4403_v44  ;;  %v4423_v57 = vsel %vm640_vm1, %v4407_v7, 0.0 }
 0x55b   : > { %11602 = vmatprep.mubr.msk.f32.mxu0 %vm640_vm1, %v13189_v31  ;;  %v12880_v52 = vpop.eup %12879 }
 0x55c   : > { %4421 = vadd.xlane.f32.xlu0 %v4420_v16  ;;  %v4417_v8 = vmul.f32 0.6931472, %v12880_v52 }
 0x55d   : > { %v12882_v43 = vpop.eup %12881 }
 0x55e   : > { %v12884_v0 = vpop.eup %12883  ;;  %11603 = vmatmul.mubr.msk.f32.vlgmr.msra.gmra.mrb[16].mxu0 %vm640_vm1, %v13187_v30  ;;  %v4419_v11 = vmul.f32 0.6931472, %v12882_v43  ;;  %v4438_v41 = vsel %vm640_vm1, %v4417_v8, 0.0  ;;  %v4980_v8 = vld [vmem:[#allocation2] sm:$0xff] }
 0x55f   : > { %11605 = vmatprep.mubr.msk.f32.mxu0 %vm640_vm1, %v13199_v40  ;;  %11615 = vmatpush3.msk.msra.mxu0 %vm862_vm0, %v10356_v59  ;;  %v12886_v1 = vpop.eup %12885  ;;  %v4415_v15 = vmul.f32 0.6931472, %v12884_v0 }
 0x560   : > { %4424 = vadd.xlane.f32.xlu0 %v4423_v57  ;;  %v4441_v54 = vsel %vm640_vm1, %v4419_v11, 0.0  ;;  %11628 = vmatprep.subr.msk.mxu0 %vm862_vm0, %v10355_v55  ;;  %v4413_v6 = vmul.f32 0.6931472, %v12886_v1  ;;  %v14236_v11 = vld [vmem:[%s15558_s7 + $0x2c] sm:$0x7] }
 0x561   : > { %4442 = vadd.xlane.f32.xlu1 %v4441_v54  ;;  %v4435_v14 = vsel %vm640_vm1, %v4415_v15, 0.0 }
 0x562   : > { %11606 = vmatmul.mubr.msk.f32.gmra.mrb[18].mxu0 %vm640_vm1, %v13197_v39  ;;  %v4432_v20 = vsel %vm640_vm1, %v4413_v6, 0.0 }
 0x563   : > { %11608 = vmatprep.mubr.msk.f32.mxu0 %vm640_vm1, %v13210_v50 }
 0x564   : > { %4439 = vadd.xlane.f32.xlu0 %v4438_v41 }
 0x565   : > { %4436 = vadd.xlane.f32.xlu1 %v4435_v14 }
 0x566   : > { %11609 = vmatmul.mubr.msk.f32.gmra.mrb[20].mxu0 %vm640_vm1, %v15657_v9 }
 0x567   : > { %11611 = vmatprep.mubr.msk.f32.mxu0 %vm640_vm1, %v15658_v38 }
 0x568   : > { %4433 = vadd.xlane.f32.xlu0 %v4432_v20 }
 0x56a   : > { %11612 = vmatmul.mubr.msk.f32.gmra.mrb[22].mxu0 %vm640_vm1, %v15659_v34 }
 0x56b   : > { %11616 = vmatprep.mubr.msk.f32.mxu0 %vm640_vm1, %v14062_v61 }
 0x56e   : > { %11617 = vmatmul.mubr.msk.f32.vlgmr.msra.gmra.mrb[24].mxu0 %vm640_vm1, %v14068_v45 }
 0x56f   : > { %11619 = vmatprep.mubr.msk.f32.mxu0 %vm640_vm1, %v14059_v3  ;;  %11629 = vmatpush3.msk.msra.mxu0 %vm862_vm0, %v10355_v55  ;;  %vm12961_vm0 = vmmov 0  }
 0x572   : > { %11620 = vmatmul.mubr.msk.f32.gmra.mrb[26].mxu0 %vm640_vm1, %v14065_v19 }
 0x573   : > { %11622 = vmatprep.mubr.msk.f32.mxu0 %vm640_vm1, %v4400_v12 }
 0x576   : > { %11623 = vmatmul.mubr.msk.f32.gmra.mrb[28].mxu0 %vm640_vm1, %v4401_v48 }
 0x577   : > { %11625 = vmatprep.mubr.msk.f32.mxu0 %vm640_vm1, %v14083_v13 }
 0x57a   : > { %11626 = vmatmul.mubr.msk.f32.gmra.mrb[30].mxu0 %vm640_vm1, %v4403_v44 }
 0x57b   : > { %11630 = vmatprep.mubr.msk.f32.mxu0 %vm640_vm1, %v13189_v31 }
 0x57e   : > { %11631 = vmatmul.mubr.msk.f32.vlgmr.msra.gmra.mrb[24].mxu0 %vm640_vm1, %v13187_v30  ;;  %v10378_v30 = vld [vmem:[%s15558_s7 + $0x28] sm:$0x7] }
 0x57f   : > { %11633 = vmatprep.mubr.msk.f32.mxu0 %vm640_vm1, %v13199_v40  ;;  %12724 = vmatprep.subr.msk.bf16.mxu0 %vm1406_vm2, %v10378_v30  ;;  %v5029_v31 = vsel %vm1406_vm2, %v10378_v30, 0  ;;  %v10354_v40 = vld [vmem:[%s15556_s5 + $0x1] ss:$0 sm:$0xff]  ;;  %v14275_v30 = vmul.f32 %v13261_v25, %v4980_v8 }
 0x580   : > { %11643 = vmatpush3.bf16.msra.mxu0 %v5029_v31 }
 0x581   : > { %15666 = vst [vmem:[#allocation10_spill] sm:$0xff] %v14275_v30 }
 0x582   : > { %11634 = vmatmul.mubr.msk.f32.gmra.mrb[26].mxu0 %vm640_vm1, %v13197_v39  ;;  %v10377_v39 = vld [vmem:[%s15558_s7 + $0x24] sm:$0x7] }
 0x583   : > { %11636 = vmatprep.mubr.msk.f32.mxu0 %vm640_vm1, %v13210_v50  ;;  %12725 = vmatprep.subr.msk.bf16.mxu0 %vm1406_vm2, %v10377_v39  ;;  %v5109_v43 = vsel %vm1406_vm2, %v10377_v39, 0 }
 0x586   : > { %11637 = vmatmul.mubr.msk.f32.gmra.mrb[28].mxu0 %vm640_vm1, %v15657_v9 }
 0x587   : > { %11639 = vmatprep.mubr.msk.f32.mxu0 %vm640_vm1, %v15658_v38 }
 0x58a   : > { %11640 = vmatmul.mubr.msk.f32.gmra.mrb[30].mxu0 %vm640_vm1, %v15659_v34 }
 0x631   : > { %v11604_v50 = vpop.f32.mrb[16].mxu0 }
 0x632   : > { %v4729_v3 = vadd.f32 %v11604_v50, %v10354_v40  ;;  %v4681_v33 = vpop.f32.mrb[17].mxu0 }
 0x633   : > { %v4728_v61 = vadd.f32 %v10354_v40, %v4681_v33 }
 0x634   : > { %9865 = vst.msk [vmem:[%s14170_s0 + $0x8] sm:$0xff] %vm640_vm1, %v4729_v3  ;;  %4973 = vst.msk [vmem:[#allocation2 + $0x11] sm:$0xff] %vm640_vm1, %v4729_v3 }
 0x635   : > { %9864 = vst.msk [vmem:[%s14170_s0] sm:$0xff] %vm640_vm1, %v4728_v61  ;;  %4972 = vst.msk [vmem:[#allocation2 + $0x9] sm:$0xff] %vm640_vm1, %v4728_v61  ;;  %v11607_v49 = vpop.f32.mrb[18].mxu0 }
 0x636   : > { %v4731_v19 = vadd.f32 %v11607_v49, %v10354_v40  ;;  %v4691_v45 = vpop.f32.mrb[19].mxu0 }
 0x637   : > { %v4730_v59 = vadd.f32 %v10354_v40, %v4691_v45 }
 0x638   : > { %9867 = vst.msk [vmem:[%s14170_s0 + $0x18] sm:$0xff] %vm640_vm1, %v4731_v19  ;;  %4975 = vst.msk [vmem:[#allocation2 + $0x21] sm:$0xff] %vm640_vm1, %v4731_v19 }
 0x639   : > { %9866 = vst.msk [vmem:[%s14170_s0 + $0x10] sm:$0xff] %vm640_vm1, %v4730_v59  ;;  %4974 = vst.msk [vmem:[#allocation2 + $0x19] sm:$0xff] %vm640_vm1, %v4730_v59  ;;  %v11610_v28 = vpop.f32.mrb[20].mxu0 }
 0x63a   : > { %v14184_v21 = vadd.f32 %v11610_v28, %v10354_v40  ;;  %v4701_v13 = vpop.f32.mrb[21].mxu0 }
 0x63b   : > { %v4732_v12 = vadd.f32 %v10354_v40, %v4701_v13  ;;  %v14210_v62 = vld [vmem:[#allocation2 + $0x11] sm:$0xff] }
 0x63c   : > { %9869 = vst.msk [vmem:[%s14170_s0 + $0x28] sm:$0xff] %vm640_vm1, %v14184_v21  ;;  %4977 = vst.msk [vmem:[#allocation2 + $0x31] sm:$0xff] %vm640_vm1, %v14184_v21  ;;  %v14193_v56 = vld [vmem:[#allocation2 + $0x9] sm:$0xff] }
 0x63d   : > { %v14195_v44 = vld [vmem:[#allocation2 + $0x8] sm:$0xff]  ;;  %v14197_v27 = vld [vmem:[#allocation2 + $0x10] sm:$0xff]  ;;  %9868 = vst.msk [vmem:[%s14170_s0 + $0x20] sm:$0xff] %vm640_vm1, %v4732_v12  ;;  %4976 = vst.msk [vmem:[#allocation2 + $0x29] sm:$0xff] %vm640_vm1, %v4732_v12  ;;  %v11613_v48 = vpop.f32.mrb[22].mxu0  ;;  %v5010_v17 = vpack.c.bf16 %v14193_v56, %v14186_v42 }
 0x63e   : > { %v14204_v18 = vld [vmem:[#allocation2 + $0x2] sm:$0xff]  ;;  %v14206_v10 = vld [vmem:[#allocation2 + $0xa] sm:$0xff]  ;;  %v4735_v4 = vadd.f32 %v11613_v48, %v10354_v40  ;;  %v4711_v32 = vpop.f32.mrb[23].mxu0  ;;  %v4989_v31 = vmul.f32 %v13264_v26, %v14195_v44  ;;  %v14281_v39 = vmul.f32 %v13261_v25, %v14197_v27 }
 0x63f   : > { %8080 = vst.msk [vmem:[#allocation2 + $0x9] sm:$0xff] %vm640_vm1, %v4728_v61  ;;  %v4734_v5 = vadd.f32 %v10354_v40, %v4711_v32  ;;  %11644 = vmatprep.mubr.msk.bf16.mxu0 %vm640_vm1, %v5010_v17  ;;  %v14242_v57 = vld [vmem:[#allocation2 + $0x21] sm:$0xff]  ;;  %v14270_v38 = vmul.f32 %v13377_v46, %v14206_v10 }
 0x640   : > { %9871 = vst.msk [vmem:[%s14170_s0 + $0x38] sm:$0xff] %vm640_vm1, %v4735_v4  ;;  %4979 = vst.msk [vmem:[#allocation2 + $0x41] sm:$0xff] %vm640_vm1, %v4735_v4  ;;  %v14215_v29 = vld [vmem:[#allocation2 + $0x19] sm:$0xff]  ;;  %v4996_v32 = vpack.c.bf16 %v4989_v31, %v14275_v30 }
 0x641   : > { %v14217_v16 = vld [vmem:[#allocation2 + $0x18] sm:$0xff]  ;;  %v14219_v7 = vld [vmem:[#allocation2 + $0x20] sm:$0xff]  ;;  %9870 = vst.msk [vmem:[%s14170_s0 + $0x30] sm:$0xff] %vm640_vm1, %v4734_v5  ;;  %4978 = vst.msk [vmem:[#allocation2 + $0x39] sm:$0xff] %vm640_vm1, %v4734_v5  ;;  %v14226_v52 = vpack.c.bf16 %v14215_v29, %v14210_v62 }
 0x642   : > { %v14229_v55 = vld [vmem:[#allocation2 + $0x12] sm:$0xff]  ;;  %v14231_v0 = vld [vmem:[#allocation2 + $0x1a] sm:$0xff]  ;;  %v14256_v6 = vmul.f32 %v13264_v26, %v14217_v16  ;;  %15665 = vst [vmem:[#allocation9_spill] sm:$0xff] %v14270_v38  ;;  %15667 = vst [vmem:[#allocation11_spill] sm:$0xff] %v14281_v39  ;;  %v14330_v28 = vmul.f32 %v13326_v60, %v14219_v7  ;;  %v4992_v39 = vmul.f32 %v13333_v36, %v14219_v7 }
 0x643   : > { %15661 = vst [vmem:[#allocation6_spill] sm:$0xff] %v14226_v52  ;;  %8081 = vst.msk [vmem:[#allocation2 + $0x11] sm:$0xff] %vm640_vm1, %v4729_v3  ;;  %11645 = vmatmul.mubr.msk.bf16.vlgmr.msra.gmra.mrb[32].mxu0 %vm640_vm1, %v14226_v52  ;;  %v14246_v1 = vmul.f32 %v13380_v58, %v14229_v55  ;;  %v14272_v34 = vld [vmem:[#allocation2 + $0x31] sm:$0xff]  ;;  %v14365_v42 = vmul.f32 %v13377_v46, %v14229_v55 }
 0x644   : > { %8082 = vst.msk [vmem:[#allocation2 + $0x19] sm:$0xff] %vm640_vm1, %v4730_v59  ;;  %11653 = vmatpush3.bf16.msra.mxu0 %v5109_v43  ;;  %v14248_v54 = vld [vmem:[#allocation2 + $0x29] sm:$0xff]  ;;  %15663 = vst [vmem:[#allocation7_spill] sm:$0xff] %v14256_v6  ;;  %v14305_v59 = vmul.f32 %v13415_v22, %v14231_v0  ;;  %v4990_v43 = vmul.f32 %v13326_v60, %v14197_v27 }
 0x645   : > { %15662 = vst [vmem:[#allocation5_spill] sm:$0xff] %v14246_v1  ;;  %v14250_v15 = vld [vmem:[#allocation2 + $0x28] sm:$0xff]  ;;  %v14252_v41 = vld [vmem:[#allocation2 + $0x30] sm:$0xff]  ;;  %v14260_v14 = vpack.c.bf16 %v14248_v54, %v14242_v57  ;;  %12726 = vmatprep.subr.msk.bf16.mxu0 %vm1406_vm2, %v14236_v11  ;;  %15673 = vst [vmem:[#allocation17_spill] sm:$0xff] %v14330_v28 }
 0x646   : > { %v14264_v9 = vld [vmem:[#allocation2 + $0x22] sm:$0xff]  ;;  %v14266_v20 = vld [vmem:[#allocation2 + $0x2a] sm:$0xff]  ;;  %15670 = vst [vmem:[#allocation14_spill] sm:$0xff] %v14305_v59  ;;  %v14357_v50 = vmul.f32 %v13333_v36, %v14252_v41  ;;  %15680 = vst [vmem:[#allocation24_spill] sm:$0xff] %v14365_v42  ;;  %v4993_v52 = vmul.f32 %v13316_v53, %v14250_v15 }
 0x647   : > { %15664 = vst [vmem:[#allocation8_spill] sm:$0xff] %v14260_v14  ;;  %8083 = vst.msk [vmem:[#allocation2 + $0x21] sm:$0xff] %vm640_vm1, %v4731_v19  ;;  %11648 = vmatprep.mubr.msk.bf16.mxu0 %vm640_vm1, %v14260_v14  ;;  %v14287_v40 = vld [vmem:[#allocation2 + $0x41] sm:$0xff]  ;;  %v14293_v3 = vmul.f32 %v13418_v63, %v14264_v9 }
 0x648   : > { %8084 = vst.msk [vmem:[#allocation2 + $0x29] sm:$0xff] %vm640_vm1, %v4732_v12  ;;  %v14295_v33 = vld [vmem:[#allocation2 + $0x42] sm:$0xff]  ;;  %v14297_v49 = vld [vmem:[#allocation2 + $0x39] sm:$0xff]  ;;  %15678 = vst [vmem:[#allocation22_spill] sm:$0xff] %v14357_v50 }
 0x649   : > { %15668 = vst [vmem:[#allocation12_spill] sm:$0xff] %v14293_v3  ;;  %15669 = vst [vmem:[#allocation13_spill] sm:$0xff] %v14295_v33  ;;  %v5615_v61 = vld [vmem:[#allocation2 + $0x48] sm:$0xff]  ;;  %v14299_v19 = vld [vmem:[#allocation2 + $0x38] sm:$0xff]  ;;  %v14311_v13 = vpack.c.bf16 %v14297_v49, %v14272_v34  ;;  %v14319_v17 = vmul.f32 %v13461_v47, %v14295_v33  ;;  %v14386_v33 = vmul.f32 %v13380_v58, %v14231_v0 }
 0x64a   : > { %v14301_v45 = vld [vmem:[#allocation2 + $0x32] sm:$0xff]  ;;  %v14313_v12 = vld [vmem:[#allocation2 + $0x3a] sm:$0xff]  ;;  %v14361_v30 = vmul.f32 %v13316_v53, %v14299_v19  ;;  %v14382_v6 = vmul.f32 %v13368_v37, %v5615_v61  ;;  %v4998_v3 = vpack.c.bf16 %v4993_v52, %v4992_v39  ;;  %v5184_v52 = vmul.f32 %v13377_v46, %v14204_v18 }
 0x64b   : > { %15671 = vst [vmem:[#allocation15_spill] sm:$0xff] %v14311_v13  ;;  %v14315_v48 = vld [vmem:[#allocation2 + $0x40] sm:$0xff]  ;;  %15672 = vst [vmem:[#allocation16_spill] sm:$0xff] %v14319_v17  ;;  %11649 = vmatmul.mubr.msk.bf16.gmra.mrb[36].mxu0 %vm640_vm1, %v14311_v13  ;;  %v14342_v31 = vmul.f32 %v13429_v24, %v14301_v45  ;;  %v14346_v8 = vmul.f32 %v13458_v23, %v14313_v12  ;;  %v14390_v13 = vmul.f32 %v13415_v22, %v14264_v9  ;;  %v10392_v50 = vld [vmem:[%s15558_s7 + $0x30] sm:$0x7] }
 0x64c   : > { %8085 = vst.msk [vmem:[#allocation2 + $0x31] sm:$0xff] %vm640_vm1, %v14184_v21  ;;  %8086 = vst.msk [vmem:[#allocation2 + $0x39] sm:$0xff] %vm640_vm1, %v4734_v5  ;;  %v14338_v21 = vmul.f32 %v13426_v2, %v14266_v20  ;;  %v14350_v5 = vmul.f32 %v13307_v51, %v14250_v15  ;;  %11654 = vmatprep.mubr.msk.bf16.mxu0 %vm640_vm1, %v4996_v32  ;;  %v14375_v14 = vmul.f32 %v13388_v35, %v14315_v48  ;;  %v14451_v18 = vld [vmem:[#allocation2 + $0x19] sm:$0xff] }
 0x64d   : > { %8087 = vst.msk [vmem:[#allocation2 + $0x41] sm:$0xff] %vm640_vm1, %v4735_v4  ;;  %15675 = vst [vmem:[#allocation19_spill] sm:$0xff] %v14342_v31  ;;  %v4991_v4 = vmul.f32 %v13307_v51, %v14217_v16  ;;  %v14394_v32 = vmul.f32 %v13418_v63, %v14266_v20  ;;  %v14398_v28 = vmul.f32 %v13426_v2, %v14301_v45  ;;  %v5211_v17 = vsel %vm1406_vm2, %v14236_v11, 0  ;;  %v14440_v31 = vld [vmem:[#allocation2 + $0x11] sm:$0xff] }
 0x64e   : > { %15674 = vst [vmem:[#allocation18_spill] sm:$0xff] %v14338_v21  ;;  %15676 = vst [vmem:[#allocation20_spill] sm:$0xff] %v14346_v8  ;;  %v14402_v61 = vmul.f32 %v13429_v24, %v14313_v12  ;;  %v4995_v11 = vmul.f32 %v13368_v37, %v14299_v19  ;;  %v5185_v39 = vmul.f32 %v13380_v58, %v14206_v10  ;;  %v14453_v10 = vld [vmem:[#allocation2 + $0xa] sm:$0xff] }
 0x64f   : > { %15677 = vst [vmem:[#allocation21_spill] sm:$0xff] %v14350_v5  ;;  %15679 = vst [vmem:[#allocation23_spill] sm:$0xff] %v14361_v30  ;;  %v4997_v8 = vpack.c.bf16 %v4991_v4, %v4990_v43 }
 0x650   : > { %15681 = vst [vmem:[#allocation25_spill] sm:$0xff] %v14375_v14  ;;  %15682 = vst [vmem:[#allocation26_spill] sm:$0xff] %v14382_v6  ;;  %v5192_v30 = vpack.c.bf16 %v5185_v39, %v5184_v52  ;;  %v5187_v52 = vmul.f32 %v13418_v63, %v14231_v0  ;;  %v14462_v39 = vld [vmem:[#allocation2 + $0x29] sm:$0xff]  ;;  %v10397_v6 = vld [vmem:[%s15558_s7 + $0x34] sm:$0x7] }
 0x651   : > { %15683 = vst [vmem:[#allocation27_spill] sm:$0xff] %v14386_v33  ;;  %15684 = vst [vmem:[#allocation28_spill] sm:$0xff] %v14390_v13  ;;  %v14410_v5 = vpop.f32.mrb[24].mxu0 }
 0x652   : > { %15685 = vst [vmem:[#allocation29_spill] sm:$0xff] %v14394_v32  ;;  %15686 = vst [vmem:[#allocation30_spill] sm:$0xff] %v14398_v28  ;;  %v14418_v59 = vpop.f32.mrb[25].mxu0 }
 0x653   : > { %15687 = vst [vmem:[#allocation31_spill] sm:$0xff] %v14402_v61  ;;  %15688 = vst [vmem:[#allocation32_spill] sm:$0xff] %v14410_v5  ;;  %11655 = vmatmul.mubr.msk.bf16.vlgmr.msra.gmra.mrb[32].mxu0 %vm640_vm1, %v4997_v8  ;;  %v4994_v8 = vmul.f32 %v13388_v35, %v14252_v41  ;;  %v14444_v5 = vld [vmem:[#allocation2 + $0x9] sm:$0xff] }
 0x654   : > { %15689 = vst [vmem:[#allocation33_spill] sm:$0xff] %v14418_v59  ;;  %11658 = vmatprep.mubr.msk.bf16.mxu0 %vm640_vm1, %v4998_v3  ;;  %11663 = vmatpush3.bf16.msra.mxu0 %v5211_v17  ;;  %15693 = vst [vmem:[#allocation37_spill] sm:$0xff] %v14440_v31  ;;  %v14448_v59 = vld [vmem:[#allocation2 + $0x31] sm:$0xff]  ;;  %v14519_v42 = vld [vmem:[#allocation2 + $0x41] sm:$0xff] }
 0x655   : > { %v14425_v43 = vpop.f32.mrb[26].mxu0  ;;  %12727 = vmatprep.subr.msk.bf16.mxu0 %vm1406_vm2, %v10392_v50  ;;  %v4999_v17 = vpack.c.bf16 %v4995_v11, %v4994_v8  ;;  %15695 = vst [vmem:[#allocation39_spill] sm:$0xff] %v14444_v5  ;;  %15697 = vst [vmem:[#allocation41_spill] sm:$0xff] %v14448_v59  ;;  %v5186_v11 = vmul.f32 %v13415_v22, %v14229_v55  ;;  %v14464_v8 = vld [vmem:[#allocation2 + $0x1a] sm:$0xff]  ;;  %v14474_v28 = vld [vmem:[#allocation2 + $0x2a] sm:$0xff]  ;;  %v14484_v0 = vpack.c.bf16 %v14448_v59, %v14462_v39 }
 0x656   : > { %15690 = vst [vmem:[#allocation34_spill] sm:$0xff] %v14425_v43  ;;  %v14430_v4 = vpop.f32.mrb[27].mxu0  ;;  %v14446_v43 = vld [vmem:[#allocation2 + $0x21] sm:$0xff]  ;;  %15698 = vst [vmem:[#allocation42_spill] sm:$0xff] %v14451_v18  ;;  %v8990_v13 = vmul.f32 %v13426_v2, %v14474_v28 }
 0x657   : > { %15691 = vst [vmem:[#allocation35_spill] sm:$0xff] %v14430_v4  ;;  %15696 = vst [vmem:[#allocation40_spill] sm:$0xff] %v14446_v43  ;;  %v14455_v4 = vld [vmem:[#allocation2 + $0x12] sm:$0xff]  ;;  %v14480_v55 = vpack.c.bf16 %v14446_v43, %v14451_v18  ;;  %v8986_v43 = vmul.f32 %v13377_v46, %v14453_v10  ;;  %v14499_v18 = vld [vmem:[#allocation2 + $0x20] sm:$0xff]  ;;  %v5193_v59 = vpack.c.bf16 %v5187_v52, %v5186_v11 }
 0x658   : > { %15699 = vst [vmem:[#allocation43_spill] sm:$0xff] %v14453_v10  ;;  %15700 = vst [vmem:[#allocation44_spill] sm:$0xff] %v14462_v39  ;;  %v5294_v39 = vmul.f32 %v13261_v25, %v14195_v44  ;;  %v14511_v10 = vld [vmem:[#allocation2 + $0x30] sm:$0xff]  ;;  %v9176_v1 = vmul.f32 %v13326_v60, %v14499_v18 }
 0x659   : > { %v14438_v3 = vpop.f32.mrb[28].mxu0  ;;  %15703 = vst [vmem:[#allocation47_spill] sm:$0xff] %v14480_v55  ;;  %15704 = vst [vmem:[#allocation48_spill] sm:$0xff] %v14484_v0  ;;  %v5321_v55 = vsel %vm1406_vm2, %v10392_v50, 0  ;;  %v14501_v0 = vld [vmem:[#allocation2 + $0x28] sm:$0xff]  ;;  %v14513_v50 = vld [vmem:[#allocation2 + $0x38] sm:$0xff] }
 0x65a   : > { %15692 = vst [vmem:[#allocation36_spill] sm:$0xff] %v14438_v3  ;;  %v14442_v21 = vpop.f32.mrb[29].mxu0  ;;  %v14466_v3 = vld [vmem:[#allocation2 + $0x22] sm:$0xff]  ;;  %15706 = vst [vmem:[#allocation50_spill] sm:$0xff] %v14519_v42 }
 0x65b   : > { %15694 = vst [vmem:[#allocation38_spill] sm:$0xff] %v14442_v21  ;;  %11659 = vmatmul.mubr.msk.bf16.gmra.mrb[36].mxu0 %vm640_vm1, %v4999_v17  ;;  %v14470_v17 = vpack.c.bf16 %v14440_v31, %v14444_v5  ;;  %v5188_v31 = vmul.f32 %v13426_v2, %v14264_v9  ;;  %v14494_v5 = vld [vmem:[#allocation2 + $0x18] sm:$0xff]  ;;  %v8988_v9 = vmul.f32 %v13415_v22, %v14464_v8 }
 0x65c   : > { %11664 = vmatprep.mubr.msk.bf16.mxu0 %vm640_vm1, %v5192_v30  ;;  %v14476_v30 = vld [vmem:[#allocation2 + $0x32] sm:$0xff]  ;;  %v9175_v44 = vmul.f32 %v13264_v26, %v14494_v5 }
 0x65d   : > { %15701 = vst [vmem:[#allocation45_spill] sm:$0xff] %v14470_v17  ;;  %v14472_v21 = vpop.f32.mrb[30].mxu0  ;;  %v14492_v17 = vld [vmem:[#allocation2 + $0x10] sm:$0xff]  ;;  %v8991_v32 = vmul.f32 %v13429_v24, %v14476_v30 }
 0x65e   : > { %15702 = vst [vmem:[#allocation46_spill] sm:$0xff] %v14472_v21  ;;  %v14486_v61 = vpop.f32.mrb[31].mxu0  ;;  %v5189_v21 = vmul.f32 %v13429_v24, %v14266_v20  ;;  %v8989_v20 = vmul.f32 %v13418_v63, %v14466_v3  ;;  %v9174_v11 = vmul.f32 %v13261_v25, %v14492_v17 }
 0x65f   : > { %15705 = vst [vmem:[#allocation49_spill] sm:$0xff] %v14486_v61  ;;  %v8987_v61 = vmul.f32 %v13380_v58, %v14455_v4  ;;  %v14532_v38 = vpack.c.bf16 %v8991_v32, %v8990_v13  ;;  %v9178_v13 = vmul.f32 %v13333_v36, %v14511_v10  ;;  %v9179_v32 = vmul.f32 %v13316_v53, %v14513_v50 }
 0x660   : > { %v14523_v14 = vpack.c.bf16 %v8989_v20, %v8988_v9  ;;  %v5194_v52 = vpack.c.bf16 %v5189_v21, %v5188_v31  ;;  %v14541_v9 = vld [vmem:[#allocation2 + $0x49] sm:$0xff]  ;;  %v14543_v21 = vld [vmem:[#allocation2 + $0x3a] sm:$0xff]  ;;  %v14545_v31 = vpack.c.bf16 %v9175_v44, %v9174_v11  ;;  %v5191_v44 = vmul.f32 %v13461_v47, %v14313_v12 }
 0x661   : > { %v14521_v33 = vpack.c.bf16 %v8987_v61, %v8986_v43  ;;  %15709 = vst [vmem:[#allocation53_spill] sm:$0xff] %v14532_v38  ;;  %v9177_v61 = vmul.f32 %v13307_v51, %v14501_v0  ;;  %v5295_v43 = vmul.f32 %v13264_v26, %v14197_v27  ;;  %v5827_v20 = vld [vmem:[#allocation2 + $0x4a] sm:$0xff]  ;;  %v14554_v27 = vld [vmem:[#allocation2 + $0x42] sm:$0xff]  ;;  %v14560_v11 = vpack.c.bf16 %v14541_v9, %v14519_v42 }
 0x662   : > { %15708 = vst [vmem:[#allocation52_spill] sm:$0xff] %v14523_v14  ;;  %15710 = vst [vmem:[#allocation54_spill] sm:$0xff] %v14545_v31  ;;  %v14565_v31 = vpack.c.bf16 %v9179_v32, %v9178_v13  ;;  %v9547_v12 = vmul.f32 %v13429_v24, %v14543_v21  ;;  %v14580_v13 = vmul.f32 %v13461_v47, %v5827_v20 }
 0x663   : > { %15707 = vst [vmem:[#allocation51_spill] sm:$0xff] %v14521_v33  ;;  %11665 = vmatmul.mubr.msk.bf16.vlgmr.msra.gmra.mrb[32].mxu0 %vm640_vm1, %v5193_v59  ;;  %v5190_v59 = vmul.f32 %v13458_v23, %v14301_v45  ;;  %v14556_v38 = vpack.c.bf16 %v9177_v61, %v9176_v1  ;;  %15712 = vst [vmem:[#allocation56_spill] sm:$0xff] %v14560_v11  ;;  %v9543_v45 = vmul.f32 %v13380_v58, %v14464_v8 }
 0x664   : > { %11668 = vmatprep.mubr.msk.bf16.mxu0 %vm640_vm1, %v5194_v52  ;;  %11673 = vmatpush3.bf16.msra.mxu0 %v5321_v55  ;;  %15713 = vst [vmem:[#allocation57_spill] sm:$0xff] %v14565_v31  ;;  %v9542_v55 = vmul.f32 %v13377_v46, %v14455_v4  ;;  %v9544_v1 = vmul.f32 %v13415_v22, %v14466_v3 }
 0x665   : > { %15711 = vst [vmem:[#allocation55_spill] sm:$0xff] %v14556_v38  ;;  %12728 = vmatprep.subr.msk.bf16.mxu0 %vm1406_vm2, %v10397_v6  ;;  %v9545_v52 = vmul.f32 %v13418_v63, %v14474_v28  ;;  %v9546_v61 = vmul.f32 %v13426_v2, %v14476_v30  ;;  %v9548_v11 = vmul.f32 %v13458_v23, %v14554_v27 }
 0x666   : > { %v14582_v32 = vpack.c.bf16 %v9543_v45, %v9542_v55  ;;  %v5195_v14 = vpack.c.bf16 %v5191_v44, %v5190_v59  ;;  %v5302_v42 = vpack.c.bf16 %v5295_v43, %v5294_v39  ;;  %v5296_v20 = vmul.f32 %v13326_v60, %v14217_v16  ;;  %v15717_v43 = vld [vmem:[#allocation12_spill] sm:$0xff] }
 0x667   : > { %v14586_v31 = vpack.c.bf16 %v9545_v52, %v9544_v1  ;;  %v14588_v38 = vpack.c.bf16 %v9547_v12, %v9546_v61  ;;  %v14591_v33 = vpack.c.bf16 %v14580_v13, %v9548_v11  ;;  %v5297_v55 = vmul.f32 %v13307_v51, %v14219_v7  ;;  %v15718_v1 = vld [vmem:[#allocation14_spill] sm:$0xff]  ;;  %v15720_v61 = vld [vmem:[#allocation19_spill] sm:$0xff] }
 0x668   : > { %v5298_v45 = vmul.f32 %v13333_v36, %v14250_v15  ;;  %v5299_v59 = vmul.f32 %v13316_v53, %v14252_v41  ;;  %v5423_v11 = vsel %vm1406_vm2, %v10397_v6, 0  ;;  %v5300_v16 = vmul.f32 %v13388_v35, %v14299_v19 }
 0x669   : > { %v5303_v44 = vpack.c.bf16 %v5297_v55, %v5296_v20  ;;  %v5301_v7 = vmul.f32 %v13368_v37, %v14315_v48  ;;  %v5404_v41 = vpack.c.bf16 %v14210_v62, %v14193_v56  ;;  %v5405_v6 = vpack.c.bf16 %v14242_v57, %v14215_v29  ;;  %v10407_v48 = vld [vmem:[%s15558_s7 + $0x3c] sm:$0x7]  ;;  %v15723_v20 = vld [vmem:[#allocation16_spill] sm:$0xff] }
 0x66a   : > { %v5304_v39 = vpack.c.bf16 %v5299_v59, %v5298_v45  ;;  %v5406_v19 = vpack.c.bf16 %v14272_v34, %v14248_v54  ;;  %v5407_v56 = vpack.c.bf16 %v14287_v40, %v14297_v49  ;;  %v15714_v62 = vld [vmem:[#allocation5_spill] sm:$0xff]  ;;  %v5643_v54 = vsel %vm1406_vm2, %v10407_v48, 0  ;;  %v10412_v34 = vld [vmem:[%s15558_s7 + $0x40] sm:$0x7]  ;;  %v15724_v55 = vld [vmem:[#allocation20_spill] sm:$0xff] }
 0x66b   : > { %11669 = vmatmul.mubr.msk.bf16.gmra.mrb[36].mxu0 %vm640_vm1, %v5195_v14  ;;  %v5305_v15 = vpack.c.bf16 %v5301_v7, %v5300_v16  ;;  %v15715_v29 = vld [vmem:[#allocation9_spill] sm:$0xff]  ;;  %v15719_v52 = vpack.c.bf16 %v15717_v43, %v15718_v1  ;;  %v15721_v49 = vld [vmem:[#allocation18_spill] sm:$0xff]  ;;  %v15725_v45 = vpack.c.bf16 %v15723_v20, %v15724_v55  ;;  %v15726_v59 = vld [vmem:[#allocation7_spill] sm:$0xff]  ;;  %v5729_v43 = vpack.c.bf16 %v14541_v9, %v14287_v40 }
 0x66c   : > { %11674 = vmatprep.mubr.msk.bf16.mxu0 %vm640_vm1, %v5302_v42  ;;  %v10402_v42 = vld [vmem:[%s15558_s7 + $0x38] sm:$0x7]  ;;  %v15716_v57 = vpack.c.bf16 %v15714_v62, %v15715_v29  ;;  %v15722_v12 = vpack.c.bf16 %v15720_v61, %v15721_v49  ;;  %v15738_v62 = vld [vmem:[#allocation6_spill] sm:$0xff]  ;;  %v15741_v1 = vld [vmem:[#allocation27_spill] sm:$0xff] }
 0x66d   : > { %v5533_v14 = vsel %vm1406_vm2, %v10402_v42, 0  ;;  %v15729_v16 = vld [vmem:[#allocation21_spill] sm:$0xff]  ;;  %v15745_v55 = vld [vmem:[#allocation28_spill] sm:$0xff]  ;;  %v15748_v40 = vld [vmem:[#allocation30_spill] sm:$0xff] }
 0x66e   : > { %v15730_v7 = vld [vmem:[#allocation17_spill] sm:$0xff] }
 0x66f   : > { %v15744_v20 = vld [vmem:[#allocation29_spill] sm:$0xff] }
 0x673   : > { %11675 = vmatmul.mubr.msk.bf16.vlgmr.msra.gmra.mrb[32].mxu0 %vm640_vm1, %v5303_v44  ;;  %v15727_v44 = vld [vmem:[#allocation11_spill] sm:$0xff] }
 0x674   : > { %11678 = vmatprep.mubr.msk.bf16.mxu0 %vm640_vm1, %v5304_v39  ;;  %11683 = vmatpush3.bf16.msra.mxu0 %v5423_v11  ;;  %v15728_v11 = vpack.c.bf16 %v15726_v59, %v15727_v44  ;;  %v5745_v39 = vsel %vm1406_vm2, %v10412_v34, 0  ;;  %v15747_v59 = vld [vmem:[#allocation31_spill] sm:$0xff]  ;;  %v15750_v44 = vld [vmem:[#allocation13_spill] sm:$0xff] }
 0x675   : > { %12729 = vmatprep.subr.msk.bf16.mxu0 %vm1406_vm2, %v10402_v42  ;;  %v10417_v42 = vld [vmem:[%s15558_s7 + $0x44] sm:$0x7]  ;;  %v15749_v9 = vpack.c.bf16 %v15747_v59, %v15748_v40 }
 0x676   : > { %v5855_v29 = vsel %vm1406_vm2, %v10417_v42, 0 }
 0x67b   : > { %11679 = vmatmul.mubr.msk.bf16.gmra.mrb[36].mxu0 %vm640_vm1, %v5305_v15  ;;  %v15731_v15 = vpack.c.bf16 %v15729_v16, %v15730_v7  ;;  %v15752_v16 = vld [vmem:[#allocation39_spill] sm:$0xff] }
 0x67c   : > { %11684 = vmatprep.mubr.msk.bf16.mxu0 %vm640_vm1, %v5404_v41  ;;  %v15732_v41 = vld [vmem:[#allocation23_spill] sm:$0xff] }
 0x683   : > { %11685 = vmatmul.mubr.msk.bf16.vlgmr.msra.gmra.mrb[32].mxu0 %vm640_vm1, %v5405_v6  ;;  %v15733_v6 = vld [vmem:[#allocation22_spill] sm:$0xff] }
 0x684   : > { %11688 = vmatprep.mubr.msk.bf16.mxu0 %vm640_vm1, %v5406_v19  ;;  %11693 = vmatpush3.bf16.msra.mxu0 %v5533_v14  ;;  %v15734_v14 = vpack.c.bf16 %v15732_v41, %v15733_v6  ;;  %v15735_v19 = vld [vmem:[#allocation26_spill] sm:$0xff] }
 0x685   : > { %12730 = vmatprep.subr.msk.bf16.mxu0 %vm1406_vm2, %v10407_v48  ;;  %v15736_v48 = vld [vmem:[#allocation25_spill] sm:$0xff]  ;;  %v15754_v41 = vld [vmem:[#allocation42_spill] sm:$0xff] }
 0x68b   : > { %11689 = vmatmul.mubr.msk.bf16.gmra.mrb[36].mxu0 %vm640_vm1, %v5407_v56  ;;  %v15737_v56 = vpack.c.bf16 %v15735_v19, %v15736_v48  ;;  %v15755_v19 = vld [vmem:[#allocation40_spill] sm:$0xff] }
 0x68c   : > { %11694 = vmatprep.mubr.msk.bf16.mxu0 %vm640_vm1, %v15716_v57  ;;  %v10628_v57 = vld [vmem:[%s15566_s15 + $0x4] sm:$0x7]  ;;  %v15756_v48 = vld [vmem:[#allocation44_spill] sm:$0xff] }
 0x68d   : > { %v8139_v49 = vsel %vm1406_vm2, %v10628_v57, 0 }
 0x693   : > { %11695 = vmatmul.mubr.msk.bf16.vlgmr.msra.gmra.mrb[32].mxu0 %vm640_vm1, %v15719_v52  ;;  %v15742_v52 = vld [vmem:[#allocation24_spill] sm:$0xff] }
 0x694   : > { %11698 = vmatprep.mubr.msk.bf16.mxu0 %vm640_vm1, %v15722_v12  ;;  %11703 = vmatpush3.bf16.msra.mxu0 %v5643_v54  ;;  %v15739_v54 = vld [vmem:[#allocation8_spill] sm:$0xff]  ;;  %v15743_v61 = vpack.c.bf16 %v15741_v1, %v15742_v52  ;;  %v10629_v12 = vld [vmem:[%s15568_s17 + $0x4] sm:$0x7] }
 0x695   : > { %12731 = vmatprep.subr.msk.bf16.mxu0 %vm1406_vm2, %v10412_v34  ;;  %v15740_v34 = vld [vmem:[#allocation15_spill] sm:$0xff]  ;;  %v15758_v52 = vld [vmem:[#allocation10_spill] sm:$0xff] }
 0x69b   : > { %11699 = vmatmul.mubr.msk.bf16.gmra.mrb[36].mxu0 %vm640_vm1, %v15725_v45  ;;  %v15746_v45 = vpack.c.bf16 %v15744_v20, %v15745_v55  ;;  %v8100_v20 = vmul.f32 %v13333_v36, %v14499_v18  ;;  %v8101_v55 = vmul.f32 %v13316_v53, %v14501_v0 }
 0x69c   : > { %11704 = vmatprep.mubr.msk.bf16.mxu0 %vm640_vm1, %v15728_v11  ;;  %v5834_v11 = vmul.f32 %v13458_v23, %v15750_v44  ;;  %v8102_v44 = vmul.f32 %v13388_v35, %v14511_v10 }
 0x69d   : > { %v8106_v40 = vpack.c.bf16 %v8101_v55, %v8100_v20  ;;  %v8619_v20 = vmul.f32 %v13264_v26, %v14492_v17 }
 0x6a3   : > { %11705 = vmatmul.mubr.msk.bf16.vlgmr.msra.gmra.mrb[32].mxu0 %vm640_vm1, %v15731_v15  ;;  %v15753_v15 = vld [vmem:[#allocation37_spill] sm:$0xff] }
 0x6a4   : > { %11708 = vmatprep.mubr.msk.bf16.mxu0 %vm640_vm1, %v15734_v14  ;;  %11713 = vmatpush3.bf16.msra.mxu0 %v5745_v39  ;;  %v5839_v39 = vpack.c.bf16 %v14580_v13, %v5834_v11  ;;  %v14714_v6 = vpack.c.bf16 %v15754_v41, %v15753_v15  ;;  %v8207_v14 = vsel %vm1406_vm2, %v10629_v12, 0  ;;  %v8108_v13 = vld [vmem:[%s15566_s15] sm:$0x7]  ;;  %v8103_v11 = vmul.f32 %v13368_v37, %v14513_v50  ;;  %v15759_v15 = vld [vmem:[#allocation43_spill] sm:$0xff] }
 0x6a5   : > { %12732 = vmatprep.subr.msk.bf16.mxu0 %vm1406_vm2, %v10417_v42  ;;  %v15751_v42 = vld [vmem:[#allocation4_spill] sm:$0xff]  ;;  %v8431_v41 = vmul.f32 %v13380_v58, %v15759_v15 }
 0x6a6   : > { %v8118_v7 = vpack.c.bf16 %v15752_v16, %v15751_v42  ;;  %v10647_v16 = vld [vmem:[%s15568_s17 + $0x8] sm:$0x7]  ;;  %v10676_v15 = vld [vmem:[%s15566_s15 + $0x14] sm:$0x7] }
 0x6ab   : > { %11709 = vmatmul.mubr.msk.bf16.gmra.mrb[36].mxu0 %vm640_vm1, %v15737_v56  ;;  %v14719_v56 = vpack.c.bf16 %v15756_v48, %v15755_v19  ;;  %v12801_v48 = vld [vmem:[%s15560_s9 + $0x10] sm:$0xff]  }
 0x6ac   : > { %11714 = vmatprep.mubr.msk.bf16.mxu0 %vm640_vm1, %v15738_v62  ;;  %v14729_v62 = vld [vmem:[#allocation2 + $0x39] sm:$0xff]  ;;  %11732 = vmatprep.subr.bf16.mxu1 %v12801_v48 }
 0x6ad   : > { %11733 = vmatpush3.bf16.msra.mxu1 %v12801_v48 }
 0x6b3   : > { %11715 = vmatmul.mubr.msk.bf16.vlgmr.msra.gmra.mrb[32].mxu0 %vm640_vm1, %v15739_v54  ;;  %v8287_v54 = vsel %vm1406_vm2, %v8108_v13, 0 }
 0x6b4   : > { %11718 = vmatprep.mubr.msk.bf16.mxu0 %vm640_vm1, %v15740_v34  ;;  %11723 = vmatpush3.bf16.msra.mxu0 %v5855_v29  ;;  %v15757_v29 = vld [vmem:[#allocation41_spill] sm:$0xff]  ;;  %v8109_v34 = vld [vmem:[%s15568_s17] sm:$0x7] }
 0x6b5   : > { %12733 = vmatprep.subr.msk.bf16.mxu0 %vm1406_vm2, %v10628_v57  ;;  %v14733_v57 = vpack.c.bf16 %v14729_v62, %v15757_v29  ;;  %v8355_v59 = vsel %vm1406_vm2, %v8109_v34, 0  ;;  %v8435_v29 = vmul.f32 %v13429_v24, %v14474_v28  ;;  %v8436_v28 = vmul.f32 %v13458_v23, %v14476_v30  ;;  %v10657_v30 = vld [vmem:[%s15568_s17 + $0xc] sm:$0x7] }
 0x6bb   : > { %11719 = vmatmul.mubr.msk.bf16.gmra.mrb[36].mxu0 %vm640_vm1, %v5729_v43  ;;  %v14744_v43 = vld [vmem:[#allocation2 + $0x8] sm:$0xff] }
 0x6bc   : > { %11724 = vmatprep.mubr.msk.bf16.mxu0 %vm640_vm1, %v15743_v61  ;;  %v8097_v1 = vmul.f32 %v13264_v26, %v14744_v43  ;;  %v8618_v55 = vmul.f32 %v13261_v25, %v14744_v43  ;;  %v8715_v43 = vsel %vm1406_vm2, %v10657_v30, 0 }
 0x6be   : > { %v8104_v61 = vpack.c.bf16 %v8097_v1, %v15758_v52  ;;  %v8527_v52 = vsel %vm1406_vm2, %v10647_v16, 0 }
 0x6c3   : > { %11725 = vmatmul.mubr.msk.bf16.vlgmr.msra.gmra.mrb[32].mxu0 %vm640_vm1, %v15746_v45 }
 0x6c4   : > { %11728 = vmatprep.mubr.msk.bf16.mxu0 %vm640_vm1, %v15749_v9  ;;  %11961 = vmatpush3.bf16.msra.mxu0 %v8139_v49  ;;  %v8098_v49 = vmul.f32 %v13326_v60, %v14492_v17  ;;  %v10646_v9 = vld [vmem:[%s15566_s15 + $0x8] sm:$0x7]  ;;  %v8622_v17 = vmul.f32 %v13333_v36, %v14501_v0 }
 0x6c5   : > { %12734 = vmatprep.subr.msk.bf16.mxu0 %vm1406_vm2, %v10629_v12  ;;  %v8099_v12 = vmul.f32 %v13307_v51, %v14494_v5  ;;  %v8459_v42 = vsel %vm1406_vm2, %v10646_v9, 0 }
 0x6c7   : > { %v8105_v45 = vpack.c.bf16 %v8099_v12, %v8098_v49  ;;  %v10656_v49 = vld [vmem:[%s15566_s15 + $0xc] sm:$0x7] }
 0x6c8   : > { %v8647_v12 = vsel %vm1406_vm2, %v10656_v49, 0 }
 0x6cb   : > { %11729 = vmatmul.mubr.msk.bf16.gmra.mrb[36].mxu0 %vm640_vm1, %v5839_v39  ;;  %v8107_v39 = vpack.c.bf16 %v8103_v11, %v8102_v44 }
 0x6cc   : > { %11962 = vmatprep.mubr.msk.bf16.mxu0 %vm640_vm1, %v8118_v7 }
 0x6d3   : > { %11963 = vmatmul.mubr.msk.bf16.vlgmr.msra.gmra.mrb[40].mxu0 %vm640_vm1, %v14714_v6 }
 0x6d4   : > { %11966 = vmatprep.mubr.msk.bf16.mxu0 %vm640_vm1, %v14719_v56  ;;  %11971 = vmatpush3.bf16.msra.mxu0 %v8207_v14 }
 0x6d5   : > { %12735 = vmatprep.subr.msk.bf16.mxu0 %vm1406_vm2, %v8108_v13  ;;  %v8433_v13 = vmul.f32 %v13418_v63, %v14464_v8  ;;  %v12802_v8 = vld [vmem:[%s15560_s9 + $0x18] sm:$0xff]  }
 0x6d6   : > { %11734 = vmatprep.subr.bf16.mxu1 %v12802_v8 }
 0x6d7   : > { %11735 = vmatpush3.bf16.msra.mxu1 %v12802_v8  ;;  %v9173_v8 = vld [vmem:[#allocation2 + $0x48] sm:$0xff] }
 0x6db   : > { %11967 = vmatmul.mubr.msk.bf16.gmra.mrb[44].mxu0 %vm640_vm1, %v14733_v57 }
 0x6dc   : > { %11972 = vmatprep.mubr.msk.bf16.mxu0 %vm640_vm1, %v8118_v7  ;;  %v8422_v7 = vld [vmem:[#allocation2 + $0x2] sm:$0xff] }
 0x6dd   : > { %v8430_v14 = vmul.f32 %v13377_v46, %v8422_v7 }
 0x6df   : > { %v8438_v19 = vpack.c.bf16 %v8431_v41, %v8430_v14  ;;  %v15761_v41 = vld [vmem:[#allocation47_spill] sm:$0xff]  ;;  %v15762_v14 = vld [vmem:[#allocation48_spill] sm:$0xff] }
 0x6e3   : > { %11973 = vmatmul.mubr.msk.bf16.vlgmr.msra.gmra.mrb[48].mxu0 %vm640_vm1, %v14714_v6 }
 0x6e4   : > { %11976 = vmatprep.mubr.msk.bf16.mxu0 %vm640_vm1, %v14719_v56  ;;  %11981 = vmatpush3.bf16.msra.mxu0 %v8287_v54  ;;  %v8432_v54 = vmul.f32 %v13415_v22, %v14455_v4  ;;  %v8437_v4 = vmul.f32 %v13461_v47, %v14543_v21 }
 0x6e5   : > { %12736 = vmatprep.subr.msk.bf16.mxu0 %vm1406_vm2, %v8109_v34  ;;  %v8434_v34 = vmul.f32 %v13426_v2, %v14466_v3 }
 0x6e6   : > { %v8439_v1 = vpack.c.bf16 %v8433_v13, %v8432_v54  ;;  %v8441_v3 = vpack.c.bf16 %v8437_v4, %v8436_v28  ;;  %v9015_v13 = vsel %vm1406_vm2, %v10676_v15, 0 }
 0x6eb   : > { %11977 = vmatmul.mubr.msk.bf16.gmra.mrb[52].mxu0 %vm640_vm1, %v14733_v57 }
 0x6ec   : > { %11982 = vmatprep.mubr.msk.bf16.mxu0 %vm640_vm1, %v8104_v61 }
 0x6f3   : > { %11983 = vmatmul.mubr.msk.bf16.vlgmr.msra.gmra.mrb[40].mxu0 %vm640_vm1, %v8105_v45 }
 0x6f4   : > { %11986 = vmatprep.mubr.msk.bf16.mxu0 %vm640_vm1, %v8106_v40  ;;  %11991 = vmatpush3.bf16.msra.mxu0 %v8355_v59  ;;  %v8621_v59 = vmul.f32 %v13307_v51, %v14499_v18 }
 0x6f5   : > { %12737 = vmatprep.subr.msk.bf16.mxu0 %vm1406_vm2, %v10646_v9  ;;  %v8620_v9 = vmul.f32 %v13326_v60, %v14494_v5  ;;  %v8624_v5 = vmul.f32 %v13388_v35, %v14513_v50  ;;  %v15760_v50 = vld [vmem:[#allocation45_spill] sm:$0xff] }
 0x6f7   : > { %v8627_v44 = vpack.c.bf16 %v8621_v59, %v8620_v9  ;;  %v9181_v59 = vmul.f32 %v13368_v37, %v9173_v8 }
 0x6fb   : > { %11987 = vmatmul.mubr.msk.bf16.gmra.mrb[44].mxu0 %vm640_vm1, %v8107_v39 }
 0x6fc   : > { %11992 = vmatprep.mubr.msk.bf16.mxu0 %vm640_vm1, %v8104_v61  ;;  %v8440_v61 = vpack.c.bf16 %v8435_v29, %v8434_v34  ;;  %v10677_v29 = vld [vmem:[%s15568_s17 + $0x14] sm:$0x7]  ;;  %v10686_v34 = vld [vmem:[%s15566_s15 + $0x18] sm:$0x7] }
 0x6fd   : > { %v9083_v54 = vsel %vm1406_vm2, %v10677_v29, 0  ;;  %v9203_v4 = vsel %vm1406_vm2, %v10686_v34, 0 }
 0x703   : > { %11993 = vmatmul.mubr.msk.bf16.vlgmr.msra.gmra.mrb[48].mxu0 %vm640_vm1, %v8105_v45  ;;  %v8626_v45 = vpack.c.bf16 %v8619_v20, %v8618_v55  ;;  %v15769_v20 = vld [vmem:[#allocation57_spill] sm:$0xff]  ;;  %v10423_v55 = vld [vmem:[%s15559_s8 + $0x1] ss:$0 sm:$0xff] }
 0x704   : > { %11996 = vmatprep.mubr.msk.bf16.mxu0 %vm640_vm1, %v8106_v40  ;;  %12001 = vmatpush3.bf16.msra.mxu0 %v8459_v42  ;;  %v8623_v40 = vmul.f32 %v13316_v53, %v14511_v10  ;;  %v10666_v42 = vld [vmem:[%s15566_s15 + $0x10] sm:$0x7] }
 0x705   : > { %12738 = vmatprep.subr.msk.bf16.mxu0 %vm1406_vm2, %v10647_v16  ;;  %v8827_v0 = vsel %vm1406_vm2, %v10666_v42, 0  ;;  %v10667_v16 = vld [vmem:[%s15568_s17 + $0x10] sm:$0x7] }
 0x706   : > { %v8628_v11 = vpack.c.bf16 %v8623_v40, %v8622_v17  ;;  %v8895_v7 = vsel %vm1406_vm2, %v10667_v16, 0 }
 0x70b   : > { %11997 = vmatmul.mubr.msk.bf16.gmra.mrb[52].mxu0 %vm640_vm1, %v8107_v39  ;;  %v8617_v39 = vld [vmem:[#allocation2 + $0x40] sm:$0xff] }
 0x70c   : > { %12002 = vmatprep.mubr.msk.bf16.mxu0 %vm640_vm1, %v8438_v19  ;;  %v8625_v18 = vmul.f32 %v13368_v37, %v8617_v39 }
 0x70e   : > { %v8629_v10 = vpack.c.bf16 %v8625_v18, %v8624_v5 }
 0x713   : > { %12003 = vmatmul.mubr.msk.bf16.vlgmr.msra.gmra.mrb[40].mxu0 %vm640_vm1, %v8439_v1 }
 0x714   : > { %12006 = vmatprep.mubr.msk.bf16.mxu0 %vm640_vm1, %v8440_v61  ;;  %12011 = vmatpush3.bf16.msra.mxu0 %v8527_v52  ;;  %v15766_v52 = vld [vmem:[#allocation53_spill] sm:$0xff] }
 0x715   : > { %12739 = vmatprep.subr.msk.bf16.mxu0 %vm1406_vm2, %v10656_v49  ;;  %v8993_v49 = vmul.f32 %v13461_v47, %v14554_v27 }
 0x71b   : > { %12007 = vmatmul.mubr.msk.bf16.gmra.mrb[44].mxu0 %vm640_vm1, %v8441_v3 }
 0x71c   : > { %12012 = vmatprep.mubr.msk.bf16.mxu0 %vm640_vm1, %v8438_v19  ;;  %v15763_v19 = vld [vmem:[#allocation50_spill] sm:$0xff] }
 0x71d   : > { %v8809_v48 = vpack.c.bf16 %v15763_v19, %v14729_v62  ;;  %v15764_v62 = vld [vmem:[#allocation51_spill] sm:$0xff] }
 0x723   : > { %12013 = vmatmul.mubr.msk.bf16.vlgmr.msra.gmra.mrb[48].mxu0 %vm640_vm1, %v8439_v1  ;;  %v15765_v1 = vld [vmem:[#allocation52_spill] sm:$0xff] }
 0x724   : > { %12016 = vmatprep.mubr.msk.bf16.mxu0 %vm640_vm1, %v8440_v61  ;;  %12021 = vmatpush3.bf16.msra.mxu0 %v8647_v12  ;;  %v8992_v61 = vmul.f32 %v13458_v23, %v14543_v21  ;;  %v15767_v21 = vld [vmem:[#allocation54_spill] sm:$0xff]  ;;  %v10696_v12 = vld [vmem:[%s15566_s15 + $0x1c] sm:$0x7] }
 0x725   : > { %12740 = vmatprep.subr.msk.bf16.mxu0 %vm1406_vm2, %v10657_v30  ;;  %v15768_v30 = vld [vmem:[#allocation55_spill] sm:$0xff] }
 0x726   : > { %v8997_v28 = vpack.c.bf16 %v8993_v49, %v8992_v61 }
 0x72b   : > { %12017 = vmatmul.mubr.msk.bf16.gmra.mrb[52].mxu0 %vm640_vm1, %v8441_v3  ;;  %v10687_v3 = vld [vmem:[%s15568_s17 + $0x18] sm:$0x7] }
 0x72c   : > { %12022 = vmatprep.mubr.msk.bf16.mxu0 %vm640_vm1, %v8626_v45  ;;  %v9271_v27 = vsel %vm1406_vm2, %v10687_v3, 0 }
 0x733   : > { %12023 = vmatmul.mubr.msk.bf16.vlgmr.msra.gmra.mrb[40].mxu0 %vm640_vm1, %v8627_v44 }
 0x734   : > { %12026 = vmatprep.mubr.msk.bf16.mxu0 %vm640_vm1, %v8628_v11  ;;  %12031 = vmatpush3.bf16.msra.mxu0 %v8715_v43 }
 0x735   : > { %12741 = vmatprep.subr.msk.bf16.mxu0 %vm1406_vm2, %v10666_v42 }
 0x73b   : > { %12027 = vmatmul.mubr.msk.bf16.gmra.mrb[44].mxu0 %vm640_vm1, %v8629_v10 }
 0x73c   : > { %12032 = vmatprep.mubr.msk.bf16.mxu0 %vm640_vm1, %v8626_v45  ;;  %v9180_v45 = vmul.f32 %v13388_v35, %v8617_v39 }
 0x73e   : > { %v9185_v5 = vpack.c.bf16 %v9181_v59, %v9180_v45 }
 0x743   : > { %12033 = vmatmul.mubr.msk.bf16.vlgmr.msra.gmra.mrb[48].mxu0 %vm640_vm1, %v8627_v44 }
 0x744   : > { %12036 = vmatprep.mubr.msk.bf16.mxu0 %vm640_vm1, %v8628_v11  ;;  %12041 = vmatpush3.bf16.msra.mxu0 %v8827_v0 }
 0x745   : > { %12742 = vmatprep.subr.msk.bf16.mxu0 %vm1406_vm2, %v10667_v16 }
 0x74b   : > { %12037 = vmatmul.mubr.msk.bf16.gmra.mrb[52].mxu0 %vm640_vm1, %v8629_v10 }
 0x74c   : > { %12042 = vmatprep.mubr.msk.bf16.mxu0 %vm640_vm1, %v15760_v50 }
 0x753   : > { %12043 = vmatmul.mubr.msk.bf16.vlgmr.msra.gmra.mrb[40].mxu0 %vm640_vm1, %v15761_v41 }
 0x754   : > { %12046 = vmatprep.mubr.msk.bf16.mxu0 %vm640_vm1, %v15762_v14  ;;  %12051 = vmatpush3.bf16.msra.mxu0 %v8895_v7 }
 0x755   : > { %12743 = vmatprep.subr.msk.bf16.mxu0 %vm1406_vm2, %v10676_v15 }
 0x75b   : > { %12047 = vmatmul.mubr.msk.bf16.gmra.mrb[44].mxu0 %vm640_vm1, %v8809_v48 }
 0x75c   : > { %12052 = vmatprep.mubr.msk.bf16.mxu0 %vm640_vm1, %v15760_v50 }
 0x763   : > { %12053 = vmatmul.mubr.msk.bf16.vlgmr.msra.gmra.mrb[48].mxu0 %vm640_vm1, %v15761_v41 }
 0x764   : > { %12056 = vmatprep.mubr.msk.bf16.mxu0 %vm640_vm1, %v15762_v14  ;;  %12061 = vmatpush3.bf16.msra.mxu0 %v9015_v13 }
 0x765   : > { %12744 = vmatprep.subr.msk.bf16.mxu0 %vm1406_vm2, %v10677_v29 }
 0x76b   : > { %12057 = vmatmul.mubr.msk.bf16.gmra.mrb[52].mxu0 %vm640_vm1, %v8809_v48 }
 0x76c   : > { %12062 = vmatprep.mubr.msk.bf16.mxu0 %vm640_vm1, %v15764_v62 }
 0x773   : > { %12063 = vmatmul.mubr.msk.bf16.vlgmr.msra.gmra.mrb[40].mxu0 %vm640_vm1, %v15765_v1 }
 0x774   : > { %12066 = vmatprep.mubr.msk.bf16.mxu0 %vm640_vm1, %v15766_v52  ;;  %12071 = vmatpush3.bf16.msra.mxu0 %v9083_v54 }
 0x775   : > { %12745 = vmatprep.subr.msk.bf16.mxu0 %vm1406_vm2, %v10686_v34  ;;  %v10697_v34 = vld [vmem:[%s15568_s17 + $0x1c] sm:$0x7] }
 0x77b   : > { %12067 = vmatmul.mubr.msk.bf16.gmra.mrb[44].mxu0 %vm640_vm1, %v8997_v28 }
 0x77c   : > { %12072 = vmatprep.mubr.msk.bf16.mxu0 %vm640_vm1, %v15764_v62  ;;  %v9383_v62 = vsel %vm1406_vm2, %v10696_v12, 0 }
 0x783   : > { %12073 = vmatmul.mubr.msk.bf16.vlgmr.msra.gmra.mrb[48].mxu0 %vm640_vm1, %v15765_v1 }
 0x784   : > { %12076 = vmatprep.mubr.msk.bf16.mxu0 %vm640_vm1, %v15766_v52  ;;  %12081 = vmatpush3.bf16.msra.mxu0 %v9203_v4 }
 0x785   : > { %12746 = vmatprep.subr.msk.bf16.mxu0 %vm1406_vm2, %v10687_v3  ;;  %v9451_v3 = vsel %vm1406_vm2, %v10697_v34, 0 }
 0x78b   : > { %12077 = vmatmul.mubr.msk.bf16.gmra.mrb[52].mxu0 %vm640_vm1, %v8997_v28 }
 0x78c   : > { %12082 = vmatprep.mubr.msk.bf16.mxu0 %vm640_vm1, %v15767_v21 }
 0x793   : > { %12083 = vmatmul.mubr.msk.bf16.vlgmr.msra.gmra.mrb[40].mxu0 %vm640_vm1, %v15768_v30 }
 0x794   : > { %12086 = vmatprep.mubr.msk.bf16.mxu0 %vm640_vm1, %v15769_v20  ;;  %12091 = vmatpush3.bf16.msra.mxu0 %v9271_v27  ;;  %v15770_v27 = vld [vmem:[#allocation56_spill] sm:$0xff] }
 0x795   : > { %12747 = vmatprep.subr.msk.bf16.mxu0 %vm1406_vm2, %v10696_v12  ;;  %v10707_v12 = vld [vmem:[%s15568_s17 + $0x20] sm:$0x7] }
 0x796   : > { %v11726_v40 = vpop.f32.mrb[32].mxu0 }
 0x797   : > { %v5940_v9 = vadd.f32 %v11726_v40, %v10423_v55  ;;  %v5891_v17 = vpop.f32.mrb[33].mxu0 }
 0x798   : > { %v5938_v44 = vadd.f32 %v10423_v55, %v5891_v17  ;;  %v11727_v43 = vpop.f32.mrb[34].mxu0 }
 0x799   : > { %v5941_v11 = vadd.f32 %v11727_v43, %v10423_v55  ;;  %v5894_v42 = vpop.f32.mrb[35].mxu0  ;;  %v5948_v10 = vmax.f32 %v5940_v9, 0.0 }
 0x79a   : > { %v5939_v18 = vadd.f32 %v10423_v55, %v5894_v42  ;;  %v5946_v16 = vmax.f32 %v5938_v44, 0.0 }
 0x79b   : > { %v5949_v0 = vmax.f32 %v5941_v11, 0.0  ;;  %12087 = vmatmul.mubr.msk.bf16.gmra.mrb[44].mxu0 %vm640_vm1, %v9185_v5 }
 0x79c   : > { %v5947_v50 = vmax.f32 %v5939_v18, 0.0  ;;  %12092 = vmatprep.mubr.msk.bf16.mxu0 %vm640_vm1, %v15767_v21  ;;  %v10706_v21 = vld [vmem:[%s15566_s15 + $0x20] sm:$0x7] }
 0x79d   : > { %v5955_v39 = vpack.c.bf16 %v5949_v0, %v5948_v10  ;;  %v9571_v8 = vsel %vm1406_vm2, %v10706_v21, 0 }
 0x79e   : > { %v5954_v7 = vpack.c.bf16 %v5947_v50, %v5946_v16  ;;  %v11730_v15 = vpop.f32.mrb[36].mxu0 }
 0x79f   : > { %v5944_v41 = vadd.f32 %v11730_v15, %v10423_v55  ;;  %v5907_v14 = vpop.f32.mrb[37].mxu0 }
 0x7a0   : > { %v5942_v19 = vadd.f32 %v10423_v55, %v5907_v14  ;;  %v11731_v48 = vpop.f32.mrb[38].mxu0  ;;  %11736 = vmatprep.mubr.msk.bf16.mxu1 %vm653_vm7, %v5954_v7 }
 0x7a1   : > { %v5945_v13 = vadd.f32 %v11731_v48, %v10423_v55  ;;  %v5910_v29 = vpop.f32.mrb[39].mxu0  ;;  %11737 = vmatmul.mubr.msk.bf16.vlgmr.msra.gmra.mrb[40].mxu1 %vm653_vm7, %v5955_v39  ;;  %v5952_v1 = vmax.f32 %v5944_v41, 0.0  ;;  %v6106_v39 = vld [vmem:[#allocation3 + $0x1] sm:$0xff] }
 0x7a2   : > { %v5943_v54 = vadd.f32 %v10423_v55, %v5910_v29  ;;  %v5950_v61 = vmax.f32 %v5942_v19, 0.0 }
 0x7a3   : > { %v5953_v52 = vmax.f32 %v5945_v13, 0.0  ;;  %12093 = vmatmul.mubr.msk.bf16.vlgmr.msra.gmra.mrb[48].mxu0 %vm640_vm1, %v15768_v30 }
 0x7a4   : > { %v5951_v49 = vmax.f32 %v5943_v54, 0.0  ;;  %12096 = vmatprep.mubr.msk.bf16.mxu0 %vm640_vm1, %v15769_v20  ;;  %12101 = vmatpush3.bf16.msra.mxu0 %v9383_v62 }
 0x7a5   : > { %v5957_v28 = vpack.c.bf16 %v5953_v52, %v5952_v1  ;;  %12748 = vmatprep.subr.msk.bf16.mxu0 %vm1406_vm2, %v10697_v34  ;;  %v12806_v34 = vld [vmem:[%s15564_s13 + $0xa8] sm:$0xff]  }
 0x7a6   : > { %v5956_v4 = vpack.c.bf16 %v5951_v49, %v5950_v61 }
 0x7a8   : > { %11740 = vmatprep.mubr.msk.bf16.mxu1 %vm653_vm7, %v5956_v4  ;;  %v12807_v4 = vld [vmem:[%s15562_s11 + $0x90] sm:$0xff]  }
 0x7a9   : > { %11741 = vmatmul.mubr.msk.bf16.gmra.mrb[44].mxu1 %vm653_vm7, %v5957_v28 }
 0x7ab   : > { %12097 = vmatmul.mubr.msk.bf16.gmra.mrb[52].mxu0 %vm640_vm1, %v9185_v5 }
 0x7ac   : > { %12102 = vmatprep.mubr.msk.bf16.mxu0 %vm640_vm1, %v14714_v6 }
 0x7b3   : > { %12103 = vmatmul.mubr.msk.bf16.vlgmr.msra.gmra.mrb[40].mxu0 %vm640_vm1, %v14719_v56 }
 0x7b4   : > { %12106 = vmatprep.mubr.msk.bf16.mxu0 %vm640_vm1, %v14733_v57  ;;  %12111 = vmatpush3.bf16.msra.mxu0 %v9451_v3 }
 0x7b5   : > { %12749 = vmatprep.subr.msk.bf16.mxu0 %vm1406_vm2, %v10706_v21 }
 0x7bb   : > { %12107 = vmatmul.mubr.msk.bf16.gmra.mrb[44].mxu0 %vm640_vm1, %v15770_v27 }
 0x7bc   : > { %12112 = vmatprep.mubr.msk.bf16.mxu0 %vm640_vm1, %v14714_v6  ;;  %v9639_v6 = vsel %vm1406_vm2, %v10707_v12, 0 }
 0x7c3   : > { %12113 = vmatmul.mubr.msk.bf16.vlgmr.msra.gmra.mrb[48].mxu0 %vm640_vm1, %v14719_v56  ;;  %v12803_v56 = vld [vmem:[%s15562_s11 + $0xa0] sm:$0xff]  }
 0x7c4   : > { %12116 = vmatprep.mubr.msk.bf16.mxu0 %vm640_vm1, %v14733_v57  ;;  %12121 = vmatpush3.bf16.msra.mxu0 %v9571_v8  ;;  %v12804_v57 = vld [vmem:[%s15562_s11 + $0xa8] sm:$0xff]  }
 0x7c5   : > { %12750 = vmatprep.subr.msk.bf16.mxu0 %vm1406_vm2, %v10707_v12  ;;  %11744 = vmatprep.subr.bf16.mxu1 %v12803_v56  ;;  %vm9946_vm2 = vcmask 0  }
 0x7c6   : > { %11745 = vmatpush3.bf16.msra.mxu1 %v12803_v56 }
 0x7c7   : > { %11746 = vmatprep.subr.bf16.mxu1 %v12804_v57 }
 0x7ca   : > { %11747 = vmatpush3.bf16.msra.mxu1 %v12804_v57 }
 0x7cb   : > { %12117 = vmatmul.mubr.msk.bf16.gmra.mrb[52].mxu0 %vm640_vm1, %v15770_v27 }
 0x7cc   : > { %12122 = vmatprep.mubr.msk.bf16.mxu0 %vm640_vm1, %v14582_v32 }
 0x7d3   : > { %12123 = vmatmul.mubr.msk.bf16.vlgmr.msra.gmra.mrb[40].mxu0 %vm640_vm1, %v14586_v31 }
 0x7d4   : > { %12126 = vmatprep.mubr.msk.bf16.mxu0 %vm640_vm1, %v14588_v38  ;;  %12131 = vmatpush3.bf16.msra.mxu0 %v9639_v6 }
 0x7db   : > { %12127 = vmatmul.mubr.msk.bf16.gmra.mrb[44].mxu0 %vm640_vm1, %v14591_v33 }
 0x7dc   : > { %12132 = vmatprep.mubr.msk.bf16.mxu0 %vm640_vm1, %v14582_v32 }
 0x7e3   : > { %12133 = vmatmul.mubr.msk.bf16.vlgmr.msra.gmra.mrb[48].mxu0 %vm640_vm1, %v14586_v31  ;;  %v12805_v31 = vld [vmem:[%s15564_s13 + $0xa0] sm:$0xff]  }
 0x7e4   : > { %12136 = vmatprep.mubr.msk.bf16.mxu0 %vm640_vm1, %v14588_v38  ;;  %11756 = vmatprep.subr.bf16.mxu1 %v12805_v31  ;;  %v10429_v38 = vld [vmem:[%s15561_s10 + $0x1] ss:$0 sm:$0xff] }
 0x7eb   : > { %12137 = vmatmul.mubr.msk.bf16.gmra.mrb[52].mxu0 %vm640_vm1, %v14591_v33 }
 0x874   : > { %v11738_v33 = vpop.f32.mrb[40].mxu1 }
 0x875   : > { %v6038_v32 = vadd.f32 %v11738_v33, %v10429_v38  ;;  %v6029_v30 = vpop.f32.mrb[41].mxu1 }
 0x876   : > { %v6030_v20 = vadd.f32 %v10429_v38, %v6029_v30  ;;  %v11739_v55 = vpop.f32.mrb[42].mxu1 }
 0x877   : > { %v6062_v45 = vmax.f32 %v6038_v32, 0.0  ;;  %v6041_v59 = vadd.f32 %v11739_v55, %v10429_v38  ;;  %v6032_v40 = vpop.f32.mrb[43].mxu1 }
 0x878   : > { %v6060_v9 = vmax.f32 %v6030_v20, 0.0  ;;  %v6033_v17 = vadd.f32 %v10429_v38, %v6032_v40 }
 0x879   : > { %6070 = vst.msk [vmem:[#allocation3 + $0x19] sm:$0xff] %vm653_vm7, %v6062_v45  ;;  %v6063_v44 = vmax.f32 %v6041_v59, 0.0 }
 0x87a   : > { %6068 = vst.msk [vmem:[#allocation3 + $0x9] sm:$0xff] %vm653_vm7, %v6060_v9  ;;  %v6061_v43 = vmax.f32 %v6033_v17, 0.0 }
 0x87b   : > { %6071 = vst.msk [vmem:[#allocation3 + $0x21] sm:$0xff] %vm653_vm7, %v6063_v44 }
 0x87c   : > { %6069 = vst.msk [vmem:[#allocation3 + $0x11] sm:$0xff] %vm653_vm7, %v6061_v43  ;;  %v11742_v11 = vpop.f32.mrb[44].mxu1 }
 0x87d   : > { %v6054_v42 = vadd.f32 %v11742_v11, %v10429_v38  ;;  %v6045_v5 = vpop.f32.mrb[45].mxu1 }
 0x87e   : > { %v6046_v18 = vadd.f32 %v10429_v38, %v6045_v5  ;;  %v11743_v10 = vpop.f32.mrb[46].mxu1 }
 0x87f   : > { %v6066_v0 = vmax.f32 %v6054_v42, 0.0  ;;  %v6057_v16 = vadd.f32 %v11743_v10, %v10429_v38  ;;  %v6048_v50 = vpop.f32.mrb[47].mxu1 }
 0x880   : > { %v6064_v7 = vmax.f32 %v6046_v18, 0.0  ;;  %v6049_v15 = vadd.f32 %v10429_v38, %v6048_v50  ;;  %v6109_v29 = vld [vmem:[#allocation3 + $0x19] sm:$0xff] }
 0x881   : > { %6074 = vst.msk [vmem:[#allocation3 + $0x39] sm:$0xff] %vm653_vm7, %v6066_v0  ;;  %v6067_v41 = vmax.f32 %v6057_v16, 0.0  ;;  %v6107_v14 = vld [vmem:[#allocation3 + $0x9] sm:$0xff] }
 0x882   : > { %6072 = vst.msk [vmem:[#allocation3 + $0x29] sm:$0xff] %vm653_vm7, %v6064_v7  ;;  %v6065_v19 = vmax.f32 %v6049_v15, 0.0  ;;  %v6114_v48 = vpack.c.bf16 %v6107_v14, %v6106_v39  ;;  %v6110_v62 = vld [vmem:[#allocation3 + $0x21] sm:$0xff] }
 0x883   : > { %6075 = vst.msk [vmem:[#allocation3 + $0x41] sm:$0xff] %vm653_vm7, %v6067_v41  ;;  %v6108_v13 = vld [vmem:[#allocation3 + $0x11] sm:$0xff]  ;;  %v15020_v49 = vpack.c.bf16 %v6110_v62, %v6109_v29  ;;  %v15035_v6 = vld [vmem:[#allocation3 + $0x1a] sm:$0xff] }
 0x884   : > { %6073 = vst.msk [vmem:[#allocation3 + $0x31] sm:$0xff] %vm653_vm7, %v6065_v19  ;;  %11748 = vmatprep.mubr.msk.bf16.mxu1 %vm653_vm7, %v6114_v48  ;;  %v15007_v54 = vpack.c.bf16 %v6109_v29, %v6108_v13  ;;  %v15012_v1 = vld [vmem:[#allocation3 + $0xa] sm:$0xff]  ;;  %v15014_v52 = vld [vmem:[#allocation3 + $0x12] sm:$0xff]  ;;  %v15018_v61 = vpack.c.bf16 %v6108_v13, %v6107_v14  ;;  %v15058_v45 = vld [vmem:[#allocation3 + $0x20] sm:$0xff]  ;;  %v7098_v17 = vmul.f32 %v13415_v22, %v15035_v6 }
 0x885   : > { %v7096_v28 = vmul.f32 %v13377_v46, %v15012_v1  ;;  %v7097_v3 = vmul.f32 %v13380_v58, %v15014_v52  ;;  %v15031_v8 = vld [vmem:[#allocation3 + $0x10] sm:$0xff]  ;;  %v15033_v12 = vld [vmem:[#allocation3 + $0x18] sm:$0xff]  ;;  %v7724_v42 = vmul.f32 %v13377_v46, %v15014_v52  ;;  %v7725_v5 = vmul.f32 %v13380_v58, %v15035_v6 }
 0x886   : > { %11749 = vmatmul.mubr.msk.bf16.vlgmr.msra.gmra.mrb[48].mxu1 %vm653_vm7, %v15007_v54  ;;  %v7308_v20 = vmul.f32 %v13261_v25, %v15031_v8  ;;  %v7309_v55 = vmul.f32 %v13264_v26, %v15033_v12  ;;  %v7310_v16 = vmul.f32 %v13326_v60, %v15058_v45 }
 0x887   : > { %11757 = vmatpush3.bf16.msra.mxu1 %v12805_v31  ;;  %v15041_v38 = vpack.c.bf16 %v7097_v3, %v7096_v28  ;;  %v15099_v19 = vpack.c.bf16 %v7725_v5, %v7724_v42  ;;  %v6076_v3 = vld [vmem:[#allocation3] sm:$0xff]  ;;  %v6087_v42 = vmul.f32 %v13307_v51, %v15033_v12 }
 0x888   : > { %11758 = vmatprep.subr.bf16.mxu1 %v12806_v34  ;;  %v15037_v57 = vld [vmem:[#allocation3 + $0x39] sm:$0xff]  ;;  %v15083_v0 = vpack.c.bf16 %v7309_v55, %v7308_v20 }
 0x889   : > { %v6111_v21 = vld [vmem:[#allocation3 + $0x29] sm:$0xff]  ;;  %v12809_v55 = vld [vmem:[%s15564_s13 + $0x90] sm:$0xff]  }
 0x88a   : > { %v15029_v27 = vpack.c.bf16 %v6111_v21, %v6110_v62  ;;  %v15039_v31 = vld [vmem:[#allocation3 + $0x22] sm:$0xff]  ;;  %v15091_v7 = vld [vmem:[#allocation3 + $0x3a] sm:$0xff] }
 0x88b   : > { %v6112_v56 = vld [vmem:[#allocation3 + $0x31] sm:$0xff]  ;;  %11759 = vmatpush3.bf16.msra.mxu1 %v12806_v34  ;;  %v15060_v59 = vld [vmem:[#allocation3 + $0x28] sm:$0xff]  ;;  %v7099_v44 = vmul.f32 %v13418_v63, %v15039_v31  ;;  %v7726_v29 = vmul.f32 %v13415_v22, %v15039_v31  ;;  %v7729_v28 = vmul.f32 %v13429_v24, %v15091_v7 }
 0x88c   : > { %11752 = vmatprep.mubr.msk.bf16.mxu1 %vm653_vm7, %v15029_v27  ;;  %v15046_v33 = vpack.c.bf16 %v15037_v57, %v6112_v56  ;;  %11768 = vmatprep.subr.bf16.mxu1 %v12807_v4  ;;  %v15048_v32 = vld [vmem:[#allocation3 + $0x2a] sm:$0xff]  ;;  %v15050_v30 = vld [vmem:[#allocation3 + $0x32] sm:$0xff]  ;;  %v15064_v9 = vpack.c.bf16 %v6112_v56, %v6111_v21  ;;  %v7311_v50 = vmul.f32 %v13307_v51, %v15060_v59 }
 0x88d   : > { %v15062_v40 = vld [vmem:[#allocation3 + $0x30] sm:$0xff]  ;;  %v7100_v43 = vmul.f32 %v13426_v2, %v15048_v32  ;;  %v15073_v11 = vld [vmem:[#allocation3 + $0x38] sm:$0xff]  ;;  %v15079_v18 = vpack.c.bf16 %v7099_v44, %v7098_v17  ;;  %v7101_v10 = vmul.f32 %v13429_v24, %v15050_v30  ;;  %v7727_v62 = vmul.f32 %v13418_v63, %v15048_v32  ;;  %v15116_v21 = vld [vmem:[#allocation3 + $0x8] sm:$0xff] }
 0x88e   : > { %11753 = vmatmul.mubr.msk.bf16.gmra.mrb[52].mxu1 %vm653_vm7, %v15046_v33  ;;  %v7312_v39 = vmul.f32 %v13333_v36, %v15062_v40  ;;  %v7313_v41 = vmul.f32 %v13316_v53, %v15073_v11  ;;  %v15097_v14 = vpack.c.bf16 %v7311_v50, %v7310_v16  ;;  %v7728_v34 = vmul.f32 %v13426_v2, %v15050_v30  ;;  %v12810_v50 = vld [vmem:[%s15564_s13 + $0x98] sm:$0xff]  }
 0x88f   : > { %11760 = vmatprep.mubr.msk.bf16.mxu1 %vm653_vm7, %v6114_v48  ;;  %v15093_v15 = vpack.c.bf16 %v7101_v10, %v7100_v43  ;;  %v12808_v48 = vld [vmem:[%s15562_s11 + $0x98] sm:$0xff]   ;;  %v15118_v56 = vpack.c.bf16 %v7727_v62, %v7726_v29  ;;  %v6084_v17 = vmul.f32 %v13261_v25, %v6076_v3  ;;  %v6085_v44 = vmul.f32 %v13264_v26, %v15116_v21 }
 0x890   : > { %v15104_v13 = vpack.c.bf16 %v7313_v41, %v7312_v39  ;;  %v15122_v20 = vpack.c.bf16 %v7729_v28, %v7728_v34  ;;  %v6089_v5 = vmul.f32 %v13316_v53, %v15060_v59  ;;  %v6088_v10 = vmul.f32 %v13333_v36, %v15058_v45  ;;  %v12811_v28 = vld [vmem:[%s15562_s11 + $0xb0] sm:$0xff]  }
 0x891   : > { %v6092_v43 = vpack.c.bf16 %v6085_v44, %v6084_v17  ;;  %v6090_v62 = vmul.f32 %v13388_v35, %v15062_v40  ;;  %v6091_v34 = vmul.f32 %v13368_v37, %v15073_v11 }
 0x892   : > { %v6094_v39 = vpack.c.bf16 %v6089_v5, %v6088_v10  ;;  %v12812_v5 = vld [vmem:[%s15562_s11 + $0xb8] sm:$0xff]  }
 0x893   : > { %v6095_v17 = vpack.c.bf16 %v6091_v34, %v6090_v62  ;;  %v6460_v62 = vld [vmem:[#allocation3 + $0x2] sm:$0xff]  ;;  %v12813_v34 = vld [vmem:[%s15564_s13 + $0xb0] sm:$0xff]  }
 0x896   : > { %11761 = vmatmul.mubr.msk.bf16.vlgmr.msra.gmra.mrb[56].mxu1 %vm653_vm7, %v15007_v54 }
 0x897   : > { %11764 = vmatprep.mubr.msk.bf16.mxu1 %vm653_vm7, %v15029_v27  ;;  %11769 = vmatpush3.bf16.msra.mxu1 %v12807_v4  ;;  %v6086_v4 = vmul.f32 %v13326_v60, %v15031_v8 }
 0x898   : > { %11770 = vmatprep.subr.bf16.mxu1 %v12808_v48 }
 0x899   : > { %v6093_v16 = vpack.c.bf16 %v6087_v42, %v6086_v4 }
 0x89b   : > { %11771 = vmatpush3.bf16.msra.mxu1 %v12808_v48 }
 0x89c   : > { %11780 = vmatprep.subr.bf16.mxu1 %v12809_v55 }
 0x89e   : > { %11765 = vmatmul.mubr.msk.bf16.gmra.mrb[60].mxu1 %vm653_vm7, %v15046_v33 }
 0x89f   : > { %11772 = vmatprep.mubr.msk.bf16.mxu1 %vm653_vm7, %v6092_v43 }
 0x8a6   : > { %11773 = vmatmul.mubr.msk.bf16.vlgmr.msra.gmra.mrb[48].mxu1 %vm653_vm7, %v6093_v16  ;;  %v15145_v41 = vpop.f32.mrb[40].mxu0 }
 0x8a7   : > { %11776 = vmatprep.mubr.msk.bf16.mxu1 %vm653_vm7, %v6094_v39  ;;  %11781 = vmatpush3.bf16.msra.mxu1 %v12809_v55  ;;  %v15148_v48 = vpop.f32.mrb[41].mxu0 }
 0x8a8   : > { %v15150_v29 = vpop.f32.mrb[42].mxu0  ;;  %11782 = vmatprep.subr.bf16.mxu1 %v12810_v50 }
 0x8a9   : > { %v15159_v3 = vpop.f32.mrb[43].mxu0 }
 0x8aa   : > { %15771 = vst [vmem:[#allocation5_spill] sm:$0xff] %v15159_v3  ;;  %v6470_v3 = vmul.f32 %v13415_v22, %v15014_v52  ;;  %v6474_v22 = vmul.f32 %v13458_v23, %v15050_v30  ;;  %v12816_v52 = vld [vmem:[%s15562_s11 + $0xc8] sm:$0xff]  }
 0x8ab   : > { %11783 = vmatpush3.bf16.msra.mxu1 %v12810_v50 }
 0x8ac   : > { %11792 = vmatprep.subr.bf16.mxu1 %v12811_v28 }
 0x8ae   : > { %11777 = vmatmul.mubr.msk.bf16.gmra.mrb[52].mxu1 %vm653_vm7, %v6095_v17  ;;  %v15162_v55 = vpop.f32.mrb[44].mxu0 }
 0x8af   : > { %15772 = vst [vmem:[#allocation9_spill] sm:$0xff] %v15162_v55  ;;  %11784 = vmatprep.mubr.msk.bf16.mxu1 %vm653_vm7, %v6092_v43  ;;  %v15165_v44 = vpop.f32.mrb[45].mxu0 }
 0x8b0   : > { %15773 = vst [vmem:[#allocation12_spill] sm:$0xff] %v15165_v44  ;;  %v15167_v4 = vpop.f32.mrb[46].mxu0 }
 0x8b1   : > { %15774 = vst [vmem:[#allocation14_spill] sm:$0xff] %v15167_v4  ;;  %v15169_v42 = vpop.f32.mrb[47].mxu0 }
 0x8b2   : > { %15775 = vst [vmem:[#allocation19_spill] sm:$0xff] %v15169_v42  ;;  %v6468_v42 = vmul.f32 %v13377_v46, %v6460_v62  ;;  %v6473_v46 = vmul.f32 %v13429_v24, %v15048_v32  ;;  %v6680_v32 = vmul.f32 %v13261_v25, %v15116_v21  ;;  %v12818_v25 = vld [vmem:[%s15564_s13 + $0xc8] sm:$0xff]  }
 0x8b6   : > { %11785 = vmatmul.mubr.msk.bf16.vlgmr.msra.gmra.mrb[56].mxu1 %vm653_vm7, %v6093_v16  ;;  %v15175_v10 = vpop.f32.mrb[48].mxu0  ;;  %v6469_v16 = vmul.f32 %v13380_v58, %v15012_v1  ;;  %v6471_v58 = vmul.f32 %v13418_v63, %v15035_v6  ;;  %v6475_v63 = vmul.f32 %v13461_v47, %v15091_v7  ;;  %v12817_v6 = vld [vmem:[%s15564_s13 + $0xc0] sm:$0xff]  }
 0x8b7   : > { %11788 = vmatprep.mubr.msk.bf16.mxu1 %vm653_vm7, %v6094_v39  ;;  %11793 = vmatpush3.bf16.msra.mxu1 %v12811_v28  ;;  %v15178_v50 = vpop.f32.mrb[49].mxu0 }
 0x8b8   : > { %v15180_v43 = vpop.f32.mrb[50].mxu0  ;;  %11794 = vmatprep.subr.bf16.mxu1 %v12812_v5  ;;  %v6476_v39 = vpack.c.bf16 %v6469_v16, %v6468_v42  ;;  %v6477_v42 = vpack.c.bf16 %v6471_v58, %v6470_v3  ;;  %v6479_v24 = vpack.c.bf16 %v6475_v63, %v6474_v22  ;;  %v6682_v3 = vmul.f32 %v13326_v60, %v15033_v12  ;;  %v12819_v60 = vld [vmem:[%s15562_s11 + $0xd0] sm:$0xff]   ;;  %v12820_v12 = vld [vmem:[%s15562_s11 + $0xd8] sm:$0xff]   ;;  %v12831_v63 = vld [vmem:[%s15562_s11 + $0x100] sm:$0xff]  }
 0x8b9   : > { %v15185_v4 = vpop.f32.mrb[51].mxu0  ;;  %v6685_v16 = vmul.f32 %v13316_v53, %v15062_v40  ;;  %v12823_v40 = vld [vmem:[%s15562_s11 + $0xe0] sm:$0xff]  }
 0x8bb   : > { %11795 = vmatpush3.bf16.msra.mxu1 %v12812_v5  ;;  %v12814_v5 = vld [vmem:[%s15564_s13 + $0xb8] sm:$0xff]  }
 0x8bc   : > { %11804 = vmatprep.subr.bf16.mxu1 %v12813_v34 }
 0x8be   : > { %11789 = vmatmul.mubr.msk.bf16.gmra.mrb[60].mxu1 %vm653_vm7, %v6095_v17  ;;  %v15191_v28 = vpop.f32.mrb[52].mxu0  ;;  %v6472_v17 = vmul.f32 %v13426_v2, %v15039_v31  ;;  %v12815_v2 = vld [vmem:[%s15562_s11 + $0xc0] sm:$0xff]   ;;  %v6681_v31 = vmul.f32 %v13264_v26, %v15031_v8  ;;  %v6684_v26 = vmul.f32 %v13333_v36, %v15060_v59  ;;  %v12822_v59 = vld [vmem:[%s15564_s13 + $0xd8] sm:$0xff]  }
 0x8bf   : > { %11796 = vmatprep.mubr.msk.bf16.mxu1 %vm653_vm7, %v6476_v39  ;;  %v15194_v44 = vpop.f32.mrb[53].mxu0 }
 0x8c0   : > { %v15196_v55 = vpop.f32.mrb[54].mxu0  ;;  %v6478_v62 = vpack.c.bf16 %v6473_v46, %v6472_v17  ;;  %v6688_v30 = vpack.c.bf16 %v6681_v31, %v6680_v32  ;;  %v6690_v21 = vpack.c.bf16 %v6685_v16, %v6684_v26  ;;  %v12824_v46 = vld [vmem:[%s15562_s11 + $0xe8] sm:$0xff]   ;;  %v15777_v26 = vld [vmem:[#allocation33_spill] sm:$0xff] }
 0x8c1   : > { %v15202_v1 = vpop.f32.mrb[55].mxu0 }
 0x8c6   : > { %11797 = vmatmul.mubr.msk.bf16.vlgmr.msra.gmra.mrb[48].mxu1 %vm653_vm7, %v6477_v42 }
 0x8c7   : > { %11800 = vmatprep.mubr.msk.bf16.mxu1 %vm653_vm7, %v6478_v62  ;;  %11805 = vmatpush3.bf16.msra.mxu1 %v12813_v34  ;;  %v6683_v34 = vmul.f32 %v13307_v51, %v15058_v45  ;;  %v6686_v51 = vmul.f32 %v13388_v35, %v15073_v11  ;;  %v12821_v45 = vld [vmem:[%s15564_s13 + $0xd0] sm:$0xff]   ;;  %v15281_v11 = vld [vmem:[#allocation3 + $0x41] sm:$0xff] }
 0x8c8   : > { %11806 = vmatprep.subr.bf16.mxu1 %v12814_v5  ;;  %v6895_v58 = vpack.c.bf16 %v15281_v11, %v15037_v57  ;;  %v12825_v57 = vld [vmem:[%s15564_s13 + $0xe0] sm:$0xff]  }
 0x8c9   : > { %v6689_v8 = vpack.c.bf16 %v6683_v34, %v6682_v3  ;;  %v15776_v3 = vld [vmem:[#allocation35_spill] sm:$0xff] }
 0x8cb   : > { %11807 = vmatpush3.bf16.msra.mxu1 %v12814_v5 }
 0x8cc   : > { %11816 = vmatprep.subr.bf16.mxu1 %v12815_v2 }
 0x8ce   : > { %11801 = vmatmul.mubr.msk.bf16.gmra.mrb[52].mxu1 %vm653_vm7, %v6479_v24 }
 0x8cf   : > { %11808 = vmatprep.mubr.msk.bf16.mxu1 %vm653_vm7, %v6476_v39  ;;  %v15247_v39 = vld [vmem:[#allocation3 + $0x40] sm:$0xff] }
 0x8d0   : > { %v6687_v53 = vmul.f32 %v13368_v37, %v15247_v39 }
 0x8d2   : > { %v6691_v36 = vpack.c.bf16 %v6687_v53, %v6686_v51 }
 0x8d6   : > { %11809 = vmatmul.mubr.msk.bf16.vlgmr.msra.gmra.mrb[56].mxu1 %vm653_vm7, %v6477_v42  ;;  %v12827_v42 = vld [vmem:[%s15562_s11 + $0xf0] sm:$0xff]  }
 0x8d7   : > { %11812 = vmatprep.mubr.msk.bf16.mxu1 %vm653_vm7, %v6478_v62  ;;  %11817 = vmatpush3.bf16.msra.mxu1 %v12815_v2  ;;  %v12829_v62 = vld [vmem:[%s15564_s13 + $0xf0] sm:$0xff]  }
 0x8d8   : > { %11818 = vmatprep.subr.bf16.mxu1 %v12816_v52 }
 0x8db   : > { %11819 = vmatpush3.bf16.msra.mxu1 %v12816_v52  ;;  %v12836_v52 = vld [vmem:[%s15562_s11 + $0x118] sm:$0xff]  }
 0x8dc   : > { %11828 = vmatprep.subr.bf16.mxu1 %v12817_v6 }
 0x8de   : > { %11813 = vmatmul.mubr.msk.bf16.gmra.mrb[60].mxu1 %vm653_vm7, %v6479_v24  ;;  %v12832_v24 = vld [vmem:[%s15562_s11 + $0x108] sm:$0xff]  }
 0x8df   : > { %11820 = vmatprep.mubr.msk.bf16.mxu1 %vm653_vm7, %v6688_v30 }
 0x8e6   : > { %11821 = vmatmul.mubr.msk.bf16.vlgmr.msra.gmra.mrb[48].mxu1 %vm653_vm7, %v6689_v8 }
 0x8e7   : > { %11824 = vmatprep.mubr.msk.bf16.mxu1 %vm653_vm7, %v6690_v21  ;;  %11829 = vmatpush3.bf16.msra.mxu1 %v12817_v6  ;;  %v12837_v6 = vld [vmem:[%s15564_s13 + $0x110] sm:$0xff]  }
 0x8e8   : > { %11830 = vmatprep.subr.bf16.mxu1 %v12818_v25 }
 0x8eb   : > { %11831 = vmatpush3.bf16.msra.mxu1 %v12818_v25 }
 0x8ec   : > { %11840 = vmatprep.subr.bf16.mxu1 %v12819_v60 }
 0x8ee   : > { %11825 = vmatmul.mubr.msk.bf16.gmra.mrb[52].mxu1 %vm653_vm7, %v6691_v36 }
 0x8ef   : > { %11832 = vmatprep.mubr.msk.bf16.mxu1 %vm653_vm7, %v6688_v30 }
 0x8f6   : > { %11833 = vmatmul.mubr.msk.bf16.vlgmr.msra.gmra.mrb[56].mxu1 %vm653_vm7, %v6689_v8 }
 0x8f7   : > { %11836 = vmatprep.mubr.msk.bf16.mxu1 %vm653_vm7, %v6690_v21  ;;  %11841 = vmatpush3.bf16.msra.mxu1 %v12819_v60  ;;  %v15779_v60 = vld [vmem:[#allocation32_spill] sm:$0xff] }
 0x8f8   : > { %11842 = vmatprep.subr.bf16.mxu1 %v12820_v12 }
 0x8fb   : > { %11843 = vmatpush3.bf16.msra.mxu1 %v12820_v12 }
 0x8fc   : > { %11852 = vmatprep.subr.bf16.mxu1 %v12821_v45 }
 0x8fe   : > { %11837 = vmatmul.mubr.msk.bf16.gmra.mrb[60].mxu1 %vm653_vm7, %v6691_v36 }
 0x8ff   : > { %11844 = vmatprep.mubr.msk.bf16.mxu1 %vm653_vm7, %v15018_v61 }
 0x906   : > { %11845 = vmatmul.mubr.msk.bf16.vlgmr.msra.gmra.mrb[48].mxu1 %vm653_vm7, %v15020_v49 }
 0x907   : > { %11848 = vmatprep.mubr.msk.bf16.mxu1 %vm653_vm7, %v15064_v9  ;;  %11853 = vmatpush3.bf16.msra.mxu1 %v12821_v45 }
 0x908   : > { %11854 = vmatprep.subr.bf16.mxu1 %v12822_v59 }
 0x90b   : > { %11855 = vmatpush3.bf16.msra.mxu1 %v12822_v59 }
 0x90c   : > { %11864 = vmatprep.subr.bf16.mxu1 %v12823_v40 }
 0x90e   : > { %11849 = vmatmul.mubr.msk.bf16.gmra.mrb[52].mxu1 %vm653_vm7, %v6895_v58 }
 0x90f   : > { %11856 = vmatprep.mubr.msk.bf16.mxu1 %vm653_vm7, %v15018_v61  ;;  %v12826_v61 = vld [vmem:[%s15564_s13 + $0xe8] sm:$0xff]  }
 0x916   : > { %11857 = vmatmul.mubr.msk.bf16.vlgmr.msra.gmra.mrb[56].mxu1 %vm653_vm7, %v15020_v49  ;;  %v15304_v49 = vld [vmem:[#allocation3 + $0x42] sm:$0xff] }
 0x917   : > { %11860 = vmatprep.mubr.msk.bf16.mxu1 %vm653_vm7, %v15064_v9  ;;  %11865 = vmatpush3.bf16.msra.mxu1 %v12823_v40  ;;  %v7102_v9 = vmul.f32 %v13458_v23, %v15091_v7  ;;  %v7103_v17 = vmul.f32 %v13461_v47, %v15304_v49  ;;  %v12828_v7 = vld [vmem:[%s15562_s11 + $0xf8] sm:$0xff]  }
 0x918   : > { %11866 = vmatprep.subr.bf16.mxu1 %v12824_v46 }
 0x919   : > { %v7107_v5 = vpack.c.bf16 %v7103_v17, %v7102_v9 }
 0x91b   : > { %11867 = vmatpush3.bf16.msra.mxu1 %v12824_v46 }
 0x91c   : > { %11876 = vmatprep.subr.bf16.mxu1 %v12825_v57 }
 0x91e   : > { %11861 = vmatmul.mubr.msk.bf16.gmra.mrb[60].mxu1 %vm653_vm7, %v6895_v58  ;;  %v15780_v58 = vld [vmem:[#allocation49_spill] sm:$0xff] }
 0x91f   : > { %11868 = vmatprep.mubr.msk.bf16.mxu1 %vm653_vm7, %v15041_v38 }
 0x926   : > { %11869 = vmatmul.mubr.msk.bf16.vlgmr.msra.gmra.mrb[48].mxu1 %vm653_vm7, %v15079_v18 }
 0x927   : > { %11872 = vmatprep.mubr.msk.bf16.mxu1 %vm653_vm7, %v15093_v15  ;;  %11877 = vmatpush3.bf16.msra.mxu1 %v12825_v57 }
 0x928   : > { %11878 = vmatprep.subr.bf16.mxu1 %v12826_v61 }
 0x92b   : > { %11879 = vmatpush3.bf16.msra.mxu1 %v12826_v61 }
 0x92c   : > { %11888 = vmatprep.subr.bf16.mxu1 %v12827_v42 }
 0x92e   : > { %11873 = vmatmul.mubr.msk.bf16.gmra.mrb[52].mxu1 %vm653_vm7, %v7107_v5 }
 0x92f   : > { %11880 = vmatprep.mubr.msk.bf16.mxu1 %vm653_vm7, %v15041_v38  ;;  %v12830_v38 = vld [vmem:[%s15564_s13 + $0xf8] sm:$0xff]  }
 0x936   : > { %11881 = vmatmul.mubr.msk.bf16.vlgmr.msra.gmra.mrb[56].mxu1 %vm653_vm7, %v15079_v18  ;;  %v7307_v18 = vld [vmem:[#allocation3 + $0x48] sm:$0xff] }
 0x937   : > { %11884 = vmatprep.mubr.msk.bf16.mxu1 %vm653_vm7, %v15093_v15  ;;  %11889 = vmatpush3.bf16.msra.mxu1 %v12827_v42  ;;  %v7314_v15 = vmul.f32 %v13388_v35, %v15247_v39  ;;  %v7315_v22 = vmul.f32 %v13368_v37, %v7307_v18  ;;  %v12833_v37 = vld [vmem:[%s15564_s13 + $0x100] sm:$0xff]   ;;  %v12834_v35 = vld [vmem:[%s15564_s13 + $0x108] sm:$0xff]  }
 0x938   : > { %11890 = vmatprep.subr.bf16.mxu1 %v12828_v7 }
 0x939   : > { %v7319_v2 = vpack.c.bf16 %v7315_v22, %v7314_v15  ;;  %v15783_v15 = vld [vmem:[#allocation36_spill] sm:$0xff] }
 0x93b   : > { %11891 = vmatpush3.bf16.msra.mxu1 %v12828_v7 }
 0x93c   : > { %11900 = vmatprep.subr.bf16.mxu1 %v12829_v62 }
 0x93e   : > { %11885 = vmatmul.mubr.msk.bf16.gmra.mrb[60].mxu1 %vm653_vm7, %v7107_v5  ;;  %v15782_v5 = vld [vmem:[#allocation46_spill] sm:$0xff] }
 0x93f   : > { %11892 = vmatprep.mubr.msk.bf16.mxu1 %vm653_vm7, %v15083_v0 }
 0x946   : > { %11893 = vmatmul.mubr.msk.bf16.vlgmr.msra.gmra.mrb[48].mxu1 %vm653_vm7, %v15097_v14 }
 0x947   : > { %11896 = vmatprep.mubr.msk.bf16.mxu1 %vm653_vm7, %v15104_v13  ;;  %11901 = vmatpush3.bf16.msra.mxu1 %v12829_v62 }
 0x948   : > { %11902 = vmatprep.subr.bf16.mxu1 %v12830_v38 }
 0x94b   : > { %11903 = vmatpush3.bf16.msra.mxu1 %v12830_v38 }
 0x94c   : > { %11912 = vmatprep.subr.bf16.mxu1 %v12831_v63 }
 0x94e   : > { %11897 = vmatmul.mubr.msk.bf16.gmra.mrb[52].mxu1 %vm653_vm7, %v7319_v2 }
 0x94f   : > { %11904 = vmatprep.mubr.msk.bf16.mxu1 %vm653_vm7, %v15083_v0  ;;  %v12835_v0 = vld [vmem:[%s15562_s11 + $0x110] sm:$0xff]  }
 0x956   : > { %11905 = vmatmul.mubr.msk.bf16.vlgmr.msra.gmra.mrb[56].mxu1 %vm653_vm7, %v15097_v14  ;;  %v7519_v14 = vld [vmem:[#allocation3 + $0x49] sm:$0xff] }
 0x957   : > { %11908 = vmatprep.mubr.msk.bf16.mxu1 %vm653_vm7, %v15104_v13  ;;  %11913 = vmatpush3.bf16.msra.mxu1 %v12831_v63  ;;  %v7523_v13 = vpack.c.bf16 %v7519_v14, %v15281_v11 }
 0x958   : > { %11914 = vmatprep.subr.bf16.mxu1 %v12832_v24 }
 0x95b   : > { %11915 = vmatpush3.bf16.msra.mxu1 %v12832_v24 }
 0x95c   : > { %11924 = vmatprep.subr.bf16.mxu1 %v12833_v37 }
 0x95e   : > { %11909 = vmatmul.mubr.msk.bf16.gmra.mrb[60].mxu1 %vm653_vm7, %v7319_v2 }
 0x95f   : > { %11916 = vmatprep.mubr.msk.bf16.mxu1 %vm653_vm7, %v15007_v54 }
 0x966   : > { %11917 = vmatmul.mubr.msk.bf16.vlgmr.msra.gmra.mrb[48].mxu1 %vm653_vm7, %v15029_v27 }
 0x967   : > { %11920 = vmatprep.mubr.msk.bf16.mxu1 %vm653_vm7, %v15046_v33  ;;  %11925 = vmatpush3.bf16.msra.mxu1 %v12833_v37 }
 0x968   : > { %11926 = vmatprep.subr.bf16.mxu1 %v12834_v35 }
 0x96b   : > { %11927 = vmatpush3.bf16.msra.mxu1 %v12834_v35  ;;  %v10619_v35 = vld [vmem:[%s15565_s14 + $0x1] ss:$0 sm:$0xff] }
 0x96c   : > { %11936 = vmatprep.subr.bf16.mxu1 %v12835_v0 }
 0x96e   : > { %11921 = vmatmul.mubr.msk.bf16.gmra.mrb[52].mxu1 %vm653_vm7, %v7523_v13 }
 0x96f   : > { %11928 = vmatprep.mubr.msk.bf16.mxu1 %vm653_vm7, %v15007_v54  ;;  %v12838_v54 = vld [vmem:[%s15564_s13 + $0x118] sm:$0xff]  }
 0x976   : > { %11929 = vmatmul.mubr.msk.bf16.vlgmr.msra.gmra.mrb[56].mxu1 %vm653_vm7, %v15029_v27  ;;  %v7723_v27 = vld [vmem:[#allocation3 + $0x4a] sm:$0xff] }
 0x977   : > { %11932 = vmatprep.mubr.msk.bf16.mxu1 %vm653_vm7, %v15046_v33  ;;  %11937 = vmatpush3.bf16.msra.mxu1 %v12835_v0  ;;  %v7730_v33 = vmul.f32 %v13458_v23, %v15304_v49  ;;  %v7731_v31 = vmul.f32 %v13461_v47, %v7723_v27  ;;  %v10617_v23 = vld [vmem:[%s15563_s12 + $0x1] ss:$0 sm:$0xff] }
 0x978   : > { %11938 = vmatprep.subr.bf16.mxu1 %v12836_v52  ;;  %v10376_v47 = vld [vmem:[%s15557_s6 + $0x1] ss:$0 sm:$0xff] }
 0x979   : > { %v7735_v32 = vpack.c.bf16 %v7731_v31, %v7730_v33  ;;  %v4966_v34 = vadd.f32 %v10376_v47, %v15776_v3  ;;  %v4965_v36 = vadd.f32 %v15779_v60, %v10376_v47  ;;  %v4970_v46 = vadd.f32 %v10376_v47, %v15780_v58  ;;  %v15781_v49 = vld [vmem:[#allocation38_spill] sm:$0xff] }
 0x97a   : > { %v4968_v9 = vadd.f32 %v10376_v47, %v15781_v49  ;;  %v4971_v7 = vadd.f32 %v15782_v5, %v10376_v47  ;;  %v4969_v22 = vadd.f32 %v15783_v15, %v10376_v47 }
 0x97b   : > { %11939 = vmatpush3.bf16.msra.mxu1 %v12836_v52 }
 0x97c   : > { %11948 = vmatprep.subr.bf16.mxu1 %v12837_v6 }
 0x97e   : > { %11933 = vmatmul.mubr.msk.bf16.gmra.mrb[60].mxu1 %vm653_vm7, %v7523_v13 }
 0x97f   : > { %11940 = vmatprep.mubr.msk.bf16.mxu1 %vm653_vm7, %v15099_v19 }
 0x986   : > { %11941 = vmatmul.mubr.msk.bf16.vlgmr.msra.gmra.mrb[48].mxu1 %vm653_vm7, %v15118_v56 }
 0x987   : > { %11944 = vmatprep.mubr.msk.bf16.mxu1 %vm653_vm7, %v15122_v20  ;;  %11949 = vmatpush3.bf16.msra.mxu1 %v12837_v6 }
 0x988   : > { %11950 = vmatprep.subr.bf16.mxu1 %v12838_v54 }
 0x98b   : > { %11951 = vmatpush3.bf16.msra.mxu1 %v12838_v54 }
 0x98e   : > { %11945 = vmatmul.mubr.msk.bf16.gmra.mrb[52].mxu1 %vm653_vm7, %v7735_v32 }
 0x98f   : > { %11952 = vmatprep.mubr.msk.bf16.mxu1 %vm653_vm7, %v15099_v19 }
 0x996   : > { %11953 = vmatmul.mubr.msk.bf16.vlgmr.msra.gmra.mrb[56].mxu1 %vm653_vm7, %v15118_v56  ;;  %v4964_v56 = vadd.f32 %v10376_v47, %v15777_v26  ;;  %v15443_v26 = vld [vmem:[%s15569_s18] ss:$0 sm:$0xff] }
 0x997   : > { %11956 = vmatprep.mubr.msk.bf16.mxu1 %vm653_vm7, %v15122_v20  ;;  %v15778_v20 = vld [vmem:[#allocation34_spill] sm:$0xff]  ;;  %v9746_v60 = vadd.f32 %v15175_v10, %v15443_v26 }
 0x998   : > { %v4967_v21 = vadd.f32 %v15778_v20, %v10376_v47 }
 0x99e   : > { %11957 = vmatmul.mubr.msk.bf16.gmra.mrb[60].mxu1 %vm653_vm7, %v7735_v32 }
 0xa59   : > { %v11942_v30 = vpop.f32.mrb[48].mxu1 }
 0xa5a   : > { %v7938_v19 = vadd.f32 %v11942_v30, %v10617_v23  ;;  %v7804_v16 = vpop.f32.mrb[49].mxu1 }
 0xa5b   : > { %v7936_v8 = vadd.f32 %v10617_v23, %v7804_v16  ;;  %v11943_v25 = vpop.f32.mrb[50].mxu1 }
 0xa5c   : > { %v15416_v39 = vadd.f32 %v7938_v19, %v4966_v34  ;;  %v7939_v51 = vadd.f32 %v11943_v25, %v10617_v23  ;;  %v7807_v53 = vpop.f32.mrb[51].mxu1 }
 0xa5d   : > { %v15419_v12 = vadd.f32 %v7936_v8, %v4964_v56  ;;  %v7937_v45 = vadd.f32 %v10617_v23, %v7807_v53 }
 0xa5e   : > { %v15421_v59 = vadd.f32 %v7939_v51, %v4967_v21 }
 0xa5f   : > { %v15423_v40 = vadd.f32 %v7937_v45, %v4965_v36 }
 0xa61   : > { %v11946_v11 = vpop.f32.mrb[52].mxu1 }
 0xa62   : > { %v7942_v57 = vadd.f32 %v11946_v11, %v10617_v23  ;;  %v7820_v61 = vpop.f32.mrb[53].mxu1  ;;  %v15449_v11 = vadd.f32 %v15443_v26, %v15178_v50 }
 0xa63   : > { %v7940_v17 = vadd.f32 %v10617_v23, %v7820_v61  ;;  %v11947_v42 = vpop.f32.mrb[54].mxu1 }
 0xa64   : > { %v15428_v62 = vadd.f32 %v7942_v57, %v4970_v46  ;;  %v7943_v38 = vadd.f32 %v11947_v42, %v10617_v23  ;;  %v7823_v18 = vpop.f32.mrb[55].mxu1  ;;  %v15453_v57 = vadd.f32 %v15180_v43, %v15443_v26  ;;  %v9784_v50 = vmul.f32 -2.0, %v15449_v11 }
 0xa65   : > { %v15431_v63 = vadd.f32 %v7940_v17, %v4968_v9  ;;  %v7941_v2 = vadd.f32 %v10617_v23, %v7823_v18  ;;  %v15457_v9 = vadd.f32 %v15443_v26, %v15185_v4  ;;  %v9786_v17 = vmul.f32 -2.0, %v9746_v60 }
 0xa66   : > { %v15433_v24 = vadd.f32 %v7943_v38, %v4971_v7  ;;  %v9787_v38 = vmul.f32 -2.0, %v15453_v57 }
 0xa67   : > { %v15435_v37 = vadd.f32 %v7941_v2, %v4969_v22  ;;  %v9785_v15 = vmul.f32 -2.0, %v15457_v9  ;;  %v9796_v2 = vmul.f32 1.442695, %v9786_v17  ;;  %v9761_v17 = vmul.f32 2.0, %v15457_v9 }
 0xa69   : > { %v11954_v0 = vpop.f32.mrb[56].mxu1 }
 0xa6a   : > { %v7954_v14 = vadd.f32 %v11954_v0, %v10619_v35  ;;  %v7881_v13 = vpop.f32.mrb[57].mxu1  ;;  %v9792_v0 = vmul.f32 1.442695, %v9784_v50 }
 0xa6b   : > { %v7952_v52 = vadd.f32 %v10619_v35, %v7881_v13  ;;  %v11955_v6 = vpop.f32.mrb[58].mxu1 }
 0xa6c   : > { %v7962_v54 = vadd.f32 2.0, %v7954_v14  ;;  %v7955_v27 = vadd.f32 %v11955_v6, %v10619_v35  ;;  %v7884_v33 = vpop.f32.mrb[59].mxu1  ;;  %v15464_v14 = vadd.f32 %v15443_v26, %v15194_v44  ;;  %v9798_v6 = vmul.f32 1.442695, %v9787_v38 }
 0xa6d   : > { %v7960_v31 = vadd.f32 2.0, %v7952_v52  ;;  %v7953_v32 = vadd.f32 %v10619_v35, %v7884_v33  ;;  %v15469_v52 = vld [vmem:[%s15567_s16] ss:$0 sm:$0xff] }
 0xa6e   : > { %v10622_v47 = vmul.f32 -1.442695, %v7962_v54  ;;  %v7963_v23 = vadd.f32 2.0, %v7955_v27  ;;  %v9794_v54 = vmul.f32 1.442695, %v9785_v15  ;;  %v15473_v27 = vadd.f32 %v15191_v28, %v15443_v26 }
 0xa6f   : > { %v10620_v30 = vmul.f32 -1.442695, %v7960_v31  ;;  %v7961_v3 = vadd.f32 2.0, %v7953_v32  ;;  %v9731_v44 = vadd.f32 %v15145_v41, %v15469_v52  ;;  %v9729_v31 = vadd.f32 %v15469_v52, %v15148_v48 }
 0xa70   : > { %12887 = vpow2.f32 %v10622_v47  ;;  %v10623_v34 = vmul.f32 -1.442695, %v7963_v23  ;;  %v9788_v32 = vmul.f32 -2.0, %v15464_v14  ;;  %v9762_v23 = vmul.f32 2.0, %v9746_v60  ;;  %v15787_v60 = vld [vmem:[#allocation19_spill] sm:$0xff] }
 0xa71   : > { %12889 = vpow2.f32 %v10620_v30  ;;  %v10621_v19 = vmul.f32 -1.442695, %v7961_v3  ;;  %v11958_v16 = vpop.f32.mrb[60].mxu1  ;;  %v15482_v30 = vadd.f32 %v15443_v26, %v15202_v1  ;;  %v9790_v1 = vmul.f32 -2.0, %v15473_v27 }
 0xa72   : > { %12891 = vpow2.f32 %v10623_v34  ;;  %v7958_v56 = vadd.f32 %v11958_v16, %v10619_v35  ;;  %v7897_v8 = vpop.f32.mrb[61].mxu1  ;;  %v9732_v34 = vadd.f32 %v15150_v29, %v15469_v52  ;;  %v15499_v29 = vadd.f32 %v15196_v55, %v15443_v26 }
 0xa73   : > { %12893 = vpow2.f32 %v10621_v19  ;;  %v7956_v25 = vadd.f32 %v10619_v35, %v7897_v8  ;;  %v11959_v20 = vpop.f32.mrb[62].mxu1  ;;  %v15784_v19 = vld [vmem:[#allocation5_spill] sm:$0xff] }
 0xa74   : > { %v7966_v21 = vadd.f32 2.0, %v7958_v56  ;;  %v7959_v51 = vadd.f32 %v11959_v20, %v10619_v35  ;;  %v7900_v53 = vpop.f32.mrb[63].mxu1  ;;  %v9730_v41 = vadd.f32 %v15469_v52, %v15784_v19  ;;  %v15785_v56 = vld [vmem:[#allocation9_spill] sm:$0xff] }
 0xa75   : > { %v7964_v36 = vadd.f32 2.0, %v7956_v25  ;;  %v7957_v45 = vadd.f32 %v10619_v35, %v7900_v53  ;;  %v15490_v8 = vadd.f32 %v15785_v56, %v15469_v52  ;;  %v15786_v25 = vld [vmem:[#allocation12_spill] sm:$0xff] }
 0xa76   : > { %v10626_v58 = vmul.f32 -1.442695, %v7966_v21  ;;  %v7967_v46 = vadd.f32 2.0, %v7959_v51  ;;  %v15494_v20 = vadd.f32 %v15469_v52, %v15786_v25  ;;  %v9800_v21 = vmul.f32 1.442695, %v9788_v32 }
 0xa77   : > { %v10624_v61 = vmul.f32 -1.442695, %v7964_v36  ;;  %v7965_v49 = vadd.f32 2.0, %v7957_v45  ;;  %v15503_v36 = vadd.f32 %v15469_v52, %v15787_v60  ;;  %v9770_v45 = vadd.f32 1.837877, %v9762_v23 }
 0xa78   : > { %12895 = vpow2.f32 %v10626_v58  ;;  %v10627_v10 = vmul.f32 -1.442695, %v7967_v46  ;;  %v9760_v58 = vmul.f32 2.0, %v15449_v11  ;;  %v9789_v46 = vmul.f32 -2.0, %v15482_v30 }
 0xa79   : > { %12897 = vpow2.f32 %v10624_v61  ;;  %v10625_v42 = vmul.f32 -1.442695, %v7965_v49  ;;  %v9763_v49 = vmul.f32 2.0, %v15453_v57  ;;  %v9791_v11 = vmul.f32 -2.0, %v15499_v29 }
 0xa7a   : > { %v12888_v5 = vpop.eup %12887  ;;  %12899 = vpow2.f32 %v10627_v10  ;;  %v9802_v57 = vmul.f32 1.442695, %v9789_v46  ;;  %v9764_v23 = vmul.f32 2.0, %v15464_v14  ;;  %v9765_v46 = vmul.f32 2.0, %v15482_v30 }
 0xa7b   : > { %v12890_v7 = vpop.eup %12889  ;;  %v7994_v43 = vadd.f32 1.0, %v12888_v5  ;;  %12901 = vpow2.f32 %v10625_v42  ;;  %v9804_v42 = vmul.f32 1.442695, %v9790_v1 }
 0xa7c   : > { %v12892_v18 = vpop.eup %12891  ;;  %v7992_v22 = vadd.f32 1.0, %v12890_v7 }
 0xa7d   : > { %v12894_v4 = vpop.eup %12893  ;;  %12903 = vrcp.f32 %v7994_v43  ;;  %v7995_v35 = vadd.f32 1.0, %v12892_v18 }
 0xa7e   : > { %12905 = vrcp.f32 %v7992_v22  ;;  %v7993_v13 = vadd.f32 1.0, %v12894_v4  ;;  %v9768_v22 = vadd.f32 1.837877, %v9760_v58 }
 0xa7f   : > { %12907 = vrcp.f32 %v7995_v35 }
 0xa80   : > { %12909 = vrcp.f32 %v7993_v13 }
 0xa81   : > { %12911 = vpow2.f32 %v9796_v2 }
 0xa82   : > { %v12896_v33 = vpop.eup %12895  ;;  %12913 = vpow2.f32 %v9792_v0 }
 0xa83   : > { %v12898_v47 = vpop.eup %12897  ;;  %12915 = vpow2.f32 %v9798_v6  ;;  %v7998_v3 = vadd.f32 1.0, %v12896_v33  ;;  %v9769_v6 = vadd.f32 1.837877, %v9761_v17 }
 0xa84   : > { %v12900_v28 = vpop.eup %12899  ;;  %12917 = vpow2.f32 %v9794_v54  ;;  %v7996_v48 = vadd.f32 1.0, %v12898_v47  ;;  %v9806_v54 = vmul.f32 1.442695, %v9791_v11 }
 0xa85   : > { %v12902_v16 = vpop.eup %12901  ;;  %12919 = vrcp.f32 %v7998_v3  ;;  %v7999_v10 = vadd.f32 1.0, %v12900_v28 }
 0xa86   : > { %12921 = vrcp.f32 %v7996_v48  ;;  %v7997_v51 = vadd.f32 1.0, %v12902_v16 }
 0xa87   : > { %v12904_v53 = vpop.eup %12903 }
 0xa88   : > { %v12906_v61 = vpop.eup %12905  ;;  %12923 = vrcp.f32 %v7997_v51  ;;  %v8026_v55 = vmul.f32 %v12904_v53, %v15416_v39 }
 0xa89   : > { %v12908_v26 = vpop.eup %12907  ;;  %12925 = vlog2.f32 %v12906_v61  ;;  %v8024_v5 = vmul.f32 %v12906_v61, %v15419_v12  ;;  %v9771_v12 = vadd.f32 1.837877, %v9763_v49 }
 0xa8a   : > { %v12910_v50 = vpop.eup %12909  ;;  %12927 = vpow2.f32 %v9800_v21  ;;  %v9754_v7 = vsub.f32 %v8026_v55, %v9731_v44  ;;  %v8027_v38 = vmul.f32 %v12908_v26, %v15421_v59 }
 0xa8b   : > { %v12912_v43 = vpop.eup %12911  ;;  %v9752_v18 = vsub.f32 %v8024_v5, %v9729_v31  ;;  %12929 = vlog2.f32 %v12904_v53  ;;  %v8025_v39 = vmul.f32 %v12910_v50, %v15423_v40  ;;  %v9766_v31 = vmul.f32 2.0, %v15473_v27 }
 0xa8c   : > { %v12914_v15 = vpop.eup %12913  ;;  %12931 = vrcp.f32 %v7999_v10  ;;  %v9778_v9 = vmul.f32 %v9754_v7, %v9754_v7  ;;  %v9755_v4 = vsub.f32 %v8027_v38, %v9732_v34 }
 0xa8d   : > { %v12916_v2 = vpop.eup %12915  ;;  %12933 = vpow2.f32 %v9804_v42  ;;  %v9776_v35 = vmul.f32 %v9752_v18, %v9752_v18  ;;  %v9753_v0 = vsub.f32 %v8025_v39, %v9730_v41 }
 0xa8e   : > { %v12918_v13 = vpop.eup %12917  ;;  %v9810_v59 = vmul.f32 %v12912_v43, %v9778_v9  ;;  %v9779_v33 = vmul.f32 %v9755_v4, %v9755_v4  ;;  %12935 = vpow2.f32 %v9802_v57  ;;  %v9773_v43 = vadd.f32 1.837877, %v9765_v46 }
 0xa8f   : > { %v12920_v44 = vpop.eup %12919  ;;  %v9808_v40 = vmul.f32 %v12914_v15, %v9776_v35  ;;  %v9777_v32 = vmul.f32 %v9753_v0, %v9753_v0  ;;  %12937 = vlog2.f32 %v12908_v26  ;;  %v9772_v26 = vadd.f32 1.837877, %v9764_v23 }
 0xa90   : > { %v12922_v47 = vpop.eup %12921  ;;  %v9818_v3 = vadd.f32 %v9810_v59, %v9770_v45  ;;  %v9811_v28 = vmul.f32 %v12916_v2, %v9779_v33  ;;  %v8030_v34 = vmul.f32 %v12920_v44, %v15428_v62  ;;  %12939 = vpow2.f32 %v9806_v54 }
 0xa91   : > { %v9816_v19 = vadd.f32 %v9808_v40, %v9768_v22  ;;  %v9809_v41 = vmul.f32 %v12918_v13, %v9777_v32  ;;  %v8028_v48 = vmul.f32 %v12922_v47, %v15431_v63  ;;  %12941 = vlog2.f32 %v12922_v47 }
 0xa92   : > { %v12924_v16 = vpop.eup %12923  ;;  %v9826_v56 = vmul.f32 -0.5, %v9818_v3  ;;  %v9819_v25 = vadd.f32 %v9811_v28, %v9771_v12  ;;  %v9758_v27 = vsub.f32 %v8030_v34, %v15490_v8  ;;  %12943 = vlog2.f32 %v12910_v50  ;;  %v15788_v50 = vld [vmem:[#allocation14_spill] sm:$0xff] }
 0xa93   : > { %v12926_v1 = vpop.eup %12925  ;;  %v9817_v21 = vadd.f32 %v9809_v41, %v9769_v6  ;;  %v9756_v51 = vsub.f32 %v8028_v48, %v15494_v20  ;;  %v8029_v14 = vmul.f32 %v12924_v16, %v15435_v37  ;;  %v9824_v45 = vmul.f32 -0.5, %v9816_v19 }
 0xa94   : > { %v12928_v53 = vpop.eup %12927  ;;  %v9838_v62 = vsel %vm640_vm1, %v9826_v56, 0.0  ;;  %v8033_v60 = vmul.f32 0.6931472, %v12926_v1  ;;  %v9782_v63 = vmul.f32 %v9758_v27, %v9758_v27  ;;  %v9827_v10 = vmul.f32 -0.5, %v9819_v25 }
 0xa95   : > { %v12930_v58 = vpop.eup %12929  ;;  %9839 = vadd.xlane.f32.xlu0 %v9838_v62  ;;  %v9780_v61 = vmul.f32 %v9756_v51, %v9756_v51  ;;  %v9757_v20 = vsub.f32 %v8029_v14, %v15503_v36  ;;  %v9774_v37 = vadd.f32 1.837877, %v9766_v31  ;;  %12945 = vlog2.f32 %v12920_v44 }
 0xa96   : > { %v12932_v8 = vpop.eup %12931  ;;  %v8048_v49 = vsel %vm640_vm1, %v8033_v60, 0.0  ;;  %v9832_v42 = vsel %vm640_vm1, %v9824_v45, 0.0  ;;  %v8037_v5 = vmul.f32 0.6931472, %v12930_v58  ;;  %v9736_v38 = vadd.f32 %v15788_v50, %v15469_v52 }
 0xa97   : > { %v12934_v55 = vpop.eup %12933  ;;  %8049 = vadd.xlane.f32.xlu1 %v8048_v49  ;;  %v9812_v17 = vmul.f32 %v12928_v53, %v9780_v61  ;;  %v9781_v11 = vmul.f32 %v9757_v20, %v9757_v20  ;;  %v8031_v36 = vmul.f32 %v12932_v8, %v15433_v24  ;;  %v9841_v18 = vsel %vm640_vm1, %v9827_v10, 0.0  ;;  %v4431_v61 = vpop.xlane.xlu1 %4430 }
 0xa98   : > { %v9814_v30 = vmul.f32 %v12934_v55, %v9782_v63  ;;  %v12936_v7 = vpop.eup %12935  ;;  %v9825_v39 = vmul.f32 -0.5, %v9817_v21  ;;  %v9767_v4 = vmul.f32 2.0, %v15499_v29  ;;  %v8054_v35 = vsel %vm640_vm1, %v8037_v5, 0.0  ;;  %v4428_v63 = vpop.xlane.xlu0 %4427 }
 0xa99   : > { %9833 = vadd.xlane.f32.xlu0 %v9832_v42  ;;  %v9820_v57 = vadd.f32 %v9812_v17, %v9772_v26  ;;  %v9813_v15 = vmul.f32 %v12936_v7, %v9781_v11  ;;  %v12938_v9 = vpop.eup %12937  ;;  %v9759_v2 = vsub.f32 %v8031_v36, %v9736_v38  ;;  %12947 = vlog2.f32 %v12924_v16 }
 0xa9a   : > { %v9822_v22 = vadd.f32 %v9814_v30, %v9774_v37  ;;  %v12940_v12 = vpop.eup %12939  ;;  %v9835_v24 = vsel %vm640_vm1, %v9825_v39, 0.0  ;;  %v8039_v54 = vmul.f32 0.6931472, %v12938_v9  ;;  %v9775_v33 = vadd.f32 1.837877, %v9767_v4 }
 0xa9b   : > { %9842 = vadd.xlane.f32.xlu1 %v9841_v18  ;;  %v9828_v0 = vmul.f32 -0.5, %v9820_v57  ;;  %v9821_v52 = vadd.f32 %v9813_v15, %v9773_v43  ;;  %v12942_v13 = vpop.eup %12941  ;;  %v9783_v6 = vmul.f32 %v9759_v2, %v9759_v2  ;;  %12949 = vlog2.f32 %v12932_v8  ;;  %v4443_v49 = vpop.xlane.xlu1 %4442 }
 0xa9c   : > { %v12944_v59 = vpop.eup %12943  ;;  %v8041_v31 = vmul.f32 0.6931472, %v12942_v13  ;;  %v8057_v47 = vsel %vm640_vm1, %v8039_v54, 0.0  ;;  %v9830_v16 = vmul.f32 -0.5, %v9822_v22  ;;  %v12960_v60 = vmov 0.0|0.0   ;;  %v4422_v58 = vpop.xlane.xlu0 %4421 }
 0xa9d   : > { %8055 = vadd.xlane.f32.xlu0 %v8054_v35  ;;  %v9815_v44 = vmul.f32 %v12940_v12, %v9783_v6  ;;  %v9844_v29 = vsel %vm640_vm1, %v9828_v0, 0.0  ;;  %v8035_v23 = vmul.f32 0.6931472, %v12944_v59  ;;  %v9829_v19 = vmul.f32 -0.5, %v9821_v52  ;;  %12159 = vmatprep.subr.bf16.mxu1 %v12960_v60 }
 0xa9e   : > { %v8060_v3 = vsel %vm640_vm1, %v8041_v31, 0.0  ;;  %v9850_v1 = vsel %vm640_vm1, %v9830_v16, 0.0  ;;  %v15789_v45 = vmov 0.0  }
 0xa9f   : > { %9836 = vadd.xlane.f32.xlu1 %v9835_v24  ;;  %v12946_v40 = vpop.eup %12945  ;;  %v9823_v32 = vadd.f32 %v9815_v44, %v9775_v33  ;;  %v8051_v34 = vsel %vm640_vm1, %v8035_v23, 0.0  ;;  %v9847_v56 = vsel %vm640_vm1, %v9829_v19, 0.0  ;;  %12156 = vmatprep.mubr.msk.f32.mxu1 %vm12961_vm0, %v15789_v45  ;;  %v4437_v20 = vpop.xlane.xlu1 %4436 }
 0xaa0   : > { %v8045_v28 = vmul.f32 0.6931472, %v12946_v40  ;;  %v4425_v46 = vpop.xlane.xlu0 %4424 }
 0xaa1   : > { %9845 = vadd.xlane.f32.xlu0 %v9844_v29  ;;  %v9831_v53 = vmul.f32 -0.5, %v9823_v32 }
 0xaa2   : > { %v8066_v48 = vsel %vm640_vm1, %v8045_v28, 0.0 }
 0xaa3   : > { %8058 = vadd.xlane.f32.xlu1 %v8057_v47  ;;  %v12948_v41 = vpop.eup %12947  ;;  %v9853_v62 = vsel %vm640_vm1, %v9831_v53, 0.0  ;;  %v12962_v47 = vmov 1.0  }
 0xaa4   : > { %v8043_v25 = vmul.f32 0.6931472, %v12948_v41  ;;  %v4440_v8 = vpop.xlane.xlu0 %4439 }
 0xaa5   : > { %8061 = vadd.xlane.f32.xlu0 %v8060_v3  ;;  %v12950_v27 = vpop.eup %12949 }
 0xaa6   : > { %v8063_v21 = vsel %vm640_vm1, %v8043_v25, 0.0  ;;  %v8047_v51 = vmul.f32 0.6931472, %v12950_v27 }
 0xaa7   : > { %8052 = vadd.xlane.f32.xlu1 %v8051_v34 }
 0xaa8   : > { %v8069_v14 = vsel %vm640_vm1, %v8047_v51, 0.0  ;;  %v4434_v10 = vpop.xlane.xlu0 %4433  ;;  %vm9872_vm1 = vcmask 523264  }
 0xaa9   : > { %8067 = vadd.xlane.f32.xlu0 %v8066_v48 }
 0xaab   : > { %9848 = vadd.xlane.f32.xlu1 %v9847_v56 }
 0xaad   : > { %9851 = vadd.xlane.f32.xlu0 %v9850_v1 }
 0xaaf   : > { %8064 = vadd.xlane.f32.xlu1 %v8063_v21 }
 0xab3   : > { %8070 = vadd.xlane.f32.xlu1 %v8069_v14 }
 0xab7   : > { %9854 = vadd.xlane.f32.xlu1 %v9853_v62 }
 0xb22   : > { %v9840_v55 = vpop.xlane.xlu0 %9839 }
 0xb24   : > { %v8050_v37 = vpop.xlane.xlu1 %8049 }
 0xb25   : > { %v8072_v7 = vadd.f32 %v8050_v37, %v4422_v58 }
 0xb26   : > { %v9834_v26 = vpop.xlane.xlu0 %9833 }
 0xb27   : > { %v9856_v36 = vadd.f32 %v9834_v26, %v8072_v7 }
 0xb28   : > { %v9843_v17 = vpop.xlane.xlu1 %9842 }
 0xb2a   : > { %v8056_v42 = vpop.xlane.xlu0 %8055 }
 0xb2b   : > { %v8074_v18 = vadd.f32 %v8056_v42, %v4428_v63 }
 0xb2c   : > { %v9837_v5 = vpop.xlane.xlu1 %9836 }
 0xb2d   : > { %v9858_v4 = vadd.f32 %v9840_v55, %v8074_v18 }
 0xb2e   : > { %v9846_v11 = vpop.xlane.xlu0 %9845 }
 0xb30   : > { %v8059_v30 = vpop.xlane.xlu1 %8058 }
 0xb31   : > { %v8075_v38 = vadd.f32 %v8059_v30, %v4431_v61 }
 0xb32   : > { %v8062_v57 = vpop.xlane.xlu0 %8061 }
 0xb33   : > { %v9859_v22 = vadd.f32 %v9843_v17, %v8075_v38  ;;  %v8076_v2 = vadd.f32 %v8062_v57, %v4434_v10 }
 0xb34   : > { %v8053_v50 = vpop.xlane.xlu1 %8052 }
 0xb35   : > { %v8073_v43 = vadd.f32 %v8053_v50, %v4425_v46  ;;  %v12163_v0 = vpack.c.bf16 %v9859_v22, %v9858_v4  ;;  %v9860_v13 = vadd.f32 %v9846_v11, %v8076_v2 }
 0xb36   : > { %v8068_v12 = vpop.xlane.xlu0 %8067 }
 0xb37   : > { %v9857_v39 = vadd.f32 %v9837_v5, %v8073_v43  ;;  %v8078_v33 = vadd.f32 %v8068_v12, %v4440_v8 }
 0xb38   : > { %v9849_v15 = vpop.xlane.xlu1 %9848 }
 0xb39   : > { %v12160_v9 = vpack.c.bf16 %v9857_v39, %v9856_v36 }
 0xb3a   : > { %v9852_v59 = vpop.xlane.xlu0 %9851 }
 0xb3b   : > { %12161 = vmatpush3.bf16.msra.mxu1 %v12160_v9  ;;  %v9862_v31 = vadd.f32 %v9852_v59, %v8078_v33 }
 0xb3c   : > { %v8065_v35 = vpop.xlane.xlu1 %8064  ;;  %12162 = vmatprep.subr.bf16.mxu1 %v12960_v60 }
 0xb3d   : > { %v8077_v52 = vadd.f32 %v8065_v35, %v4437_v20 }
 0xb3f   : > { %v9861_v6 = vadd.f32 %v9849_v15, %v8077_v52  ;;  %12164 = vmatpush3.bf16.msra.mxu1 %v12163_v0 }
 0xb40   : > { %v8071_v24 = vpop.xlane.xlu1 %8070  ;;  %12165 = vmatprep.subr.bf16.mxu1 %v12960_v60 }
 0xb41   : > { %v12166_v54 = vpack.c.bf16 %v9861_v6, %v9860_v13  ;;  %v8079_v44 = vadd.f32 %v8071_v24, %v4443_v49 }
 0xb43   : > { %12167 = vmatpush3.bf16.msra.mxu1 %v12166_v54 }
 0xb44   : > { %v9855_v29 = vpop.xlane.xlu1 %9854  ;;  %12168 = vmatprep.subr.bf16.mxu1 %v12960_v60 }
 0xb45   : > { %v9863_v40 = vadd.f32 %v9855_v29, %v8079_v44 }
 0xb47   : > { %v12169_v32 = vpack.c.bf16 %v9863_v40, %v9862_v31 }
 0xb49   : > { %12170 = vmatpush3.bf16.msra.mxu1 %v12169_v32 }
 0xb4c   : > { %12157 = vmatmul.mubr.msk.f32.vlgmr.msra.gmra.mrb[64].mxu1 %vm9872_vm1, %v12962_v47 }
 0xc1f   : > { %v9942_v23 = vpop.f32.mrb[64].mxu1 }
 0xc20   : > { %9947 = vst.msk [vmem:[%s638_s29] sm:$0x1] %vm9946_vm2, %v9942_v23  ;;  %v12158_v3 = vpop.f32.mrb[65].mxu1 }
 0xc21 PF: > { %s31_s1 = sadd.s32 1, %s12957_s1  }
 0xc22   : > { %p28_p4 = scmp.ge.s32.totalorder %s31_s1, 4  }
 0xc24   :  { %30 = sbr.rel (!%p28_p4) target bundleno = 6 (0x6), region = 217 }

</bundles_post_ra>
